<compile_context>
chip_gen: v5e
topology: v5e:2x2
jax: 0.10.0
libtpu: 0.0.40
codegen_flags: <defaults>
</compile_context>

<pallas_src>
import functools

import jax
import jax.numpy as jnp
from jax.experimental import pallas as pl
from jax.experimental.pallas import tpu as pltpu

IMG_FEAT_DIM = 8
STATE_DIM = 8
SENSORY_DIM = 64
UNION1_DIM = 64
UNION2_DIM = 64
H_LSTM = SENSORY_DIM                     # all four LSTMs share hidden dim 64 here
LSTM_NAMES = ("img_feat", "state", "union1", "union2")


# ----------------------------------------------------------------------------
# Pallas kernel 1: lane-dense conv GEMM   out(C_out, M) = act(W @ Pt + b)
# ----------------------------------------------------------------------------
def _conv_gemm_kernel(w_ref, p_ref, b_ref, o_ref, *, act):
    y = jnp.dot(w_ref[...], p_ref[...], preferred_element_type=jnp.float32)
    y = y + b_ref[...]                                  # (C_out, 1) lane-broadcast
    if act == "relu":
        y = jnp.maximum(y, 0.0)
    elif act == "sigmoid":
        y = jax.nn.sigmoid(y)
    o_ref[...] = y.astype(o_ref.dtype)


def _pick_bn(M):
    if M <= 4096:
        return M
    for bn in (4096, 2048, 1024, 512, 256, 128):
        if M % bn == 0:
            return bn
    return M


def conv_gemm(w2, b2, pT, act):
    """w2: (C_out, K) bf16, b2: (C_out, 1) f32, pT: (K, M) bf16 -> (C_out, M) f32."""
    C_out, K = w2.shape
    M = pT.shape[1]
    bn = _pick_bn(M)
    return pl.pallas_call(
        functools.partial(_conv_gemm_kernel, act=act),
        out_shape=jax.ShapeDtypeStruct((C_out, M), jnp.float32),
        grid=(pl.cdiv(M, bn),),
        in_specs=[
            pl.BlockSpec((C_out, K), lambda i: (0, 0)),
            pl.BlockSpec((K, bn), lambda i: (0, i)),
            pl.BlockSpec((C_out, 1), lambda i: (0, 0)),
        ],
        out_specs=pl.BlockSpec((C_out, bn), lambda i: (0, i)),
        compiler_params=pltpu.CompilerParams(
            dimension_semantics=("parallel",)),     # v7x: both TCs split the M axis
    )(w2, pT, b2)


# ----------------------------------------------------------------------------
# Conv / ConvTranspose glue: im2col built directly in (K, M) orientation from
# CNHW activations -> no NCHW<->NHWC transposes anywhere in the conv chains.
# ----------------------------------------------------------------------------
def _patches_T(x_cnhw, k, stride, pad):
    """x: (C, N, H, W) -> Pt (C*k*k, N*Ho*Wo) bf16; row order (c major, kh, kw)
    matching w.reshape(C_out, C_in*k*k)."""
    C, N, H, W = x_cnhw.shape
    Ho = (H + 2 * pad - k) // stride + 1
    Wo = (W + 2 * pad - k) // stride + 1
    xp = jnp.pad(x_cnhw, ((0, 0), (0, 0), (pad, pad), (pad, pad)))
    taps = []
    for kh in range(k):
        for kw in range(k):
            taps.append(xp[:, :, kh:kh + stride * (Ho - 1) + 1:stride,
                               kw:kw + stride * (Wo - 1) + 1:stride])
    p = jnp.stack(taps, axis=1)                          # (C, k*k, N, Ho, Wo)
    p = p.reshape(C * k * k, N * Ho * Wo)
    return p.astype(jnp.bfloat16), N, Ho, Wo


def conv2d_cnhw(x_cnhw, w2, b2, k, stride, pad, act):
    # TODO(synk): im2col could be folded into the Pallas kernel (strided ref
    # reads) to avoid materializing the k*k-expanded patch matrix in HBM.
    pT, N, Ho, Wo = _patches_T(x_cnhw, k, stride, pad)
    y = conv_gemm(w2, b2, pT, act)                       # (C_out, N*Ho*Wo)
    return y.reshape(w2.shape[0], N, Ho, Wo)


def conv_transpose2d_cnhw(x_cnhw, w2, b2, act):
    """ConvTranspose2d(k=3, s=2, p=1, output_padding=1) == conv(k=3, s=1) over the
    zero-dilated, (1,2)-padded input with a flipped/transposed kernel (pre-baked
    into w2 at init time). Output spatial = 2x input."""
    C, N, H, W = x_cnhw.shape
    xd = jnp.zeros((C, N, 2 * H - 1, 2 * W - 1), x_cnhw.dtype)
    xd = xd.at[:, :, ::2, ::2].set(x_cnhw)
    xd = jnp.pad(xd, ((0, 0), (0, 0), (1, 2), (1, 2)))
    return conv2d_cnhw(xd, w2, b2, k=3, stride=1, pad=0, act=act)


# ----------------------------------------------------------------------------
# Pallas kernel 2: fused core -- enc FCs + 4 LSTM cells + heads + dec FCs.
# Everything stays resident in VMEM (largest tensor is a (64, 2048) weight).
# ----------------------------------------------------------------------------
def _core_kernel(flat_ref, xs_ref, h_ref, c_ref,
                 efc1_w, efc1_b, efc2_w, efc2_b,
                 wih_img, wih_state, wih_u1, wih_u2,
                 whh_ref, lstm_b_ref, head_w, head_b,
                 dfc1_w, dfc1_b, dfc2_w, dfc2_b,
                 dec_flat_ref, ys_ref, h_out_ref, c_out_ref):
    f32, bf16 = jnp.float32, jnp.bfloat16
    H = H_LSTM

    # --- ImgEnc FC chain ---
    x = flat_ref[...].astype(bf16)
    e1 = jnp.dot(x, efc1_w[...], preferred_element_type=f32) + efc1_b[...]
    e1 = jnp.maximum(e1, 0.0)
    z_img = jnp.dot(e1.astype(bf16), efc2_w[...],
                    preferred_element_type=f32) + efc2_b[...]

    # --- hierarchical LSTM stack (PyTorch gate order i, f, g, o) ---
    def lstm(x_in, l, wih):
        gates = (jnp.dot(x_in, wih[...], preferred_element_type=f32)
                 + jnp.dot(h_ref[l], whh_ref[l], preferred_element_type=f32)
                 + lstm_b_ref[l])
        sig_if = jax.nn.sigmoid(gates[:, :2 * H])        # i|f share one 128-lane slab
        i = sig_if[:, :H]
        f = sig_if[:, H:]
        g = jnp.tanh(gates[:, 2 * H:3 * H])
        o = jax.nn.sigmoid(gates[:, 3 * H:])
        c_new = f * c_ref[l] + i * g
        h_new = o * jnp.tanh(c_new)
        h_out_ref[l] = h_new
        c_out_ref[l] = c_new
        return h_new

    h_i = lstm(z_img, 0, wih_img)
    h_s = lstm(xs_ref[...], 1, wih_state)
    h_u1 = lstm(jnp.concatenate([h_i, h_s], axis=-1), 2, wih_u1)
    h_u2 = lstm(h_u1, 3, wih_u2)

    # --- packed output heads: [:, :8] -> img-feat, [:, 8:] -> state ---
    heads = jnp.dot(h_u2, head_w[...], preferred_element_type=f32) + head_b[...]
    z_img_dec = heads[:, :IMG_FEAT_DIM]
    ys_ref[...] = heads[:, IMG_FEAT_DIM:]

    # --- ImgDec FC chain ---
    d1 = jnp.dot(z_img_dec.astype(bf16), dfc1_w[...],
                 preferred_element_type=f32) + dfc1_b[...]
    d1 = jnp.maximum(d1, 0.0)
    d2 = jnp.dot(d1.astype(bf16), dfc2_w[...],
                 preferred_element_type=f32) + dfc2_b[...]
    dec_flat_ref[...] = jnp.maximum(d2, 0.0)


def core_call(p, flat, x_state, h_pack, c_pack):
    B = flat.shape[0]
    vm = pl.BlockSpec(memory_space=pltpu.MemorySpace.VMEM)
    return pl.pallas_call(
        _core_kernel,
        out_shape=(jax.ShapeDtypeStruct((B, 32 * 8 * 8), jnp.float32),
                   jax.ShapeDtypeStruct((B, STATE_DIM), jnp.float32),
                   jax.ShapeDtypeStruct((4, B, H_LSTM), jnp.float32),
                   jax.ShapeDtypeStruct((4, B, H_LSTM), jnp.float32)),
        in_specs=[vm] * 20,
        out_specs=(vm, vm, vm, vm),
    )(flat, x_state, h_pack, c_pack,
      p["enc_fc1_w"], p["enc_fc1_b"], p["enc_fc2_w"], p["enc_fc2_b"],
      p["lstm_img_wih"], p["lstm_state_wih"], p["lstm_union1_wih"], p["lstm_union2_wih"],
      p["lstm_whh_pack"], p["lstm_b_pack"], p["head_w"], p["head_b"],
      p["dec_fc1_w"], p["dec_fc1_b"], p["dec_fc2_w"], p["dec_fc2_b"])


# ----------------------------------------------------------------------------
# Parameter init (deterministic, Keras-like: xavier-uniform weights, zero bias)
# stored in kernel-ready layouts: conv/deconv weights as (C_out, C_in*k*k) bf16,
# FC weights as (din, dout) bf16, LSTM weights f32 (whh / bias packed per layer).
# ----------------------------------------------------------------------------
def init_params(key):
    ks = iter(jax.random.split(key, 32))
    p = {}

    def xavier(shape, fan_in, fan_out, dtype=jnp.float32):
        lim = (6.0 / (fan_in + fan_out)) ** 0.5
        return jax.random.uniform(next(ks), shape, jnp.float32, -lim, lim).astype(dtype)

    def conv(name, cin, cout, k=3):
        w = xavier((cout, cin, k, k), cin * k * k, cout * k * k)
        p[name + "_w"] = w.reshape(cout, cin * k * k).astype(jnp.bfloat16)
        p[name + "_b"] = jnp.zeros((cout, 1), jnp.float32)

    def deconv(name, cin, cout, k=3):
        w = xavier((cin, cout, k, k), cin * k * k, cout * k * k)   # PyTorch ConvT layout
        w_conv = jnp.flip(w, axis=(2, 3)).transpose(1, 0, 2, 3)    # equivalent direct conv
        p[name + "_w"] = w_conv.reshape(cout, cin * k * k).astype(jnp.bfloat16)
        p[name + "_b"] = jnp.zeros((cout, 1), jnp.float32)

    def lin(name, din, dout):
        p[name + "_w"] = xavier((din, dout), din, dout, jnp.bfloat16)
        p[name + "_b"] = jnp.zeros((1, dout), jnp.float32)

    # ImgEnc
    conv("enc_conv1", 3, 8)
    conv("enc_conv2", 8, 16)
    conv("enc_conv3", 16, 32)
    lin("enc_fc1", 32 * 8 * 8, 64)
    lin("enc_fc2", 64, IMG_FEAT_DIM)
    # ImgDec
    lin("dec_fc1", IMG_FEAT_DIM, 64)
    lin("dec_fc2", 64, 32 * 8 * 8)
    deconv("dec_deconv1", 32, 16)
    deconv("dec_deconv2", 16, 8)
    deconv("dec_deconv3", 8, 3)
    # HRNNCell: 4 LSTMCells + packed linear heads.
    # TODO(synk): PyTorch init uses orthogonal weight_hh and separate b_ih/b_hh;
    # xavier + fused bias here (forward is identical when b = b_ih + b_hh).
    p["lstm_img_wih"] = xavier((IMG_FEAT_DIM, 4 * H_LSTM), IMG_FEAT_DIM, 4 * H_LSTM)
    p["lstm_state_wih"] = xavier((STATE_DIM, 4 * H_LSTM), STATE_DIM, 4 * H_LSTM)
    p["lstm_union1_wih"] = xavier((2 * SENSORY_DIM, 4 * H_LSTM), 2 * SENSORY_DIM, 4 * H_LSTM)
    p["lstm_union2_wih"] = xavier((UNION1_DIM, 4 * H_LSTM), UNION1_DIM, 4 * H_LSTM)
    p["lstm_whh_pack"] = jnp.stack(
        [xavier((H_LSTM, 4 * H_LSTM), H_LSTM, 4 * H_LSTM) for _ in range(4)], axis=0)
    p["lstm_b_pack"] = jnp.zeros((4, 1, 4 * H_LSTM), jnp.float32)
    p["head_w"] = jnp.concatenate(
        [xavier((UNION2_DIM, IMG_FEAT_DIM), UNION2_DIM, IMG_FEAT_DIM),
         xavier((UNION2_DIM, STATE_DIM), UNION2_DIM, STATE_DIM)], axis=1)
    p["head_b"] = jnp.zeros((1, IMG_FEAT_DIM + STATE_DIM), jnp.float32)
    return p


# ----------------------------------------------------------------------------
# Full HRNN forward
# ----------------------------------------------------------------------------
def hrnn_forward(params, x_img, x_state, hid_dict=None):
    """x_img: (N, 3, 64, 64) NCHW, x_state: (N, STATE_DIM)."""
    p = params
    N = x_img.shape[0]

    # ---- ImgEnc convs (CNHW chaining) ----
    x = x_img.transpose(1, 0, 2, 3)                                   # (3, N, 64, 64)
    h1 = conv2d_cnhw(x, p["enc_conv1_w"], p["enc_conv1_b"], 3, 2, 1, "relu")
    h2 = conv2d_cnhw(h1, p["enc_conv2_w"], p["enc_conv2_b"], 3, 2, 1, "relu")
    h3 = conv2d_cnhw(h2, p["enc_conv3_w"], p["enc_conv3_b"], 3, 2, 1, "relu")
    flat = h3.transpose(1, 0, 2, 3).reshape(N, 32 * 8 * 8)            # == PyTorch Flatten

    # ---- packed hidden state (all four LSTMs have hidden dim 64 here) ----
    def get(name):
        v = None if hid_dict is None else hid_dict.get(name)
        if v is None:
            z = jnp.zeros((N, H_LSTM), jnp.float32)
            return z, z
        return v

    hs, cs = zip(*(get(n) for n in LSTM_NAMES))
    h_pack = jnp.stack(hs, axis=0)
    c_pack = jnp.stack(cs, axis=0)

    # ---- fused core: enc FCs + 4 LSTM cells + heads + dec FCs (ONE kernel) ----
    dec_flat, y_state, h_out, c_out = core_call(p, flat, x_state, h_pack, c_pack)
    new_hid = {name: (h_out[l], c_out[l]) for l, name in enumerate(LSTM_NAMES)}

    # ---- ImgDec deconvs ----
    d = dec_flat.reshape(N, 32, 8, 8).transpose(1, 0, 2, 3)           # Unflatten -> CNHW
    d1 = conv_transpose2d_cnhw(d, p["dec_deconv1_w"], p["dec_deconv1_b"], "relu")
    d2 = conv_transpose2d_cnhw(d1, p["dec_deconv2_w"], p["dec_deconv2_b"], "relu")
    d3 = conv_transpose2d_cnhw(d2, p["dec_deconv3_w"], p["dec_deconv3_b"], "sigmoid")
    y_img = d3.transpose(1, 0, 2, 3)                                  # back to NCHW
    return y_img, y_state, new_hid


# ----------------------------------------------------------------------------
if __name__ == "__main__":
    key = jax.random.PRNGKey(0)
    pkey, ikey, skey = jax.random.split(key, 3)
    params = init_params(pkey)

    batch = 2
    x_img = jax.random.uniform(ikey, (batch, 3, 64, 64), jnp.float32)   # NCHW
    x_state = jax.random.normal(skey, (batch, STATE_DIM), jnp.float32)

    fwd = jax.jit(hrnn_forward)
    y_img, y_state, hid = fwd(params, x_img, x_state)
    # second step reuses the returned hidden state (exercises the hid_dict path)
    y_img, y_state, hid = fwd(params, x_img, x_state, hid)
    jax.block_until_ready((y_img, y_state, hid))

    assert y_img.shape == (batch, 3, 64, 64)
    assert y_state.shape == (batch, STATE_DIM)
    assert hid["union2"][0].shape == (batch, UNION2_DIM)
    assert bool(jnp.all(jnp.isfinite(y_img))) and bool(jnp.all(jnp.isfinite(y_state)))
    print("KERNEL_OK")
</pallas_src>

<mosaic_0001>
module attributes {stable_mosaic.version = 11 : i64} {
  func.func @_conv_gemm_kernel(%arg0: i32, %arg1: memref<8x27xbf16, #tpu.memory_space<vmem>>, %arg2: memref<27x2048xbf16, #tpu.memory_space<vmem>>, %arg3: memref<8x1xf32, #tpu.memory_space<vmem>>, %arg4: memref<8x2048xf32, #tpu.memory_space<vmem>>) attributes {dimension_semantics = [#tpu.dimension_semantics<parallel>], iteration_bounds = array<i64: 1>, scalar_prefetch = 0 : i64, scratch_operands = 0 : i64, tpu.core_type = #tpu.core_type<tc>, window_params = [{pipeline_mode = #tpu.pipeline_mode<synchronous>, transform_indices = @transform_0, window_bounds = array<i64: 8, 27>}, {transform_indices = @transform_1, window_bounds = array<i64: 27, 2048>}, {pipeline_mode = #tpu.pipeline_mode<synchronous>, transform_indices = @transform_2, window_bounds = array<i64: 8, 1>}, {transform_indices = @transform_3, window_bounds = array<i64: 8, 2048>}]} {
    %c0 = arith.constant 0 : index
    %c0_0 = arith.constant 0 : index
    %0 = vector.load %arg1[%c0, %c0_0] : memref<8x27xbf16, #tpu.memory_space<vmem>>, vector<8x27xbf16>
    %c0_1 = arith.constant 0 : index
    %c0_2 = arith.constant 0 : index
    %1 = vector.load %arg2[%c0_1, %c0_2] : memref<27x2048xbf16, #tpu.memory_space<vmem>>, vector<27x2048xbf16>
    %cst = arith.constant dense<0.000000e+00> : vector<8x2048xf32>
    %2 = tpu.matmul %0, %1, %cst {dimension_numbers = #tpu.dot_dimension_numbers<[1], [0], [0], [1], [0, 0, 1, 1], [], []>} : vector<8x27xbf16>, vector<27x2048xbf16>, vector<8x2048xf32> -> vector<8x2048xf32>
    %c0_3 = arith.constant 0 : index
    %c0_4 = arith.constant 0 : index
    %3 = vector.load %arg3[%c0_3, %c0_4] : memref<8x1xf32, #tpu.memory_space<vmem>>, vector<8x1xf32>
    %4 = vector.broadcast %3 : vector<8x1xf32> to vector<8x2048xf32>
    %5 = arith.addf %2, %4 : vector<8x2048xf32>
    %cst_5 = arith.constant 0.000000e+00 : f32
    %6 = vector.broadcast %cst_5 : f32 to vector<8x2048xf32>
    %7 = arith.maximumf %5, %6 : vector<8x2048xf32>
    %c0_6 = arith.constant 0 : index
    %c0_7 = arith.constant 0 : index
    %8 = vector.load %arg4[%c0_6, %c0_7] : memref<8x2048xf32, #tpu.memory_space<vmem>>, vector<8x2048xf32>
    tpu.vector_store %arg4[%c0_6, %c0_7], %7 {strides = array<i32>} : memref<8x2048xf32, #tpu.memory_space<vmem>>, vector<8x2048xf32>,
    return
  }
  func.func @transform_0(%arg0: i32) -> (i32, i32) {
    %c0_i32 = arith.constant 0 : i32
    %c0_i32_0 = arith.constant 0 : i32
    %c0_i32_1 = arith.constant 0 : i32
    return %c0_i32, %c0_i32_0 : i32, i32
  }
  func.func @transform_1(%arg0: i32) -> (i32, i32) {
    %c0_i32 = arith.constant 0 : i32
    %c0_i32_0 = arith.constant 0 : i32
    return %c0_i32, %arg0 : i32, i32
  }
  func.func @transform_2(%arg0: i32) -> (i32, i32) {
    %c0_i32 = arith.constant 0 : i32
    %c0_i32_0 = arith.constant 0 : i32
    %c0_i32_1 = arith.constant 0 : i32
    return %c0_i32, %c0_i32_0 : i32, i32
  }
  func.func @transform_3(%arg0: i32) -> (i32, i32) {
    %c0_i32 = arith.constant 0 : i32
    %c0_i32_0 = arith.constant 0 : i32
    return %c0_i32, %arg0 : i32, i32
  }
}

module attributes {stable_mosaic.version = 11 : i64} {
  func.func @_conv_gemm_kernel(%arg0: i32, %arg1: memref<16x72xbf16, #tpu.memory_space<vmem>>, %arg2: memref<72x512xbf16, #tpu.memory_space<vmem>>, %arg3: memref<16x1xf32, #tpu.memory_space<vmem>>, %arg4: memref<16x512xf32, #tpu.memory_space<vmem>>) attributes {dimension_semantics = [#tpu.dimension_semantics<parallel>], iteration_bounds = array<i64: 1>, scalar_prefetch = 0 : i64, scratch_operands = 0 : i64, tpu.core_type = #tpu.core_type<tc>, window_params = [{pipeline_mode = #tpu.pipeline_mode<synchronous>, transform_indices = @transform_0, window_bounds = array<i64: 16, 72>}, {transform_indices = @transform_1, window_bounds = array<i64: 72, 512>}, {pipeline_mode = #tpu.pipeline_mode<synchronous>, transform_indices = @transform_2, window_bounds = array<i64: 16, 1>}, {transform_indices = @transform_3, window_bounds = array<i64: 16, 512>}]} {
    %c0 = arith.constant 0 : index
    %c0_0 = arith.constant 0 : index
    %0 = vector.load %arg1[%c0, %c0_0] : memref<16x72xbf16, #tpu.memory_space<vmem>>, vector<16x72xbf16>
    %c0_1 = arith.constant 0 : index
    %c0_2 = arith.constant 0 : index
    %1 = vector.load %arg2[%c0_1, %c0_2] : memref<72x512xbf16, #tpu.memory_space<vmem>>, vector<72x512xbf16>
    %cst = arith.constant dense<0.000000e+00> : vector<16x512xf32>
    %2 = tpu.matmul %0, %1, %cst {dimension_numbers = #tpu.dot_dimension_numbers<[1], [0], [0], [1], [0, 0, 1, 1], [], []>} : vector<16x72xbf16>, vector<72x512xbf16>, vector<16x512xf32> -> vector<16x512xf32>
    %c0_3 = arith.constant 0 : index
    %c0_4 = arith.constant 0 : index
    %3 = vector.load %arg3[%c0_3, %c0_4] : memref<16x1xf32, #tpu.memory_space<vmem>>, vector<16x1xf32>
    %4 = vector.broadcast %3 : vector<16x1xf32> to vector<16x512xf32>
    %5 = arith.addf %2, %4 : vector<16x512xf32>
    %cst_5 = arith.constant 0.000000e+00 : f32
    %6 = vector.broadcast %cst_5 : f32 to vector<16x512xf32>
    %7 = arith.maximumf %5, %6 : vector<16x512xf32>
    %c0_6 = arith.constant 0 : index
    %c0_7 = arith.constant 0 : index
    %8 = vector.load %arg4[%c0_6, %c0_7] : memref<16x512xf32, #tpu.memory_space<vmem>>, vector<16x512xf32>
    tpu.vector_store %arg4[%c0_6, %c0_7], %7 {strides = array<i32>} : memref<16x512xf32, #tpu.memory_space<vmem>>, vector<16x512xf32>,
    return
  }
  func.func @transform_0(%arg0: i32) -> (i32, i32) {
    %c0_i32 = arith.constant 0 : i32
    %c0_i32_0 = arith.constant 0 : i32
    %c0_i32_1 = arith.constant 0 : i32
    return %c0_i32, %c0_i32_0 : i32, i32
  }
  func.func @transform_1(%arg0: i32) -> (i32, i32) {
    %c0_i32 = arith.constant 0 : i32
    %c0_i32_0 = arith.constant 0 : i32
    return %c0_i32, %arg0 : i32, i32
  }
  func.func @transform_2(%arg0: i32) -> (i32, i32) {
    %c0_i32 = arith.constant 0 : i32
    %c0_i32_0 = arith.constant 0 : i32
    %c0_i32_1 = arith.constant 0 : i32
    return %c0_i32, %c0_i32_0 : i32, i32
  }
  func.func @transform_3(%arg0: i32) -> (i32, i32) {
    %c0_i32 = arith.constant 0 : i32
    %c0_i32_0 = arith.constant 0 : i32
    return %c0_i32, %arg0 : i32, i32
  }
}

module attributes {stable_mosaic.version = 11 : i64} {
  func.func @_conv_gemm_kernel(%arg0: i32, %arg1: memref<32x144xbf16, #tpu.memory_space<vmem>>, %arg2: memref<144x128xbf16, #tpu.memory_space<vmem>>, %arg3: memref<32x1xf32, #tpu.memory_space<vmem>>, %arg4: memref<32x128xf32, #tpu.memory_space<vmem>>) attributes {dimension_semantics = [#tpu.dimension_semantics<parallel>], iteration_bounds = array<i64: 1>, scalar_prefetch = 0 : i64, scratch_operands = 0 : i64, tpu.core_type = #tpu.core_type<tc>, window_params = [{pipeline_mode = #tpu.pipeline_mode<synchronous>, transform_indices = @transform_0, window_bounds = array<i64: 32, 144>}, {transform_indices = @transform_1, window_bounds = array<i64: 144, 128>}, {pipeline_mode = #tpu.pipeline_mode<synchronous>, transform_indices = @transform_2, window_bounds = array<i64: 32, 1>}, {transform_indices = @transform_3, window_bounds = array<i64: 32, 128>}]} {
    %c0 = arith.constant 0 : index
    %c0_0 = arith.constant 0 : index
    %0 = vector.load %arg1[%c0, %c0_0] : memref<32x144xbf16, #tpu.memory_space<vmem>>, vector<32x144xbf16>
    %c0_1 = arith.constant 0 : index
    %c0_2 = arith.constant 0 : index
    %1 = vector.load %arg2[%c0_1, %c0_2] : memref<144x128xbf16, #tpu.memory_space<vmem>>, vector<144x128xbf16>
    %cst = arith.constant dense<0.000000e+00> : vector<32x128xf32>
    %2 = tpu.matmul %0, %1, %cst {dimension_numbers = #tpu.dot_dimension_numbers<[1], [0], [0], [1], [0, 0, 1, 1], [], []>} : vector<32x144xbf16>, vector<144x128xbf16>, vector<32x128xf32> -> vector<32x128xf32>
    %c0_3 = arith.constant 0 : index
    %c0_4 = arith.constant 0 : index
    %3 = vector.load %arg3[%c0_3, %c0_4] : memref<32x1xf32, #tpu.memory_space<vmem>>, vector<32x1xf32>
    %4 = vector.broadcast %3 : vector<32x1xf32> to vector<32x128xf32>
    %5 = arith.addf %2, %4 : vector<32x128xf32>
    %cst_5 = arith.constant 0.000000e+00 : f32
    %6 = vector.broadcast %cst_5 : f32 to vector<32x128xf32>
    %7 = arith.maximumf %5, %6 : vector<32x128xf32>
    %c0_6 = arith.constant 0 : index
    %c0_7 = arith.constant 0 : index
    %8 = vector.load %arg4[%c0_6, %c0_7] : memref<32x128xf32, #tpu.memory_space<vmem>>, vector<32x128xf32>
    tpu.vector_store %arg4[%c0_6, %c0_7], %7 {strides = array<i32>} : memref<32x128xf32, #tpu.memory_space<vmem>>, vector<32x128xf32>,
    return
  }
  func.func @transform_0(%arg0: i32) -> (i32, i32) {
    %c0_i32 = arith.constant 0 : i32
    %c0_i32_0 = arith.constant 0 : i32
    %c0_i32_1 = arith.constant 0 : i32
    return %c0_i32, %c0_i32_0 : i32, i32
  }
  func.func @transform_1(%arg0: i32) -> (i32, i32) {
    %c0_i32 = arith.constant 0 : i32
    %c0_i32_0 = arith.constant 0 : i32
    return %c0_i32, %arg0 : i32, i32
  }
  func.func @transform_2(%arg0: i32) -> (i32, i32) {
    %c0_i32 = arith.constant 0 : i32
    %c0_i32_0 = arith.constant 0 : i32
    %c0_i32_1 = arith.constant 0 : i32
    return %c0_i32, %c0_i32_0 : i32, i32
  }
  func.func @transform_3(%arg0: i32) -> (i32, i32) {
    %c0_i32 = arith.constant 0 : i32
    %c0_i32_0 = arith.constant 0 : i32
    return %c0_i32, %arg0 : i32, i32
  }
}

module attributes {stable_mosaic.version = 11 : i64} {
  func.func @_core_kernel(%arg0: memref<2x2048xf32, #tpu.memory_space<vmem>>, %arg1: memref<2x8xf32, #tpu.memory_space<vmem>>, %arg2: memref<4x2x64xf32, #tpu.memory_space<vmem>>, %arg3: memref<4x2x64xf32, #tpu.memory_space<vmem>>, %arg4: memref<2048x64xbf16, #tpu.memory_space<vmem>>, %arg5: memref<1x64xf32, #tpu.memory_space<vmem>>, %arg6: memref<64x8xbf16, #tpu.memory_space<vmem>>, %arg7: memref<1x8xf32, #tpu.memory_space<vmem>>, %arg8: memref<8x256xf32, #tpu.memory_space<vmem>>, %arg9: memref<8x256xf32, #tpu.memory_space<vmem>>, %arg10: memref<128x256xf32, #tpu.memory_space<vmem>>, %arg11: memref<64x256xf32, #tpu.memory_space<vmem>>, %arg12: memref<4x64x256xf32, #tpu.memory_space<vmem>>, %arg13: memref<4x1x256xf32, #tpu.memory_space<vmem>>, %arg14: memref<64x16xf32, #tpu.memory_space<vmem>>, %arg15: memref<1x16xf32, #tpu.memory_space<vmem>>, %arg16: memref<8x64xbf16, #tpu.memory_space<vmem>>, %arg17: memref<1x64xf32, #tpu.memory_space<vmem>>, %arg18: memref<64x2048xbf16, #tpu.memory_space<vmem>>, %arg19: memref<1x2048xf32, #tpu.memory_space<vmem>>, %arg20: memref<2x2048xf32, #tpu.memory_space<vmem>>, %arg21: memref<2x8xf32, #tpu.memory_space<vmem>>, %arg22: memref<4x2x64xf32, #tpu.memory_space<vmem>>, %arg23: memref<4x2x64xf32, #tpu.memory_space<vmem>>) attributes {dimension_semantics = [], scalar_prefetch = 0 : i64, scratch_operands = 0 : i64, tpu.core_type = #tpu.core_type<tc>} {
    %c0 = arith.constant 0 : index
    %c0_0 = arith.constant 0 : index
    %0 = vector.load %arg0[%c0, %c0_0] : memref<2x2048xf32, #tpu.memory_space<vmem>>, vector<2x2048xf32>
    %1 = arith.truncf %0 : vector<2x2048xf32> to vector<2x2048xbf16>
    %c0_1 = arith.constant 0 : index
    %c0_2 = arith.constant 0 : index
    %2 = vector.load %arg4[%c0_1, %c0_2] : memref<2048x64xbf16, #tpu.memory_space<vmem>>, vector<2048x64xbf16>
    %cst = arith.constant dense<0.000000e+00> : vector<2x64xf32>
    %3 = tpu.matmul %1, %2, %cst {dimension_numbers = #tpu.dot_dimension_numbers<[1], [0], [0], [1], [0, 0, 1, 1], [], []>} : vector<2x2048xbf16>, vector<2048x64xbf16>, vector<2x64xf32> -> vector<2x64xf32>
    %c0_3 = arith.constant 0 : index
    %c0_4 = arith.constant 0 : index
    %4 = vector.load %arg5[%c0_3, %c0_4] : memref<1x64xf32, #tpu.memory_space<vmem>>, vector<1x64xf32>
    %5 = vector.broadcast %4 : vector<1x64xf32> to vector<2x64xf32>
    %6 = arith.addf %3, %5 : vector<2x64xf32>
    %cst_5 = arith.constant 0.000000e+00 : f32
    %7 = vector.broadcast %cst_5 : f32 to vector<2x64xf32>
    %8 = arith.maximumf %6, %7 : vector<2x64xf32>
    %9 = arith.truncf %8 : vector<2x64xf32> to vector<2x64xbf16>
    %c0_6 = arith.constant 0 : index
    %c0_7 = arith.constant 0 : index
    %10 = vector.load %arg6[%c0_6, %c0_7] : memref<64x8xbf16, #tpu.memory_space<vmem>>, vector<64x8xbf16>
    %cst_8 = arith.constant dense<0.000000e+00> : vector<2x8xf32>
    %11 = tpu.matmul %9, %10, %cst_8 {dimension_numbers = #tpu.dot_dimension_numbers<[1], [0], [0], [1], [0, 0, 1, 1], [], []>} : vector<2x64xbf16>, vector<64x8xbf16>, vector<2x8xf32> -> vector<2x8xf32>
    %c0_9 = arith.constant 0 : index
    %c0_10 = arith.constant 0 : index
    %12 = vector.load %arg7[%c0_9, %c0_10] : memref<1x8xf32, #tpu.memory_space<vmem>>, vector<1x8xf32>
    %13 = vector.broadcast %12 : vector<1x8xf32> to vector<2x8xf32>
    %14 = arith.addf %11, %13 : vector<2x8xf32>
    %c0_11 = arith.constant 0 : index
    %c0_12 = arith.constant 0 : index
    %15 = vector.load %arg8[%c0_11, %c0_12] : memref<8x256xf32, #tpu.memory_space<vmem>>, vector<8x256xf32>
    %cst_13 = arith.constant dense<0.000000e+00> : vector<2x256xf32>
    %16 = tpu.matmul %14, %15, %cst_13 {dimension_numbers = #tpu.dot_dimension_numbers<[1], [0], [0], [1], [0, 0, 1, 1], [], []>} : vector<2x8xf32>, vector<8x256xf32>, vector<2x256xf32> -> vector<2x256xf32>
    %c0_14 = arith.constant 0 : index
    %c0_15 = arith.constant 0 : index
    %c0_16 = arith.constant 0 : index
    %17 = vector.load %arg2[%c0_14, %c0_15, %c0_16] : memref<4x2x64xf32, #tpu.memory_space<vmem>>, vector<1x2x64xf32>
    %18 = vector.shape_cast %17 : vector<1x2x64xf32> to vector<2x64xf32>
    %c0_17 = arith.constant 0 : index
    %c0_18 = arith.constant 0 : index
    %c0_19 = arith.constant 0 : index
    %19 = vector.load %arg12[%c0_17, %c0_18, %c0_19] : memref<4x64x256xf32, #tpu.memory_space<vmem>>, vector<1x64x256xf32>
    %20 = vector.shape_cast %19 : vector<1x64x256xf32> to vector<64x256xf32>
    %cst_20 = arith.constant dense<0.000000e+00> : vector<2x256xf32>
    %21 = tpu.matmul %18, %20, %cst_20 {dimension_numbers = #tpu.dot_dimension_numbers<[1], [0], [0], [1], [0, 0, 1, 1], [], []>} : vector<2x64xf32>, vector<64x256xf32>, vector<2x256xf32> -> vector<2x256xf32>
    %22 = arith.addf %16, %21 : vector<2x256xf32>
    %c0_21 = arith.constant 0 : index
    %c0_22 = arith.constant 0 : index
    %c0_23 = arith.constant 0 : index
    %23 = vector.load %arg13[%c0_21, %c0_22, %c0_23] : memref<4x1x256xf32, #tpu.memory_space<vmem>>, vector<1x1x256xf32>
    %24 = vector.shape_cast %23 : vector<1x1x256xf32> to vector<1x256xf32>
    %25 = vector.broadcast %24 : vector<1x256xf32> to vector<2x256xf32>
    %26 = arith.addf %22, %25 : vector<2x256xf32>
    %27 = vector.extract_strided_slice %26 {offsets = [0, 0], sizes = [2, 128], strides = [1, 1]} : vector<2x256xf32> to vector<2x128xf32>
    %28 = arith.negf %27 : vector<2x128xf32>
    %29 = math.exp %28 : vector<2x128xf32>
    %cst_24 = arith.constant 1.000000e+00 : f32
    %30 = vector.broadcast %cst_24 : f32 to vector<2x128xf32>
    %31 = arith.addf %30, %29 : vector<2x128xf32>
    %32 = arith.divf %30, %31 : vector<2x128xf32>
    %33 = vector.extract_strided_slice %32 {offsets = [0, 0], sizes = [2, 64], strides = [1, 1]} : vector<2x128xf32> to vector<2x64xf32>
    %34 = vector.extract_strided_slice %32 {offsets = [0, 64], sizes = [2, 64], strides = [1, 1]} : vector<2x128xf32> to vector<2x64xf32>
    %35 = vector.extract_strided_slice %26 {offsets = [0, 128], sizes = [2, 64], strides = [1, 1]} : vector<2x256xf32> to vector<2x64xf32>
    %36 = math.tanh %35 : vector<2x64xf32>
    %37 = vector.extract_strided_slice %26 {offsets = [0, 192], sizes = [2, 64], strides = [1, 1]} : vector<2x256xf32> to vector<2x64xf32>
    %38 = arith.negf %37 : vector<2x64xf32>
    %39 = math.exp %38 : vector<2x64xf32>
    %cst_25 = arith.constant 1.000000e+00 : f32
    %40 = vector.broadcast %cst_25 : f32 to vector<2x64xf32>
    %41 = arith.addf %40, %39 : vector<2x64xf32>
    %42 = arith.divf %40, %41 : vector<2x64xf32>
    %c0_26 = arith.constant 0 : index
    %c0_27 = arith.constant 0 : index
    %c0_28 = arith.constant 0 : index
    %43 = vector.load %arg3[%c0_26, %c0_27, %c0_28] : memref<4x2x64xf32, #tpu.memory_space<vmem>>, vector<1x2x64xf32>
    %44 = vector.shape_cast %43 : vector<1x2x64xf32> to vector<2x64xf32>
    %45 = arith.mulf %34, %44 : vector<2x64xf32>
    %46 = arith.mulf %33, %36 : vector<2x64xf32>
    %47 = arith.addf %45, %46 : vector<2x64xf32>
    %48 = math.tanh %47 : vector<2x64xf32>
    %49 = arith.mulf %42, %48 : vector<2x64xf32>
    %c0_29 = arith.constant 0 : index
    %c0_30 = arith.constant 0 : index
    %c0_31 = arith.constant 0 : index
    %50 = vector.load %arg22[%c0_29, %c0_30, %c0_31] : memref<4x2x64xf32, #tpu.memory_space<vmem>>, vector<1x2x64xf32>
    %51 = vector.shape_cast %50 : vector<1x2x64xf32> to vector<2x64xf32>
    %52 = vector.shape_cast %49 : vector<2x64xf32> to vector<1x2x64xf32>
    tpu.vector_store %arg22[%c0_29, %c0_30, %c0_31], %52 {strides = array<i32>} : memref<4x2x64xf32, #tpu.memory_space<vmem>>, vector<1x2x64xf32>,
    %c0_32 = arith.constant 0 : index
    %c0_33 = arith.constant 0 : index
    %c0_34 = arith.constant 0 : index
    %53 = vector.load %arg23[%c0_32, %c0_33, %c0_34] : memref<4x2x64xf32, #tpu.memory_space<vmem>>, vector<1x2x64xf32>
    %54 = vector.shape_cast %53 : vector<1x2x64xf32> to vector<2x64xf32>
    %55 = vector.shape_cast %47 : vector<2x64xf32> to vector<1x2x64xf32>
    tpu.vector_store %arg23[%c0_32, %c0_33, %c0_34], %55 {strides = array<i32>} : memref<4x2x64xf32, #tpu.memory_space<vmem>>, vector<1x2x64xf32>,
    %c0_35 = arith.constant 0 : index
    %c0_36 = arith.constant 0 : index
    %56 = vector.load %arg1[%c0_35, %c0_36] : memref<2x8xf32, #tpu.memory_space<vmem>>, vector<2x8xf32>
    %c0_37 = arith.constant 0 : index
    %c0_38 = arith.constant 0 : index
    %57 = vector.load %arg9[%c0_37, %c0_38] : memref<8x256xf32, #tpu.memory_space<vmem>>, vector<8x256xf32>
    %cst_39 = arith.constant dense<0.000000e+00> : vector<2x256xf32>
    %58 = tpu.matmul %56, %57, %cst_39 {dimension_numbers = #tpu.dot_dimension_numbers<[1], [0], [0], [1], [0, 0, 1, 1], [], []>} : vector<2x8xf32>, vector<8x256xf32>, vector<2x256xf32> -> vector<2x256xf32>
    %c1 = arith.constant 1 : index
    %c0_40 = arith.constant 0 : index
    %c0_41 = arith.constant 0 : index
    %59 = vector.load %arg2[%c1, %c0_40, %c0_41] : memref<4x2x64xf32, #tpu.memory_space<vmem>>, vector<1x2x64xf32>
    %60 = vector.shape_cast %59 : vector<1x2x64xf32> to vector<2x64xf32>
    %c1_42 = arith.constant 1 : index
    %c0_43 = arith.constant 0 : index
    %c0_44 = arith.constant 0 : index
    %61 = vector.load %arg12[%c1_42, %c0_43, %c0_44] : memref<4x64x256xf32, #tpu.memory_space<vmem>>, vector<1x64x256xf32>
    %62 = vector.shape_cast %61 : vector<1x64x256xf32> to vector<64x256xf32>
    %cst_45 = arith.constant dense<0.000000e+00> : vector<2x256xf32>
    %63 = tpu.matmul %60, %62, %cst_45 {dimension_numbers = #tpu.dot_dimension_numbers<[1], [0], [0], [1], [0, 0, 1, 1], [], []>} : vector<2x64xf32>, vector<64x256xf32>, vector<2x256xf32> -> vector<2x256xf32>
    %64 = arith.addf %58, %63 : vector<2x256xf32>
    %c1_46 = arith.constant 1 : index
    %c0_47 = arith.constant 0 : index
    %c0_48 = arith.constant 0 : index
    %65 = vector.load %arg13[%c1_46, %c0_47, %c0_48] : memref<4x1x256xf32, #tpu.memory_space<vmem>>, vector<1x1x256xf32>
    %66 = vector.shape_cast %65 : vector<1x1x256xf32> to vector<1x256xf32>
    %67 = vector.broadcast %66 : vector<1x256xf32> to vector<2x256xf32>
    %68 = arith.addf %64, %67 : vector<2x256xf32>
    %69 = vector.extract_strided_slice %68 {offsets = [0, 0], sizes = [2, 128], strides = [1, 1]} : vector<2x256xf32> to vector<2x128xf32>
    %70 = arith.negf %69 : vector<2x128xf32>
    %71 = math.exp %70 : vector<2x128xf32>
    %cst_49 = arith.constant 1.000000e+00 : f32
    %72 = vector.broadcast %cst_49 : f32 to vector<2x128xf32>
    %73 = arith.addf %72, %71 : vector<2x128xf32>
    %74 = arith.divf %72, %73 : vector<2x128xf32>
    %75 = vector.extract_strided_slice %74 {offsets = [0, 0], sizes = [2, 64], strides = [1, 1]} : vector<2x128xf32> to vector<2x64xf32>
    %76 = vector.extract_strided_slice %74 {offsets = [0, 64], sizes = [2, 64], strides = [1, 1]} : vector<2x128xf32> to vector<2x64xf32>
    %77 = vector.extract_strided_slice %68 {offsets = [0, 128], sizes = [2, 64], strides = [1, 1]} : vector<2x256xf32> to vector<2x64xf32>
    %78 = math.tanh %77 : vector<2x64xf32>
    %79 = vector.extract_strided_slice %68 {offsets = [0, 192], sizes = [2, 64], strides = [1, 1]} : vector<2x256xf32> to vector<2x64xf32>
    %80 = arith.negf %79 : vector<2x64xf32>
    %81 = math.exp %80 : vector<2x64xf32>
    %cst_50 = arith.constant 1.000000e+00 : f32
    %82 = vector.broadcast %cst_50 : f32 to vector<2x64xf32>
    %83 = arith.addf %82, %81 : vector<2x64xf32>
    %84 = arith.divf %82, %83 : vector<2x64xf32>
    %c1_51 = arith.constant 1 : index
    %c0_52 = arith.constant 0 : index
    %c0_53 = arith.constant 0 : index
    %85 = vector.load %arg3[%c1_51, %c0_52, %c0_53] : memref<4x2x64xf32, #tpu.memory_space<vmem>>, vector<1x2x64xf32>
    %86 = vector.shape_cast %85 : vector<1x2x64xf32> to vector<2x64xf32>
    %87 = arith.mulf %76, %86 : vector<2x64xf32>
    %88 = arith.mulf %75, %78 : vector<2x64xf32>
    %89 = arith.addf %87, %88 : vector<2x64xf32>
    %90 = math.tanh %89 : vector<2x64xf32>
    %91 = arith.mulf %84, %90 : vector<2x64xf32>
    %c1_54 = arith.constant 1 : index
    %c0_55 = arith.constant 0 : index
    %c0_56 = arith.constant 0 : index
    %92 = vector.load %arg22[%c1_54, %c0_55, %c0_56] : memref<4x2x64xf32, #tpu.memory_space<vmem>>, vector<1x2x64xf32>
    %93 = vector.shape_cast %92 : vector<1x2x64xf32> to vector<2x64xf32>
    %94 = vector.shape_cast %91 : vector<2x64xf32> to vector<1x2x64xf32>
    tpu.vector_store %arg22[%c1_54, %c0_55, %c0_56], %94 {strides = array<i32>} : memref<4x2x64xf32, #tpu.memory_space<vmem>>, vector<1x2x64xf32>,
    %c1_57 = arith.constant 1 : index
    %c0_58 = arith.constant 0 : index
    %c0_59 = arith.constant 0 : index
    %95 = vector.load %arg23[%c1_57, %c0_58, %c0_59] : memref<4x2x64xf32, #tpu.memory_space<vmem>>, vector<1x2x64xf32>
    %96 = vector.shape_cast %95 : vector<1x2x64xf32> to vector<2x64xf32>
    %97 = vector.shape_cast %89 : vector<2x64xf32> to vector<1x2x64xf32>
    tpu.vector_store %arg23[%c1_57, %c0_58, %c0_59], %97 {strides = array<i32>} : memref<4x2x64xf32, #tpu.memory_space<vmem>>, vector<1x2x64xf32>,
    %98 = tpu.concatenate %49, %91 in 1 : vector<2x64xf32>, vector<2x64xf32> -> vector<2x128xf32>
    %c0_60 = arith.constant 0 : index
    %c0_61 = arith.constant 0 : index
    %99 = vector.load %arg10[%c0_60, %c0_61] : memref<128x256xf32, #tpu.memory_space<vmem>>, vector<128x256xf32>
    %cst_62 = arith.constant dense<0.000000e+00> : vector<2x256xf32>
    %100 = tpu.matmul %98, %99, %cst_62 {dimension_numbers = #tpu.dot_dimension_numbers<[1], [0], [0], [1], [0, 0, 1, 1], [], []>} : vector<2x128xf32>, vector<128x256xf32>, vector<2x256xf32> -> vector<2x256xf32>
    %c2 = arith.constant 2 : index
    %c0_63 = arith.constant 0 : index
    %c0_64 = arith.constant 0 : index
    %101 = vector.load %arg2[%c2, %c0_63, %c0_64] : memref<4x2x64xf32, #tpu.memory_space<vmem>>, vector<1x2x64xf32>
    %102 = vector.shape_cast %101 : vector<1x2x64xf32> to vector<2x64xf32>
    %c2_65 = arith.constant 2 : index
    %c0_66 = arith.constant 0 : index
    %c0_67 = arith.constant 0 : index
    %103 = vector.load %arg12[%c2_65, %c0_66, %c0_67] : memref<4x64x256xf32, #tpu.memory_space<vmem>>, vector<1x64x256xf32>
    %104 = vector.shape_cast %103 : vector<1x64x256xf32> to vector<64x256xf32>
    %cst_68 = arith.constant dense<0.000000e+00> : vector<2x256xf32>
    %105 = tpu.matmul %102, %104, %cst_68 {dimension_numbers = #tpu.dot_dimension_numbers<[1], [0], [0], [1], [0, 0, 1, 1], [], []>} : vector<2x64xf32>, vector<64x256xf32>, vector<2x256xf32> -> vector<2x256xf32>
    %106 = arith.addf %100, %105 : vector<2x256xf32>
    %c2_69 = arith.constant 2 : index
    %c0_70 = arith.constant 0 : index
    %c0_71 = arith.constant 0 : index
    %107 = vector.load %arg13[%c2_69, %c0_70, %c0_71] : memref<4x1x256xf32, #tpu.memory_space<vmem>>, vector<1x1x256xf32>
    %108 = vector.shape_cast %107 : vector<1x1x256xf32> to vector<1x256xf32>
    %109 = vector.broadcast %108 : vector<1x256xf32> to vector<2x256xf32>
    %110 = arith.addf %106, %109 : vector<2x256xf32>
    %111 = vector.extract_strided_slice %110 {offsets = [0, 0], sizes = [2, 128], strides = [1, 1]} : vector<2x256xf32> to vector<2x128xf32>
    %112 = arith.negf %111 : vector<2x128xf32>
    %113 = math.exp %112 : vector<2x128xf32>
    %cst_72 = arith.constant 1.000000e+00 : f32
    %114 = vector.broadcast %cst_72 : f32 to vector<2x128xf32>
    %115 = arith.addf %114, %113 : vector<2x128xf32>
    %116 = arith.divf %114, %115 : vector<2x128xf32>
    %117 = vector.extract_strided_slice %116 {offsets = [0, 0], sizes = [2, 64], strides = [1, 1]} : vector<2x128xf32> to vector<2x64xf32>
    %118 = vector.extract_strided_slice %116 {offsets = [0, 64], sizes = [2, 64], strides = [1, 1]} : vector<2x128xf32> to vector<2x64xf32>
    %119 = vector.extract_strided_slice %110 {offsets = [0, 128], sizes = [2, 64], strides = [1, 1]} : vector<2x256xf32> to vector<2x64xf32>
    %120 = math.tanh %119 : vector<2x64xf32>
    %121 = vector.extract_strided_slice %110 {offsets = [0, 192], sizes = [2, 64], strides = [1, 1]} : vector<2x256xf32> to vector<2x64xf32>
    %122 = arith.negf %121 : vector<2x64xf32>
    %123 = math.exp %122 : vector<2x64xf32>
    %cst_73 = arith.constant 1.000000e+00 : f32
    %124 = vector.broadcast %cst_73 : f32 to vector<2x64xf32>
    %125 = arith.addf %124, %123 : vector<2x64xf32>
    %126 = arith.divf %124, %125 : vector<2x64xf32>
    %c2_74 = arith.constant 2 : index
    %c0_75 = arith.constant 0 : index
    %c0_76 = arith.constant 0 : index
    %127 = vector.load %arg3[%c2_74, %c0_75, %c0_76] : memref<4x2x64xf32, #tpu.memory_space<vmem>>, vector<1x2x64xf32>
    %128 = vector.shape_cast %127 : vector<1x2x64xf32> to vector<2x64xf32>
    %129 = arith.mulf %118, %128 : vector<2x64xf32>
    %130 = arith.mulf %117, %120 : vector<2x64xf32>
    %131 = arith.addf %129, %130 : vector<2x64xf32>
    %132 = math.tanh %131 : vector<2x64xf32>
    %133 = arith.mulf %126, %132 : vector<2x64xf32>
    %c2_77 = arith.constant 2 : index
    %c0_78 = arith.constant 0 : index
    %c0_79 = arith.constant 0 : index
    %134 = vector.load %arg22[%c2_77, %c0_78, %c0_79] : memref<4x2x64xf32, #tpu.memory_space<vmem>>, vector<1x2x64xf32>
    %135 = vector.shape_cast %134 : vector<1x2x64xf32> to vector<2x64xf32>
    %136 = vector.shape_cast %133 : vector<2x64xf32> to vector<1x2x64xf32>
    tpu.vector_store %arg22[%c2_77, %c0_78, %c0_79], %136 {strides = array<i32>} : memref<4x2x64xf32, #tpu.memory_space<vmem>>, vector<1x2x64xf32>,
    %c2_80 = arith.constant 2 : index
    %c0_81 = arith.constant 0 : index
    %c0_82 = arith.constant 0 : index
    %137 = vector.load %arg23[%c2_80, %c0_81, %c0_82] : memref<4x2x64xf32, #tpu.memory_space<vmem>>, vector<1x2x64xf32>
    %138 = vector.shape_cast %137 : vector<1x2x64xf32> to vector<2x64xf32>
    %139 = vector.shape_cast %131 : vector<2x64xf32> to vector<1x2x64xf32>
    tpu.vector_store %arg23[%c2_80, %c0_81, %c0_82], %139 {strides = array<i32>} : memref<4x2x64xf32, #tpu.memory_space<vmem>>, vector<1x2x64xf32>,
    %c0_83 = arith.constant 0 : index
    %c0_84 = arith.constant 0 : index
    %140 = vector.load %arg11[%c0_83, %c0_84] : memref<64x256xf32, #tpu.memory_space<vmem>>, vector<64x256xf32>
    %cst_85 = arith.constant dense<0.000000e+00> : vector<2x256xf32>
    %141 = tpu.matmul %133, %140, %cst_85 {dimension_numbers = #tpu.dot_dimension_numbers<[1], [0], [0], [1], [0, 0, 1, 1], [], []>} : vector<2x64xf32>, vector<64x256xf32>, vector<2x256xf32> -> vector<2x256xf32>
    %c3 = arith.constant 3 : index
    %c0_86 = arith.constant 0 : index
    %c0_87 = arith.constant 0 : index
    %142 = vector.load %arg2[%c3, %c0_86, %c0_87] : memref<4x2x64xf32, #tpu.memory_space<vmem>>, vector<1x2x64xf32>
    %143 = vector.shape_cast %142 : vector<1x2x64xf32> to vector<2x64xf32>
    %c3_88 = arith.constant 3 : index
    %c0_89 = arith.constant 0 : index
    %c0_90 = arith.constant 0 : index
    %144 = vector.load %arg12[%c3_88, %c0_89, %c0_90] : memref<4x64x256xf32, #tpu.memory_space<vmem>>, vector<1x64x256xf32>
    %145 = vector.shape_cast %144 : vector<1x64x256xf32> to vector<64x256xf32>
    %cst_91 = arith.constant dense<0.000000e+00> : vector<2x256xf32>
    %146 = tpu.matmul %143, %145, %cst_91 {dimension_numbers = #tpu.dot_dimension_numbers<[1], [0], [0], [1], [0, 0, 1, 1], [], []>} : vector<2x64xf32>, vector<64x256xf32>, vector<2x256xf32> -> vector<2x256xf32>
    %147 = arith.addf %141, %146 : vector<2x256xf32>
    %c3_92 = arith.constant 3 : index
    %c0_93 = arith.constant 0 : index
    %c0_94 = arith.constant 0 : index
    %148 = vector.load %arg13[%c3_92, %c0_93, %c0_94] : memref<4x1x256xf32, #tpu.memory_space<vmem>>, vector<1x1x256xf32>
    %149 = vector.shape_cast %148 : vector<1x1x256xf32> to vector<1x256xf32>
    %150 = vector.broadcast %149 : vector<1x256xf32> to vector<2x256xf32>
    %151 = arith.addf %147, %150 : vector<2x256xf32>
    %152 = vector.extract_strided_slice %151 {offsets = [0, 0], sizes = [2, 128], strides = [1, 1]} : vector<2x256xf32> to vector<2x128xf32>
    %153 = arith.negf %152 : vector<2x128xf32>
    %154 = math.exp %153 : vector<2x128xf32>
    %cst_95 = arith.constant 1.000000e+00 : f32
    %155 = vector.broadcast %cst_95 : f32 to vector<2x128xf32>
    %156 = arith.addf %155, %154 : vector<2x128xf32>
    %157 = arith.divf %155, %156 : vector<2x128xf32>
    %158 = vector.extract_strided_slice %157 {offsets = [0, 0], sizes = [2, 64], strides = [1, 1]} : vector<2x128xf32> to vector<2x64xf32>
    %159 = vector.extract_strided_slice %157 {offsets = [0, 64], sizes = [2, 64], strides = [1, 1]} : vector<2x128xf32> to vector<2x64xf32>
    %160 = vector.extract_strided_slice %151 {offsets = [0, 128], sizes = [2, 64], strides = [1, 1]} : vector<2x256xf32> to vector<2x64xf32>
    %161 = math.tanh %160 : vector<2x64xf32>
    %162 = vector.extract_strided_slice %151 {offsets = [0, 192], sizes = [2, 64], strides = [1, 1]} : vector<2x256xf32> to vector<2x64xf32>
    %163 = arith.negf %162 : vector<2x64xf32>
    %164 = math.exp %163 : vector<2x64xf32>
    %cst_96 = arith.constant 1.000000e+00 : f32
    %165 = vector.broadcast %cst_96 : f32 to vector<2x64xf32>
    %166 = arith.addf %165, %164 : vector<2x64xf32>
    %167 = arith.divf %165, %166 : vector<2x64xf32>
    %c3_97 = arith.constant 3 : index
    %c0_98 = arith.constant 0 : index
    %c0_99 = arith.constant 0 : index
    %168 = vector.load %arg3[%c3_97, %c0_98, %c0_99] : memref<4x2x64xf32, #tpu.memory_space<vmem>>, vector<1x2x64xf32>
    %169 = vector.shape_cast %168 : vector<1x2x64xf32> to vector<2x64xf32>
    %170 = arith.mulf %159, %169 : vector<2x64xf32>
    %171 = arith.mulf %158, %161 : vector<2x64xf32>
    %172 = arith.addf %170, %171 : vector<2x64xf32>
    %173 = math.tanh %172 : vector<2x64xf32>
    %174 = arith.mulf %167, %173 : vector<2x64xf32>
    %c3_100 = arith.constant 3 : index
    %c0_101 = arith.constant 0 : index
    %c0_102 = arith.constant 0 : index
    %175 = vector.load %arg22[%c3_100, %c0_101, %c0_102] : memref<4x2x64xf32, #tpu.memory_space<vmem>>, vector<1x2x64xf32>
    %176 = vector.shape_cast %175 : vector<1x2x64xf32> to vector<2x64xf32>
    %177 = vector.shape_cast %174 : vector<2x64xf32> to vector<1x2x64xf32>
    tpu.vector_store %arg22[%c3_100, %c0_101, %c0_102], %177 {strides = array<i32>} : memref<4x2x64xf32, #tpu.memory_space<vmem>>, vector<1x2x64xf32>,
    %c3_103 = arith.constant 3 : index
    %c0_104 = arith.constant 0 : index
    %c0_105 = arith.constant 0 : index
    %178 = vector.load %arg23[%c3_103, %c0_104, %c0_105] : memref<4x2x64xf32, #tpu.memory_space<vmem>>, vector<1x2x64xf32>
    %179 = vector.shape_cast %178 : vector<1x2x64xf32> to vector<2x64xf32>
    %180 = vector.shape_cast %172 : vector<2x64xf32> to vector<1x2x64xf32>
    tpu.vector_store %arg23[%c3_103, %c0_104, %c0_105], %180 {strides = array<i32>} : memref<4x2x64xf32, #tpu.memory_space<vmem>>, vector<1x2x64xf32>,
    %c0_106 = arith.constant 0 : index
    %c0_107 = arith.constant 0 : index
    %181 = vector.load %arg14[%c0_106, %c0_107] : memref<64x16xf32, #tpu.memory_space<vmem>>, vector<64x16xf32>
    %cst_108 = arith.constant dense<0.000000e+00> : vector<2x16xf32>
    %182 = tpu.matmul %174, %181, %cst_108 {dimension_numbers = #tpu.dot_dimension_numbers<[1], [0], [0], [1], [0, 0, 1, 1], [], []>} : vector<2x64xf32>, vector<64x16xf32>, vector<2x16xf32> -> vector<2x16xf32>
    %c0_109 = arith.constant 0 : index
    %c0_110 = arith.constant 0 : index
    %183 = vector.load %arg15[%c0_109, %c0_110] : memref<1x16xf32, #tpu.memory_space<vmem>>, vector<1x16xf32>
    %184 = vector.broadcast %183 : vector<1x16xf32> to vector<2x16xf32>
    %185 = arith.addf %182, %184 : vector<2x16xf32>
    %186 = vector.extract_strided_slice %185 {offsets = [0, 0], sizes = [2, 8], strides = [1, 1]} : vector<2x16xf32> to vector<2x8xf32>
    %187 = vector.extract_strided_slice %185 {offsets = [0, 8], sizes = [2, 8], strides = [1, 1]} : vector<2x16xf32> to vector<2x8xf32>
    %c0_111 = arith.constant 0 : index
    %c0_112 = arith.constant 0 : index
    %188 = vector.load %arg21[%c0_111, %c0_112] : memref<2x8xf32, #tpu.memory_space<vmem>>, vector<2x8xf32>
    tpu.vector_store %arg21[%c0_111, %c0_112], %187 {strides = array<i32>} : memref<2x8xf32, #tpu.memory_space<vmem>>, vector<2x8xf32>,
    %189 = arith.truncf %186 : vector<2x8xf32> to vector<2x8xbf16>
    %c0_113 = arith.constant 0 : index
    %c0_114 = arith.constant 0 : index
    %190 = vector.load %arg16[%c0_113, %c0_114] : memref<8x64xbf16, #tpu.memory_space<vmem>>, vector<8x64xbf16>
    %cst_115 = arith.constant dense<0.000000e+00> : vector<2x64xf32>
    %191 = tpu.matmul %189, %190, %cst_115 {dimension_numbers = #tpu.dot_dimension_numbers<[1], [0], [0], [1], [0, 0, 1, 1], [], []>} : vector<2x8xbf16>, vector<8x64xbf16>, vector<2x64xf32> -> vector<2x64xf32>
    %c0_116 = arith.constant 0 : index
    %c0_117 = arith.constant 0 : index
    %192 = vector.load %arg17[%c0_116, %c0_117] : memref<1x64xf32, #tpu.memory_space<vmem>>, vector<1x64xf32>
    %193 = vector.broadcast %192 : vector<1x64xf32> to vector<2x64xf32>
    %194 = arith.addf %191, %193 : vector<2x64xf32>
    %cst_118 = arith.constant 0.000000e+00 : f32
    %195 = vector.broadcast %cst_118 : f32 to vector<2x64xf32>
    %196 = arith.maximumf %194, %195 : vector<2x64xf32>
    %197 = arith.truncf %196 : vector<2x64xf32> to vector<2x64xbf16>
    %c0_119 = arith.constant 0 : index
    %c0_120 = arith.constant 0 : index
    %198 = vector.load %arg18[%c0_119, %c0_120] : memref<64x2048xbf16, #tpu.memory_space<vmem>>, vector<64x2048xbf16>
    %cst_121 = arith.constant dense<0.000000e+00> : vector<2x2048xf32>
    %199 = tpu.matmul %197, %198, %cst_121 {dimension_numbers = #tpu.dot_dimension_numbers<[1], [0], [0], [1], [0, 0, 1, 1], [], []>} : vector<2x64xbf16>, vector<64x2048xbf16>, vector<2x2048xf32> -> vector<2x2048xf32>
    %c0_122 = arith.constant 0 : index
    %c0_123 = arith.constant 0 : index
    %200 = vector.load %arg19[%c0_122, %c0_123] : memref<1x2048xf32, #tpu.memory_space<vmem>>, vector<1x2048xf32>
    %201 = vector.broadcast %200 : vector<1x2048xf32> to vector<2x2048xf32>
    %202 = arith.addf %199, %201 : vector<2x2048xf32>
    %cst_124 = arith.constant 0.000000e+00 : f32
    %203 = vector.broadcast %cst_124 : f32 to vector<2x2048xf32>
    %204 = arith.maximumf %202, %203 : vector<2x2048xf32>
    %c0_125 = arith.constant 0 : index
    %c0_126 = arith.constant 0 : index
    %205 = vector.load %arg20[%c0_125, %c0_126] : memref<2x2048xf32, #tpu.memory_space<vmem>>, vector<2x2048xf32>
    tpu.vector_store %arg20[%c0_125, %c0_126], %204 {strides = array<i32>} : memref<2x2048xf32, #tpu.memory_space<vmem>>, vector<2x2048xf32>,
    return
  }
}

module attributes {stable_mosaic.version = 11 : i64} {
  func.func @_conv_gemm_kernel(%arg0: i32, %arg1: memref<16x288xbf16, #tpu.memory_space<vmem>>, %arg2: memref<288x512xbf16, #tpu.memory_space<vmem>>, %arg3: memref<16x1xf32, #tpu.memory_space<vmem>>, %arg4: memref<16x512xf32, #tpu.memory_space<vmem>>) attributes {dimension_semantics = [#tpu.dimension_semantics<parallel>], iteration_bounds = array<i64: 1>, scalar_prefetch = 0 : i64, scratch_operands = 0 : i64, tpu.core_type = #tpu.core_type<tc>, window_params = [{pipeline_mode = #tpu.pipeline_mode<synchronous>, transform_indices = @transform_0, window_bounds = array<i64: 16, 288>}, {transform_indices = @transform_1, window_bounds = array<i64: 288, 512>}, {pipeline_mode = #tpu.pipeline_mode<synchronous>, transform_indices = @transform_2, window_bounds = array<i64: 16, 1>}, {transform_indices = @transform_3, window_bounds = array<i64: 16, 512>}]} {
    %c0 = arith.constant 0 : index
    %c0_0 = arith.constant 0 : index
    %0 = vector.load %arg1[%c0, %c0_0] : memref<16x288xbf16, #tpu.memory_space<vmem>>, vector<16x288xbf16>
    %c0_1 = arith.constant 0 : index
    %c0_2 = arith.constant 0 : index
    %1 = vector.load %arg2[%c0_1, %c0_2] : memref<288x512xbf16, #tpu.memory_space<vmem>>, vector<288x512xbf16>
    %cst = arith.constant dense<0.000000e+00> : vector<16x512xf32>
    %2 = tpu.matmul %0, %1, %cst {dimension_numbers = #tpu.dot_dimension_numbers<[1], [0], [0], [1], [0, 0, 1, 1], [], []>} : vector<16x288xbf16>, vector<288x512xbf16>, vector<16x512xf32> -> vector<16x512xf32>
    %c0_3 = arith.constant 0 : index
    %c0_4 = arith.constant 0 : index
    %3 = vector.load %arg3[%c0_3, %c0_4] : memref<16x1xf32, #tpu.memory_space<vmem>>, vector<16x1xf32>
    %4 = vector.broadcast %3 : vector<16x1xf32> to vector<16x512xf32>
    %5 = arith.addf %2, %4 : vector<16x512xf32>
    %cst_5 = arith.constant 0.000000e+00 : f32
    %6 = vector.broadcast %cst_5 : f32 to vector<16x512xf32>
    %7 = arith.maximumf %5, %6 : vector<16x512xf32>
    %c0_6 = arith.constant 0 : index
    %c0_7 = arith.constant 0 : index
    %8 = vector.load %arg4[%c0_6, %c0_7] : memref<16x512xf32, #tpu.memory_space<vmem>>, vector<16x512xf32>
    tpu.vector_store %arg4[%c0_6, %c0_7], %7 {strides = array<i32>} : memref<16x512xf32, #tpu.memory_space<vmem>>, vector<16x512xf32>,
    return
  }
  func.func @transform_0(%arg0: i32) -> (i32, i32) {
    %c0_i32 = arith.constant 0 : i32
    %c0_i32_0 = arith.constant 0 : i32
    %c0_i32_1 = arith.constant 0 : i32
    return %c0_i32, %c0_i32_0 : i32, i32
  }
  func.func @transform_1(%arg0: i32) -> (i32, i32) {
    %c0_i32 = arith.constant 0 : i32
    %c0_i32_0 = arith.constant 0 : i32
    return %c0_i32, %arg0 : i32, i32
  }
  func.func @transform_2(%arg0: i32) -> (i32, i32) {
    %c0_i32 = arith.constant 0 : i32
    %c0_i32_0 = arith.constant 0 : i32
    %c0_i32_1 = arith.constant 0 : i32
    return %c0_i32, %c0_i32_0 : i32, i32
  }
  func.func @transform_3(%arg0: i32) -> (i32, i32) {
    %c0_i32 = arith.constant 0 : i32
    %c0_i32_0 = arith.constant 0 : i32
    return %c0_i32, %arg0 : i32, i32
  }
}

module attributes {stable_mosaic.version = 11 : i64} {
  func.func @_conv_gemm_kernel(%arg0: i32, %arg1: memref<8x144xbf16, #tpu.memory_space<vmem>>, %arg2: memref<144x2048xbf16, #tpu.memory_space<vmem>>, %arg3: memref<8x1xf32, #tpu.memory_space<vmem>>, %arg4: memref<8x2048xf32, #tpu.memory_space<vmem>>) attributes {dimension_semantics = [#tpu.dimension_semantics<parallel>], iteration_bounds = array<i64: 1>, scalar_prefetch = 0 : i64, scratch_operands = 0 : i64, tpu.core_type = #tpu.core_type<tc>, window_params = [{pipeline_mode = #tpu.pipeline_mode<synchronous>, transform_indices = @transform_0, window_bounds = array<i64: 8, 144>}, {transform_indices = @transform_1, window_bounds = array<i64: 144, 2048>}, {pipeline_mode = #tpu.pipeline_mode<synchronous>, transform_indices = @transform_2, window_bounds = array<i64: 8, 1>}, {transform_indices = @transform_3, window_bounds = array<i64: 8, 2048>}]} {
    %c0 = arith.constant 0 : index
    %c0_0 = arith.constant 0 : index
    %0 = vector.load %arg1[%c0, %c0_0] : memref<8x144xbf16, #tpu.memory_space<vmem>>, vector<8x144xbf16>
    %c0_1 = arith.constant 0 : index
    %c0_2 = arith.constant 0 : index
    %1 = vector.load %arg2[%c0_1, %c0_2] : memref<144x2048xbf16, #tpu.memory_space<vmem>>, vector<144x2048xbf16>
    %cst = arith.constant dense<0.000000e+00> : vector<8x2048xf32>
    %2 = tpu.matmul %0, %1, %cst {dimension_numbers = #tpu.dot_dimension_numbers<[1], [0], [0], [1], [0, 0, 1, 1], [], []>} : vector<8x144xbf16>, vector<144x2048xbf16>, vector<8x2048xf32> -> vector<8x2048xf32>
    %c0_3 = arith.constant 0 : index
    %c0_4 = arith.constant 0 : index
    %3 = vector.load %arg3[%c0_3, %c0_4] : memref<8x1xf32, #tpu.memory_space<vmem>>, vector<8x1xf32>
    %4 = vector.broadcast %3 : vector<8x1xf32> to vector<8x2048xf32>
    %5 = arith.addf %2, %4 : vector<8x2048xf32>
    %cst_5 = arith.constant 0.000000e+00 : f32
    %6 = vector.broadcast %cst_5 : f32 to vector<8x2048xf32>
    %7 = arith.maximumf %5, %6 : vector<8x2048xf32>
    %c0_6 = arith.constant 0 : index
    %c0_7 = arith.constant 0 : index
    %8 = vector.load %arg4[%c0_6, %c0_7] : memref<8x2048xf32, #tpu.memory_space<vmem>>, vector<8x2048xf32>
    tpu.vector_store %arg4[%c0_6, %c0_7], %7 {strides = array<i32>} : memref<8x2048xf32, #tpu.memory_space<vmem>>, vector<8x2048xf32>,
    return
  }
  func.func @transform_0(%arg0: i32) -> (i32, i32) {
    %c0_i32 = arith.constant 0 : i32
    %c0_i32_0 = arith.constant 0 : i32
    %c0_i32_1 = arith.constant 0 : i32
    return %c0_i32, %c0_i32_0 : i32, i32
  }
  func.func @transform_1(%arg0: i32) -> (i32, i32) {
    %c0_i32 = arith.constant 0 : i32
    %c0_i32_0 = arith.constant 0 : i32
    return %c0_i32, %arg0 : i32, i32
  }
  func.func @transform_2(%arg0: i32) -> (i32, i32) {
    %c0_i32 = arith.constant 0 : i32
    %c0_i32_0 = arith.constant 0 : i32
    %c0_i32_1 = arith.constant 0 : i32
    return %c0_i32, %c0_i32_0 : i32, i32
  }
  func.func @transform_3(%arg0: i32) -> (i32, i32) {
    %c0_i32 = arith.constant 0 : i32
    %c0_i32_0 = arith.constant 0 : i32
    return %c0_i32, %arg0 : i32, i32
  }
}

module attributes {stable_mosaic.version = 11 : i64} {
  func.func @_conv_gemm_kernel(%arg0: i32, %arg1: memref<3x72xbf16, #tpu.memory_space<vmem>>, %arg2: memref<72x4096xbf16, #tpu.memory_space<vmem>>, %arg3: memref<3x1xf32, #tpu.memory_space<vmem>>, %arg4: memref<3x4096xf32, #tpu.memory_space<vmem>>) attributes {dimension_semantics = [#tpu.dimension_semantics<parallel>], iteration_bounds = array<i64: 2>, scalar_prefetch = 0 : i64, scratch_operands = 0 : i64, tpu.core_type = #tpu.core_type<tc>, window_params = [{pipeline_mode = #tpu.pipeline_mode<synchronous>, transform_indices = @transform_0, window_bounds = array<i64: 3, 72>}, {transform_indices = @transform_1, window_bounds = array<i64: 72, 4096>}, {pipeline_mode = #tpu.pipeline_mode<synchronous>, transform_indices = @transform_2, window_bounds = array<i64: 3, 1>}, {transform_indices = @transform_3, window_bounds = array<i64: 3, 4096>}]} {
    %c0 = arith.constant 0 : index
    %c0_0 = arith.constant 0 : index
    %0 = vector.load %arg1[%c0, %c0_0] : memref<3x72xbf16, #tpu.memory_space<vmem>>, vector<3x72xbf16>
    %c0_1 = arith.constant 0 : index
    %c0_2 = arith.constant 0 : index
    %1 = vector.load %arg2[%c0_1, %c0_2] : memref<72x4096xbf16, #tpu.memory_space<vmem>>, vector<72x4096xbf16>
    %cst = arith.constant dense<0.000000e+00> : vector<3x4096xf32>
    %2 = tpu.matmul %0, %1, %cst {dimension_numbers = #tpu.dot_dimension_numbers<[1], [0], [0], [1], [0, 0, 1, 1], [], []>} : vector<3x72xbf16>, vector<72x4096xbf16>, vector<3x4096xf32> -> vector<3x4096xf32>
    %c0_3 = arith.constant 0 : index
    %c0_4 = arith.constant 0 : index
    %3 = vector.load %arg3[%c0_3, %c0_4] : memref<3x1xf32, #tpu.memory_space<vmem>>, vector<3x1xf32>
    %4 = vector.broadcast %3 : vector<3x1xf32> to vector<3x4096xf32>
    %5 = arith.addf %2, %4 : vector<3x4096xf32>
    %6 = arith.negf %5 : vector<3x4096xf32>
    %7 = math.exp %6 : vector<3x4096xf32>
    %cst_5 = arith.constant 1.000000e+00 : f32
    %8 = vector.broadcast %cst_5 : f32 to vector<3x4096xf32>
    %9 = arith.addf %8, %7 : vector<3x4096xf32>
    %10 = arith.divf %8, %9 : vector<3x4096xf32>
    %c0_6 = arith.constant 0 : index
    %c0_7 = arith.constant 0 : index
    %11 = vector.load %arg4[%c0_6, %c0_7] : memref<3x4096xf32, #tpu.memory_space<vmem>>, vector<3x4096xf32>
    tpu.vector_store %arg4[%c0_6, %c0_7], %10 {strides = array<i32>} : memref<3x4096xf32, #tpu.memory_space<vmem>>, vector<3x4096xf32>,
    return
  }
  func.func @transform_0(%arg0: i32) -> (i32, i32) {
    %c0_i32 = arith.constant 0 : i32
    %c0_i32_0 = arith.constant 0 : i32
    %c0_i32_1 = arith.constant 0 : i32
    return %c0_i32, %c0_i32_0 : i32, i32
  }
  func.func @transform_1(%arg0: i32) -> (i32, i32) {
    %c0_i32 = arith.constant 0 : i32
    %c0_i32_0 = arith.constant 0 : i32
    return %c0_i32, %arg0 : i32, i32
  }
  func.func @transform_2(%arg0: i32) -> (i32, i32) {
    %c0_i32 = arith.constant 0 : i32
    %c0_i32_0 = arith.constant 0 : i32
    %c0_i32_1 = arith.constant 0 : i32
    return %c0_i32, %c0_i32_0 : i32, i32
  }
  func.func @transform_3(%arg0: i32) -> (i32, i32) {
    %c0_i32 = arith.constant 0 : i32
    %c0_i32_0 = arith.constant 0 : i32
    return %c0_i32, %arg0 : i32, i32
  }
}

</mosaic_0001>

<bundles_post_ra>
// kernel: hrnn_forward.7
= control target key start
LH: loop header
LB: loop body
LE: loop exit
PB: predicated region body
PF: predicated region fallthrough
CT: control target
= control target key end

     0   :  { %vm202_vm0 = vcmask 1044480   ;;  %vm203_vm1 = vcmask 1045504   ;;  %v677_v2 = vmov 65535   ;;  %v678_v8 = vmov 0   ;;  %s1015_s1 = inlined_call_operand.vmem [shape: bf16[27,2048], index: 1, kind: input, shape index: {}]   ;;  %s1016_s2 = inlined_call_operand.vmem [shape: f32[8,1], index: 2, kind: input, shape index: {}]   ;;  %s1017_s0 = inlined_call_operand.vmem [shape: bf16[8,27], index: 0, kind: input, shape index: {}]   ;;  %s1018_s3 = inlined_call_operand.vmem [shape: f32[8,2048], index: 3, kind: output, shape index: {}]  }
   0x1   :  { %v564_v0 = vld [vmem:[%s1015_s1 + $0x80] sm:$0xf]  ;;  %v204_v3 = vsel %vm202_vm0, 4294967295, %v677_v2  ;;  %v658_v6 = vld [vmem:[%s1015_s1 + $0x84] sm:$0xf]  ;;  %676 = vset.pattern.permute.xlu0 %v678_v8  ;;  %vm198_vm2 = vcmask 220160  }
   0x2   :  { %v666_v1 = vld [vmem:[%s1015_s1 + $0xbc] sm:$0x30]  ;;  %v705_v5 = vsel %vm203_vm1, %v204_v3, 0  ;;  %v566_v7 = vld [vmem:[%s1015_s1 + $0xc0] sm:$0x30] }
   0x3   :  { %v565_v4 = vor.u32 %v666_v1, %v564_v0  ;;  %v48_v9 = vld [vmem:[%s1016_s2] sm:$0xff]  ;;  %v569_v10 = vor.u32 %v658_v6, %v566_v7  ;;  %v572_v11 = vld [vmem:[%s1015_s1 + $0x88] sm:$0xf]  ;;  %v659_v13 = vld [vmem:[%s1015_s1 + $0x8c] sm:$0xf] }
   0x4   :  { %v667_v12 = vld [vmem:[%s1015_s1 + $0xc4] sm:$0x30]  ;;  %51 = vperm.xlu0 %676, %v48_v9   ;;  %v574_v16 = vld [vmem:[%s1015_s1 + $0xc8] sm:$0x30]  ;;  %v500_v17 = vld [vmem:[%s1015_s1] sm:$0xf] }
   0x5   :  { %v207_v14 = vand.u32 %v565_v4, %v705_v5  ;;  %v573_v15 = vor.u32 %v667_v12, %v572_v11  ;;  %v650_v18 = vld [vmem:[%s1015_s1 + $0x3c] sm:$0xf0]  ;;  %v210_v19 = vand.u32 %v569_v10, %v705_v5  ;;  %v577_v20 = vor.u32 %v659_v13, %v574_v16  ;;  %v642_v21 = vld [vmem:[%s1015_s1 + $0x4] sm:$0xf]  ;;  %v508_v23 = vld [vmem:[%s1015_s1 + $0x8] sm:$0xf] }
   0x6   :  { %v502_v22 = vld [vmem:[%s1015_s1 + $0x40] sm:$0xf0]  ;;  %v501_v25 = vor.u32 %v650_v18, %v500_v17  ;;  %v651_v26 = vld [vmem:[%s1015_s1 + $0x44] sm:$0xf0]  ;;  %v643_v27 = vld [vmem:[%s1015_s1 + $0xc] sm:$0xf] }
   0x7   :  { %260 = vmatpush.bf16.msra.mxu0 %v207_v14  ;;  %v213_v24 = vand.u32 %v573_v15, %v705_v5  ;;  %v510_v28 = vld [vmem:[%s1015_s1 + $0x48] sm:$0xf0]  ;;  %273 = vmatpush.bf16.msra.mxu1 %v210_v19  ;;  %v216_v29 = vand.u32 %v577_v20, %v705_v5  ;;  %v505_v30 = vor.u32 %v642_v21, %v502_v22  ;;  %v588_v31 = vld [vmem:[%s1015_s1 + $0x98] sm:$0xf]  ;;  %v765_v34 = vld [vmem:[%s1017_s0] sm:$0xf] }
   0x8   :  { %v669_v32 = vld [vmem:[%s1015_s1 + $0xd4] sm:$0x30]  ;;  %v509_v33 = vor.u32 %v651_v26, %v508_v23  ;;  %v661_v36 = vld [vmem:[%s1015_s1 + $0x9c] sm:$0xf]  ;;  %v580_v38 = vld [vmem:[%s1015_s1 + $0x90] sm:$0xf]  ;;  %v513_v39 = vor.u32 %v643_v27, %v510_v28 }
   0x9   :  { %286 = vmatpush.bf16.msra.mxu2 %v213_v24  ;;  %v589_v35 = vor.u32 %v669_v32, %v588_v31  ;;  %v590_v37 = vld [vmem:[%s1015_s1 + $0xd8] sm:$0x30]  ;;  %299 = vmatpush.bf16.msra.mxu3 %v216_v29  ;;  %v668_v41 = vld [vmem:[%s1015_s1 + $0xcc] sm:$0x30]  ;;  %v660_v42 = vld [vmem:[%s1015_s1 + $0x94] sm:$0xf] }
   0xa   :  { %v593_v40 = vor.u32 %v661_v36, %v590_v37  ;;  %v582_v43 = vld [vmem:[%s1015_s1 + $0xd0] sm:$0x30]  ;;  %v581_v45 = vor.u32 %v668_v41, %v580_v38  ;;  %v524_v47 = vld [vmem:[%s1015_s1 + $0x18] sm:$0xf]  ;;  %v645_v49 = vld [vmem:[%s1015_s1 + $0x1c] sm:$0xf] }
   0xb   :  { %261 = vmatpush.bf16.msra.mxu0 %v501_v25  ;;  %v225_v44 = vand.u32 %v589_v35, %v705_v5  ;;  %v585_v46 = vor.u32 %v660_v42, %v582_v43  ;;  %v653_v48 = vld [vmem:[%s1015_s1 + $0x54] sm:$0xf0]  ;;  %274 = vmatpush.bf16.msra.mxu1 %v505_v30  ;;  %v526_v51 = vld [vmem:[%s1015_s1 + $0x58] sm:$0xf0]  ;;  %v516_v52 = vld [vmem:[%s1015_s1 + $0x10] sm:$0xf] }
   0xc   :  { %v228_v50 = vand.u32 %v593_v40, %v705_v5  ;;  %v652_v53 = vld [vmem:[%s1015_s1 + $0x4c] sm:$0xf0]  ;;  %v219_v54 = vand.u32 %v581_v45, %v705_v5  ;;  %v644_v55 = vld [vmem:[%s1015_s1 + $0x14] sm:$0xf]  ;;  %v604_v57 = vld [vmem:[%s1015_s1 + $0xa8] sm:$0xf]  ;;  %v525_v62 = vor.u32 %v653_v48, %v524_v47  ;;  %v529_v4 = vor.u32 %v645_v49, %v526_v51 }
   0xd   :  { %287 = vmatpush.bf16.msra.mxu2 %v509_v33  ;;  %v518_v56 = vld [vmem:[%s1015_s1 + $0x50] sm:$0xf0]  ;;  %300 = vmatpush.bf16.msra.mxu3 %v513_v39  ;;  %v222_v58 = vand.u32 %v585_v46, %v705_v5  ;;  %v671_v59 = vld [vmem:[%s1015_s1 + $0xe4] sm:$0x30]  ;;  %v663_v60 = vld [vmem:[%s1015_s1 + $0xac] sm:$0xf]  ;;  %v517_v6 = vor.u32 %v652_v53, %v516_v52 }
   0xe   :  { %626 = vmatmul.msk.bf16.vlgmr.msra.gmra.mxu0 %vm198_vm2, %v765_v34  ;;  %v606_v61 = vld [vmem:[%s1015_s1 + $0xe8] sm:$0x30]  ;;  %627 = vmatmul.msk.bf16.vlgmr.msra.gmra.mxu1 %vm198_vm2, %v765_v34  ;;  %v605_v63 = vor.u32 %v671_v59, %v604_v57  ;;  %v596_v1 = vld [vmem:[%s1015_s1 + $0xa0] sm:$0xf]  ;;  %v662_v3 = vld [vmem:[%s1015_s1 + $0xa4] sm:$0xf]  ;;  %v521_v14 = vor.u32 %v644_v55, %v518_v56 }
   0xf   :  { %v609_v0 = vor.u32 %v663_v60, %v606_v61  ;;  %v670_v2 = vld [vmem:[%s1015_s1 + $0xdc] sm:$0x30]  ;;  %v598_v8 = vld [vmem:[%s1015_s1 + $0xe0] sm:$0x30]  ;;  %312 = vmatpush.bf16.msrb.mxu0 %v219_v54  ;;  %v540_v12 = vld [vmem:[%s1015_s1 + $0x28] sm:$0xf]  ;;  %325 = vmatpush.bf16.msrb.mxu1 %v222_v58 }
  0x10   :  { %628 = vmatmul.msk.bf16.vlgmr.msra.gmra.mxu2 %vm198_vm2, %v765_v34  ;;  %v597_v7 = vor.u32 %v670_v2, %v596_v1  ;;  %629 = vmatmul.msk.bf16.vlgmr.msra.gmra.mxu3 %vm198_vm2, %v765_v34  ;;  %v237_v9 = vand.u32 %v605_v63, %v705_v5  ;;  %v601_v11 = vor.u32 %v662_v3, %v598_v8  ;;  %v655_v13 = vld [vmem:[%s1015_s1 + $0x64] sm:$0xf0]  ;;  %v647_v16 = vld [vmem:[%s1015_s1 + $0x2c] sm:$0xf]  ;;  %v532_v19 = vld [vmem:[%s1015_s1 + $0x20] sm:$0xf] }
  0x11   :  { %338 = vmatpush.bf16.msrb.mxu2 %v225_v44  ;;  %351 = vmatpush.bf16.msrb.mxu3 %v228_v50  ;;  %v240_v10 = vand.u32 %v609_v0, %v705_v5  ;;  %v542_v17 = vld [vmem:[%s1015_s1 + $0x68] sm:$0xf0]  ;;  %v654_v20 = vld [vmem:[%s1015_s1 + $0x5c] sm:$0xf0]  ;;  %v646_v21 = vld [vmem:[%s1015_s1 + $0x24] sm:$0xf]  ;;  %v541_v22 = vor.u32 %v655_v13, %v540_v12 }
  0x12   :  { %v231_v15 = vand.u32 %v597_v7, %v705_v5  ;;  %v234_v18 = vand.u32 %v601_v11, %v705_v5  ;;  %v534_v23 = vld [vmem:[%s1015_s1 + $0x60] sm:$0xf0]  ;;  %v612_v24 = vld [vmem:[%s1015_s1 + $0xb0] sm:$0xf]  ;;  %v545_v26 = vor.u32 %v647_v16, %v542_v17  ;;  %v664_v27 = vld [vmem:[%s1015_s1 + $0xb4] sm:$0xf]  ;;  %v533_v29 = vor.u32 %v654_v20, %v532_v19 }
  0x13   :  { %v672_v25 = vld [vmem:[%s1015_s1 + $0xec] sm:$0x30]  ;;  %313 = vmatpush.bf16.msrb.mxu0 %v517_v6  ;;  %v614_v28 = vld [vmem:[%s1015_s1 + $0xf0] sm:$0x30]  ;;  %326 = vmatpush.bf16.msrb.mxu1 %v521_v14  ;;  %v620_v30 = vld [vmem:[%s1015_s1 + $0xb8] sm:$0xf]  ;;  %v537_v32 = vor.u32 %v646_v21, %v534_v23 }
  0x14   :  { %v673_v31 = vld [vmem:[%s1015_s1 + $0xf4] sm:$0x30]  ;;  %v665_v33 = vld [vmem:[%s1015_s1 + $0xbc] sm:$0xf]  ;;  %v613_v36 = vor.u32 %v672_v25, %v612_v24  ;;  %v617_v37 = vor.u32 %v664_v27, %v614_v28  ;;  %v548_v42 = vld [vmem:[%s1015_s1 + $0x30] sm:$0xf] }
  0x15   :  { %339 = vmatpush.bf16.msrb.mxu2 %v525_v62  ;;  %352 = vmatpush.bf16.msrb.mxu3 %v529_v4  ;;  %v622_v35 = vld [vmem:[%s1015_s1 + $0xf8] sm:$0x30]  ;;  %v621_v38 = vor.u32 %v673_v31, %v620_v30  ;;  %v656_v43 = vld [vmem:[%s1015_s1 + $0x6c] sm:$0xf0]  ;;  %v648_v45 = vld [vmem:[%s1015_s1 + $0x34] sm:$0xf] }
  0x16   :  { %v625_v39 = vor.u32 %v665_v33, %v622_v35  ;;  %v243_v40 = vand.u32 %v613_v36, %v705_v5  ;;  %v246_v41 = vand.u32 %v617_v37, %v705_v5  ;;  %v550_v46 = vld [vmem:[%s1015_s1 + $0x70] sm:$0xf0]  ;;  %v556_v48 = vld [vmem:[%s1015_s1 + $0x38] sm:$0xf]  ;;  %v649_v50 = vld [vmem:[%s1015_s1 + $0x3c] sm:$0xf]  ;;  %v549_v51 = vor.u32 %v656_v43, %v548_v42 }
  0x17   :  { %364 = vmatpush.bf16.msra.mxu0 %v231_v15  ;;  %377 = vmatpush.bf16.msra.mxu1 %v234_v18  ;;  %v249_v44 = vand.u32 %v621_v38, %v705_v5  ;;  %v657_v49 = vld [vmem:[%s1015_s1 + $0x74] sm:$0xf0]  ;;  %v553_v52 = vor.u32 %v648_v45, %v550_v46 }
  0x18   :  { %v252_v47 = vand.u32 %v625_v39, %v705_v5  ;;  %v558_v5 = vld [vmem:[%s1015_s1 + $0x78] sm:$0xf0]  ;;  %v557_v53 = vor.u32 %v657_v49, %v556_v48 }
  0x19   :  { %390 = vmatpush.bf16.msra.mxu2 %v237_v9  ;;  %403 = vmatpush.bf16.msra.mxu3 %v240_v10  ;;  %v561_v54 = vor.u32 %v649_v50, %v558_v5 }
  0x1b   :  { %365 = vmatpush.bf16.msra.mxu0 %v533_v29  ;;  %378 = vmatpush.bf16.msra.mxu1 %v537_v32 }
  0x1d   :  { %391 = vmatpush.bf16.msra.mxu2 %v541_v22  ;;  %404 = vmatpush.bf16.msra.mxu3 %v545_v26 }
  0x1e   :  { %630 = vmatmul.msk.bf16.vlgmr.msrb.gmra.mxu0 %vm198_vm2, %v765_v34  ;;  %631 = vmatmul.msk.bf16.vlgmr.msrb.gmra.mxu1 %vm198_vm2, %v765_v34 }
  0x1f   :  { %416 = vmatpush.bf16.msrb.mxu0 %v243_v40  ;;  %429 = vmatpush.bf16.msrb.mxu1 %v246_v41 }
  0x20   :  { %632 = vmatmul.msk.bf16.vlgmr.msrb.gmra.mxu2 %vm198_vm2, %v765_v34  ;;  %633 = vmatmul.msk.bf16.vlgmr.msrb.gmra.mxu3 %vm198_vm2, %v765_v34 }
  0x21   :  { %442 = vmatpush.bf16.msrb.mxu2 %v249_v44  ;;  %455 = vmatpush.bf16.msrb.mxu3 %v252_v47 }
  0x23   :  { %417 = vmatpush.bf16.msrb.mxu0 %v549_v51  ;;  %430 = vmatpush.bf16.msrb.mxu1 %v553_v52 }
  0x25   :  { %443 = vmatpush.bf16.msrb.mxu2 %v557_v53  ;;  %456 = vmatpush.bf16.msrb.mxu3 %v561_v54 }
  0x2e   :  { %634 = vmatmul.msk.bf16.vlgmr.msra.gmra.mxu0 %vm198_vm2, %v765_v34  ;;  %635 = vmatmul.msk.bf16.vlgmr.msra.gmra.mxu1 %vm198_vm2, %v765_v34 }
  0x30   :  { %636 = vmatmul.msk.bf16.vlgmr.msra.gmra.mxu2 %vm198_vm2, %v765_v34  ;;  %637 = vmatmul.msk.bf16.vlgmr.msra.gmra.mxu3 %vm198_vm2, %v765_v34 }
  0x3e   :  { %638 = vmatmul.msk.bf16.vlgmr.msrb.gmra.mxu0 %vm198_vm2, %v765_v34  ;;  %639 = vmatmul.msk.bf16.vlgmr.msrb.gmra.mxu1 %vm198_vm2, %v765_v34 }
  0x40   :  { %640 = vmatmul.msk.bf16.vlgmr.msrb.gmra.mxu2 %vm198_vm2, %v765_v34  ;;  %641 = vmatmul.msk.bf16.vlgmr.msrb.gmra.mxu3 %vm198_vm2, %v765_v34 }
  0x76   :  { %v949_v55 = vpop.permute.xlu0 %51 }
  0x8b   :  { %v263_v56 = vpop.f32.mrf.mxu0  ;;  %v276_v57 = vpop.f32.mrf.mxu1 }
  0x8c   :  { %v264_v58 = vadd.f32 %v263_v56, %v949_v55  ;;  %v277_v59 = vadd.f32 %v276_v57, %v949_v55 }
  0x8e   :  { %v462_v60 = vmax.f32 %v264_v58, 0.0  ;;  %v463_v61 = vmax.f32 %v277_v59, 0.0 }
  0x90   :  { %478 = vst [vmem:[%s1018_s3] sm:$0xff] %v462_v60 }
  0x91   :  { %479 = vst [vmem:[%s1018_s3 + $0x8] sm:$0xff] %v463_v61 }
  0x93   :  { %v289_v62 = vpop.f32.mrf.mxu2  ;;  %v265_v34 = vpop.f32.mrf.mxu0 }
  0x94   :  { %v290_v63 = vadd.f32 %v289_v62, %v949_v55  ;;  %v302_v0 = vpop.f32.mrf.mxu3  ;;  %v278_v1 = vpop.f32.mrf.mxu1 }
  0x95   :  { %v303_v2 = vadd.f32 %v302_v0, %v949_v55 }
  0x96   :  { %v464_v3 = vmax.f32 %v290_v63, 0.0 }
  0x97   :  { %v465_v4 = vmax.f32 %v303_v2, 0.0 }
  0x98   :  { %480 = vst [vmem:[%s1018_s3 + $0x10] sm:$0xff] %v464_v3 }
  0x99   :  { %481 = vst [vmem:[%s1018_s3 + $0x18] sm:$0xff] %v465_v4 }
  0x9b   :  { %v291_v6 = vpop.f32.mrf.mxu2  ;;  %v315_v7 = vpop.f32.mrf.mxu0 }
  0x9c   :  { %v304_v8 = vpop.f32.mrf.mxu3  ;;  %v316_v9 = vadd.f32 %v315_v7, %v949_v55  ;;  %v328_v10 = vpop.f32.mrf.mxu1 }
  0x9d   :  { %v329_v11 = vadd.f32 %v328_v10, %v949_v55 }
  0x9e   :  { %v466_v12 = vmax.f32 %v316_v9, 0.0 }
  0x9f   :  { %v467_v13 = vmax.f32 %v329_v11, 0.0 }
  0xa0   :  { %482 = vst [vmem:[%s1018_s3 + $0x20] sm:$0xff] %v466_v12 }
  0xa1   :  { %483 = vst [vmem:[%s1018_s3 + $0x28] sm:$0xff] %v467_v13 }
  0xa3   :  { %v341_v14 = vpop.f32.mrf.mxu2  ;;  %v317_v15 = vpop.f32.mrf.mxu0 }
  0xa4   :  { %v342_v16 = vadd.f32 %v341_v14, %v949_v55  ;;  %v354_v17 = vpop.f32.mrf.mxu3  ;;  %v330_v18 = vpop.f32.mrf.mxu1 }
  0xa5   :  { %v355_v19 = vadd.f32 %v354_v17, %v949_v55 }
  0xa6   :  { %v468_v20 = vmax.f32 %v342_v16, 0.0 }
  0xa7   :  { %v469_v21 = vmax.f32 %v355_v19, 0.0 }
  0xa8   :  { %484 = vst [vmem:[%s1018_s3 + $0x30] sm:$0xff] %v468_v20 }
  0xa9   :  { %485 = vst [vmem:[%s1018_s3 + $0x38] sm:$0xff] %v469_v21 }
  0xab   :  { %v343_v22 = vpop.f32.mrf.mxu2  ;;  %v367_v23 = vpop.f32.mrf.mxu0 }
  0xac   :  { %v356_v24 = vpop.f32.mrf.mxu3  ;;  %v368_v25 = vadd.f32 %v367_v23, %v949_v55  ;;  %v380_v26 = vpop.f32.mrf.mxu1 }
  0xad   :  { %v381_v27 = vadd.f32 %v380_v26, %v949_v55 }
  0xae   :  { %v470_v28 = vmax.f32 %v368_v25, 0.0 }
  0xaf   :  { %v471_v29 = vmax.f32 %v381_v27, 0.0 }
  0xb0   :  { %486 = vst [vmem:[%s1018_s3 + $0x40] sm:$0xff] %v470_v28 }
  0xb1   :  { %487 = vst [vmem:[%s1018_s3 + $0x48] sm:$0xff] %v471_v29 }
  0xb3   :  { %v393_v30 = vpop.f32.mrf.mxu2  ;;  %v369_v31 = vpop.f32.mrf.mxu0 }
  0xb4   :  { %v394_v32 = vadd.f32 %v393_v30, %v949_v55  ;;  %v406_v33 = vpop.f32.mrf.mxu3  ;;  %v382_v35 = vpop.f32.mrf.mxu1 }
  0xb5   :  { %v407_v36 = vadd.f32 %v406_v33, %v949_v55 }
  0xb6   :  { %v472_v37 = vmax.f32 %v394_v32, 0.0 }
  0xb7   :  { %v473_v38 = vmax.f32 %v407_v36, 0.0 }
  0xb8   :  { %488 = vst [vmem:[%s1018_s3 + $0x50] sm:$0xff] %v472_v37 }
  0xb9   :  { %489 = vst [vmem:[%s1018_s3 + $0x58] sm:$0xff] %v473_v38 }
  0xbb   :  { %v395_v39 = vpop.f32.mrf.mxu2  ;;  %v419_v40 = vpop.f32.mrf.mxu0 }
  0xbc   :  { %v408_v41 = vpop.f32.mrf.mxu3  ;;  %v420_v42 = vadd.f32 %v419_v40, %v949_v55  ;;  %v432_v43 = vpop.f32.mrf.mxu1 }
  0xbd   :  { %v433_v44 = vadd.f32 %v432_v43, %v949_v55 }
  0xbe   :  { %v474_v45 = vmax.f32 %v420_v42, 0.0 }
  0xbf   :  { %v475_v46 = vmax.f32 %v433_v44, 0.0 }
  0xc0   :  { %490 = vst [vmem:[%s1018_s3 + $0x60] sm:$0xff] %v474_v45 }
  0xc1   :  { %491 = vst [vmem:[%s1018_s3 + $0x68] sm:$0xff] %v475_v46 }
  0xc3   :  { %v445_v47 = vpop.f32.mrf.mxu2  ;;  %v421_v48 = vpop.f32.mrf.mxu0 }
  0xc4   :  { %v446_v49 = vadd.f32 %v445_v47, %v949_v55  ;;  %v458_v50 = vpop.f32.mrf.mxu3  ;;  %v434_v5 = vpop.f32.mrf.mxu1 }
  0xc5   :  { %v459_v51 = vadd.f32 %v458_v50, %v949_v55 }
  0xc6   :  { %v476_v52 = vmax.f32 %v446_v49, 0.0 }
  0xc7   :  { %v477_v53 = vmax.f32 %v459_v51, 0.0 }
  0xc8   :  { %492 = vst [vmem:[%s1018_s3 + $0x70] sm:$0xff] %v476_v52 }
  0xc9   :  { %493 = vst [vmem:[%s1018_s3 + $0x78] sm:$0xff] %v477_v53 }
  0xcb   :  { %v447_v54 = vpop.f32.mrf.mxu2 }
  0xcc   :  { %v460_v56 = vpop.f32.mrf.mxu3 }

// kernel: hrnn_forward.8
= control target key start
LH: loop header
LB: loop body
LE: loop exit
PB: predicated region body
PF: predicated region fallthrough
CT: control target
= control target key end

     0   :  { %v326_v2 = vmov 0   ;;  %vm146_vm0 = vcmask 1043456   ;;  %vm142_vm1 = vcmask 588800   ;;  %s486_s1 = inlined_call_operand.vmem [shape: bf16[72,512], index: 1, kind: input, shape index: {}]   ;;  %s487_s2 = inlined_call_operand.vmem [shape: f32[16,1], index: 2, kind: input, shape index: {}]   ;;  %s488_s0 = inlined_call_operand.vmem [shape: bf16[16,72], index: 0, kind: input, shape index: {}]   ;;  %s489_s3 = inlined_call_operand.vmem [shape: f32[16,512], index: 3, kind: output, shape index: {}]  }
   0x1   :  { %v33_v0 = vld [vmem:[%s486_s1 + $0x80] sm:$0xff]  ;;  %v34_v1 = vld [vmem:[%s486_s1 + $0x88] sm:$0xff]  ;;  %325 = vset.pattern.permute.xlu0 %v326_v2  ;;  %v322_v8 = vld [vmem:[%s486_s1 + $0x6c] sm:$0xf0] }
   0x2   :  { %v102_v3 = vunpack.c.l.b16 %v33_v0  ;;  %v103_v4 = vunpack.c.h.b16 %v33_v0  ;;  %v104_v5 = vunpack.c.l.b16 %v34_v1  ;;  %v105_v6 = vunpack.c.h.b16 %v34_v1  ;;  %v289_v7 = vld [vmem:[%s486_s1 + $0x60] sm:$0xf]  ;;  %v320_v13 = vld [vmem:[%s486_s1 + $0x64] sm:$0xf]  ;;  %v291_v14 = vld [vmem:[%s486_s1 + $0x70] sm:$0xf0] }
   0x3   :  { %v297_v15 = vld [vmem:[%s486_s1 + $0x68] sm:$0xf]  ;;  %v323_v16 = vld [vmem:[%s486_s1 + $0x74] sm:$0xf0]  ;;  %v321_v17 = vld [vmem:[%s486_s1 + $0x6c] sm:$0xf]  ;;  %v290_v23 = vor.u32 %v322_v8, %v289_v7  ;;  %v294_v24 = vor.u32 %v320_v13, %v291_v14 }
   0x4   :  { %v122_v9 = vpack.c.b16 %v102_v3, %v102_v3  ;;  %v123_v10 = vpack.c.b16 %v103_v4, %v103_v4  ;;  %v124_v11 = vpack.c.b16 %v104_v5, %v104_v5  ;;  %v125_v12 = vpack.c.b16 %v105_v6, %v105_v6  ;;  %v299_v18 = vld [vmem:[%s486_s1 + $0x78] sm:$0xf0]  ;;  %v273_v25 = vld [vmem:[%s486_s1 + $0x40] sm:$0xf]  ;;  %v318_v26 = vld [vmem:[%s486_s1 + $0x4c] sm:$0xf0] }
   0x5   :  { %v298_v27 = vor.u32 %v323_v16, %v297_v15  ;;  %v302_v28 = vor.u32 %v321_v17, %v299_v18  ;;  %v316_v29 = vld [vmem:[%s486_s1 + $0x44] sm:$0xf]  ;;  %v275_v30 = vld [vmem:[%s486_s1 + $0x50] sm:$0xf0]  ;;  %v281_v31 = vld [vmem:[%s486_s1 + $0x48] sm:$0xf]  ;;  %v274_v35 = vor.u32 %v318_v26, %v273_v25 }
   0x6   :  { %v148_v19 = vsel %vm146_vm0, %v122_v9, 0  ;;  %v151_v20 = vsel %vm146_vm0, %v123_v10, 0  ;;  %v154_v21 = vsel %vm146_vm0, %v124_v11, 0  ;;  %v157_v22 = vsel %vm146_vm0, %v125_v12, 0  ;;  %v319_v32 = vld [vmem:[%s486_s1 + $0x54] sm:$0xf0] }
   0x7   :  { %162 = vmatpush.bf16.msra.mxu0 %v148_v19  ;;  %176 = vmatpush.bf16.msra.mxu1 %v151_v20  ;;  %v317_v33 = vld [vmem:[%s486_s1 + $0x4c] sm:$0xf]  ;;  %v283_v34 = vld [vmem:[%s486_s1 + $0x58] sm:$0xf0]  ;;  %v278_v36 = vor.u32 %v316_v29, %v275_v30  ;;  %v257_v37 = vld [vmem:[%s486_s1 + $0x20] sm:$0xf]  ;;  %v282_v40 = vor.u32 %v319_v32, %v281_v31 }
   0x8   :  { %190 = vmatpush.bf16.msra.mxu2 %v154_v21  ;;  %204 = vmatpush.bf16.msra.mxu3 %v157_v22  ;;  %v314_v38 = vld [vmem:[%s486_s1 + $0x2c] sm:$0xf0]  ;;  %v312_v39 = vld [vmem:[%s486_s1 + $0x24] sm:$0xf]  ;;  %v286_v41 = vor.u32 %v317_v33, %v283_v34  ;;  %v259_v42 = vld [vmem:[%s486_s1 + $0x30] sm:$0xf0] }
   0x9   :  { %v265_v43 = vld [vmem:[%s486_s1 + $0x28] sm:$0xf]  ;;  %v315_v44 = vld [vmem:[%s486_s1 + $0x34] sm:$0xf0]  ;;  %v313_v45 = vld [vmem:[%s486_s1 + $0x2c] sm:$0xf]  ;;  %v258_v48 = vor.u32 %v314_v38, %v257_v37  ;;  %v262_v49 = vor.u32 %v312_v39, %v259_v42 }
   0xa   :  { %v267_v46 = vld [vmem:[%s486_s1 + $0x38] sm:$0xf0]  ;;  %v35_v47 = vld [vmem:[%s487_s2] sm:$0xff]  ;;  %v310_v51 = vld [vmem:[%s486_s1 + $0xc] sm:$0xf0]  ;;  %v266_v52 = vor.u32 %v315_v44, %v265_v43 }
   0xb   :  { %163 = vmatpush.bf16.msra.mxu0 %v290_v23  ;;  %177 = vmatpush.bf16.msra.mxu1 %v294_v24  ;;  %v241_v50 = vld [vmem:[%s486_s1] sm:$0xf]  ;;  %v270_v53 = vor.u32 %v313_v45, %v267_v46  ;;  %v308_v54 = vld [vmem:[%s486_s1 + $0x4] sm:$0xf]  ;;  %v243_v55 = vld [vmem:[%s486_s1 + $0x10] sm:$0xf0] }
   0xc   :  { %191 = vmatpush.bf16.msra.mxu2 %v298_v27  ;;  %205 = vmatpush.bf16.msra.mxu3 %v302_v28  ;;  %v249_v56 = vld [vmem:[%s486_s1 + $0x8] sm:$0xf]  ;;  %v311_v57 = vld [vmem:[%s486_s1 + $0x14] sm:$0xf0]  ;;  %v309_v58 = vld [vmem:[%s486_s1 + $0xc] sm:$0xf]  ;;  %v242_v60 = vor.u32 %v310_v51, %v241_v50  ;;  %v246_v61 = vor.u32 %v308_v54, %v243_v55 }
   0xd   :  { %39 = vperm.xlu0 %325, %v35_v47   ;;  %v251_v59 = vld [vmem:[%s486_s1 + $0x18] sm:$0xf0]  ;;  %v36_v62 = vld [vmem:[%s487_s2 + $0x8] sm:$0xff]  ;;  %v250_v63 = vor.u32 %v311_v57, %v249_v56  ;;  %v307_v1 = vld [vmem:[%s488_s0] sm:$0xff] }
   0xe   :  { %v254_v0 = vor.u32 %v309_v58, %v251_v59 }
   0xf   :  { %164 = vmatpush.bf16.msra.mxu0 %v274_v35  ;;  %178 = vmatpush.bf16.msra.mxu1 %v278_v36 }
  0x10   :  { %192 = vmatpush.bf16.msra.mxu2 %v282_v40  ;;  %206 = vmatpush.bf16.msra.mxu3 %v286_v41 }
  0x13   :  { %165 = vmatpush.bf16.msra.mxu0 %v258_v48  ;;  %179 = vmatpush.bf16.msra.mxu1 %v262_v49 }
  0x14   :  { %193 = vmatpush.bf16.msra.mxu2 %v266_v52  ;;  %207 = vmatpush.bf16.msra.mxu3 %v270_v53 }
  0x15   :  { %44 = vperm.xlu0 %325, %v36_v62  }
  0x17   :  { %166 = vmatpush.bf16.msra.mxu0 %v242_v60  ;;  %180 = vmatpush.bf16.msra.mxu1 %v246_v61 }
  0x18   :  { %194 = vmatpush.bf16.msra.mxu2 %v250_v63  ;;  %208 = vmatpush.bf16.msra.mxu3 %v254_v0 }
  0x1a   :  { %303 = vmatmul.msk.bf16.vlgmr.msra.gmra.mxu0 %vm142_vm1, %v307_v1  ;;  %304 = vmatmul.msk.bf16.vlgmr.msra.gmra.mxu1 %vm142_vm1, %v307_v1 }
  0x1b   :  { %305 = vmatmul.msk.bf16.vlgmr.msra.gmra.mxu2 %vm142_vm1, %v307_v1  ;;  %306 = vmatmul.msk.bf16.vlgmr.msra.gmra.mxu3 %vm142_vm1, %v307_v1 }
  0x7f   :  { %v40_v2 = vpop.permute.xlu0 %39 }
  0x87   :  { %v45_v9 = vpop.permute.xlu0 %44 }
  0x97   :  { %v168_v3 = vpop.f32.mrf.mxu0  ;;  %v182_v4 = vpop.f32.mrf.mxu1 }
  0x98   :  { %v169_v5 = vadd.f32 %v168_v3, %v40_v2  ;;  %v183_v6 = vadd.f32 %v182_v4, %v40_v2 }
  0x9a   :  { %v215_v7 = vmax.f32 %v169_v5, 0.0  ;;  %v216_v8 = vmax.f32 %v183_v6, 0.0 }
  0x9c   :  { %223 = vst [vmem:[%s489_s3] sm:$0xff] %v215_v7 }
  0x9d   :  { %224 = vst [vmem:[%s489_s3 + $0x8] sm:$0xff] %v216_v8 }
  0x9e   :  { %v196_v10 = vpop.f32.mrf.mxu2  ;;  %v210_v11 = vpop.f32.mrf.mxu3 }
  0x9f   :  { %v197_v12 = vadd.f32 %v196_v10, %v40_v2  ;;  %v211_v13 = vadd.f32 %v210_v11, %v40_v2  ;;  %v170_v14 = vpop.f32.mrf.mxu0  ;;  %v184_v15 = vpop.f32.mrf.mxu1 }
  0xa0   :  { %v171_v16 = vadd.f32 %v170_v14, %v45_v9  ;;  %v185_v17 = vadd.f32 %v184_v15, %v45_v9 }
  0xa1   :  { %v217_v18 = vmax.f32 %v197_v12, 0.0  ;;  %v218_v19 = vmax.f32 %v211_v13, 0.0 }
  0xa2   :  { %v219_v20 = vmax.f32 %v171_v16, 0.0  ;;  %v220_v21 = vmax.f32 %v185_v17, 0.0 }
  0xa3   :  { %225 = vst [vmem:[%s489_s3 + $0x10] sm:$0xff] %v217_v18 }
  0xa4   :  { %226 = vst [vmem:[%s489_s3 + $0x18] sm:$0xff] %v218_v19 }
  0xa5   :  { %227 = vst [vmem:[%s489_s3 + $0x20] sm:$0xff] %v219_v20 }
  0xa6   :  { %228 = vst [vmem:[%s489_s3 + $0x28] sm:$0xff] %v220_v21  ;;  %v198_v22 = vpop.f32.mrf.mxu2  ;;  %v212_v23 = vpop.f32.mrf.mxu3 }
  0xa7   :  { %v199_v24 = vadd.f32 %v198_v22, %v45_v9  ;;  %v213_v25 = vadd.f32 %v212_v23, %v45_v9 }
  0xa9   :  { %v221_v26 = vmax.f32 %v199_v24, 0.0  ;;  %v222_v27 = vmax.f32 %v213_v25, 0.0 }
  0xab   :  { %229 = vst [vmem:[%s489_s3 + $0x30] sm:$0xff] %v221_v26 }
  0xac   :  { %230 = vst [vmem:[%s489_s3 + $0x38] sm:$0xff] %v222_v27 }

// kernel: hrnn_forward.9
= control target key start
LH: loop header
LB: loop body
LE: loop exit
PB: predicated region body
PF: predicated region fallthrough
CT: control target
= control target key end

     0   :  { %v268_v6 = vmov 0   ;;  %vm133_vm0 = vcmask 130048   ;;  %s366_s1 = inlined_call_operand.vmem [shape: bf16[144,128], index: 1, kind: input, shape index: {}]   ;;  %s367_s0 = inlined_call_operand.vmem [shape: bf16[32,144], index: 0, kind: input, shape index: {}]   ;;  %s368_s2 = inlined_call_operand.vmem [shape: f32[32,1], index: 2, kind: input, shape index: {}]   ;;  %s369_s3 = inlined_call_operand.vmem [shape: f32[32,128], index: 3, kind: output, shape index: {}]  }
   0x1   :  { %v255_v0 = vld [vmem:[%s366_s1 + $0x38] sm:$0xff]  ;;  %v256_v1 = vld [vmem:[%s366_s1 + $0x40] sm:$0xff]  ;;  %v254_v3 = vld [vmem:[%s366_s1 + $0x30] sm:$0xff]  ;;  %267 = vset.pattern.permute.xlu1 %v268_v6  ;;  %266 = vset.pattern.permute.xlu0 %v268_v6 }
   0x2   :  { %v244_v2 = vld [vmem:[%s367_s0 + $0x4] sm:$0xf]  ;;  %140 = vmatpush.bf16.msra.mxu0 %v255_v0  ;;  %257 = vmatpush.bf16.msra.mxu2 %v255_v0  ;;  %v194_v4 = vld [vmem:[%s367_s0 + $0x8] sm:$0xf0]  ;;  %v39_v7 = vld [vmem:[%s368_s2 + $0x10] sm:$0xff] }
   0x3   :  { %166 = vmatpush.bf16.msra.mxu1 %v256_v1  ;;  %v197_v5 = vor.u32 %v244_v2, %v194_v4  ;;  %v253_v8 = vld [vmem:[%s366_s1 + $0x28] sm:$0xff]  ;;  %v37_v9 = vld [vmem:[%s368_s2] sm:$0xff]  ;;  %53 = vperm.xlu1 %267, %v39_v7   ;;  %v40_v11 = vld [vmem:[%s368_s2 + $0x18] sm:$0xff] }
   0x4   :  { %43 = vperm.xlu0 %266, %v37_v9   ;;  %v252_v10 = vld [vmem:[%s366_s1 + $0x20] sm:$0xff]  ;;  %v38_v12 = vld [vmem:[%s368_s2 + $0x8] sm:$0xff]  ;;  %v251_v13 = vld [vmem:[%s366_s1 + $0x18] sm:$0xff] }
   0x5   :  { %v246_v14 = vld [vmem:[%s367_s0 + $0x14] sm:$0xf]  ;;  %v202_v15 = vld [vmem:[%s367_s0 + $0x18] sm:$0xf0]  ;;  %v249_v18 = vld [vmem:[%s366_s1 + $0x8] sm:$0xff] }
   0x6   :  { %141 = vmatpush.bf16.msra.mxu0 %v254_v3  ;;  %258 = vmatpush.bf16.msra.mxu2 %v254_v3  ;;  %v250_v16 = vld [vmem:[%s366_s1 + $0x10] sm:$0xff]  ;;  %v205_v17 = vor.u32 %v246_v14, %v202_v15  ;;  %v248_v19 = vld [vmem:[%s366_s1] sm:$0xff]  ;;  %v245_v21 = vld [vmem:[%s367_s0 + $0x4] sm:$0xf0] }
   0x7   :  { %242 = vmatmul.msk.bf16.vlgmr.msra.gmra.mxu1 %vm133_vm0, %v197_v5  ;;  %v192_v20 = vld [vmem:[%s367_s0] sm:$0xf]  ;;  %v200_v22 = vld [vmem:[%s367_s0 + $0x10] sm:$0xf]  ;;  %v247_v23 = vld [vmem:[%s367_s0 + $0x14] sm:$0xf0] }
   0x8   :  { %v193_v24 = vor.u32 %v245_v21, %v192_v20  ;;  %v201_v25 = vor.u32 %v247_v23, %v200_v22 }
   0xa   :  { %142 = vmatpush.bf16.msra.mxu0 %v253_v8  ;;  %259 = vmatpush.bf16.msra.mxu2 %v253_v8 }
   0xb   :  { %58 = vperm.xlu1 %267, %v40_v11  }
   0xc   :  { %48 = vperm.xlu0 %266, %v38_v12  }
   0xe   :  { %143 = vmatpush.bf16.msra.mxu0 %v252_v10  ;;  %260 = vmatpush.bf16.msra.mxu2 %v252_v10 }
  0x12   :  { %144 = vmatpush.bf16.msra.mxu0 %v251_v13  ;;  %261 = vmatpush.bf16.msra.mxu2 %v251_v13 }
  0x16   :  { %145 = vmatpush.bf16.msra.mxu0 %v250_v16  ;;  %262 = vmatpush.bf16.msra.mxu2 %v250_v16 }
  0x17   :  { %243 = vmatmul.msk.bf16.gmra.mxu1 %vm133_vm0, %v205_v17 }
  0x1a   :  { %146 = vmatpush.bf16.msra.mxu0 %v249_v18  ;;  %263 = vmatpush.bf16.msra.mxu2 %v249_v18 }
  0x1e   :  { %147 = vmatpush.bf16.msra.mxu0 %v248_v19  ;;  %264 = vmatpush.bf16.msra.mxu2 %v248_v19 }
  0x21   :  { %148 = vmatmul.bf16.vlgmr.msra.gmra.mxu0 %v193_v24  ;;  %153 = vmatmul.bf16.vlgmr.msra.gmra.mxu2 %v201_v25 }
  0x75   :  { %v54_v32 = vpop.permute.xlu1 %53 }
  0x76   :  { %v44_v28 = vpop.permute.xlu0 %43 }
  0x7d   :  { %v59_v44 = vpop.permute.xlu1 %58 }
  0x7e   :  { %v49_v37 = vpop.permute.xlu0 %48 }
  0x84   :  { %v168_v26 = vpop.f32.mrf.mxu1 }
  0x8c   :  { %v170_v27 = vpop.f32.mrf.mxu1 }
  0x94   :  { %v173_v34 = vpop.f32.mrf.mxu1 }
  0x9c   :  { %v175_v47 = vpop.f32.mrf.mxu1 }
  0x9e   :  { %v149_v29 = vpop.f32.mrf.mxu0 }
  0x9f   :  { %v150_v30 = vadd.f32 %v149_v29, %v44_v28 }
  0xa1   :  { %v169_v31 = vadd.f32 %v168_v26, %v150_v30 }
  0xa3   :  { %v178_v33 = vmax.f32 %v169_v31, 0.0 }
  0xa4   :  { %v154_v35 = vpop.f32.mrf.mxu2 }
  0xa5   :  { %182 = vst [vmem:[%s369_s3] sm:$0xff] %v178_v33  ;;  %v155_v36 = vadd.f32 %v154_v35, %v54_v32 }
  0xa6   :  { %v151_v38 = vpop.f32.mrf.mxu0 }
  0xa7   :  { %v174_v39 = vadd.f32 %v173_v34, %v155_v36  ;;  %v152_v40 = vadd.f32 %v151_v38, %v49_v37 }
  0xa9   :  { %v180_v41 = vmax.f32 %v174_v39, 0.0  ;;  %v171_v42 = vadd.f32 %v170_v27, %v152_v40 }
  0xab   :  { %184 = vst [vmem:[%s369_s3 + $0x10] sm:$0xff] %v180_v41  ;;  %v179_v43 = vmax.f32 %v171_v42, 0.0 }
  0xac   :  { %v156_v45 = vpop.f32.mrf.mxu2 }
  0xad   :  { %183 = vst [vmem:[%s369_s3 + $0x8] sm:$0xff] %v179_v43  ;;  %v157_v46 = vadd.f32 %v156_v45, %v59_v44 }
  0xaf   :  { %v176_v48 = vadd.f32 %v175_v47, %v157_v46 }
  0xb1   :  { %v181_v49 = vmax.f32 %v176_v48, 0.0 }
  0xb3   :  { %185 = vst [vmem:[%s369_s3 + $0x18] sm:$0xff] %v181_v49 }

// kernel: hrnn_forward.10
= control target key start
LH: loop header
LB: loop body
LE: loop exit
PB: predicated region body
PF: predicated region fallthrough
CT: control target
= control target key end

     0   :  { %s5690_s0 = inlined_call_operand.vmem [shape: f32[2,2048], index: 0, kind: input, shape index: {}]   ;;  %s5691_s1 = inlined_call_operand.vmem [shape: f32[2,8], index: 1, kind: input, shape index: {}]   ;;  %s5692_s2 = inlined_call_operand.vmem [shape: f32[4,2,64], index: 2, kind: input, shape index: {}, may-alias: {2,3}]   ;;  %s5693_s3 = inlined_call_operand.vmem [shape: f32[4,2,64], index: 3, kind: input, shape index: {}, may-alias: {2,3}]   ;;  %s5694_s4 = inlined_call_operand.vmem [shape: bf16[2048,64], index: 4, kind: input, shape index: {}]   ;;  %s5695_s5 = inlined_call_operand.vmem [shape: f32[1,64], index: 5, kind: input, shape index: {}]   ;;  %s5696_s6 = inlined_call_operand.vmem [shape: bf16[64,8], index: 6, kind: input, shape index: {}]   ;;  %s5697_s7 = inlined_call_operand.vmem [shape: f32[1,8], index: 7, kind: input, shape index: {}]   ;;  %s5698_s8 = inlined_call_operand.vmem [shape: f32[8,256], index: 8, kind: input, shape index: {}]   ;;  %s5699_s9 = inlined_call_operand.vmem [shape: f32[8,256], index: 9, kind: input, shape index: {}]   ;;  %s5700_s10 = inlined_call_operand.vmem [shape: f32[128,256], index: 10, kind: input, shape index: {}]   ;;  %s5701_s11 = inlined_call_operand.vmem [shape: f32[64,256], index: 11, kind: input, shape index: {}]   ;;  %s5702_s12 = inlined_call_operand.vmem [shape: f32[4,64,256], index: 12, kind: input, shape index: {}]   ;;  %s5703_s13 = inlined_call_operand.vmem [shape: f32[4,1,256], index: 13, kind: input, shape index: {}]   ;;  %s5704_s14 = inlined_call_operand.vmem [shape: f32[64,16], index: 14, kind: input, shape index: {}]   ;;  %s5705_s15 = inlined_call_operand.vmem [shape: f32[1,16], index: 15, kind: input, shape index: {}]   ;;  %s5706_s16 = inlined_call_operand.vmem [shape: bf16[8,64], index: 16, kind: input, shape index: {}]   ;;  %s5707_s17 = inlined_call_operand.vmem [shape: f32[1,64], index: 17, kind: input, shape index: {}]   ;;  %s5708_s18 = inlined_call_operand.vmem [shape: bf16[64,2048], index: 18, kind: input, shape index: {}]   ;;  %s5709_s19 = inlined_call_operand.vmem [shape: f32[1,2048], index: 19, kind: input, shape index: {}]   ;;  %s5710_s20 = inlined_call_operand.vmem [shape: f32[2,2048], index: 20, kind: output, shape index: {0}]   ;;  %s5711_s21 = inlined_call_operand.hbm [shape: f32[2,8], index: 21, kind: output, shape index: {1}]   ;;  %s5712_s22 = inlined_call_operand.vmem [shape: f32[4,2,64], index: 22, kind: output, shape index: {2}]   ;;  %s5713_s23 = inlined_call_operand.vmem [shape: f32[4,2,64], index: 23, kind: output, shape index: {3}]  }
   0x1   :  { %5719 = sst [smem:[#allocation5_spill]] %s5690_s0 }
   0x2   :  { %5720 = sst [smem:[#allocation6_spill]] %s5691_s1 }
   0x3   :  { %5721 = sst [smem:[#allocation7_spill]] %s5692_s2 }
   0x4   :  { %5722 = sst [smem:[#allocation8_spill]] %s5693_s3 }
   0x5   :  { %5723 = sst [smem:[#allocation9_spill]] %s5694_s4 }
   0x6   :  { %5724 = sst [smem:[#allocation10_spill]] %s5695_s5 }
   0x7   :  { %5725 = sst [smem:[#allocation11_spill]] %s5696_s6 }
   0x8   :  { %5726 = sst [smem:[#allocation12_spill]] %s5697_s7 }
   0x9   :  { %s5727_s24 = sld [smem:[#allocation9_spill]] }
   0xa   :  { %s5728_s1 = sld [smem:[#allocation5_spill]] }
   0xf   :  { %v3877_v0 = vld [vmem:[%s5727_s24 + $0x38] sm:$0xff]  ;;  %v3876_v4 = vld [vmem:[%s5727_s24 + $0x30] sm:$0xff]  ;;  %v3875_v8 = vld [vmem:[%s5727_s24 + $0x28] sm:$0xff] }
  0x10   :  { %v3885_v1 = vld [vmem:[%s5727_s24 + $0x78] sm:$0xff]  ;;  %1160 = vmatpush.bf16.msra.mxu0 %v3877_v0  ;;  %v3884_v5 = vld [vmem:[%s5727_s24 + $0x70] sm:$0xff]  ;;  %v3883_v9 = vld [vmem:[%s5727_s24 + $0x68] sm:$0xff] }
  0x11   :  { %v3893_v2 = vld [vmem:[%s5727_s24 + $0xb8] sm:$0xff]  ;;  %1173 = vmatpush.bf16.msra.mxu1 %v3885_v1  ;;  %v3892_v6 = vld [vmem:[%s5727_s24 + $0xb0] sm:$0xff]  ;;  %v3891_v10 = vld [vmem:[%s5727_s24 + $0xa8] sm:$0xff] }
  0x12   :  { %v3901_v3 = vld [vmem:[%s5727_s24 + $0xf8] sm:$0xff]  ;;  %1186 = vmatpush.bf16.msra.mxu2 %v3893_v2  ;;  %v3900_v7 = vld [vmem:[%s5727_s24 + $0xf0] sm:$0xff]  ;;  %v3899_v11 = vld [vmem:[%s5727_s24 + $0xe8] sm:$0xff] }
  0x13   :  { %1199 = vmatpush.bf16.msra.mxu3 %v3901_v3  ;;  %v3874_v12 = vld [vmem:[%s5727_s24 + $0x20] sm:$0xff]  ;;  %v3873_v16 = vld [vmem:[%s5727_s24 + $0x18] sm:$0xff]  ;;  %v3872_v20 = vld [vmem:[%s5727_s24 + $0x10] sm:$0xff] }
  0x14   :  { %1161 = vmatpush.bf16.msra.mxu0 %v3876_v4  ;;  %v3882_v13 = vld [vmem:[%s5727_s24 + $0x60] sm:$0xff]  ;;  %v3881_v17 = vld [vmem:[%s5727_s24 + $0x58] sm:$0xff]  ;;  %v3880_v21 = vld [vmem:[%s5727_s24 + $0x50] sm:$0xff] }
  0x15   :  { %1174 = vmatpush.bf16.msra.mxu1 %v3884_v5  ;;  %v3890_v14 = vld [vmem:[%s5727_s24 + $0xa0] sm:$0xff]  ;;  %v3889_v18 = vld [vmem:[%s5727_s24 + $0x98] sm:$0xff]  ;;  %v3888_v23 = vld [vmem:[%s5727_s24 + $0x90] sm:$0xff] }
  0x16   :  { %1187 = vmatpush.bf16.msra.mxu2 %v3892_v6  ;;  %v3898_v15 = vld [vmem:[%s5727_s24 + $0xe0] sm:$0xff]  ;;  %v3897_v19 = vld [vmem:[%s5727_s24 + $0xd8] sm:$0xff]  ;;  %v3896_v24 = vld [vmem:[%s5727_s24 + $0xd0] sm:$0xff] }
  0x17   :  { %1200 = vmatpush.bf16.msra.mxu3 %v3900_v7  ;;  %v71_v22 = vld [vmem:[%s5728_s1] sm:$0xff] }
  0x18   :  { %1162 = vmatpush.bf16.msra.mxu0 %v3875_v8  ;;  %79 = vst [vmem:[#allocation1] ss:$4 sm:$0xff] %v71_v22 }
  0x19   :  { %1175 = vmatpush.bf16.msra.mxu1 %v3883_v9 }
  0x1a   :  { %1188 = vmatpush.bf16.msra.mxu2 %v3891_v10 }
  0x1b   :  { %1201 = vmatpush.bf16.msra.mxu3 %v3899_v11 }
  0x1c   :  { %1163 = vmatpush.bf16.msra.mxu0 %v3874_v12 }
  0x1d   :  { %1176 = vmatpush.bf16.msra.mxu1 %v3882_v13 }
  0x1e   :  { %1189 = vmatpush.bf16.msra.mxu2 %v3890_v14 }
  0x1f   :  { %1202 = vmatpush.bf16.msra.mxu3 %v3898_v15 }
  0x20   :  { %1164 = vmatpush.bf16.msra.mxu0 %v3873_v16 }
  0x21   :  { %1177 = vmatpush.bf16.msra.mxu1 %v3881_v17 }
  0x22   :  { %1190 = vmatpush.bf16.msra.mxu2 %v3889_v18 }
  0x23   :  { %1203 = vmatpush.bf16.msra.mxu3 %v3897_v19 }
  0x24   :  { %29 = vsyncpa [#allocation3], 0  ;;  %1165 = vmatpush.bf16.msra.mxu0 %v3872_v20  ;;  %v3871_v25 = vld [vmem:[%s5727_s24 + $0x8] sm:$0xff]  ;;  %v3870_v29 = vld [vmem:[%s5727_s24] sm:$0xff]  ;;  %s5729_s5 = sld [smem:[#allocation10_spill]]  ;;  %vm1406_vm0 = vcmask 523264  }
  0x25   :  { %1178 = vmatpush.bf16.msra.mxu1 %v3880_v21  ;;  %v3879_v26 = vld [vmem:[%s5727_s24 + $0x48] sm:$0xff]  ;;  %v3878_v30 = vld [vmem:[%s5727_s24 + $0x40] sm:$0xff]  ;;  %v84_v32 = vld.sshfl [vmem:[#allocation1 + $0x10] sm:$0xff pattern:$0x73625140]  ;;  %s5730_s6 = sld [smem:[#allocation11_spill]] }
  0x26   :  { %1191 = vmatpush.bf16.msra.mxu2 %v3888_v23  ;;  %v3887_v27 = vld [vmem:[%s5727_s24 + $0x88] sm:$0xff]  ;;  %v3886_v31 = vld [vmem:[%s5727_s24 + $0x80] sm:$0xff]  ;;  %v73_v35 = vld [vmem:[%s5728_s1 + $0x10] sm:$0xff]  ;;  %v118_v43 = vpack.c.bf16 %v84_v32, %v84_v32  ;;  %s5731_s26 = sld [smem:[#allocation7_spill]]  ;;  %vm1485_vm1 = vcmask 64512   ;;  %s4148_s25 = smov 120  }
  0x27   :  { %1204 = vmatpush.bf16.msra.mxu3 %v3896_v24  ;;  %v3895_v28 = vld [vmem:[%s5727_s24 + $0xc8] sm:$0xff]  ;;  %v3894_v33 = vld [vmem:[%s5727_s24 + $0xc0] sm:$0xff]  ;;  %v85_v36 = vld.sshfl [vmem:[#allocation1 + $0x18] sm:$0xff pattern:$0x73625140]  ;;  %s5732_s27 = sld [smem:[#allocation8_spill]] }
  0x28   :  { %1166 = vmatpush.bf16.msra.mxu0 %v3871_v25  ;;  %v82_v34 = vld.sshfl [vmem:[#allocation1] sm:$0xff pattern:$0x73625140]  ;;  %v83_v37 = vld.sshfl [vmem:[#allocation1 + $0x8] sm:$0xff pattern:$0x73625140]  ;;  %v119_v45 = vpack.c.bf16 %v85_v36, %v85_v36 }
  0x29   :  { %1179 = vmatpush.bf16.msra.mxu1 %v3879_v26  ;;  %v3909_v38 = vld [vmem:[%s5727_s24 + $0x138] sm:$0xff]  ;;  %90 = vst [vmem:[#allocation1] ss:$4 sm:$0xff] %v73_v35  ;;  %v72_v42 = vld [vmem:[%s5728_s1 + $0x8] sm:$0xff]  ;;  %v116_v44 = vpack.c.bf16 %v82_v34, %v82_v34  ;;  %v117_v46 = vpack.c.bf16 %v83_v37, %v83_v37  ;;  %v3908_v47 = vld [vmem:[%s5727_s24 + $0x130] sm:$0xff]  ;;  %s5733_s2 = sld [smem:[#allocation12_spill]] }
  0x2a   :  { %1192 = vmatpush.bf16.msra.mxu2 %v3887_v27  ;;  %v3917_v39 = vld [vmem:[%s5727_s24 + $0x178] sm:$0xff]  ;;  %81 = vst [vmem:[#allocation1 + $0x20] ss:$4 sm:$0xff] %v72_v42  ;;  %v3916_v48 = vld [vmem:[%s5727_s24 + $0x170] sm:$0xff]  ;;  %v3907_v51 = vld [vmem:[%s5727_s24 + $0x128] sm:$0xff]  ;;  %s5734_s28 = sld [smem:[#allocation6_spill]] }
  0x2b   :  { %1205 = vmatpush.bf16.msra.mxu3 %v3895_v28  ;;  %v3925_v40 = vld [vmem:[%s5727_s24 + $0x1b8] sm:$0xff]  ;;  %v3924_v49 = vld [vmem:[%s5727_s24 + $0x1b0] sm:$0xff]  ;;  %v3915_v52 = vld [vmem:[%s5727_s24 + $0x168] sm:$0xff] }
  0x2c   :  { %v3933_v41 = vld [vmem:[%s5727_s24 + $0x1f8] sm:$0xff]  ;;  %1167 = vmatpush.bf16.msra.mxu0 %v3870_v29  ;;  %v3932_v50 = vld [vmem:[%s5727_s24 + $0x1f0] sm:$0xff]  ;;  %v3923_v53 = vld [vmem:[%s5727_s24 + $0x1a8] sm:$0xff] }
  0x2d   :  { %1180 = vmatpush.bf16.msra.mxu1 %v3878_v30  ;;  %v3931_v54 = vld [vmem:[%s5727_s24 + $0x1e8] sm:$0xff]  ;;  %v3906_v55 = vld [vmem:[%s5727_s24 + $0x120] sm:$0xff]  ;;  %v74_v59 = vld [vmem:[%s5728_s1 + $0x18] sm:$0xff]  ;;  %s4147_s1 = smov 64  }
  0x2e   :  { %1193 = vmatpush.bf16.msra.mxu2 %v3886_v31  ;;  %v3914_v57 = vld [vmem:[%s5727_s24 + $0x160] sm:$0xff]  ;;  %v3905_v0 = vld [vmem:[%s5727_s24 + $0x118] sm:$0xff]  ;;  %v3904_v4 = vld [vmem:[%s5727_s24 + $0x110] sm:$0xff] }
  0x2f   :  { %1206 = vmatpush.bf16.msra.mxu3 %v3894_v33  ;;  %1168 = vmatmul.bf16.vlgmr.msra.gmra.mxu0 %v116_v44  ;;  %v3922_v62 = vld [vmem:[%s5727_s24 + $0x1a0] sm:$0xff]  ;;  %v3913_v1 = vld [vmem:[%s5727_s24 + $0x158] sm:$0xff]  ;;  %v3912_v5 = vld [vmem:[%s5727_s24 + $0x150] sm:$0xff] }
  0x30   :  { %1212 = vmatpush.bf16.msrb.mxu0 %v3909_v38  ;;  %1181 = vmatmul.bf16.vlgmr.msra.gmra.mxu1 %v117_v46  ;;  %v3930_v63 = vld [vmem:[%s5727_s24 + $0x1e0] sm:$0xff]  ;;  %v3921_v2 = vld [vmem:[%s5727_s24 + $0x198] sm:$0xff]  ;;  %v3920_v6 = vld [vmem:[%s5727_s24 + $0x190] sm:$0xff] }
  0x31   :  { %1225 = vmatpush.bf16.msrb.mxu1 %v3917_v39  ;;  %1194 = vmatmul.bf16.vlgmr.msra.gmra.mxu2 %v118_v43  ;;  %v4414_v56 = vld.sshfl [vmem:[#allocation1 + $0x30] sm:$0xff pattern:$0x73625140]  ;;  %v4419_v58 = vld.sshfl [vmem:[#allocation1 + $0x20] sm:$0xff pattern:$0x73625140] }
  0x32   :  { %1238 = vmatpush.bf16.msrb.mxu2 %v3925_v40  ;;  %1207 = vmatmul.bf16.vlgmr.msra.gmra.mxu3 %v119_v45  ;;  %v89_v60 = vld.sshfl [vmem:[#allocation1 + $0x38] sm:$0xff pattern:$0x73625140]  ;;  %v87_v61 = vld.sshfl [vmem:[#allocation1 + $0x28] sm:$0xff pattern:$0x73625140]  ;;  %v122_v20 = vpack.c.bf16 %v4414_v56, %v4414_v56  ;;  %v120_v21 = vpack.c.bf16 %v4419_v58, %v4419_v58 }
  0x33   :  { %1251 = vmatpush.bf16.msrb.mxu3 %v3933_v41  ;;  %91 = vst [vmem:[#allocation1 + $0x20] ss:$4 sm:$0xff] %v74_v59  ;;  %v3929_v3 = vld [vmem:[%s5727_s24 + $0x1d8] sm:$0xff]  ;;  %v3928_v7 = vld [vmem:[%s5727_s24 + $0x1d0] sm:$0xff]  ;;  %v3903_v8 = vld [vmem:[%s5727_s24 + $0x108] sm:$0xff]  ;;  %v123_v22 = vpack.c.bf16 %v89_v60, %v89_v60  ;;  %v121_v23 = vpack.c.bf16 %v87_v61, %v87_v61 }
  0x34   :  { %1213 = vmatpush.bf16.msrb.mxu0 %v3908_v47  ;;  %v3911_v9 = vld [vmem:[%s5727_s24 + $0x148] sm:$0xff]  ;;  %v3902_v12 = vld [vmem:[%s5727_s24 + $0x100] sm:$0xff]  ;;  %v3941_v16 = vld [vmem:[%s5727_s24 + $0x238] sm:$0xff] }
  0x35   :  { %1226 = vmatpush.bf16.msrb.mxu1 %v3916_v48  ;;  %v3919_v10 = vld [vmem:[%s5727_s24 + $0x188] sm:$0xff]  ;;  %v3910_v13 = vld [vmem:[%s5727_s24 + $0x140] sm:$0xff]  ;;  %v3949_v17 = vld [vmem:[%s5727_s24 + $0x278] sm:$0xff] }
  0x36   :  { %1239 = vmatpush.bf16.msrb.mxu2 %v3924_v49  ;;  %v3927_v11 = vld [vmem:[%s5727_s24 + $0x1c8] sm:$0xff]  ;;  %v3918_v14 = vld [vmem:[%s5727_s24 + $0x180] sm:$0xff]  ;;  %v3957_v18 = vld [vmem:[%s5727_s24 + $0x2b8] sm:$0xff] }
  0x37   :  { %1252 = vmatpush.bf16.msrb.mxu3 %v3932_v50  ;;  %v3926_v15 = vld [vmem:[%s5727_s24 + $0x1c0] sm:$0xff]  ;;  %v3965_v19 = vld [vmem:[%s5727_s24 + $0x2f8] sm:$0xff]  ;;  %v3940_v24 = vld [vmem:[%s5727_s24 + $0x230] sm:$0xff] }
  0x38   :  { %1214 = vmatpush.bf16.msrb.mxu0 %v3907_v51  ;;  %v3948_v25 = vld [vmem:[%s5727_s24 + $0x270] sm:$0xff]  ;;  %v3939_v28 = vld [vmem:[%s5727_s24 + $0x228] sm:$0xff]  ;;  %v3938_v32 = vld [vmem:[%s5727_s24 + $0x220] sm:$0xff] }
  0x39   :  { %1227 = vmatpush.bf16.msrb.mxu1 %v3915_v52  ;;  %v3956_v26 = vld [vmem:[%s5727_s24 + $0x2b0] sm:$0xff]  ;;  %v3947_v29 = vld [vmem:[%s5727_s24 + $0x268] sm:$0xff]  ;;  %v3946_v33 = vld [vmem:[%s5727_s24 + $0x260] sm:$0xff] }
  0x3a   :  { %1240 = vmatpush.bf16.msrb.mxu2 %v3923_v53  ;;  %v3964_v27 = vld [vmem:[%s5727_s24 + $0x2f0] sm:$0xff]  ;;  %v3955_v30 = vld [vmem:[%s5727_s24 + $0x2a8] sm:$0xff]  ;;  %v3954_v34 = vld [vmem:[%s5727_s24 + $0x2a0] sm:$0xff] }
  0x3b   :  { %1253 = vmatpush.bf16.msrb.mxu3 %v3931_v54  ;;  %v3963_v31 = vld [vmem:[%s5727_s24 + $0x2e8] sm:$0xff]  ;;  %v3962_v35 = vld [vmem:[%s5727_s24 + $0x2e0] sm:$0xff]  ;;  %v3937_v36 = vld [vmem:[%s5727_s24 + $0x218] sm:$0xff] }
  0x3c   :  { %1215 = vmatpush.bf16.msrb.mxu0 %v3906_v55  ;;  %v3945_v37 = vld [vmem:[%s5727_s24 + $0x258] sm:$0xff]  ;;  %v3936_v40 = vld [vmem:[%s5727_s24 + $0x210] sm:$0xff]  ;;  %v3935_v44 = vld [vmem:[%s5727_s24 + $0x208] sm:$0xff] }
  0x3d   :  { %1228 = vmatpush.bf16.msrb.mxu1 %v3914_v57  ;;  %v3953_v38 = vld [vmem:[%s5727_s24 + $0x298] sm:$0xff]  ;;  %v3944_v41 = vld [vmem:[%s5727_s24 + $0x250] sm:$0xff]  ;;  %v3943_v45 = vld [vmem:[%s5727_s24 + $0x248] sm:$0xff] }
  0x3e   :  { %1241 = vmatpush.bf16.msrb.mxu2 %v3922_v62  ;;  %v3961_v39 = vld [vmem:[%s5727_s24 + $0x2d8] sm:$0xff]  ;;  %v3952_v42 = vld [vmem:[%s5727_s24 + $0x290] sm:$0xff]  ;;  %v3951_v46 = vld [vmem:[%s5727_s24 + $0x288] sm:$0xff] }
  0x3f   :  { %1254 = vmatpush.bf16.msrb.mxu3 %v3930_v63  ;;  %v3960_v43 = vld [vmem:[%s5727_s24 + $0x2d0] sm:$0xff]  ;;  %v3959_v47 = vld [vmem:[%s5727_s24 + $0x2c8] sm:$0xff]  ;;  %v3934_v48 = vld [vmem:[%s5727_s24 + $0x200] sm:$0xff] }
  0x40   :  { %1216 = vmatpush.bf16.msrb.mxu0 %v3905_v0  ;;  %v3942_v49 = vld [vmem:[%s5727_s24 + $0x240] sm:$0xff]  ;;  %v3973_v52 = vld [vmem:[%s5727_s24 + $0x338] sm:$0xff]  ;;  %v94_v55 = vld.sshfl [vmem:[#allocation1 + $0x10] sm:$0xff pattern:$0x73625140] }
  0x41   :  { %1229 = vmatpush.bf16.msrb.mxu1 %v3913_v1  ;;  %v3950_v50 = vld [vmem:[%s5727_s24 + $0x280] sm:$0xff]  ;;  %v3981_v53 = vld [vmem:[%s5727_s24 + $0x378] sm:$0xff]  ;;  %v93_v56 = vld.sshfl [vmem:[#allocation1 + $0x8] sm:$0xff pattern:$0x73625140]  ;;  %v126_v61 = vpack.c.bf16 %v94_v55, %v94_v55 }
  0x42   :  { %1242 = vmatpush.bf16.msrb.mxu2 %v3921_v2  ;;  %v3958_v51 = vld [vmem:[%s5727_s24 + $0x2c0] sm:$0xff]  ;;  %v95_v57 = vld.sshfl [vmem:[#allocation1 + $0x18] sm:$0xff pattern:$0x73625140]  ;;  %v125_v62 = vpack.c.bf16 %v93_v56, %v93_v56  ;;  %v3972_v0 = vld [vmem:[%s5727_s24 + $0x330] sm:$0xff] }
  0x43   :  { %1255 = vmatpush.bf16.msrb.mxu3 %v3929_v3  ;;  %v92_v54 = vld.sshfl [vmem:[#allocation1] sm:$0xff pattern:$0x73625140]  ;;  %v3989_v58 = vld [vmem:[%s5727_s24 + $0x3b8] sm:$0xff]  ;;  %v127_v63 = vpack.c.bf16 %v95_v57, %v95_v57  ;;  %v3980_v1 = vld [vmem:[%s5727_s24 + $0x370] sm:$0xff] }
  0x44   :  { %1217 = vmatpush.bf16.msrb.mxu0 %v3904_v4  ;;  %v3997_v59 = vld [vmem:[%s5727_s24 + $0x3f8] sm:$0xff]  ;;  %v124_v60 = vpack.c.bf16 %v92_v54, %v92_v54  ;;  %v3988_v2 = vld [vmem:[%s5727_s24 + $0x3b0] sm:$0xff]  ;;  %v3971_v4 = vld [vmem:[%s5727_s24 + $0x328] sm:$0xff] }
  0x45   :  { %1230 = vmatpush.bf16.msrb.mxu1 %v3912_v5  ;;  %v3996_v3 = vld [vmem:[%s5727_s24 + $0x3f0] sm:$0xff]  ;;  %v3979_v5 = vld [vmem:[%s5727_s24 + $0x368] sm:$0xff]  ;;  %v4001_v55 = vld [vmem:[%s5730_s6 + $0x18] sm:$0xff] }
  0x46   :  { %1243 = vmatpush.bf16.msrb.mxu2 %v3920_v6  ;;  %v3987_v6 = vld [vmem:[%s5727_s24 + $0x3a8] sm:$0xff] }
  0x47   :  { %1256 = vmatpush.bf16.msrb.mxu3 %v3928_v7  ;;  %v3995_v7 = vld [vmem:[%s5727_s24 + $0x3e8] sm:$0xff] }
  0x48   :  { %1218 = vmatpush.bf16.msrb.mxu0 %v3903_v8  ;;  %v3970_v8 = vld [vmem:[%s5727_s24 + $0x320] sm:$0xff] }
  0x49   :  { %1231 = vmatpush.bf16.msrb.mxu1 %v3911_v9  ;;  %v3978_v9 = vld [vmem:[%s5727_s24 + $0x360] sm:$0xff] }
  0x4a   :  { %1244 = vmatpush.bf16.msrb.mxu2 %v3919_v10  ;;  %v3986_v10 = vld [vmem:[%s5727_s24 + $0x3a0] sm:$0xff] }
  0x4b   :  { %1257 = vmatpush.bf16.msrb.mxu3 %v3927_v11  ;;  %v3994_v11 = vld [vmem:[%s5727_s24 + $0x3e0] sm:$0xff] }
  0x4c   :  { %1219 = vmatpush.bf16.msrb.mxu0 %v3902_v12  ;;  %v3969_v12 = vld [vmem:[%s5727_s24 + $0x318] sm:$0xff] }
  0x4d   :  { %1232 = vmatpush.bf16.msrb.mxu1 %v3910_v13  ;;  %v3977_v13 = vld [vmem:[%s5727_s24 + $0x358] sm:$0xff] }
  0x4e   :  { %1245 = vmatpush.bf16.msrb.mxu2 %v3918_v14  ;;  %v3985_v14 = vld [vmem:[%s5727_s24 + $0x398] sm:$0xff] }
  0x4f   :  { %1258 = vmatpush.bf16.msrb.mxu3 %v3926_v15  ;;  %1220 = vmatmul.bf16.vlgmr.msrb.gmra.mxu0 %v120_v21  ;;  %v3993_v15 = vld [vmem:[%s5727_s24 + $0x3d8] sm:$0xff]  ;;  %v3975_v21 = vld [vmem:[%s5727_s24 + $0x348] sm:$0xff] }
  0x50   :  { %1264 = vmatpush.bf16.msra.mxu0 %v3941_v16  ;;  %1233 = vmatmul.bf16.vlgmr.msrb.gmra.mxu1 %v121_v23  ;;  %v3968_v16 = vld [vmem:[%s5727_s24 + $0x310] sm:$0xff]  ;;  %v3991_v23 = vld [vmem:[%s5727_s24 + $0x3c8] sm:$0xff] }
  0x51   :  { %1277 = vmatpush.bf16.msra.mxu1 %v3949_v17  ;;  %1246 = vmatmul.bf16.vlgmr.msrb.gmra.mxu2 %v122_v20  ;;  %v3976_v17 = vld [vmem:[%s5727_s24 + $0x350] sm:$0xff]  ;;  %v3967_v20 = vld [vmem:[%s5727_s24 + $0x308] sm:$0xff] }
  0x52   :  { %1290 = vmatpush.bf16.msra.mxu2 %v3957_v18  ;;  %1259 = vmatmul.bf16.vlgmr.msrb.gmra.mxu3 %v123_v22  ;;  %v3984_v18 = vld [vmem:[%s5727_s24 + $0x390] sm:$0xff]  ;;  %v3983_v22 = vld [vmem:[%s5727_s24 + $0x388] sm:$0xff] }
  0x53   :  { %1303 = vmatpush.bf16.msra.mxu3 %v3965_v19  ;;  %v3992_v19 = vld [vmem:[%s5727_s24 + $0x3d0] sm:$0xff] }
  0x54   :  { %1265 = vmatpush.bf16.msra.mxu0 %v3940_v24  ;;  %v3966_v24 = vld [vmem:[%s5727_s24 + $0x300] sm:$0xff] }
  0x55   :  { %1278 = vmatpush.bf16.msra.mxu1 %v3948_v25  ;;  %v3974_v25 = vld [vmem:[%s5727_s24 + $0x340] sm:$0xff] }
  0x56   :  { %1291 = vmatpush.bf16.msra.mxu2 %v3956_v26  ;;  %v3982_v26 = vld [vmem:[%s5727_s24 + $0x380] sm:$0xff] }
  0x57   :  { %1304 = vmatpush.bf16.msra.mxu3 %v3964_v27  ;;  %v3990_v27 = vld [vmem:[%s5727_s24 + $0x3c0] sm:$0xff] }
  0x58   :  { %1266 = vmatpush.bf16.msra.mxu0 %v3939_v28  ;;  %v96_v28 = vld.sshfl [vmem:[#allocation1 + $0x20] sm:$0xff pattern:$0x73625140] }
  0x59   :  { %1279 = vmatpush.bf16.msra.mxu1 %v3947_v29  ;;  %v97_v29 = vld.sshfl [vmem:[#allocation1 + $0x28] sm:$0xff pattern:$0x73625140] }
  0x5a   :  { %1292 = vmatpush.bf16.msra.mxu2 %v3955_v30  ;;  %v98_v30 = vld.sshfl [vmem:[#allocation1 + $0x30] sm:$0xff pattern:$0x73625140] }
  0x5b   :  { %1305 = vmatpush.bf16.msra.mxu3 %v3963_v31  ;;  %v99_v31 = vld.sshfl [vmem:[#allocation1 + $0x38] sm:$0xff pattern:$0x73625140] }
  0x5c   :  { %1267 = vmatpush.bf16.msra.mxu0 %v3938_v32  ;;  %v128_v32 = vpack.c.bf16 %v96_v28, %v96_v28  ;;  %v1427_v28 = vld [vmem:[%s5702_s12 + $0x8] sm:$0xff] }
  0x5d   :  { %1280 = vmatpush.bf16.msra.mxu1 %v3946_v33  ;;  %v129_v33 = vpack.c.bf16 %v97_v29, %v97_v29  ;;  %v1425_v29 = vld [vmem:[%s5731_s26] sm:$0x3] }
  0x5e   :  { %1293 = vmatpush.bf16.msra.mxu2 %v3954_v34  ;;  %v130_v34 = vpack.c.bf16 %v98_v30, %v98_v30 }
  0x5f   :  { %1306 = vmatpush.bf16.msra.mxu3 %v3962_v35  ;;  %v131_v35 = vpack.c.bf16 %v99_v31, %v99_v31 }
  0x60   :  { %1268 = vmatpush.bf16.msra.mxu0 %v3937_v36  ;;  %v4069_v36 = vld [vmem:[%s5729_s5] ss:$0 sm:$0xff] }
  0x61   :  { %1281 = vmatpush.bf16.msra.mxu1 %v3945_v37 }
  0x62   :  { %1294 = vmatpush.bf16.msra.mxu2 %v3953_v38 }
  0x63   :  { %1307 = vmatpush.bf16.msra.mxu3 %v3961_v39 }
  0x64   :  { %1269 = vmatpush.bf16.msra.mxu0 %v3936_v40 }
  0x65   :  { %1282 = vmatpush.bf16.msra.mxu1 %v3944_v41 }
  0x66   :  { %1295 = vmatpush.bf16.msra.mxu2 %v3952_v42 }
  0x67   :  { %1308 = vmatpush.bf16.msra.mxu3 %v3960_v43 }
  0x68   :  { %1270 = vmatpush.bf16.msra.mxu0 %v3935_v44 }
  0x69   :  { %1283 = vmatpush.bf16.msra.mxu1 %v3943_v45 }
  0x6a   :  { %1296 = vmatpush.bf16.msra.mxu2 %v3951_v46 }
  0x6b   :  { %1309 = vmatpush.bf16.msra.mxu3 %v3959_v47 }
  0x6c   :  { %1271 = vmatpush.bf16.msra.mxu0 %v3934_v48 }
  0x6d   :  { %1284 = vmatpush.bf16.msra.mxu1 %v3942_v49 }
  0x6e   :  { %1297 = vmatpush.bf16.msra.mxu2 %v3950_v50 }
  0x6f   :  { %1310 = vmatpush.bf16.msra.mxu3 %v3958_v51  ;;  %1272 = vmatmul.bf16.vlgmr.msra.gmra.mxu0 %v124_v60 }
  0x70   :  { %1316 = vmatpush.bf16.msrb.mxu0 %v3973_v52  ;;  %1285 = vmatmul.bf16.vlgmr.msra.gmra.mxu1 %v125_v62 }
  0x71   :  { %1329 = vmatpush.bf16.msrb.mxu1 %v3981_v53  ;;  %1298 = vmatmul.bf16.vlgmr.msra.gmra.mxu2 %v126_v61  ;;  %v3999_v61 = vld [vmem:[%s5730_s6 + $0x8] sm:$0xff] }
  0x72   :  { %1342 = vmatpush.bf16.msrb.mxu2 %v3989_v58  ;;  %1311 = vmatmul.bf16.vlgmr.msra.gmra.mxu3 %v127_v63 }
  0x73   :  { %1355 = vmatpush.bf16.msrb.mxu3 %v3997_v59  ;;  %v4000_v59 = vld [vmem:[%s5730_s6 + $0x10] sm:$0xff] }
  0x74   :  { %1317 = vmatpush.bf16.msrb.mxu0 %v3972_v0 }
  0x75   :  { %1330 = vmatpush.bf16.msrb.mxu1 %v3980_v1 }
  0x76   :  { %1343 = vmatpush.bf16.msrb.mxu2 %v3988_v2  ;;  %v3998_v2 = vld [vmem:[%s5730_s6] sm:$0xff] }
  0x77   :  { %1356 = vmatpush.bf16.msrb.mxu3 %v3996_v3 }
  0x78   :  { %1318 = vmatpush.bf16.msrb.mxu0 %v3971_v4 }
  0x79   :  { %1331 = vmatpush.bf16.msrb.mxu1 %v3979_v5 }
  0x7a   :  { %1344 = vmatpush.bf16.msrb.mxu2 %v3987_v6  ;;  %v1440_v6 = vld [vmem:[%s5702_s12 + $0x70] sm:$0xff] }
  0x7b   :  { %1357 = vmatpush.bf16.msrb.mxu3 %v3995_v7  ;;  %v1438_v7 = vld [vmem:[%s5702_s12 + $0x60] sm:$0xff] }
  0x7c   :  { %1319 = vmatpush.bf16.msrb.mxu0 %v3970_v8  ;;  %v1441_v8 = vld [vmem:[%s5702_s12 + $0x78] sm:$0xff] }
  0x7d   :  { %1332 = vmatpush.bf16.msrb.mxu1 %v3978_v9 }
  0x7e   :  { %1345 = vmatpush.bf16.msrb.mxu2 %v3986_v10  ;;  %v1439_v10 = vld [vmem:[%s5702_s12 + $0x68] sm:$0xff] }
  0x7f   :  { %1358 = vmatpush.bf16.msrb.mxu3 %v3994_v11 }
  0x80   :  { %1320 = vmatpush.bf16.msrb.mxu0 %v3969_v12  ;;  %v1436_v12 = vld [vmem:[%s5702_s12 + $0x50] sm:$0xff] }
  0x81   :  { %1333 = vmatpush.bf16.msrb.mxu1 %v3977_v13  ;;  %v1437_v13 = vld [vmem:[%s5702_s12 + $0x58] sm:$0xff] }
  0x82   :  { %1346 = vmatpush.bf16.msrb.mxu2 %v3985_v14  ;;  %v1423_v14 = vld [vmem:[%s5698_s8] sm:$0xff] }
  0x83   :  { %1359 = vmatpush.bf16.msrb.mxu3 %v3993_v15 }
  0x84   :  { %1321 = vmatpush.bf16.msrb.mxu0 %v3968_v16  ;;  %v1434_v16 = vld [vmem:[%s5702_s12 + $0x40] sm:$0xff] }
  0x85   :  { %1334 = vmatpush.bf16.msrb.mxu1 %v3976_v17  ;;  %v1435_v17 = vld [vmem:[%s5702_s12 + $0x48] sm:$0xff] }
  0x86   :  { %1347 = vmatpush.bf16.msrb.mxu2 %v3984_v18 }
  0x87   :  { %1360 = vmatpush.bf16.msrb.mxu3 %v3992_v19  ;;  %v1432_v19 = vld [vmem:[%s5702_s12 + $0x30] sm:$0xff] }
  0x88   :  { %1322 = vmatpush.bf16.msrb.mxu0 %v3967_v20  ;;  %v1433_v20 = vld [vmem:[%s5702_s12 + $0x38] sm:$0xff] }
  0x89   :  { %1335 = vmatpush.bf16.msrb.mxu1 %v3975_v21  ;;  %v1430_v21 = vld [vmem:[%s5702_s12 + $0x20] sm:$0xff] }
  0x8a   :  { %1348 = vmatpush.bf16.msrb.mxu2 %v3983_v22  ;;  %v1431_v22 = vld [vmem:[%s5702_s12 + $0x28] sm:$0xff] }
  0x8b   :  { %1361 = vmatpush.bf16.msrb.mxu3 %v3991_v23 }
  0x8c   :  { %1323 = vmatpush.bf16.msrb.mxu0 %v3966_v24  ;;  %v1428_v24 = vld [vmem:[%s5702_s12 + $0x10] sm:$0xff] }
  0x8d   :  { %1336 = vmatpush.bf16.msrb.mxu1 %v3974_v25  ;;  %v1429_v25 = vld [vmem:[%s5702_s12 + $0x18] sm:$0xff] }
  0x8e   :  { %1349 = vmatpush.bf16.msrb.mxu2 %v3982_v26 }
  0x8f   :  { %1362 = vmatpush.bf16.msrb.mxu3 %v3990_v27  ;;  %1324 = vmatmul.bf16.vlgmr.msrb.gmra.mxu0 %v128_v32  ;;  %v1426_v27 = vld [vmem:[%s5702_s12] sm:$0xff] }
  0x90   :  { %1337 = vmatmul.bf16.vlgmr.msrb.gmra.mxu1 %v129_v33  ;;  %1414 = vmatpush.bf16.msra.mxu0 %v4001_v55  ;;  %v3531_v55 = vld [vmem:[%s5702_s12 + $0xe8] sm:$0xff] }
  0x91   :  { %1350 = vmatmul.bf16.vlgmr.msrb.gmra.mxu2 %v130_v34  ;;  %1453 = vmatpush.msra.mxu1 %v1440_v6  ;;  %v1601_v6 = vld [vmem:[%s5734_s28] sm:$0x3] }
  0x92   :  { %1363 = vmatmul.bf16.vlgmr.msrb.gmra.mxu3 %v131_v35  ;;  %1473 = vmatpush.msra.mxu2 %v1441_v8  ;;  %v1529_v8 = vld [vmem:[%s5703_s13] sm:$0x3] }
  0x93   :  { %1454 = vmatpush.msra.mxu1 %v1438_v7  ;;  %1504 = vmatpush.msra.mxu3 %v1423_v14  ;;  %v3541_v7 = vld [vmem:[%s5732_s27 + $0x2] sm:$0x3] }
  0x94   :  { %1415 = vmatpush.bf16.msra.mxu0 %v4000_v59  ;;  %1474 = vmatpush.msra.mxu2 %v1439_v10  ;;  %v1603_v59 = vld [vmem:[%s5699_s9 + $0x8] sm:$0xff]  ;;  %v3538_v14 = vld [vmem:[%s5703_s13 + $0x2] sm:$0x3] }
  0x95   :  { %1455 = vmatpush.msra.mxu1 %v1436_v12  ;;  %1760 = vrot.lane.b32.xlu1 %v3541_v7, %s4147_s1  ;;  %v1810_v7 = vld [vmem:[%s5700_s10 + $0xc8] sm:$0xff] }
  0x96   :  { %1475 = vmatpush.msra.mxu2 %v1437_v13 }
  0x97   :  { %1456 = vmatpush.msra.mxu1 %v1434_v16 }
  0x98   :  { %1416 = vmatpush.bf16.msra.mxu0 %v3999_v61  ;;  %1476 = vmatpush.msra.mxu2 %v1435_v17  ;;  %v3527_v61 = vld [vmem:[%s5702_s12 + $0xc8] sm:$0xff]  ;;  %v1712_v17 = vperm.slane %v3538_v14, 0 }
  0x99   :  { %1457 = vmatpush.msra.mxu1 %v1432_v19 }
  0x9a   :  { %1477 = vmatpush.msra.mxu2 %v1433_v20 }
  0x9b   :  { %1458 = vmatpush.msra.mxu1 %v1430_v21 }
  0x9c   :  { %1417 = vmatpush.bf16.msra.mxu0 %v3998_v2  ;;  %1478 = vmatpush.msra.mxu2 %v1431_v22  ;;  %v4070_v2 = vld [vmem:[%s5733_s2] ss:$0 sm:$0xff] }
  0x9d   :  { %1459 = vmatpush.msra.mxu1 %v1428_v24 }
  0x9e   :  { %1479 = vmatpush.msra.mxu2 %v1429_v25 }
  0x9f   :  { %1460 = vmatpush.msra.mxu1 %v1426_v27  ;;  %v1532_v27 = vperm.slane %v1529_v8, 1 }
  0xa0   :  { %1480 = vmatpush.msra.mxu2 %v1427_v28  ;;  %3511 = vmatmul.msk.f32.vlgmr.msra.gmra.mxu1 %vm1406_vm0, %v1425_v29 }
  0xa1   :  { %3512 = vmatmul.msk.f32.vlgmr.msra.gmra.mxu2 %vm1406_vm0, %v1425_v29 }
  0xac   :  { %v1169_v37 = vpop.f32.mrf.mxu0 }
  0xad   :  { %v1170_v38 = vadd.f32 %v4069_v36, %v1169_v37  ;;  %v1182_v39 = vpop.f32.mrf.mxu1 }
  0xaf   :  { %v1183_v40 = vadd.f32 %v1182_v39, %v1170_v38 }
  0xb4   :  { %v1195_v41 = vpop.f32.mrf.mxu2  ;;  %v1171_v44 = vpop.f32.mrf.mxu0 }
  0xb5   :  { %v1196_v42 = vadd.f32 %v1195_v41, %v1183_v40  ;;  %v1208_v43 = vpop.f32.mrf.mxu3  ;;  %v1184_v46 = vpop.f32.mrf.mxu1 }
  0xb6   :  { %v3532_v46 = vld [vmem:[%s5702_s12 + $0xf0] sm:$0xff] }
  0xb7   :  { %v1209_v45 = vadd.f32 %v1208_v43, %v1196_v42  ;;  %1634 = vmatpush.msrb.mxu0 %v3532_v46 }
  0xbc   :  { %v1197_v47 = vpop.f32.mrf.mxu2 }
  0xbd   :  { %v1210_v48 = vpop.f32.mrf.mxu3  ;;  %v3530_v47 = vld [vmem:[%s5702_s12 + $0xe0] sm:$0xff] }
  0xbe   :  { %v3528_v48 = vld [vmem:[%s5702_s12 + $0xd0] sm:$0xff]  ;;  %1635 = vmatpush.msrb.mxu0 %v3530_v47 }
  0xc0   :  { %1636 = vmatpush.msrb.mxu0 %v3528_v48 }
  0xcc   :  { %v1221_v49 = vpop.f32.mrf.mxu0 }
  0xcd   :  { %v1234_v50 = vpop.f32.mrf.mxu1  ;;  %v1222_v62 = vadd.f32 %v1221_v49, %v1209_v45  ;;  %v1424_v45 = vld [vmem:[%s5698_s8 + $0x8] sm:$0xff]  ;;  %v3526_v49 = vld [vmem:[%s5702_s12 + $0xc0] sm:$0xff] }
  0xce   :  { %1524 = vmatpush.msrb.mxu1 %v1424_v45  ;;  %1637 = vmatpush.msrb.mxu0 %v3526_v49 }
  0xcf   :  { %v1235_v3 = vadd.f32 %v1234_v50, %v1222_v62  ;;  %v3524_v50 = vld [vmem:[%s5702_s12 + $0xb0] sm:$0xff]  ;;  %v3525_v62 = vld [vmem:[%s5702_s12 + $0xb8] sm:$0xff] }
  0xd0   :  { %1638 = vmatpush.msrb.mxu0 %v3524_v50  ;;  %1704 = vmatpush.msra.mxu1 %v1603_v59 }
  0xd4   :  { %v1247_v51 = vpop.f32.mrf.mxu2  ;;  %v1223_v53 = vpop.f32.mrf.mxu0 }
  0xd5   :  { %v1260_v52 = vpop.f32.mrf.mxu3  ;;  %v1236_v54 = vpop.f32.mrf.mxu1  ;;  %v1248_v5 = vadd.f32 %v1247_v51, %v1235_v3  ;;  %v1602_v51 = vld [vmem:[%s5699_s9] sm:$0xff]  ;;  %v3520_v53 = vld [vmem:[%s5702_s12 + $0x90] sm:$0xff] }
  0xd6   :  { %1684 = vmatpush.msrb.mxu3 %v1602_v51  ;;  %v3533_v54 = vld [vmem:[%s5702_s12 + $0xf8] sm:$0xff] }
  0xd7   :  { %v1261_v15 = vadd.f32 %v1260_v52, %v1248_v5  ;;  %v3522_v52 = vld [vmem:[%s5702_s12 + $0xa0] sm:$0xff]  ;;  %1654 = vmatpush.msrb.mxu2 %v3533_v54 }
  0xd8   :  { %1639 = vmatpush.msrb.mxu0 %v3522_v52 }
  0xd9   :  { %1655 = vmatpush.msrb.mxu2 %v3531_v55 }
  0xda   :  { %1640 = vmatpush.msrb.mxu0 %v3520_v53 }
  0xdc   :  { %v1249_v56 = vpop.f32.mrf.mxu2 }
  0xdd   :  { %v1262_v57 = vpop.f32.mrf.mxu3  ;;  %v3518_v56 = vld [vmem:[%s5702_s12 + $0x80] sm:$0xff] }
  0xde   :  { %v3517_v57 = vld [vmem:[%s5731_s26 + $0x2] sm:$0x3]  ;;  %1641 = vmatpush.msrb.mxu0 %v3518_v56 }
  0xec   :  { %v1273_v58 = vpop.f32.mrf.mxu0 }
  0xed   :  { %v1286_v60 = vpop.f32.mrf.mxu1  ;;  %v1274_v18 = vadd.f32 %v1273_v58, %v1261_v15  ;;  %v3529_v58 = vld [vmem:[%s5702_s12 + $0xd8] sm:$0xff] }
  0xee   :  { %1656 = vmatpush.msrb.mxu2 %v3529_v58 }
  0xef   :  { %v1287_v23 = vadd.f32 %v1286_v60, %v1274_v18  ;;  %v1576_v60 = vld [vmem:[%s5732_s27] sm:$0x3] }
  0xf0   :  { %1578 = vrot.lane.b32.xlu0 %v1576_v60, %s4147_s1  ;;  %1657 = vmatpush.msrb.mxu2 %v3527_v61 }
  0xf2   :  { %1658 = vmatpush.msrb.mxu2 %v3525_v62 }
  0xf4   :  { %v1299_v63 = vpop.f32.mrf.mxu2  ;;  %v1275_v1 = vpop.f32.mrf.mxu0 }
  0xf5   :  { %v1312_v0 = vpop.f32.mrf.mxu3  ;;  %v1288_v4 = vpop.f32.mrf.mxu1  ;;  %v1300_v26 = vadd.f32 %v1299_v63, %v1287_v23  ;;  %v3523_v63 = vld [vmem:[%s5702_s12 + $0xa8] sm:$0xff] }
  0xf6   :  { %1659 = vmatpush.msrb.mxu2 %v3523_v63  ;;  %v3519_v1 = vld [vmem:[%s5702_s12 + $0x88] sm:$0xff]  ;;  %v1815_v63 = vld [vmem:[%s5700_s10 + $0xf0] sm:$0xff] }
  0xf7   :  { %v1313_v30 = vadd.f32 %v1312_v0, %v1300_v26  ;;  %v3521_v0 = vld [vmem:[%s5702_s12 + $0x98] sm:$0xff] }
  0xf8   :  { %1660 = vmatpush.msrb.mxu2 %v3521_v0  ;;  %v1816_v0 = vld [vmem:[%s5700_s10 + $0xf8] sm:$0xff] }
  0xfa   :  { %1661 = vmatpush.msrb.mxu2 %v3519_v1  ;;  %v1813_v1 = vld [vmem:[%s5700_s10 + $0xe0] sm:$0xff] }
  0xfb   :  { %3535 = vmatmul.msk.f32.vlgmr.msrb.gmra.mxu2 %vm1406_vm0, %v3517_v57 }
  0xfc   :  { %v1301_v9 = vpop.f32.mrf.mxu2  ;;  %1899 = vmatpush.msra.mxu2 %v1816_v0  ;;  %v1785_v0 = vld [vmem:[%s5700_s10] sm:$0xff] }
  0xfd   :  { %v1314_v11 = vpop.f32.mrf.mxu3  ;;  %v1531_v9 = vperm.slane %v1529_v8, 0  ;;  %v3557_v8 = vld [vmem:[%s5702_s12 + $0x160] sm:$0xff] }
 0x10c   :  { %v1325_v31 = vpop.f32.mrf.mxu0 }
 0x10d   :  { %v1338_v32 = vpop.f32.mrf.mxu1  ;;  %v1326_v33 = vadd.f32 %v1325_v31, %v1313_v30 }
 0x10f   :  { %v1339_v34 = vadd.f32 %v1338_v32, %v1326_v33 }
 0x114   :  { %v1351_v35 = vpop.f32.mrf.mxu2  ;;  %v1327_v38 = vpop.f32.mrf.mxu0 }
 0x115   :  { %v1364_v36 = vpop.f32.mrf.mxu3  ;;  %v1352_v37 = vadd.f32 %v1351_v35, %v1339_v34  ;;  %v1340_v39 = vpop.f32.mrf.mxu1 }
 0x117   :  { %v1365_v40 = vadd.f32 %v1364_v36, %v1352_v37  ;;  %v1713_v36 = vperm.slane %v3538_v14, 1  ;;  %v1805_v14 = vld [vmem:[%s5700_s10 + $0xa0] sm:$0xff] }
 0x119   :  { %v1368_v41 = vmax.f32 %v1365_v40, 0.0 }
 0x11b   :  { %v1369_v42 = vpack.c.bf16 %v1368_v41, %v1368_v41 }
 0x11c   :  { %v1353_v43 = vpop.f32.mrf.mxu2 }
 0x11d   :  { %v1366_v44 = vpop.f32.mrf.mxu3  ;;  %3510 = vmatmul.msk.bf16.vlgmr.msra.gmra.mxu0 %vm1406_vm0, %v1369_v42  ;;  %v1462_v10 = vpop.f32.mrf.mxu1 }
 0x124   :  { %v1482_v22 = vpop.f32.mrf.mxu2 }
 0x12d   :  { %3534 = vmatmul.msk.f32.vlgmr.msrb.gmra.mxu0 %vm1406_vm0, %v3517_v57 }
 0x17e   :  { %v1663_v29 = vpop.f32.mrf.mxu2 }
 0x19a   :  { %v1419_v3 = vpop.f32.mrf.mxu0 }
 0x19b   :  { %v1420_v4 = vadd.f32 %v4070_v2, %v1419_v3  ;;  %v1814_v2 = vld [vmem:[%s5700_s10 + $0xe8] sm:$0xff]  ;;  %v1811_v3 = vld [vmem:[%s5700_s10 + $0xd0] sm:$0xff] }
 0x19c   :  { %1900 = vmatpush.msra.mxu2 %v1814_v2  ;;  %v3548_v2 = vld [vmem:[%s5702_s12 + $0x118] sm:$0xff] }
 0x19d   :  { %3513 = vmatmul.msk.f32.vlgmr.msra.gmra.mxu3 %vm1485_vm1, %v1420_v4  ;;  %3514 = vmatmul.msk.f32.vlgmr.msrb.gmra.mxu1 %vm1485_vm1, %v1420_v4  ;;  %v1812_v4 = vld [vmem:[%s5700_s10 + $0xd8] sm:$0xff] }
 0x19e   :  { %1879 = vmatpush.msrb.mxu1 %v1815_v63  ;;  %1901 = vmatpush.msra.mxu2 %v1812_v4  ;;  %v3552_v63 = vld [vmem:[%s5702_s12 + $0x138] sm:$0xff]  ;;  %v3546_v4 = vld [vmem:[%s5702_s12 + $0x108] sm:$0xff] }
 0x1a0   :  { %1880 = vmatpush.msrb.mxu1 %v1813_v1  ;;  %1902 = vmatpush.msra.mxu2 %v1810_v7  ;;  %v1786_v1 = vld [vmem:[%s5700_s10 + $0x8] sm:$0xff] }
 0x1a2   :  { %v1421_v5 = vpop.f32.mrf.mxu0  ;;  %1881 = vmatpush.msrb.mxu1 %v1811_v3  ;;  %v3566_v3 = vld [vmem:[%s5732_s27 + $0x4] sm:$0x3] }
 0x1a3   :  { %v3559_v5 = vld [vmem:[%s5702_s12 + $0x170] sm:$0xff] }
 0x1a4   :  { %1847 = vmatpush.msra.mxu3 %v3559_v5  ;;  %v1761_v5 = vpop.permute.xlu1 %1760 }
 0x1a5   :  { %3536 = vmatmul.msk.f32.vlgmr.msrb.gmra.mxu3 %vm1485_vm1, %v1601_v6  ;;  %3537 = vmatmul.msk.f32.vlgmr.msra.gmra.mxu1 %vm1485_vm1, %v1601_v6  ;;  %v1809_v6 = vld [vmem:[%s5700_s10 + $0xc0] sm:$0xff] }
 0x1a6   :  { %1848 = vmatpush.msra.mxu3 %v3557_v8  ;;  %1882 = vmatpush.msrb.mxu1 %v1809_v6 }
 0x1aa   :  { %v1643_v16 = vpop.f32.mrf.mxu0 }
 0x21a   :  { %v1526_v23 = vpop.f32.mrf.mxu1 }
 0x21b   :  { %v1527_v26 = vadd.f32 %v1526_v23, %v1482_v22  ;;  %v3558_v22 = vld [vmem:[%s5702_s12 + $0x168] sm:$0xff]  ;;  %v1579_v23 = vpop.permute.xlu0 %1578 }
 0x21d   :  { %v1536_v32 = vadd.f32 %v1532_v27, %v1527_v26  ;;  %v3556_v26 = vld [vmem:[%s5702_s12 + $0x158] sm:$0xff]  ;;  %v3547_v27 = vld [vmem:[%s5702_s12 + $0x110] sm:$0xff] }
 0x21f   :  { %v3516_v60 = vmul.f32 -1.442695, %v1536_v32 }
 0x220   :  { %v1506_v11 = vpop.f32.mrf.mxu3 }
 0x221   :  { %v1507_v12 = vadd.f32 %v1506_v11, %v1462_v10  ;;  %v1807_v10 = vld [vmem:[%s5700_s10 + $0xb0] sm:$0xff]  ;;  %v1808_v11 = vld [vmem:[%s5700_s10 + $0xb8] sm:$0xff] }
 0x222   :  { %v1706_v30 = vpop.f32.mrf.mxu1  ;;  %1883 = vmatpush.msrb.mxu1 %v1807_v10  ;;  %1903 = vmatpush.msra.mxu2 %v1808_v11 }
 0x223   :  { %v1535_v13 = vadd.f32 %v1531_v9, %v1507_v12  ;;  %v1707_v35 = vadd.f32 %v1706_v30, %v1663_v29  ;;  %v3555_v9 = vld [vmem:[%s5702_s12 + $0x150] sm:$0xff] }
 0x224   :  { %1849 = vmatpush.msra.mxu3 %v3555_v9  ;;  %1884 = vmatpush.msrb.mxu1 %v1805_v14  ;;  %v1799_v30 = vld [vmem:[%s5700_s10 + $0x70] sm:$0xff] }
 0x225   :  { %v3515_v15 = vmul.f32 -1.442695, %v1535_v13  ;;  %v4832_v41 = vadd.f32 %v1713_v36, %v1707_v35  ;;  %v3553_v13 = vld [vmem:[%s5702_s12 + $0x140] sm:$0xff] }
 0x226   :  { %1850 = vmatpush.msra.mxu3 %v3553_v13  ;;  %v4949_v35 = vld [vmem:[%s5731_s26 + $0x4] sm:$0x3] }
 0x227   :  { %4073 = vpow2.f32 %v3515_v15  ;;  %v1806_v15 = vld [vmem:[%s5700_s10 + $0xa8] sm:$0xff] }
 0x228   :  { %v1686_v18 = vpop.f32.mrf.mxu3  ;;  %1904 = vmatpush.msra.mxu2 %v1806_v15 }
 0x229   :  { %v1687_v19 = vadd.f32 %v1686_v18, %v1643_v16  ;;  %v3551_v16 = vld [vmem:[%s5702_s12 + $0x130] sm:$0xff] }
 0x22a   :  { %1851 = vmatpush.msra.mxu3 %v3551_v16 }
 0x22b   :  { %v1716_v20 = vadd.f32 %v1712_v17, %v1687_v19  ;;  %v3560_v17 = vld [vmem:[%s5702_s12 + $0x178] sm:$0xff]  ;;  %v1803_v19 = vld [vmem:[%s5700_s10 + $0x90] sm:$0xff] }
 0x22c   :  { %1867 = vmatpush.msra.mxu0 %v3560_v17  ;;  %1885 = vmatpush.msrb.mxu1 %v1803_v19 }
 0x22d   :  { %v4074_v21 = vpop.eup %4073  ;;  %v3539_v24 = vmul.f32 -1.442695, %v1716_v20  ;;  %v1804_v20 = vld [vmem:[%s5700_s10 + $0x98] sm:$0xff] }
 0x22e   :  { %v1540_v25 = vadd.f32 1.0, %v4074_v21  ;;  %v3549_v21 = vld [vmem:[%s5702_s12 + $0x120] sm:$0xff]  ;;  %1868 = vmatpush.msra.mxu0 %v3558_v22  ;;  %1905 = vmatpush.msra.mxu2 %v1804_v20 }
 0x22f   :  { %4075 = vpow2.f32 %v3539_v24  ;;  %v1801_v24 = vld [vmem:[%s5700_s10 + $0x80] sm:$0xff]  ;;  %1852 = vmatpush.msra.mxu3 %v3549_v21 }
 0x230   :  { %4077 = vrcp.f32 %v1540_v25  ;;  %v1552_v38 = vand.u32 2147483648, %v1540_v25  ;;  %v1550_v40 = vand.u32 2147483647, %v1540_v25  ;;  %vm1546_vm3 = vweird.f32 %v1540_v25  ;;  %1869 = vmatpush.msra.mxu0 %v3556_v26  ;;  %1886 = vmatpush.msrb.mxu1 %v1801_v24  ;;  %v3563_v22 = vld [vmem:[%s5703_s13 + $0x4] sm:$0x3] }
 0x231   :  { %1853 = vmatpush.msra.mxu3 %v3547_v27  ;;  %v1922_v24 = vperm.slane %v3563_v22, 0 }
 0x232   :  { %v1553_v44 = vor.u32 1.1754944e-38, %v1552_v38  ;;  %vm1551_vm5 = vcmp.eq.f32.partialorder %v1550_v40, 8.507059e+37  ;;  %1887 = vmatpush.msrb.mxu1 %v1799_v30  ;;  %v1796_v38 = vld [vmem:[%s5700_s10 + $0x58] sm:$0xff] }
 0x235   :  { %v4076_v28 = vpop.eup %4075 }
 0x236   :  { %v4078_v31 = vpop.eup %4077  ;;  %v1721_v33 = vadd.f32 1.0, %v4076_v28  ;;  %v3554_v28 = vld [vmem:[%s5702_s12 + $0x148] sm:$0xff] }
 0x237   :  { %v1542_v34 = vmul.f32 %v4078_v31, %v1540_v25  ;;  %vm1547_vm2 = vweird.f32 %v4078_v31  ;;  %v1802_v25 = vld [vmem:[%s5700_s10 + $0x88] sm:$0xff]  ;;  %1870 = vmatpush.msra.mxu0 %v3554_v28 }
 0x238   :  { %4079 = vrcp.f32 %v1721_v33  ;;  %vm1548_vm4 = vmor %vm1546_vm3, %vm1547_vm2  ;;  %vm1727_vm6 = vweird.f32 %v1721_v33  ;;  %v1733_v49 = vand.u32 2147483648, %v1721_v33  ;;  %v1731_v52 = vand.u32 2147483647, %v1721_v33  ;;  %1906 = vmatpush.msra.mxu2 %v1802_v25 }
 0x239   :  { %v1543_v37 = vsub.f32 1.0, %v1542_v34  ;;  %4081 = vtanh.f32 %v1536_v32  ;;  %v3545_v32 = vld [vmem:[%s5702_s12 + $0x100] sm:$0xff]  ;;  %v1798_v34 = vld [vmem:[%s5700_s10 + $0x68] sm:$0xff]  ;;  %1871 = vmatpush.msra.mxu0 %v3552_v63  ;;  %v3577_v63 = vld [vmem:[%s5702_s12 + $0x1b8] sm:$0xff] }
 0x23a   :  { %4083 = vtanh.f32 %v4832_v41  ;;  %v1734_v54 = vor.u32 1.1754944e-38, %v1733_v49  ;;  %vm1732_vm9 = vcmp.eq.f32.partialorder %v1731_v52, 8.507059e+37  ;;  %1854 = vmatpush.msra.mxu3 %v3545_v32 }
 0x23b   :  { %v1544_v39 = vmul.f32 %v4078_v31, %v1543_v37  ;;  %4085 = vpow2.f32 %v3516_v60  ;;  %v1795_v37 = vld [vmem:[%s5700_s10 + $0x50] sm:$0xff]  ;;  %3561 = vmatmul.msk.f32.vlgmr.msra.gmra.mxu3 %vm1406_vm0, %v4949_v35  ;;  %v3540_v60 = vmul.f32 -1.442695, %v4832_v41  ;;  %v3550_v41 = vld [vmem:[%s5702_s12 + $0x128] sm:$0xff] }
 0x23c   :  { %1872 = vmatpush.msra.mxu0 %v3550_v41  ;;  %v3575_v41 = vld [vmem:[%s5702_s12 + $0x1a8] sm:$0xff] }
 0x23d   :  { %v1545_v42 = vadd.f32 %v4078_v31, %v1544_v39 }
 0x23e   :  { %v4080_v43 = vpop.eup %4079  ;;  %1873 = vmatpush.msra.mxu0 %v3548_v2 }
 0x23f   :  { %v1549_v45 = vsel %vm1548_vm4, %v4078_v31, %v1545_v42  ;;  %v1723_v46 = vmul.f32 %v4080_v43, %v1721_v33  ;;  %v4082_v47 = vpop.eup %4081  ;;  %vm1728_vm7 = vweird.f32 %v4080_v43  ;;  %v1800_v31 = vld [vmem:[%s5700_s10 + $0x78] sm:$0xff]  ;;  %v1797_v33 = vld [vmem:[%s5700_s10 + $0x60] sm:$0xff]  ;;  %vm1594_vm4 = vcmask 517120  }
 0x240   :  { %v4835_v48 = vsel %vm1551_vm5, %v1553_v44, %v1549_v45  ;;  %vm1729_vm8 = vmor %vm1727_vm6, %vm1728_vm7  ;;  %v4084_v56 = vpop.eup %4083  ;;  %1907 = vmatpush.msra.mxu2 %v1800_v31  ;;  %1888 = vmatpush.msrb.mxu1 %v1797_v33  ;;  %v1793_v42 = vld [vmem:[%s5700_s10 + $0x40] sm:$0xff] }
 0x241   :  { %v1582_v50 = vmul.f32 %v4082_v47, %v4835_v48  ;;  %v1724_v51 = vsub.f32 1.0, %v1723_v46  ;;  %v4086_v61 = vpop.eup %4085  ;;  %v1581_v39 = vmul.f32 %v1579_v23, %v4835_v48  ;;  %v1791_v46 = vld [vmem:[%s5700_s10 + $0x30] sm:$0xff]  ;;  %v1792_v47 = vld [vmem:[%s5700_s10 + $0x38] sm:$0xff]  ;;  %1874 = vmatpush.msra.mxu0 %v3546_v4 }
 0x242   :  { %v4843_v62 = vadd.f32 1.0, %v4086_v61  ;;  %1908 = vmatpush.msra.mxu2 %v1798_v34  ;;  %1889 = vmatpush.msrb.mxu1 %v1795_v37  ;;  %v1923_v34 = vperm.slane %v3563_v22, 1  ;;  %v3573_v4 = vld [vmem:[%s5702_s12 + $0x198] sm:$0xff] }
 0x243   :  { %1584 = vrot.lane.b32.xlu0 %v1582_v50, %s4147_s1  ;;  %v1725_v53 = vmul.f32 %v4080_v43, %v1724_v51  ;;  %v1789_v50 = vld [vmem:[%s5700_s10 + $0x20] sm:$0xff]  ;;  %v1790_v51 = vld [vmem:[%s5700_s10 + $0x28] sm:$0xff]  ;;  %3562 = vmatmul.msk.f32.vlgmr.msra.gmra.mxu0 %vm1406_vm0, %v4949_v35 }
 0x244   :  { %4087 = vrcp.f32 %v4843_v62  ;;  %1909 = vmatpush.msra.mxu2 %v1796_v38  ;;  %v1572_v48 = vand.u32 2147483648, %v4843_v62  ;;  %1890 = vmatpush.msrb.mxu1 %v1793_v42  ;;  %vm1566_vm11 = vweird.f32 %v4843_v62  ;;  %v1570_v49 = vand.u32 2147483647, %v4843_v62 }
 0x245   :  { %v1726_v55 = vadd.f32 %v4080_v43, %v1725_v53  ;;  %v1787_v53 = vld [vmem:[%s5700_s10 + $0x10] sm:$0xff] }
 0x246   :  { %1891 = vmatpush.msrb.mxu1 %v1791_v46  ;;  %vm1571_vm13 = vcmp.eq.f32.partialorder %v1570_v49, 8.507059e+37 }
 0x247   :  { %v1730_v57 = vsel %vm1729_vm8, %v4080_v43, %v1726_v55  ;;  %v1794_v43 = vld [vmem:[%s5700_s10 + $0x48] sm:$0xff]  ;;  %v1573_v55 = vor.u32 1.1754944e-38, %v1572_v48 }
 0x248   :  { %v4839_v58 = vsel %vm1732_vm9, %v1734_v54, %v1730_v57  ;;  %1910 = vmatpush.msra.mxu2 %v1794_v43  ;;  %v1788_v54 = vld [vmem:[%s5700_s10 + $0x18] sm:$0xff]  ;;  %1892 = vmatpush.msrb.mxu1 %v1789_v50 }
 0x249   :  { %v1764_v59 = vmul.f32 %v4084_v56, %v4839_v58  ;;  %v1763_v10 = vmul.f32 %v1761_v5, %v4839_v58  ;;  %v3570_v5 = vld [vmem:[%s5702_s12 + $0x180] sm:$0xff] }
 0x24a   :  { %v4885_v12 = vpop.eup %4087  ;;  %1911 = vmatpush.msra.mxu2 %v1792_v47  ;;  %1893 = vmatpush.msrb.mxu1 %v1787_v53  ;;  %v3584_v53 = vld [vmem:[%s5702_s12 + $0x1f0] sm:$0xff] }
 0x24b   :  { %1766 = vrot.lane.b32.xlu1 %v1764_v59, %s4147_s1  ;;  %v1562_v18 = vmul.f32 %v4885_v12, %v4843_v62  ;;  %vm1567_vm10 = vweird.f32 %v4885_v12  ;;  %2040 = vmatpush.msrb.mxu3 %v3584_v53 }
 0x24c   :  { %vm1568_vm12 = vmor %vm1566_vm11, %vm1567_vm10  ;;  %1912 = vmatpush.msra.mxu2 %v1790_v51  ;;  %1894 = vmatpush.msrb.mxu1 %v1785_v0 }
 0x24d   :  { %v1563_v29 = vsub.f32 1.0, %v1562_v18 }
 0x24e   :  { %1913 = vmatpush.msra.mxu2 %v1788_v54  ;;  %v3585_v54 = vld [vmem:[%s5702_s12 + $0x1f8] sm:$0xff] }
 0x24f   :  { %v1564_v36 = vmul.f32 %v4885_v12, %v1563_v29  ;;  %2060 = vmatpush.msrb.mxu0 %v3585_v54 }
 0x250   :  { %1914 = vmatpush.msra.mxu2 %v1786_v1  ;;  %v3574_v1 = vld [vmem:[%s5702_s12 + $0x1a0] sm:$0xff] }
 0x251   :  { %v1565_v45 = vadd.f32 %v4885_v12, %v1564_v36 }
 0x253   :  { %v1569_v52 = vsel %vm1568_vm12, %v4885_v12, %v1565_v45 }
 0x254   :  { %v1574_v57 = vsel %vm1571_vm13, %v1573_v55, %v1569_v52  ;;  %v3582_v55 = vld [vmem:[%s5702_s12 + $0x1e0] sm:$0xff] }
 0x255   :  { %2041 = vmatpush.msrb.mxu3 %v3582_v55 }
 0x2b5   :  { %v1585_v40 = vpop.permute.xlu0 %1584 }
 0x2b6   :  { %v4967_v44 = vadd.f32 %v1585_v40, %v1581_v39 }
 0x2b8   :  { %4089 = vtanh.f32 %v4967_v44 }
 0x2b9   :  { %4091 = vpow2.f32 %v3540_v60  ;;  %v3578_v60 = vld [vmem:[%s5702_s12 + $0x1c0] sm:$0xff] }
 0x2bd   :  { %v1767_v8 = vpop.permute.xlu1 %1766 }
 0x2be   :  { %v4090_v56 = vpop.eup %4089  ;;  %v5021_v11 = vadd.f32 %v1767_v8, %v1763_v10  ;;  %v1856_v23 = vpop.f32.mrf.mxu3  ;;  %v2009_v8 = vld [vmem:[%s5701_s11 + $0x78] sm:$0xff]  ;;  %v3569_v10 = vld [vmem:[%s5731_s26 + $0x6] sm:$0x3] }
 0x2bf   :  { %v1589_v59 = vmul.f32 %v4090_v56, %v1574_v57  ;;  %v4092_v61 = vpop.eup %4091  ;;  %v3583_v56 = vld [vmem:[%s5702_s12 + $0x1e8] sm:$0xff]  ;;  %v3580_v57 = vld [vmem:[%s5702_s12 + $0x1d0] sm:$0xff] }
 0x2c0   :  { %v1741_v62 = vadd.f32 1.0, %v4092_v61  ;;  %v1876_v31 = vpop.f32.mrf.mxu0  ;;  %2061 = vmatpush.msrb.mxu0 %v3583_v56  ;;  %v3579_v61 = vld [vmem:[%s5702_s12 + $0x1c8] sm:$0xff]  ;;  %2042 = vmatpush.msrb.mxu3 %v3580_v57 }
 0x2c1   :  { %1591 = vrot.lane.b32.xlu2 %v1589_v59, %s4147_s1  ;;  %v3581_v59 = vld [vmem:[%s5702_s12 + $0x1d8] sm:$0xff] }
 0x2c2   :  { %4093 = vrcp.f32 %v1741_v62  ;;  %vm1747_vm14 = vweird.f32 %v1741_v62  ;;  %v1753_v13 = vand.u32 2147483648, %v1741_v62  ;;  %v1751_v15 = vand.u32 2147483647, %v1741_v62  ;;  %2062 = vmatpush.msrb.mxu0 %v3581_v59  ;;  %2043 = vmatpush.msrb.mxu3 %v3578_v60 }
 0x2c3   :  { %4095 = vtanh.f32 %v5021_v11 }
 0x2c4   :  { %v1754_v16 = vor.u32 1.1754944e-38, %v1753_v13  ;;  %vm1752_vm3 = vcmp.eq.f32.partialorder %v1751_v15, 8.507059e+37  ;;  %2063 = vmatpush.msrb.mxu0 %v3579_v61  ;;  %v2007_v13 = vld [vmem:[%s5701_s11 + $0x68] sm:$0xff]  ;;  %v2004_v15 = vld [vmem:[%s5701_s11 + $0x50] sm:$0xff] }
 0x2c6   :  { %2064 = vmatpush.msrb.mxu0 %v3577_v63 }
 0x2c8   :  { %v4094_v6 = vpop.eup %4093  ;;  %2065 = vmatpush.msrb.mxu0 %v3575_v41 }
 0x2c9   :  { %1970 = vrot.lane.b32.xlu2 %v3566_v3, %s4147_s1  ;;  %v1743_v7 = vmul.f32 %v4094_v6, %v1741_v62  ;;  %vm1748_vm15 = vweird.f32 %v4094_v6  ;;  %v4096_v18 = vpop.eup %4095  ;;  %v3576_v62 = vld [vmem:[%s5702_s12 + $0x1b0] sm:$0xff] }
 0x2ca   :  { %vm1749_vm2 = vmor %vm1747_vm14, %vm1748_vm15  ;;  %2044 = vmatpush.msrb.mxu3 %v3576_v62  ;;  %v3572_v3 = vld [vmem:[%s5702_s12 + $0x190] sm:$0xff]  ;;  %2066 = vmatpush.msrb.mxu0 %v3573_v4 }
 0x2cb   :  { %v1744_v9 = vsub.f32 1.0, %v1743_v7  ;;  %v2008_v7 = vld [vmem:[%s5701_s11 + $0x70] sm:$0xff] }
 0x2cc   :  { %2045 = vmatpush.msrb.mxu3 %v3574_v1 }
 0x2cd   :  { %v1745_v12 = vmul.f32 %v4094_v6, %v1744_v9 }
 0x2ce   :  { %2046 = vmatpush.msrb.mxu3 %v3572_v3 }
 0x2cf   :  { %v1746_v14 = vadd.f32 %v4094_v6, %v1745_v12  ;;  %v2006_v12 = vld [vmem:[%s5701_s11 + $0x60] sm:$0xff] }
 0x2d0   :  { %2047 = vmatpush.msrb.mxu3 %v3570_v5 }
 0x2d1   :  { %v1750_v17 = vsel %vm1749_vm2, %v4094_v6, %v1746_v14  ;;  %v3571_v6 = vld [vmem:[%s5702_s12 + $0x188] sm:$0xff]  ;;  %3586 = vmatmul.msk.f32.vlgmr.msrb.gmra.mxu3 %vm1406_vm0, %v3569_v10 }
 0x2d2   :  { %v1755_v19 = vsel %vm1752_vm3, %v1754_v16, %v1750_v17  ;;  %2067 = vmatpush.msrb.mxu0 %v3571_v6  ;;  %2082 = vmatpush.msra.mxu3 %v2008_v7  ;;  %v2005_v16 = vld [vmem:[%s5701_s11 + $0x58] sm:$0xff] }
 0x2d3   :  { %v5024_v20 = vmul.f32 %v4096_v18, %v1755_v19  ;;  %3587 = vmatmul.msk.f32.vlgmr.msrb.gmra.mxu0 %vm1406_vm0, %v3569_v10  ;;  %v2002_v19 = vld [vmem:[%s5701_s11 + $0x40] sm:$0xff] }
 0x2d4   :  { %2102 = vmatpush.msra.mxu0 %v2009_v8  ;;  %2083 = vmatpush.msra.mxu3 %v2006_v12 }
 0x2d6   :  { %2103 = vmatpush.msra.mxu0 %v2007_v13  ;;  %2084 = vmatpush.msra.mxu3 %v2004_v15  ;;  %v2196_v13 = vld [vmem:[%s5704_s14 + $0x38] sm:$0xff]  ;;  %v2194_v15 = vld [vmem:[%s5704_s14 + $0x28] sm:$0xff] }
 0x2d7   :  { %2211 = vmatpush.msra.mxu1 %v2196_v13  ;;  %v4027_v13 = vld [vmem:[%s5708_s18 + $0xc4] sm:$0xf0] }
 0x2d8   :  { %2104 = vmatpush.msra.mxu0 %v2005_v16  ;;  %2085 = vmatpush.msra.mxu3 %v2002_v19 }
 0x31b   :  { %v1592_v58 = vpop.permute.xlu2 %1591 }
 0x31c   :  { %1595 = vst.msk [vmem:[%s5712_s22] sm:$0x3] %vm1594_vm4, %v1592_v58  ;;  %v1784_v21 = vsel %vm1406_vm0, %v1592_v58, %v5024_v20  ;;  %v2003_v58 = vld [vmem:[%s5701_s11 + $0x48] sm:$0xff] }
 0x31d   :  { %1895 = vmatmul.f32.vlgmr.msrb.gmra.mxu1 %v1784_v21  ;;  %1915 = vmatmul.f32.vlgmr.msra.gmra.mxu2 %v1784_v21 }
 0x31e   :  { %2105 = vmatpush.msra.mxu0 %v2003_v58 }
 0x323   :  { %v1971_v14 = vpop.permute.xlu2 %1970 }
 0x39a   :  { %v1896_v25 = vpop.f32.mrf.mxu1 }
 0x39b   :  { %v1897_v26 = vadd.f32 %v1896_v25, %v1856_v23  ;;  %v2000_v23 = vld [vmem:[%s5701_s11 + $0x30] sm:$0xff] }
 0x39c   :  { %2086 = vmatpush.msra.mxu3 %v2000_v23 }
 0x39d   :  { %v1926_v27 = vadd.f32 %v1922_v24, %v1897_v26  ;;  %v2001_v24 = vld [vmem:[%s5701_s11 + $0x38] sm:$0xff] }
 0x39e   :  { %2106 = vmatpush.msra.mxu0 %v2001_v24  ;;  %v2191_v24 = vld [vmem:[%s5704_s14 + $0x10] sm:$0xff] }
 0x39f   :  { %v3564_v28 = vmul.f32 -1.442695, %v1926_v27  ;;  %v1998_v27 = vld [vmem:[%s5701_s11 + $0x20] sm:$0xff] }
 0x3a0   :  { %v1916_v32 = vpop.f32.mrf.mxu2  ;;  %2087 = vmatpush.msra.mxu3 %v1998_v27 }
 0x3a1   :  { %4097 = vpow2.f32 %v3564_v28  ;;  %v1917_v33 = vadd.f32 %v1916_v32, %v1876_v31  ;;  %v1999_v28 = vld [vmem:[%s5701_s11 + $0x28] sm:$0xff]  ;;  %v1997_v31 = vld [vmem:[%s5701_s11 + $0x18] sm:$0xff] }
 0x3a2   :  { %2107 = vmatpush.msra.mxu0 %v1999_v28 }
 0x3a3   :  { %v1927_v36 = vadd.f32 %v1923_v34, %v1917_v33  ;;  %v1994_v34 = vld [vmem:[%s5701_s11] sm:$0xff] }
 0x3a4   :  { %2108 = vmatpush.msra.mxu0 %v1997_v31 }
 0x3a5   :  { %v3565_v50 = vmul.f32 -1.442695, %v1927_v36 }
 0x3a7   :  { %v4098_v29 = vpop.eup %4097 }
 0x3a8   :  { %v1931_v30 = vadd.f32 1.0, %v4098_v29 }
 0x3aa   :  { %4099 = vrcp.f32 %v1931_v30  ;;  %v1943_v39 = vand.u32 2147483648, %v1931_v30  ;;  %v1941_v42 = vand.u32 2147483647, %v1931_v30  ;;  %vm1937_vm6 = vweird.f32 %v1931_v30 }
 0x3ab   :  { %4101 = vtanh.f32 %v1927_v36 }
 0x3ac   :  { %v1944_v45 = vor.u32 1.1754944e-38, %v1943_v39  ;;  %vm1942_vm8 = vcmp.eq.f32.partialorder %v1941_v42, 8.507059e+37  ;;  %4103 = vpow2.f32 %v3565_v50  ;;  %v3593_v39 = vld [vmem:[%s5732_s27 + $0x6] sm:$0x3]  ;;  %v2049_v42 = vpop.f32.mrf.mxu3 }
 0x3ad   :  { %2165 = vrot.lane.b32.xlu2 %v3593_v39, %s4147_s1 }
 0x3b0   :  { %v4100_v35 = vpop.eup %4099 }
 0x3b1   :  { %v1933_v37 = vmul.f32 %v4100_v35, %v1931_v30  ;;  %vm1938_vm5 = vweird.f32 %v4100_v35  ;;  %v4102_v47 = vpop.eup %4101  ;;  %v1996_v30 = vld [vmem:[%s5701_s11 + $0x10] sm:$0xff] }
 0x3b2   :  { %vm1939_vm7 = vmor %vm1937_vm6, %vm1938_vm5  ;;  %v4104_v51 = vpop.eup %4103  ;;  %2088 = vmatpush.msra.mxu3 %v1996_v30 }
 0x3b3   :  { %v1934_v38 = vsub.f32 1.0, %v1933_v37  ;;  %v5036_v52 = vadd.f32 1.0, %v4104_v51 }
 0x3b4   :  { %2089 = vmatpush.msra.mxu3 %v1994_v34  ;;  %v2230_v34 = vld [vmem:[%s5706_s16] sm:$0xf] }
 0x3b5   :  { %v1935_v40 = vmul.f32 %v4100_v35, %v1934_v38  ;;  %4105 = vrcp.f32 %v5036_v52  ;;  %v1963_v26 = vand.u32 2147483648, %v5036_v52  ;;  %vm1957_vm10 = vweird.f32 %v5036_v52 }
 0x3b6   :  { %v1961_v29 = vand.u32 2147483647, %v5036_v52 }
 0x3b7   :  { %v1936_v43 = vadd.f32 %v4100_v35, %v1935_v40  ;;  %v1964_v33 = vor.u32 1.1754944e-38, %v1963_v26  ;;  %v2190_v26 = vld [vmem:[%s5704_s14 + $0x8] sm:$0xff] }
 0x3b8   :  { %vm1962_vm12 = vcmp.eq.f32.partialorder %v1961_v29, 8.507059e+37  ;;  %v2189_v29 = vld [vmem:[%s5704_s14] sm:$0xff] }
 0x3b9   :  { %v1940_v46 = vsel %vm1939_vm7, %v4100_v35, %v1936_v43  ;;  %v1995_v35 = vld [vmem:[%s5701_s11 + $0x8] sm:$0xff]  ;;  %v3590_v43 = vld [vmem:[%s5703_s13 + $0x6] sm:$0x3] }
 0x3ba   :  { %v1945_v48 = vsel %vm1942_vm8, %v1944_v45, %v1940_v46  ;;  %2109 = vmatpush.msra.mxu0 %v1995_v35  ;;  %v2117_v45 = vperm.slane %v3590_v43, 0  ;;  %v2118_v55 = vperm.slane %v3590_v43, 1  ;;  %vm2238_vm8 = vcmask 1043456   ;;  %v3792_v43 = vld [vmem:[%s5708_s18 + $0x180] sm:$0xf] }
 0x3bb   :  { %v1974_v49 = vmul.f32 %v4102_v47, %v1945_v48  ;;  %v5069_v0 = vpop.eup %4105  ;;  %v1973_v18 = vmul.f32 %v1971_v14, %v1945_v48  ;;  %v2240_v35 = vsel %vm2238_vm8, %v2230_v34, 0  ;;  %v3816_v34 = vld [vmem:[%s5708_s18 + $0x198] sm:$0xf] }
 0x3bc   :  { %v1953_v2 = vmul.f32 %v5069_v0, %v5036_v52  ;;  %vm1958_vm9 = vweird.f32 %v5069_v0  ;;  %2249 = vmatpush.bf16.msrb.mxu2 %v2240_v35  ;;  %v4061_v35 = vld [vmem:[%s5708_s18 + $0x1d4] sm:$0xf0] }
 0x3bd   :  { %1976 = vrot.lane.b32.xlu0 %v1974_v49, %s4147_s1  ;;  %vm1959_vm11 = vmor %vm1957_vm10, %vm1958_vm9  ;;  %v2069_v49 = vpop.f32.mrf.mxu0 }
 0x3be   :  { %v1954_v9 = vsub.f32 1.0, %v1953_v2 }
 0x3c0   :  { %v1955_v17 = vmul.f32 %v5069_v0, %v1954_v9 }
 0x3c2   :  { %v1956_v25 = vadd.f32 %v5069_v0, %v1955_v17 }
 0x3c4   :  { %v1960_v32 = vsel %vm1959_vm11, %v5069_v0, %v1956_v25 }
 0x3c5   :  { %v1965_v37 = vsel %vm1962_vm12, %v1964_v33, %v1960_v32 }
 0x407   :  { %v2166_v12 = vpop.permute.xlu2 %2165 }
 0x42f   :  { %v1977_v21 = vpop.permute.xlu0 %1976 }
 0x430   :  { %v5121_v22 = vadd.f32 %v1977_v21, %v1973_v18  ;;  %v2193_v18 = vld [vmem:[%s5704_s14 + $0x20] sm:$0xff]  ;;  %v2192_v21 = vld [vmem:[%s5704_s14 + $0x18] sm:$0xff] }
 0x432   :  { %4107 = vtanh.f32 %v5121_v22 }
 0x438   :  { %v4108_v36 = vpop.eup %4107 }
 0x439   :  { %v1981_v38 = vmul.f32 %v4108_v36, %v1965_v37 }
 0x43b   :  { %1983 = vrot.lane.b32.xlu1 %v1981_v38, %s4147_s1  ;;  %v4071_v38 = vld [vmem:[%s5705_s15] ss:$0 sm:$0xff] }
 0x4ad   :  { %v1984_v40 = vpop.permute.xlu1 %1983 }
 0x4ae   :  { %3567 = vst.msk [vmem:[%s5712_s22 + $0x4] sm:$0x3] %vm1594_vm4, %v1984_v40  ;;  %3588 = vmatmul.msk.f32.vlgmr.msra.gmra.mxu3 %vm1406_vm0, %v1984_v40  ;;  %3589 = vmatmul.msk.f32.vlgmr.msra.gmra.mxu0 %vm1406_vm0, %v1984_v40 }
 0x52b   :  { %v2111_v53 = vpop.f32.mrf.mxu0 }
 0x52c   :  { %v2112_v54 = vadd.f32 %v2111_v53, %v2069_v49  ;;  %v4059_v49 = vld [vmem:[%s5708_s18 + $0x1c4] sm:$0xf0]  ;;  %v3802_v53 = vld [vmem:[%s5708_s18 + $0x1c8] sm:$0xf0] }
 0x52e   :  { %v2122_v57 = vadd.f32 %v2118_v55, %v2112_v54  ;;  %v3728_v54 = vld [vmem:[%s5708_s18 + $0x100] sm:$0xf] }
 0x530   :  { %v3592_v5 = vmul.f32 -1.442695, %v2122_v57 }
 0x531   :  { %v2091_v46 = vpop.f32.mrf.mxu3 }
 0x532   :  { %v2092_v47 = vadd.f32 %v2091_v46, %v2049_v42  ;;  %v4050_v46 = vld [vmem:[%s5708_s18 + $0x184] sm:$0xf] }
 0x534   :  { %v2121_v48 = vadd.f32 %v2117_v45, %v2092_v47  ;;  %v4058_v45 = vld [vmem:[%s5708_s18 + $0x1bc] sm:$0xf0] }
 0x535   :  { %v3793_v47 = vor.u32 %v4058_v45, %v3792_v43  ;;  %v3744_v43 = vld [vmem:[%s5708_s18 + $0x110] sm:$0xf] }
 0x536   :  { %v3591_v50 = vmul.f32 -1.442695, %v2121_v48  ;;  %v3794_v48 = vld [vmem:[%s5708_s18 + $0x1c0] sm:$0xf0]  ;;  %v4044_v45 = vld [vmem:[%s5708_s18 + $0x14c] sm:$0xf0] }
 0x537   :  { %2684 = vmatpush.bf16.msra.mxu2 %v3793_v47  ;;  %v3745_v47 = vor.u32 %v4044_v45, %v3744_v43 }
 0x538   :  { %4109 = vpow2.f32 %v3591_v50  ;;  %v3797_v50 = vor.u32 %v4050_v46, %v3794_v48  ;;  %v3752_v48 = vld [vmem:[%s5708_s18 + $0x118] sm:$0xf] }
 0x53a   :  { %2697 = vmatpush.bf16.msrb.mxu3 %v3797_v50 }
 0x53e   :  { %v4110_v51 = vpop.eup %4109 }
 0x53f   :  { %v2126_v52 = vadd.f32 1.0, %v4110_v51 }
 0x541   :  { %4111 = vrcp.f32 %v2126_v52  ;;  %v2138_v61 = vand.u32 2147483648, %v2126_v52  ;;  %v2136_v63 = vand.u32 2147483647, %v2126_v52  ;;  %vm2132_vm14 = vweird.f32 %v2126_v52 }
 0x542   :  { %4113 = vtanh.f32 %v2122_v57  ;;  %v4034_v57 = vld [vmem:[%s5708_s18 + $0x104] sm:$0xf] }
 0x543   :  { %v2139_v1 = vor.u32 1.1754944e-38, %v2138_v61  ;;  %vm2137_vm2 = vcmp.eq.f32.partialorder %v2136_v63, 8.507059e+37  ;;  %4115 = vpow2.f32 %v3592_v5  ;;  %v4043_v63 = vld [vmem:[%s5708_s18 + $0x144] sm:$0xf0]  ;;  %v3664_v5 = vld [vmem:[%s5708_s18 + $0x80] sm:$0xf] }
 0x547   :  { %v4112_v56 = vpop.eup %4111 }
 0x548   :  { %v2128_v59 = vmul.f32 %v4112_v56, %v2126_v52  ;;  %vm2133_vm13 = vweird.f32 %v4112_v56  ;;  %v4114_v2 = vpop.eup %4113  ;;  %v4051_v52 = vld [vmem:[%s5708_s18 + $0x18c] sm:$0xf] }
 0x549   :  { %vm2134_vm15 = vmor %vm2132_vm14, %vm2133_vm13  ;;  %v4116_v6 = vpop.eup %4115  ;;  %v3805_v55 = vor.u32 %v4051_v52, %v3802_v53  ;;  %v4020_v52 = vld [vmem:[%s5708_s18 + $0x94] sm:$0xf] }
 0x54a   :  { %v2129_v60 = vsub.f32 1.0, %v2128_v59  ;;  %v2146_v7 = vadd.f32 1.0, %v4116_v6  ;;  %v3730_v59 = vld [vmem:[%s5708_s18 + $0x140] sm:$0xf0]  ;;  %v4026_v6 = vld [vmem:[%s5708_s18 + $0xbc] sm:$0xf0] }
 0x54b   :  { %v3733_v61 = vor.u32 %v4034_v57, %v3730_v59  ;;  %v3682_v53 = vld [vmem:[%s5708_s18 + $0xd0] sm:$0xf0]  ;;  %v3688_v57 = vld [vmem:[%s5708_s18 + $0x98] sm:$0xf] }
 0x54c   :  { %v2130_v62 = vmul.f32 %v4112_v56, %v2129_v60  ;;  %4117 = vrcp.f32 %v2146_v7  ;;  %vm2152_vm5 = vweird.f32 %v2146_v7  ;;  %v2156_v23 = vand.u32 2147483647, %v2146_v7 }
 0x54d   :  { %2698 = vmatpush.bf16.msrb.mxu3 %v3733_v61  ;;  %v3685_v59 = vor.u32 %v4020_v52, %v3682_v53  ;;  %v4021_v61 = vld [vmem:[%s5708_s18 + $0x9c] sm:$0xf]  ;;  %v4006_v53 = vld [vmem:[%s5708_s18 + $0x24] sm:$0xf] }
 0x54e   :  { %v2131_v0 = vadd.f32 %v4112_v56, %v2130_v62  ;;  %vm2157_vm7 = vcmp.eq.f32.partialorder %v2156_v23, 8.507059e+37  ;;  %v3736_v62 = vld [vmem:[%s5708_s18 + $0x108] sm:$0xf] }
 0x54f   :  { %v4011_v23 = vld [vmem:[%s5708_s18 + $0x44] sm:$0xf0] }
 0x550   :  { %v2135_v41 = vsel %vm2134_vm15, %v4112_v56, %v2131_v0  ;;  %v4042_v56 = vld [vmem:[%s5708_s18 + $0x13c] sm:$0xf0]  ;;  %v4035_v0 = vld [vmem:[%s5708_s18 + $0x10c] sm:$0xf] }
 0x551   :  { %v2140_v3 = vsel %vm2137_vm2, %v2139_v1, %v2135_v41  ;;  %v3729_v60 = vor.u32 %v4042_v56, %v3728_v54  ;;  %v3737_v1 = vor.u32 %v4043_v63, %v3736_v62  ;;  %v3738_v41 = vld [vmem:[%s5708_s18 + $0x148] sm:$0xf0]  ;;  %v4028_v56 = vld [vmem:[%s5708_s18 + $0xcc] sm:$0xf0]  ;;  %v3690_v62 = vld [vmem:[%s5708_s18 + $0xd8] sm:$0xf0] }
 0x552   :  { %v2169_v4 = vmul.f32 %v4114_v2, %v2140_v3  ;;  %v4118_v8 = vpop.eup %4117  ;;  %v2168_v16 = vmul.f32 %v2166_v12, %v2140_v3  ;;  %v3741_v2 = vor.u32 %v4035_v0, %v3738_v41  ;;  %v3618_v41 = vld [vmem:[%s5708_s18 + $0x50] sm:$0xf0] }
 0x553   :  { %v2148_v9 = vmul.f32 %v4118_v8, %v2146_v7  ;;  %vm2153_vm3 = vweird.f32 %v4118_v8  ;;  %2685 = vmatpush.bf16.msra.mxu2 %v3729_v60  ;;  %v4029_v60 = vld [vmem:[%s5708_s18 + $0xd4] sm:$0xf0] }
 0x554   :  { %2171 = vrot.lane.b32.xlu0 %v2169_v4, %s4147_s1  ;;  %vm2154_vm6 = vmor %vm2152_vm5, %vm2153_vm3  ;;  %v3689_v0 = vor.u32 %v4029_v60, %v3688_v57  ;;  %v3632_v57 = vld [vmem:[%s5708_s18 + $0x20] sm:$0xf]  ;;  %v3640_v60 = vld [vmem:[%s5708_s18 + $0x28] sm:$0xf] }
 0x555   :  { %v2149_v10 = vsub.f32 1.0, %v2148_v9  ;;  %v3666_v9 = vld [vmem:[%s5708_s18 + $0xc0] sm:$0xf0] }
 0x557   :  { %v2150_v14 = vmul.f32 %v4118_v8, %v2149_v10  ;;  %v3672_v10 = vld [vmem:[%s5708_s18 + $0x88] sm:$0xf] }
 0x559   :  { %v2151_v58 = vadd.f32 %v4118_v8, %v2150_v14  ;;  %v3674_v14 = vld [vmem:[%s5708_s18 + $0xc8] sm:$0xf0] }
 0x55b   :  { %v2155_v25 = vsel %vm2154_vm6, %v4118_v8, %v2151_v58  ;;  %v4018_v8 = vld [vmem:[%s5708_s18 + $0x84] sm:$0xf] }
 0x55c   :  { %1597 = vrot.lane.b32.xlu0 %v4967_v44, %s4147_s1  ;;  %v2195_v44 = vld [vmem:[%s5704_s14 + $0x30] sm:$0xff]  ;;  %v3669_v12 = vor.u32 %v4018_v8, %v3666_v9  ;;  %v3626_v8 = vld [vmem:[%s5708_s18 + $0x58] sm:$0xf0] }
 0x55d   :  { %2212 = vmatpush.msra.mxu1 %v2195_v44  ;;  %v4019_v44 = vld [vmem:[%s5708_s18 + $0x8c] sm:$0xf] }
 0x55e   :  { %2699 = vmatpush.bf16.msrb.mxu3 %v3669_v12 }
 0x55f   :  { %2213 = vmatpush.msra.mxu1 %v2194_v15  ;;  %v3673_v15 = vor.u32 %v4027_v13, %v3672_v10 }
 0x561   :  { %2214 = vmatpush.msra.mxu1 %v2193_v18  ;;  %v4010_v18 = vld [vmem:[%s5708_s18 + $0x3c] sm:$0xf0] }
 0x563   :  { %2215 = vmatpush.msra.mxu1 %v2192_v21  ;;  %v3602_v21 = vld [vmem:[%s5708_s18 + $0x40] sm:$0xf0] }
 0x564   :  { %1989 = vrot.lane.b32.xlu0 %v5121_v22, %s4147_s1  ;;  %v2158_v22 = vand.u32 2147483648, %v2146_v7  ;;  %v3665_v7 = vor.u32 %v4026_v6, %v3664_v5  ;;  %v3624_v5 = vld [vmem:[%s5708_s18 + $0x18] sm:$0xf] }
 0x565   :  { %2216 = vmatpush.msra.mxu1 %v2191_v24  ;;  %v4013_v6 = vld [vmem:[%s5708_s18 + $0x54] sm:$0xf0] }
 0x566   :  { %v2159_v27 = vor.u32 1.1754944e-38, %v2158_v22  ;;  %2686 = vmatpush.bf16.msra.mxu2 %v3665_v7  ;;  %v3608_v22 = vld [vmem:[%s5708_s18 + $0x8] sm:$0xf]  ;;  %v4005_v7 = vld [vmem:[%s5708_s18 + $0x1c] sm:$0xf]  ;;  %v3625_v12 = vor.u32 %v4013_v6, %v3624_v5 }
 0x567   :  { %2217 = vmatpush.msra.mxu1 %v2190_v26  ;;  %v4003_v26 = vld [vmem:[%s5708_s18 + $0xc] sm:$0xf]  ;;  %v3629_v13 = vor.u32 %v4005_v7, %v3626_v8  ;;  %v3840_v5 = vld [vmem:[%s5708_s18 + $0x1b0] sm:$0xf]  ;;  %v3848_v7 = vld [vmem:[%s5708_s18 + $0x1b8] sm:$0xf] }
 0x568   :  { %v2160_v31 = vsel %vm2157_vm7, %v2159_v27, %v2155_v25  ;;  %v3609_v25 = vor.u32 %v4011_v23, %v3608_v22  ;;  %v3610_v27 = vld [vmem:[%s5708_s18 + $0x48] sm:$0xf0]  ;;  %v4064_v6 = vld [vmem:[%s5708_s18 + $0x1ec] sm:$0xf0]  ;;  %v4065_v8 = vld [vmem:[%s5708_s18 + $0x1f4] sm:$0xf0] }
 0x569   :  { %2218 = vmatpush.msra.mxu1 %v2189_v29  ;;  %v4052_v29 = vld [vmem:[%s5708_s18 + $0x194] sm:$0xf]  ;;  %v4055_v23 = vld [vmem:[%s5708_s18 + $0x1ac] sm:$0xf] }
 0x56b   :  { %2723 = vmatpush.bf16.msrb.mxu1 %v3805_v55  ;;  %v3680_v55 = vld [vmem:[%s5708_s18 + $0x90] sm:$0xf] }
 0x56c   :  { %v3681_v63 = vor.u32 %v4028_v56, %v3680_v55 }
 0x56f   :  { %2724 = vmatpush.bf16.msrb.mxu1 %v3741_v2  ;;  %v3616_v2 = vld [vmem:[%s5708_s18 + $0x10] sm:$0xf] }
 0x5c6   :  { %v2172_v17 = vpop.permute.xlu0 %2171 }
 0x5c7   :  { %v2174_v19 = vadd.f32 %v2172_v17, %v2168_v16  ;;  %v3677_v16 = vor.u32 %v4019_v44, %v3674_v14  ;;  %v3600_v17 = vld [vmem:[%s5708_s18] sm:$0xf] }
 0x5c8   :  { %v3601_v58 = vor.u32 %v4010_v18, %v3600_v17  ;;  %v4072_v44 = vld [vmem:[%s5707_s17] ss:$0 sm:$0xff]  ;;  %v3826_v17 = vld [vmem:[%s5708_s18 + $0x1e0] sm:$0xf0] }
 0x5c9   :  { %4119 = vtanh.f32 %v2174_v19  ;;  %2725 = vmatpush.bf16.msrb.mxu1 %v3677_v16  ;;  %v4054_v16 = vld [vmem:[%s5708_s18 + $0x1a4] sm:$0xf]  ;;  %v3824_v18 = vld [vmem:[%s5708_s18 + $0x1a0] sm:$0xf] }
 0x5ca   :  { %2687 = vmatpush.bf16.msra.mxu2 %v3601_v58  ;;  %v3832_v58 = vld [vmem:[%s5708_s18 + $0x1a8] sm:$0xf] }
 0x5ce   :  { %v1598_v28 = vpop.permute.xlu0 %1597 }
 0x5cf   :  { %v4120_v30 = vpop.eup %4119  ;;  %1600 = vst.msk [vmem:[%s5713_s23] sm:$0x3] %vm1594_vm4, %v1598_v28  ;;  %v3613_v28 = vor.u32 %v4003_v26, %v3610_v27  ;;  %v3829_v26 = vor.u32 %v4054_v16, %v3826_v17  ;;  %v3776_v17 = vld [vmem:[%s5708_s18 + $0x130] sm:$0xf] }
 0x5d0   :  { %v2176_v32 = vmul.f32 %v4120_v30, %v2160_v31  ;;  %v3810_v30 = vld [vmem:[%s5708_s18 + $0x1d0] sm:$0xf0]  ;;  %v3808_v31 = vld [vmem:[%s5708_s18 + $0x190] sm:$0xf] }
 0x5d1   :  { %2726 = vmatpush.bf16.msrb.mxu1 %v3613_v28  ;;  %v4038_v28 = vld [vmem:[%s5708_s18 + $0x124] sm:$0xf] }
 0x5d2   :  { %2178 = vrot.lane.b32.xlu1 %v2176_v32, %s4147_s1  ;;  %v3813_v32 = vor.u32 %v4052_v29, %v3810_v30  ;;  %v3762_v29 = vld [vmem:[%s5708_s18 + $0x160] sm:$0xf0] }
 0x5d6   :  { %v1990_v33 = vpop.permute.xlu0 %1989 }
 0x5d7   :  { %3568 = vst.msk [vmem:[%s5713_s23 + $0x4] sm:$0x3] %vm1594_vm4, %v1990_v33  ;;  %v4060_v33 = vld [vmem:[%s5708_s18 + $0x1cc] sm:$0xf0] }
 0x5da   :  { %1773 = vrot.lane.b32.xlu1 %v5024_v20, %s4147_s1 }
 0x5e2   :  { %2184 = vrot.lane.b32.xlu1 %v2174_v19, %s4147_s1  ;;  %v4002_v19 = vld [vmem:[%s5708_s18 + $0x4] sm:$0xf] }
 0x5e3   :  { %v3605_v24 = vor.u32 %v4002_v19, %v3602_v21  ;;  %v4062_v19 = vld [vmem:[%s5708_s18 + $0x1dc] sm:$0xf0]  ;;  %v4063_v21 = vld [vmem:[%s5708_s18 + $0x1e4] sm:$0xf0] }
 0x5e4   :  { %v3825_v27 = vor.u32 %v4062_v19, %v3824_v18  ;;  %v3833_v30 = vor.u32 %v4063_v21, %v3832_v58  ;;  %v4048_v18 = vld [vmem:[%s5708_s18 + $0x16c] sm:$0xf0]  ;;  %v3784_v19 = vld [vmem:[%s5708_s18 + $0x138] sm:$0xf]  ;;  %v4041_v21 = vld [vmem:[%s5708_s18 + $0x13c] sm:$0xf] }
 0x5e5   :  { %2700 = vmatpush.bf16.msrb.mxu3 %v3605_v24  ;;  %v3834_v24 = vld [vmem:[%s5708_s18 + $0x1e8] sm:$0xf0]  ;;  %v4049_v58 = vld [vmem:[%s5708_s18 + $0x174] sm:$0xf0] }
 0x5e9   :  { %2749 = vmatpush.bf16.msra.mxu3 %v3813_v32  ;;  %v3760_v32 = vld [vmem:[%s5708_s18 + $0x120] sm:$0xf] }
 0x644   :  { %v2179_v36 = vpop.permute.xlu1 %2178 }
 0x645   :  { %3594 = vst.msk [vmem:[%s5712_s22 + $0x6] sm:$0x3] %vm1594_vm4, %v2179_v36  ;;  %3596 = vmatmul.msk.f32.vlgmr.msra.gmra.mxu1 %vm1406_vm0, %v2179_v36  ;;  %v3809_v36 = vor.u32 %v4060_v33, %v3808_v31  ;;  %v3837_v31 = vor.u32 %v4055_v23, %v3834_v24  ;;  %v4046_v33 = vld [vmem:[%s5708_s18 + $0x15c] sm:$0xf0]  ;;  %v3777_v24 = vor.u32 %v4048_v18, %v3776_v17 }
 0x64c   :  { %v1774_v37 = vpop.permute.xlu1 %1773 }
 0x64d   :  { %3542 = vst.msk [vmem:[%s5712_s22 + $0x2] sm:$0x3] %vm1594_vm4, %v1774_v37  ;;  %v3817_v37 = vor.u32 %v4061_v35, %v3816_v34  ;;  %v3768_v34 = vld [vmem:[%s5708_s18 + $0x128] sm:$0xf] }
 0x64e   :  { %v4047_v35 = vld [vmem:[%s5708_s18 + $0x164] sm:$0xf0] }
 0x64f   :  { %v3769_v43 = vor.u32 %v4047_v35, %v3768_v34  ;;  %v4025_v34 = vld [vmem:[%s5708_s18 + $0xbc] sm:$0xf] }
 0x650   :  { %v3722_v35 = vld [vmem:[%s5708_s18 + $0xf8] sm:$0xf0] }
 0x654   :  { %v2185_v20 = vpop.permute.xlu1 %2184 }
 0x655   :  { %3595 = vst.msk [vmem:[%s5713_s23 + $0x6] sm:$0x3] %vm1594_vm4, %v2185_v20  ;;  %v4053_v20 = vld [vmem:[%s5708_s18 + $0x19c] sm:$0xf] }
 0x6c2   :  { %v2220_v39 = vpop.f32.mrf.mxu1 }
 0x6c3   :  { %v2221_v40 = vadd.f32 %v4071_v38, %v2220_v39  ;;  %v3818_v38 = vld [vmem:[%s5708_s18 + $0x1d8] sm:$0xf0]  ;;  %v4036_v39 = vld [vmem:[%s5708_s18 + $0x114] sm:$0xf] }
 0x6c5   :  { %v2229_v42 = vpack.c.bf16 %v2221_v40, %v2221_v40  ;;  %2224 = vrot.lane.b32.xlu2 %v2221_v40, %s4148_s25  ;;  %v3821_v40 = vor.u32 %v4053_v20, %v3818_v38  ;;  %v3765_v38 = vor.u32 %v4038_v28, %v3762_v29  ;;  %v3785_v28 = vor.u32 %v4049_v58, %v3784_v19  ;;  %s2963_s25 = sshll.u32 %s5711_s21, 4  ;;  %s2964_s25 = int_to_ptr.hbm [resolvable:$true] %s2963_s25 }
 0x6c7   :  { %3597 = vmatmul.msk.bf16.vlgmr.msrb.gmra.mxu2 %vm1485_vm1, %v2229_v42  ;;  %vm2227_vm1 = vcmask 58368   ;;  %v3746_v42 = vld [vmem:[%s5708_s18 + $0x150] sm:$0xf0]  ;;  %2775 = vmatpush.bf16.msra.mxu1 %v3821_v40  ;;  %v4022_v40 = vld [vmem:[%s5708_s18 + $0xa4] sm:$0xf] }
 0x6c8   :  { %2736 = vmatpush.bf16.msrb.mxu2 %v3809_v36  ;;  %v3749_v46 = vor.u32 %v4036_v39, %v3746_v42  ;;  %v4039_v36 = vld [vmem:[%s5708_s18 + $0x12c] sm:$0xf]  ;;  %v3761_v39 = vor.u32 %v4046_v33, %v3760_v32  ;;  %v3698_v42 = vld [vmem:[%s5708_s18 + $0xe0] sm:$0xf0]  ;;  %v3720_v32 = vld [vmem:[%s5708_s18 + $0xb8] sm:$0xf] }
 0x6c9   :  { %v4033_v33 = vld [vmem:[%s5708_s18 + $0xf4] sm:$0xf0] }
 0x6ca   :  { %2750 = vmatpush.bf16.msra.mxu3 %v3749_v46  ;;  %v3696_v46 = vld [vmem:[%s5708_s18 + $0xa0] sm:$0xf] }
 0x6cc   :  { %2737 = vmatpush.bf16.msrb.mxu2 %v3745_v47  ;;  %v4030_v47 = vld [vmem:[%s5708_s18 + $0xdc] sm:$0xf0] }
 0x6cd   :  { %1779 = vrot.lane.b32.xlu2 %v5021_v11, %s4147_s1  ;;  %v3800_v11 = vld [vmem:[%s5708_s18 + $0x188] sm:$0xf]  ;;  %v3697_v52 = vor.u32 %v4030_v47, %v3696_v46  ;;  %v4017_v46 = vld [vmem:[%s5708_s18 + $0x74] sm:$0xf0]  ;;  %v4009_v47 = vld [vmem:[%s5708_s18 + $0x3c] sm:$0xf] }
 0x6ce   :  { %v3801_v51 = vor.u32 %v4059_v49, %v3800_v11  ;;  %v4045_v11 = vld [vmem:[%s5708_s18 + $0x154] sm:$0xf0]  ;;  %v4037_v49 = vld [vmem:[%s5708_s18 + $0x11c] sm:$0xf]  ;;  %2751 = vmatpush.bf16.msra.mxu3 %v3685_v59  ;;  %v4014_v59 = vld [vmem:[%s5708_s18 + $0x5c] sm:$0xf0] }
 0x6cf   :  { %v3753_v50 = vor.u32 %v4045_v11, %v3752_v48  ;;  %v3704_v48 = vld [vmem:[%s5708_s18 + $0xa8] sm:$0xf] }
 0x6d0   :  { %2710 = vmatpush.bf16.msrb.mxu0 %v3801_v51  ;;  %v3754_v51 = vld [vmem:[%s5708_s18 + $0x158] sm:$0xf0]  ;;  %2738 = vmatpush.bf16.msrb.mxu2 %v3681_v63  ;;  %v4031_v11 = vld [vmem:[%s5708_s18 + $0xe4] sm:$0xf0]  ;;  %v3642_v63 = vld [vmem:[%s5708_s18 + $0x68] sm:$0xf0] }
 0x6d1   :  { %v3757_v54 = vor.u32 %v4037_v49, %v3754_v51  ;;  %v4023_v49 = vld [vmem:[%s5708_s18 + $0xac] sm:$0xf]  ;;  %v3701_v51 = vor.u32 %v4022_v40, %v3698_v42  ;;  %v3705_v55 = vor.u32 %v4031_v11, %v3704_v48  ;;  %v3725_v40 = vor.u32 %v4025_v34, %v3722_v35  ;;  %v3648_v42 = vld [vmem:[%s5708_s18 + $0x30] sm:$0xf]  ;;  %v3658_v48 = vld [vmem:[%s5708_s18 + $0x78] sm:$0xf0] }
 0x6d3   :  { %2776 = vmatpush.bf16.msra.mxu1 %v3757_v54  ;;  %v3634_v54 = vld [vmem:[%s5708_s18 + $0x60] sm:$0xf0] }
 0x6d4   :  { %2711 = vmatpush.bf16.msrb.mxu0 %v3737_v1  ;;  %v4004_v1 = vld [vmem:[%s5708_s18 + $0x14] sm:$0xf] }
 0x6d5   :  { %v3621_v9 = vor.u32 %v4004_v1, %v3618_v41  ;;  %v3633_v1 = vor.u32 %v4014_v59, %v3632_v57  ;;  %v4056_v41 = vld [vmem:[%s5708_s18 + $0x1b4] sm:$0xf] }
 0x6d7   :  { %2752 = vmatpush.bf16.msra.mxu3 %v3621_v9  ;;  %v4057_v9 = vld [vmem:[%s5708_s18 + $0x1bc] sm:$0xf] }
 0x6d8   :  { %2712 = vmatpush.bf16.msrb.mxu0 %v3673_v15 }
 0x6dc   :  { %2713 = vmatpush.bf16.msrb.mxu0 %v3609_v25 }
 0x6e0   :  { %2762 = vmatpush.bf16.msra.mxu0 %v3817_v37  ;;  %v3770_v37 = vld [vmem:[%s5708_s18 + $0x168] sm:$0xf0] }
 0x6e1   :  { %v3773_v45 = vor.u32 %v4039_v36, %v3770_v37 }
 0x6e4   :  { %2763 = vmatpush.bf16.msra.mxu0 %v3753_v50  ;;  %v3706_v50 = vld [vmem:[%s5708_s18 + $0xe8] sm:$0xf0] }
 0x6e5   :  { %v3709_v56 = vor.u32 %v4023_v49, %v3706_v50 }
 0x6e8   :  { %2764 = vmatpush.bf16.msra.mxu0 %v3689_v0  ;;  %v3637_v0 = vor.u32 %v4006_v53, %v3634_v54 }
 0x6ec   :  { %2765 = vmatpush.bf16.msra.mxu0 %v3625_v12 }
 0x71f   :  { %v2225_v3 = vpop.permute.xlu2 %2224 }
 0x720   :  { %2228 = vst.msk [vmem:[#allocation2] sm:$0x3] %vm2227_vm1, %v2225_v3  ;;  %v3693_v3 = vor.u32 %v4021_v61, %v3690_v62  ;;  %v4015_v61 = vld [vmem:[%s5708_s18 + $0x64] sm:$0xf0]  ;;  %v4007_v62 = vld [vmem:[%s5708_s18 + $0x2c] sm:$0xf] }
 0x722   :  { %2777 = vmatpush.bf16.msra.mxu1 %v3693_v3  ;;  %v3641_v3 = vor.u32 %v4015_v61, %v3640_v60 }
 0x726   :  { %2778 = vmatpush.bf16.msra.mxu1 %v3629_v13  ;;  %v3841_v13 = vor.u32 %v4064_v6, %v3840_v5 }
 0x727   :  { %v1780_v4 = vpop.permute.xlu2 %1779 }
 0x728   :  { %3543 = vst.msk [vmem:[%s5713_s23 + $0x2] sm:$0x3] %vm1594_vm4, %v1780_v4  ;;  %v4012_v4 = vld [vmem:[%s5708_s18 + $0x4c] sm:$0xf0]  ;;  %vm2932_vm4 = vcmask 1041408  }
 0x729   :  { %v3617_v10 = vor.u32 %v4012_v4, %v3616_v2  ;;  %v3842_v2 = vld [vmem:[%s5708_s18 + $0x1f0] sm:$0xf0]  ;;  %v3645_v4 = vor.u32 %v4007_v62, %v3642_v63 }
 0x72a   :  { %v3845_v12 = vor.u32 %v4056_v41, %v3842_v2 }
 0x72b   :  { %2739 = vmatpush.bf16.msrb.mxu2 %v3617_v10  ;;  %v3850_v10 = vld [vmem:[%s5708_s18 + $0x1f8] sm:$0xf0] }
 0x72c   :  { %v3853_v16 = vor.u32 %v4057_v9, %v3850_v10 }
 0x74a   :  { %v2251_v14 = vpop.f32.mrf.mxu2 }
 0x74b   :  { %v2252_v15 = vadd.f32 %v4072_v44, %v2251_v14  ;;  %v4040_v44 = vld [vmem:[%s5708_s18 + $0x134] sm:$0xf] }
 0x74c   :  { %v3778_v14 = vld [vmem:[%s5708_s18 + $0x170] sm:$0xf0] }
 0x74d   :  { %v2255_v22 = vmax.f32 %v2252_v15, 0.0  ;;  %v3849_v15 = vor.u32 %v4065_v8, %v3848_v7  ;;  %v3781_v23 = vor.u32 %v4040_v44, %v3778_v14 }
 0x74f   :  { %v5455_v25 = vpack.c.bf16 %v2255_v22, %v2255_v22  ;;  %v3786_v22 = vld [vmem:[%s5708_s18 + $0x178] sm:$0xf0] }
 0x750   :  { %v3789_v29 = vor.u32 %v4041_v21, %v3786_v22 }
 0x751   :  { %3854 = vmatmul.msk.bf16.vlgmr.msra.gmra.mxu2 %vm1406_vm0, %v5455_v25  ;;  %3855 = vmatmul.msk.bf16.vlgmr.msrb.gmra.mxu3 %vm1406_vm0, %v5455_v25 }
 0x752   :  { %3856 = vmatmul.msk.bf16.vlgmr.msrb.gmra.mxu0 %vm1406_vm0, %v5455_v25  ;;  %3857 = vmatmul.msk.bf16.vlgmr.msrb.gmra.mxu1 %vm1406_vm0, %v5455_v25  ;;  %v2253_v20 = vpop.f32.mrf.mxu2 }
 0x753   :  { %2801 = vmatpush.bf16.msrb.mxu3 %v3829_v26  ;;  %2788 = vmatpush.bf16.msra.mxu2 %v3825_v27  ;;  %v4024_v26 = vld [vmem:[%s5708_s18 + $0xb4] sm:$0xf] }
 0x754   :  { %2814 = vmatpush.bf16.msrb.mxu0 %v3833_v30  ;;  %2827 = vmatpush.bf16.msrb.mxu1 %v3837_v31  ;;  %v3714_v27 = vld [vmem:[%s5708_s18 + $0xf0] sm:$0xf0]  ;;  %v3712_v30 = vld [vmem:[%s5708_s18 + $0xb0] sm:$0xf] }
 0x755   :  { %v4032_v31 = vld [vmem:[%s5708_s18 + $0xec] sm:$0xf0]  ;;  %v3717_v36 = vor.u32 %v4024_v26, %v3714_v27  ;;  %v4008_v20 = vld [vmem:[%s5708_s18 + $0x34] sm:$0xf] }
 0x756   :  { %v3713_v37 = vor.u32 %v4032_v31, %v3712_v30 }
 0x757   :  { %2802 = vmatpush.bf16.msrb.mxu3 %v3765_v38  ;;  %2789 = vmatpush.bf16.msra.mxu2 %v3761_v39  ;;  %v3650_v38 = vld [vmem:[%s5708_s18 + $0x70] sm:$0xf0]  ;;  %v3721_v39 = vor.u32 %v4033_v33, %v3720_v32 }
 0x758   :  { %2815 = vmatpush.bf16.msrb.mxu0 %v3769_v43  ;;  %2828 = vmatpush.bf16.msrb.mxu1 %v3773_v45  ;;  %v4016_v43 = vld [vmem:[%s5708_s18 + $0x6c] sm:$0xf0]  ;;  %v3656_v45 = vld [vmem:[%s5708_s18 + $0x38] sm:$0xf]  ;;  %v3653_v11 = vor.u32 %v4008_v20, %v3650_v38  ;;  %s4149_s18 = smov [#allocation2]  }
 0x759   :  { %v3649_v49 = vor.u32 %v4016_v43, %v3648_v42  ;;  %v3657_v50 = vor.u32 %v4017_v46, %v3656_v45  ;;  %s2961_s12 = sshll.u32 %s4149_s18, 4  ;;  %s2962_s12 = int_to_ptr.vmem [resolvable:$true] %s2961_s12 }
 0x75a   :  { %2966 = dma.vmem_to_hbm [thread:$0]  %s2962_s12, 32, %s2964_s25, [#allocation3]  }
 0x75b   :  { %2803 = vmatpush.bf16.msrb.mxu3 %v3701_v51  ;;  %2790 = vmatpush.bf16.msra.mxu2 %v3697_v52  ;;  %v3661_v51 = vor.u32 %v4009_v47, %v3658_v48  ;;  %v2321_v52 = vld [vmem:[%s5709_s19] sm:$0xff] }
 0x75c   :  { %2816 = vmatpush.bf16.msrb.mxu0 %v3705_v55  ;;  %2829 = vmatpush.bf16.msrb.mxu1 %v3709_v56  ;;  %v2327_v53 = vperm.slane %v2321_v52, 2  ;;  %v2328_v54 = vperm.slane %v2321_v52, 3  ;;  %v2326_v60 = vperm.slane %v2321_v52, 1  ;;  %v2331_v14 = vperm.slane %v2321_v52, 6 }
 0x75d   :  { %v2329_v58 = vperm.slane %v2321_v52, 4  ;;  %v2330_v21 = vperm.slane %v2321_v52, 5 }
 0x75f   :  { %2804 = vmatpush.bf16.msrb.mxu3 %v3637_v0  ;;  %2791 = vmatpush.bf16.msra.mxu2 %v3633_v1 }
 0x760   :  { %2817 = vmatpush.bf16.msrb.mxu0 %v3641_v3  ;;  %2830 = vmatpush.bf16.msrb.mxu1 %v3645_v4 }
 0x761   :  { %3858 = vmatmul.msk.bf16.vlgmr.msrb.gmra.mxu2 %vm1406_vm0, %v5455_v25  ;;  %3859 = vmatmul.msk.bf16.vlgmr.msra.gmra.mxu3 %vm1406_vm0, %v5455_v25 }
 0x762   :  { %3860 = vmatmul.msk.bf16.vlgmr.msra.gmra.mxu0 %vm1406_vm0, %v5455_v25  ;;  %3861 = vmatmul.msk.bf16.vlgmr.msra.gmra.mxu1 %vm1406_vm0, %v5455_v25 }
 0x763   :  { %2853 = vmatpush.bf16.msra.mxu3 %v3845_v12  ;;  %2840 = vmatpush.bf16.msrb.mxu2 %v3841_v13 }
 0x764   :  { %2866 = vmatpush.bf16.msra.mxu0 %v3849_v15  ;;  %2879 = vmatpush.bf16.msra.mxu1 %v3853_v16  ;;  %v2332_v15 = vperm.slane %v2321_v52, 7 }
 0x767   :  { %2854 = vmatpush.bf16.msra.mxu3 %v3781_v23  ;;  %2841 = vmatpush.bf16.msrb.mxu2 %v3777_v24 }
 0x768   :  { %2867 = vmatpush.bf16.msra.mxu0 %v3785_v28  ;;  %2880 = vmatpush.bf16.msra.mxu1 %v3789_v29 }
 0x76b   :  { %2855 = vmatpush.bf16.msra.mxu3 %v3717_v36  ;;  %2842 = vmatpush.bf16.msrb.mxu2 %v3713_v37  ;;  %v2322_v36 = vld [vmem:[%s5709_s19 + $0x8] sm:$0xff] }
 0x76c   :  { %2868 = vmatpush.bf16.msra.mxu0 %v3721_v39  ;;  %2881 = vmatpush.bf16.msra.mxu1 %v3725_v40  ;;  %v2335_v42 = vperm.slane %v2322_v36, 2  ;;  %v2336_v43 = vperm.slane %v2322_v36, 3 }
 0x76f   :  { %2856 = vmatpush.bf16.msra.mxu3 %v3653_v11  ;;  %2843 = vmatpush.bf16.msrb.mxu2 %v3649_v49  ;;  %v2333_v11 = vperm.slane %v2322_v36, 0  ;;  %v2334_v49 = vperm.slane %v2322_v36, 1 }
 0x770   :  { %2869 = vmatpush.bf16.msra.mxu0 %v3657_v50  ;;  %2882 = vmatpush.bf16.msra.mxu1 %v3661_v51 }
 0x771   :  { %3862 = vmatmul.msk.bf16.vlgmr.msra.gmra.mxu2 %vm1406_vm0, %v5455_v25  ;;  %3863 = vmatmul.msk.bf16.vlgmr.msrb.gmra.mxu3 %vm1406_vm0, %v5455_v25 }
 0x772   :  { %3864 = vmatmul.msk.bf16.vlgmr.msrb.gmra.mxu0 %vm1406_vm0, %v5455_v25  ;;  %3865 = vmatmul.msk.bf16.vlgmr.msrb.gmra.mxu1 %vm1406_vm0, %v5455_v25 }
 0x781   :  { %3866 = vmatmul.msk.bf16.vlgmr.msrb.gmra.mxu2 %vm1406_vm0, %v5455_v25  ;;  %3867 = vmatmul.msk.bf16.vlgmr.msra.gmra.mxu3 %vm1406_vm0, %v5455_v25 }
 0x782   :  { %3868 = vmatmul.msk.bf16.vlgmr.msra.gmra.mxu0 %vm1406_vm0, %v5455_v25  ;;  %3869 = vmatmul.msk.bf16.vlgmr.msra.gmra.mxu1 %vm1406_vm0, %v5455_v25  ;;  %v2325_v25 = vperm.slane %v2321_v52, 0  ;;  %vm2934_vm0 = vcmask 1045508  }
 0x7cf   :  { %v2715_v55 = vpop.f32.mrf.mxu0  ;;  %v2728_v56 = vpop.f32.mrf.mxu1 }
 0x7d0   :  { %v2716_v57 = vadd.f32 %v2715_v55, %v2327_v53  ;;  %v2729_v59 = vadd.f32 %v2728_v56, %v2328_v54 }
 0x7d2   :  { %v2890_v61 = vmax.f32 %v2716_v57, 0.0  ;;  %v2891_v62 = vmax.f32 %v2729_v59, 0.0 }
 0x7d4   :  { %v2689_v63 = vpop.f32.mrf.mxu2  ;;  %v2702_v0 = vpop.f32.mrf.mxu3  ;;  %v2921_v2 = vrot.slane %v2890_v61, 4  ;;  %v2922_v3 = vrot.slane %v2891_v62, 2 }
 0x7d5   :  { %v2690_v1 = vadd.f32 %v2689_v63, %v2325_v25  ;;  %v2703_v41 = vadd.f32 %v2702_v0, %v2326_v60 }
 0x7d6   :  { %v2935_v9 = vsel %vm2934_vm0, %v2921_v2, %v2922_v3  ;;  %v2339_v3 = vperm.slane %v2322_v36, 6 }
 0x7d7   :  { %v2889_v4 = vmax.f32 %v2703_v41, 0.0  ;;  %v2717_v5 = vpop.f32.mrf.mxu0  ;;  %v2730_v6 = vpop.f32.mrf.mxu1  ;;  %v2888_v7 = vmax.f32 %v2690_v1, 0.0 }
 0x7d9   :  { %v2920_v8 = vrot.slane %v2889_v4, 6  ;;  %v2340_v4 = vperm.slane %v2322_v36, 7 }
 0x7db   :  { %v2933_v10 = vsel %vm2932_vm4, %v2888_v7, %v2920_v8 }
 0x7dc   :  { %v2936_v12 = vsel %vm2238_vm8, %v2933_v10, %v2935_v9  ;;  %v2691_v13 = vpop.f32.mrf.mxu2  ;;  %v2704_v44 = vpop.f32.mrf.mxu3  ;;  %v2337_v9 = vperm.slane %v2322_v36, 4  ;;  %v2338_v10 = vperm.slane %v2322_v36, 5 }
 0x7dd   :  { %2950 = vst [vmem:[%s5710_s20] sm:$0xff] %v2936_v12 }
 0x7df   :  { %v2767_v16 = vpop.f32.mrf.mxu0  ;;  %v2780_v17 = vpop.f32.mrf.mxu1 }
 0x7e0   :  { %v2768_v18 = vadd.f32 %v2767_v16, %v2331_v14  ;;  %v2781_v19 = vadd.f32 %v2780_v17, %v2332_v15 }
 0x7e2   :  { %v2894_v22 = vmax.f32 %v2768_v18, 0.0  ;;  %v2895_v23 = vmax.f32 %v2781_v19, 0.0 }
 0x7e4   :  { %v2741_v24 = vpop.f32.mrf.mxu2  ;;  %v2754_v26 = vpop.f32.mrf.mxu3  ;;  %v2924_v29 = vrot.slane %v2894_v22, 4  ;;  %v2925_v30 = vrot.slane %v2895_v23, 2 }
 0x7e5   :  { %v2742_v27 = vadd.f32 %v2741_v24, %v2329_v58  ;;  %v2755_v28 = vadd.f32 %v2754_v26, %v2330_v21 }
 0x7e6   :  { %v2938_v37 = vsel %vm2934_vm0, %v2924_v29, %v2925_v30 }
 0x7e7   :  { %v2893_v31 = vmax.f32 %v2755_v28, 0.0  ;;  %v2769_v32 = vpop.f32.mrf.mxu0  ;;  %v2782_v33 = vpop.f32.mrf.mxu1  ;;  %v2892_v34 = vmax.f32 %v2742_v27, 0.0 }
 0x7e9   :  { %v2923_v35 = vrot.slane %v2893_v31, 6 }
 0x7eb   :  { %v2937_v20 = vsel %vm2932_vm4, %v2892_v34, %v2923_v35 }
 0x7ec   :  { %v2939_v38 = vsel %vm2238_vm8, %v2937_v20, %v2938_v37  ;;  %v2743_v39 = vpop.f32.mrf.mxu2  ;;  %v2756_v40 = vpop.f32.mrf.mxu3 }
 0x7ed   :  { %2951 = vst [vmem:[%s5710_s20 + $0x8] sm:$0xff] %v2939_v38 }
 0x7ef   :  { %v2819_v45 = vpop.f32.mrf.mxu0  ;;  %v2832_v46 = vpop.f32.mrf.mxu1 }
 0x7f0   :  { %v2820_v47 = vadd.f32 %v2819_v45, %v2335_v42  ;;  %v2833_v48 = vadd.f32 %v2832_v46, %v2336_v43 }
 0x7f2   :  { %v2898_v50 = vmax.f32 %v2820_v47, 0.0  ;;  %v2899_v51 = vmax.f32 %v2833_v48, 0.0 }
 0x7f4   :  { %v2793_v52 = vpop.f32.mrf.mxu2  ;;  %v2806_v53 = vpop.f32.mrf.mxu3  ;;  %v2927_v56 = vrot.slane %v2898_v50, 4  ;;  %v2928_v57 = vrot.slane %v2899_v51, 2 }
 0x7f5   :  { %v2794_v54 = vadd.f32 %v2793_v52, %v2333_v11  ;;  %v2807_v55 = vadd.f32 %v2806_v53, %v2334_v49 }
 0x7f6   :  { %v2941_v63 = vsel %vm2934_vm0, %v2927_v56, %v2928_v57 }
 0x7f7   :  { %v2897_v59 = vmax.f32 %v2807_v55, 0.0  ;;  %v2821_v25 = vpop.f32.mrf.mxu0  ;;  %v2834_v60 = vpop.f32.mrf.mxu1  ;;  %v2896_v61 = vmax.f32 %v2794_v54, 0.0 }
 0x7f9   :  { %v2926_v62 = vrot.slane %v2897_v59, 6 }
 0x7fb   :  { %v2940_v0 = vsel %vm2932_vm4, %v2896_v61, %v2926_v62 }
 0x7fc   :  { %v2942_v1 = vsel %vm2238_vm8, %v2940_v0, %v2941_v63  ;;  %v2795_v41 = vpop.f32.mrf.mxu2  ;;  %v2808_v2 = vpop.f32.mrf.mxu3 }
 0x7fd   :  { %2952 = vst [vmem:[%s5710_s20 + $0x10] sm:$0xff] %v2942_v1 }
 0x7ff   :  { %v2871_v5 = vpop.f32.mrf.mxu0  ;;  %v2884_v6 = vpop.f32.mrf.mxu1 }
 0x800   :  { %v2872_v7 = vadd.f32 %v2871_v5, %v2339_v3  ;;  %v2885_v8 = vadd.f32 %v2884_v6, %v2340_v4 }
 0x802   :  { %v2902_v12 = vmax.f32 %v2872_v7, 0.0  ;;  %v2903_v13 = vmax.f32 %v2885_v8, 0.0 }
 0x804   :  { %v2845_v44 = vpop.f32.mrf.mxu2  ;;  %v2858_v14 = vpop.f32.mrf.mxu3  ;;  %v2930_v17 = vrot.slane %v2902_v12, 4  ;;  %v2931_v18 = vrot.slane %v2903_v13, 2 }
 0x805   :  { %v2846_v15 = vadd.f32 %v2845_v44, %v2337_v9  ;;  %v2859_v16 = vadd.f32 %v2858_v14, %v2338_v10 }
 0x806   :  { %v2944_v24 = vsel %vm2934_vm0, %v2930_v17, %v2931_v18 }
 0x807   :  { %v2901_v19 = vmax.f32 %v2859_v16, 0.0  ;;  %v2873_v58 = vpop.f32.mrf.mxu0  ;;  %v2886_v21 = vpop.f32.mrf.mxu1  ;;  %v2900_v22 = vmax.f32 %v2846_v15, 0.0 }
 0x809   :  { %v2929_v23 = vrot.slane %v2901_v19, 6 }
 0x80b   :  { %v2943_v26 = vsel %vm2932_vm4, %v2900_v22, %v2929_v23 }
 0x80c   :  { %v2945_v27 = vsel %vm2238_vm8, %v2943_v26, %v2944_v24  ;;  %v2847_v28 = vpop.f32.mrf.mxu2  ;;  %v2860_v29 = vpop.f32.mrf.mxu3 }
 0x80d   :  { %2953 = vst [vmem:[%s5710_s20 + $0x18] sm:$0xff] %v2945_v27 }
 0x80e   :  { %4145 = dma.done.wait [#allocation3], 32  }
 0x80f   :  { %4146 = vsyncadd [#allocation3], 4294967264 }
 0x810   :  { %2981 = vsyncpa [#allocation3], 1 }

// kernel: hrnn_forward.11
= control target key start
LH: loop header
LB: loop body
LE: loop exit
PB: predicated region body
PF: predicated region fallthrough
CT: control target
= control target key end

     0   :  { %vm478_vm0 = vcmask 261120   ;;  %s1574_s1 = inlined_call_operand.vmem [shape: bf16[288,512], index: 1, kind: input, shape index: {}]   ;;  %s1575_s0 = inlined_call_operand.vmem [shape: bf16[16,288], index: 0, kind: input, shape index: {}]   ;;  %s1576_s2 = inlined_call_operand.vmem [shape: f32[16,1], index: 2, kind: input, shape index: {}]   ;;  %s1577_s3 = inlined_call_operand.vmem [shape: f32[16,512], index: 3, kind: output, shape index: {}]  }
   0x1   :  { %v796_v0 = vld [vmem:[%s1574_s1 + $0xe0] sm:$0xf]  ;;  %v1007_v1 = vld [vmem:[%s1574_s1 + $0xec] sm:$0xf0]  ;;  %v1037_v9 = vld [vmem:[%s1574_s1 + $0x1e4] sm:$0xf] }
   0x2   :  { %v924_v2 = vld [vmem:[%s1574_s1 + $0x1e0] sm:$0xf]  ;;  %v797_v3 = vor.u32 %v1007_v1, %v796_v0  ;;  %v1039_v4 = vld [vmem:[%s1574_s1 + $0x1ec] sm:$0xf0]  ;;  %v926_v10 = vld [vmem:[%s1574_s1 + $0x1f0] sm:$0xf0] }
   0x3   :  { %v956_v5 = vld [vmem:[%s1574_s1 + $0x220] sm:$0xf]  ;;  %v1047_v6 = vld [vmem:[%s1574_s1 + $0x22c] sm:$0xf0]  ;;  %v925_v7 = vor.u32 %v1039_v4, %v924_v2  ;;  %v929_v12 = vor.u32 %v1037_v9, %v926_v10  ;;  %v1033_v20 = vld [vmem:[%s1574_s1 + $0x1c4] sm:$0xf] }
   0x4   :  { %v957_v8 = vor.u32 %v1047_v6, %v956_v5  ;;  %v780_v11 = vld [vmem:[%s1574_s1 + $0xc0] sm:$0xf]  ;;  %482 = vmatpush.bf16.msra.mxu0 %v797_v3  ;;  %v1003_v13 = vld [vmem:[%s1574_s1 + $0xcc] sm:$0xf0]  ;;  %v910_v22 = vld [vmem:[%s1574_s1 + $0x1d0] sm:$0xf0] }
   0x5   :  { %v908_v14 = vld [vmem:[%s1574_s1 + $0x1c0] sm:$0xf]  ;;  %v1035_v15 = vld [vmem:[%s1574_s1 + $0x1cc] sm:$0xf0]  ;;  %496 = vmatpush.bf16.msra.mxu1 %v925_v7  ;;  %v781_v16 = vor.u32 %v1003_v13, %v780_v11  ;;  %538 = vmatpush.bf16.msra.mxu2 %v929_v12  ;;  %v1005_v23 = vld [vmem:[%s1574_s1 + $0xe4] sm:$0xf]  ;;  %v913_v25 = vor.u32 %v1033_v20, %v910_v22 }
   0x6   :  { %516 = vmatpush.bf16.msra.mxu3 %v957_v8  ;;  %v909_v17 = vor.u32 %v1035_v15, %v908_v14  ;;  %v940_v18 = vld [vmem:[%s1574_s1 + $0x200] sm:$0xf]  ;;  %v1043_v19 = vld [vmem:[%s1574_s1 + $0x20c] sm:$0xf0]  ;;  %v798_v24 = vld [vmem:[%s1574_s1 + $0xf0] sm:$0xf0] }
   0x7   :  { %v941_v21 = vor.u32 %v1043_v19, %v940_v18  ;;  %v801_v26 = vor.u32 %v1005_v23, %v798_v24  ;;  %v764_v27 = vld [vmem:[%s1574_s1 + $0xa0] sm:$0xf]  ;;  %v999_v28 = vld [vmem:[%s1574_s1 + $0xac] sm:$0xf0]  ;;  %v1029_v32 = vld [vmem:[%s1574_s1 + $0x1a4] sm:$0xf] }
   0x8   :  { %v892_v29 = vld [vmem:[%s1574_s1 + $0x1a0] sm:$0xf]  ;;  %483 = vmatpush.bf16.msra.mxu0 %v781_v16  ;;  %v765_v30 = vor.u32 %v999_v28, %v764_v27  ;;  %v1031_v31 = vld [vmem:[%s1574_s1 + $0x1ac] sm:$0xf0]  ;;  %v894_v33 = vld [vmem:[%s1574_s1 + $0x1b0] sm:$0xf0] }
   0x9   :  { %497 = vmatpush.bf16.msra.mxu1 %v909_v17  ;;  %v893_v34 = vor.u32 %v1031_v31, %v892_v29  ;;  %v1001_v35 = vld [vmem:[%s1574_s1 + $0xc4] sm:$0xf]  ;;  %v782_v36 = vld [vmem:[%s1574_s1 + $0xd0] sm:$0xf0]  ;;  %v748_v37 = vld [vmem:[%s1574_s1 + $0x80] sm:$0xf]  ;;  %539 = vmatpush.bf16.msra.mxu2 %v913_v25  ;;  %v897_v38 = vor.u32 %v1029_v32, %v894_v33 }
   0xa   :  { %517 = vmatpush.bf16.msra.mxu3 %v941_v21  ;;  %v785_v39 = vor.u32 %v1001_v35, %v782_v36  ;;  %v995_v40 = vld [vmem:[%s1574_s1 + $0x8c] sm:$0xf0]  ;;  %v876_v41 = vld [vmem:[%s1574_s1 + $0x180] sm:$0xf]  ;;  %v1025_v43 = vld [vmem:[%s1574_s1 + $0x184] sm:$0xf] }
   0xb   :  { %v1027_v42 = vld [vmem:[%s1574_s1 + $0x18c] sm:$0xf0]  ;;  %v878_v44 = vld [vmem:[%s1574_s1 + $0x190] sm:$0xf0]  ;;  %v997_v45 = vld [vmem:[%s1574_s1 + $0xa4] sm:$0xf]  ;;  %v749_v46 = vor.u32 %v995_v40, %v748_v37 }
   0xc   :  { %484 = vmatpush.bf16.msra.mxu0 %v765_v30  ;;  %v766_v47 = vld [vmem:[%s1574_s1 + $0xb0] sm:$0xf0]  ;;  %v877_v48 = vor.u32 %v1027_v42, %v876_v41  ;;  %v732_v49 = vld [vmem:[%s1574_s1 + $0x60] sm:$0xf]  ;;  %v991_v50 = vld [vmem:[%s1574_s1 + $0x6c] sm:$0xf0]  ;;  %v881_v51 = vor.u32 %v1025_v43, %v878_v44 }
   0xd   :  { %498 = vmatpush.bf16.msra.mxu1 %v893_v34  ;;  %540 = vmatpush.bf16.msra.mxu2 %v897_v38  ;;  %v769_v52 = vor.u32 %v997_v45, %v766_v47  ;;  %v860_v53 = vld [vmem:[%s1574_s1 + $0x160] sm:$0xf]  ;;  %v1023_v54 = vld [vmem:[%s1574_s1 + $0x16c] sm:$0xf0]  ;;  %v1021_v55 = vld [vmem:[%s1574_s1 + $0x164] sm:$0xf]  ;;  %v733_v59 = vor.u32 %v991_v50, %v732_v49 }
   0xe   :  { %524 = vmatpush.bf16.msrb.mxu3 %v801_v26  ;;  %v862_v56 = vld [vmem:[%s1574_s1 + $0x170] sm:$0xf0]  ;;  %v993_v57 = vld [vmem:[%s1574_s1 + $0x84] sm:$0xf]  ;;  %v680_v60 = vld [vmem:[%s1575_s0 + $0x8] sm:$0xf]  ;;  %v861_v62 = vor.u32 %v1023_v54, %v860_v53 }
   0xf   :  { %v750_v58 = vld [vmem:[%s1574_s1 + $0x90] sm:$0xf0]  ;;  %v716_v63 = vld [vmem:[%s1574_s1 + $0x40] sm:$0xf]  ;;  %v987_v0 = vld [vmem:[%s1574_s1 + $0x4c] sm:$0xf0]  ;;  %v865_v2 = vor.u32 %v1021_v55, %v862_v56 }
  0x10   :  { %485 = vmatpush.bf16.msra.mxu0 %v749_v46  ;;  %v976_v61 = vld [vmem:[%s1575_s0 + $0x10] sm:$0xf0]  ;;  %v753_v3 = vor.u32 %v993_v57, %v750_v58  ;;  %v844_v4 = vld [vmem:[%s1574_s1 + $0x140] sm:$0xf]  ;;  %v1019_v5 = vld [vmem:[%s1574_s1 + $0x14c] sm:$0xf0]  ;;  %v717_v10 = vor.u32 %v987_v0, %v716_v63 }
  0x11   :  { %499 = vmatpush.bf16.msra.mxu1 %v877_v48  ;;  %v1210_v1 = vor.u32 %v976_v61, %v680_v60  ;;  %541 = vmatpush.bf16.msra.mxu2 %v881_v51  ;;  %v1017_v6 = vld [vmem:[%s1574_s1 + $0x144] sm:$0xf]  ;;  %v846_v7 = vld [vmem:[%s1574_s1 + $0x150] sm:$0xf0]  ;;  %v845_v11 = vor.u32 %v1019_v5, %v844_v4  ;;  %v700_v12 = vld [vmem:[%s1574_s1 + $0x20] sm:$0xf] }
  0x12   :  { %525 = vmatpush.bf16.msrb.mxu3 %v785_v39  ;;  %v989_v8 = vld [vmem:[%s1574_s1 + $0x64] sm:$0xf]  ;;  %v734_v9 = vld [vmem:[%s1574_s1 + $0x70] sm:$0xf0]  ;;  %v983_v13 = vld [vmem:[%s1574_s1 + $0x2c] sm:$0xf0]  ;;  %v849_v15 = vor.u32 %v1017_v6, %v846_v7 }
  0x13   :  { %970 = vmatmul.msk.bf16.vlgmr.msra.gmra.mxu3 %vm478_vm0, %v1210_v1  ;;  %v828_v14 = vld [vmem:[%s1574_s1 + $0x120] sm:$0xf]  ;;  %v737_v16 = vor.u32 %v989_v8, %v734_v9  ;;  %v1015_v17 = vld [vmem:[%s1574_s1 + $0x12c] sm:$0xf0]  ;;  %v1013_v18 = vld [vmem:[%s1574_s1 + $0x124] sm:$0xf]  ;;  %v701_v23 = vor.u32 %v983_v13, %v700_v12 }
  0x14   :  { %486 = vmatpush.bf16.msra.mxu0 %v733_v59  ;;  %v830_v19 = vld [vmem:[%s1574_s1 + $0x130] sm:$0xf0]  ;;  %v985_v20 = vld [vmem:[%s1574_s1 + $0x44] sm:$0xf]  ;;  %v684_v22 = vld [vmem:[%s1574_s1] sm:$0xf]  ;;  %v829_v27 = vor.u32 %v1015_v17, %v828_v14 }
  0x15   :  { %500 = vmatpush.bf16.msra.mxu1 %v861_v62  ;;  %542 = vmatpush.bf16.msra.mxu2 %v865_v2  ;;  %v718_v21 = vld [vmem:[%s1574_s1 + $0x50] sm:$0xf0]  ;;  %v979_v24 = vld [vmem:[%s1574_s1 + $0xc] sm:$0xf0]  ;;  %v812_v25 = vld [vmem:[%s1574_s1 + $0x100] sm:$0xf]  ;;  %v833_v32 = vor.u32 %v1013_v18, %v830_v19 }
  0x16   :  { %526 = vmatpush.bf16.msrb.mxu3 %v769_v52  ;;  %v1011_v26 = vld [vmem:[%s1574_s1 + $0x10c] sm:$0xf0]  ;;  %v1009_v28 = vld [vmem:[%s1574_s1 + $0x104] sm:$0xf]  ;;  %v814_v29 = vld [vmem:[%s1574_s1 + $0x110] sm:$0xf0]  ;;  %v721_v33 = vor.u32 %v985_v20, %v718_v21  ;;  %v685_v40 = vor.u32 %v979_v24, %v684_v22 }
  0x17   :  { %v981_v30 = vld [vmem:[%s1574_s1 + $0x24] sm:$0xf]  ;;  %v702_v31 = vld [vmem:[%s1574_s1 + $0x30] sm:$0xf0]  ;;  %v804_v36 = vld [vmem:[%s1574_s1 + $0xe8] sm:$0xf]  ;;  %v813_v44 = vor.u32 %v1011_v26, %v812_v25  ;;  %v817_v49 = vor.u32 %v1009_v28, %v814_v29 }
  0x18   :  { %487 = vmatpush.bf16.msra.mxu0 %v717_v10  ;;  %v1045_v34 = vld [vmem:[%s1574_s1 + $0x224] sm:$0xf]  ;;  %v958_v35 = vld [vmem:[%s1574_s1 + $0x230] sm:$0xf0]  ;;  %v1008_v37 = vld [vmem:[%s1574_s1 + $0xf4] sm:$0xf0]  ;;  %v705_v50 = vor.u32 %v981_v30, %v702_v31 }
  0x19   :  { %501 = vmatpush.bf16.msra.mxu1 %v845_v11  ;;  %543 = vmatpush.bf16.msra.mxu2 %v849_v15  ;;  %v964_v38 = vld [vmem:[%s1574_s1 + $0x228] sm:$0xf]  ;;  %v1048_v39 = vld [vmem:[%s1574_s1 + $0x234] sm:$0xf0]  ;;  %v672_v41 = vld [vmem:[%s1575_s0] sm:$0xf]  ;;  %v961_v45 = vor.u32 %v1045_v34, %v958_v35  ;;  %v805_v54 = vor.u32 %v1008_v37, %v804_v36 }
  0x1a   :  { %527 = vmatpush.bf16.msrb.mxu3 %v753_v3  ;;  %v975_v42 = vld [vmem:[%s1575_s0 + $0x8] sm:$0xf0]  ;;  %v974_v43 = vld [vmem:[%s1575_s0 + $0x4] sm:$0xf]  ;;  %v674_v46 = vld [vmem:[%s1575_s0 + $0xc] sm:$0xf0]  ;;  %v965_v55 = vor.u32 %v1048_v39, %v964_v38 }
  0x1b   :  { %v977_v47 = vld [vmem:[%s1574_s1 + $0x4] sm:$0xf]  ;;  %v686_v48 = vld [vmem:[%s1574_s1 + $0x10] sm:$0xf0]  ;;  %v788_v53 = vld [vmem:[%s1574_s1 + $0xc8] sm:$0xf]  ;;  %v1334_v59 = vor.u32 %v975_v42, %v672_v41  ;;  %v1345_v63 = vor.u32 %v974_v43, %v674_v46 }
  0x1c   :  { %488 = vmatpush.bf16.msra.mxu0 %v701_v23  ;;  %v1041_v51 = vld [vmem:[%s1574_s1 + $0x204] sm:$0xf]  ;;  %v942_v52 = vld [vmem:[%s1574_s1 + $0x210] sm:$0xf0]  ;;  %v1004_v56 = vld [vmem:[%s1574_s1 + $0xd4] sm:$0xf0]  ;;  %v689_v5 = vor.u32 %v977_v47, %v686_v48 }
  0x1d   :  { %502 = vmatpush.bf16.msra.mxu1 %v829_v27  ;;  %544 = vmatpush.bf16.msra.mxu2 %v833_v32  ;;  %v1006_v57 = vld [vmem:[%s1574_s1 + $0xec] sm:$0xf]  ;;  %v806_v58 = vld [vmem:[%s1574_s1 + $0xf8] sm:$0xf0]  ;;  %v948_v60 = vld [vmem:[%s1574_s1 + $0x208] sm:$0xf]  ;;  %v945_v0 = vor.u32 %v1041_v51, %v942_v52  ;;  %v789_v7 = vor.u32 %v1004_v56, %v788_v53 }
  0x1e   :  { %528 = vmatpush.bf16.msrb.mxu3 %v737_v16  ;;  %v1044_v61 = vld [vmem:[%s1574_s1 + $0x214] sm:$0xf0]  ;;  %v932_v62 = vld [vmem:[%s1574_s1 + $0x1e8] sm:$0xf]  ;;  %v1038_v3 = vld [vmem:[%s1574_s1 + $0x1ec] sm:$0xf]  ;;  %v809_v6 = vor.u32 %v1006_v57, %v806_v58 }
  0x1f   :  { %v1040_v2 = vld [vmem:[%s1574_s1 + $0x1f4] sm:$0xf0]  ;;  %v934_v4 = vld [vmem:[%s1574_s1 + $0x1f8] sm:$0xf0]  ;;  %v949_v8 = vor.u32 %v1044_v61, %v948_v60  ;;  %v1002_v9 = vld [vmem:[%s1574_s1 + $0xcc] sm:$0xf] }
  0x20   :  { %489 = vmatpush.bf16.msra.mxu0 %v685_v40  ;;  %v790_v10 = vld [vmem:[%s1574_s1 + $0xd8] sm:$0xf0]  ;;  %v933_v11 = vor.u32 %v1040_v2, %v932_v62  ;;  %v937_v12 = vor.u32 %v1038_v3, %v934_v4  ;;  %v772_v13 = vld [vmem:[%s1574_s1 + $0xa8] sm:$0xf]  ;;  %v1000_v14 = vld [vmem:[%s1574_s1 + $0xb4] sm:$0xf0] }
  0x21   :  { %503 = vmatpush.bf16.msra.mxu1 %v813_v44  ;;  %545 = vmatpush.bf16.msra.mxu2 %v817_v49  ;;  %v916_v15 = vld [vmem:[%s1574_s1 + $0x1c8] sm:$0xf]  ;;  %v1036_v16 = vld [vmem:[%s1574_s1 + $0x1d4] sm:$0xf0]  ;;  %v1034_v17 = vld [vmem:[%s1574_s1 + $0x1cc] sm:$0xf]  ;;  %v793_v19 = vor.u32 %v1002_v9, %v790_v10  ;;  %v773_v20 = vor.u32 %v1000_v14, %v772_v13 }
  0x22   :  { %529 = vmatpush.bf16.msrb.mxu3 %v721_v33  ;;  %v918_v18 = vld [vmem:[%s1574_s1 + $0x1d8] sm:$0xf0]  ;;  %v91_v21 = vld [vmem:[%s1576_s2] sm:$0xff]  ;;  %v998_v22 = vld [vmem:[%s1574_s1 + $0xac] sm:$0xf]  ;;  %v917_v24 = vor.u32 %v1036_v16, %v916_v15  ;;  %v1051_v29 = vmov 0  }
  0x23   :  { %490 = vmatmul.bf16.vlgmr.msra.gmra.mxu0 %v1334_v59  ;;  %v774_v23 = vld [vmem:[%s1574_s1 + $0xb8] sm:$0xf0]  ;;  %v921_v25 = vor.u32 %v1034_v17, %v918_v18  ;;  %v756_v26 = vld [vmem:[%s1574_s1 + $0x88] sm:$0xf]  ;;  %v996_v27 = vld [vmem:[%s1574_s1 + $0x94] sm:$0xf0]  ;;  %1050 = vset.pattern.permute.xlu0 %v1051_v29 }
  0x24   :  { %558 = vmatpush.bf16.msrb.mxu0 %v961_v45  ;;  %504 = vmatmul.bf16.vlgmr.msra.gmra.mxu1 %v1345_v63  ;;  %v900_v28 = vld [vmem:[%s1574_s1 + $0x1a8] sm:$0xf]  ;;  %v1032_v30 = vld [vmem:[%s1574_s1 + $0x1b4] sm:$0xf0]  ;;  %v1030_v31 = vld [vmem:[%s1574_s1 + $0x1ac] sm:$0xf]  ;;  %v777_v33 = vor.u32 %v998_v22, %v774_v23  ;;  %v757_v34 = vor.u32 %v996_v27, %v756_v26 }
  0x25   :  { %566 = vmatpush.bf16.msrb.mxu1 %v805_v54  ;;  %600 = vmatpush.bf16.msrb.mxu2 %v965_v55  ;;  %v902_v32 = vld [vmem:[%s1574_s1 + $0x1b8] sm:$0xf0]  ;;  %v994_v35 = vld [vmem:[%s1574_s1 + $0x8c] sm:$0xf]  ;;  %v901_v37 = vor.u32 %v1032_v30, %v900_v28  ;;  %v740_v39 = vld [vmem:[%s1574_s1 + $0x68] sm:$0xf] }
  0x26   :  { %530 = vmatpush.bf16.msrb.mxu3 %v705_v50  ;;  %546 = vmatmul.bf16.vlgmr.msra.gmra.mxu2 %v1345_v63  ;;  %v758_v36 = vld [vmem:[%s1574_s1 + $0x98] sm:$0xf0]  ;;  %v905_v38 = vor.u32 %v1030_v31, %v902_v32  ;;  %v992_v40 = vld [vmem:[%s1574_s1 + $0x74] sm:$0xf0]  ;;  %v884_v41 = vld [vmem:[%s1574_s1 + $0x188] sm:$0xf] }
  0x27   :  { %95 = vperm.xlu0 %1050, %v91_v21   ;;  %v1028_v42 = vld [vmem:[%s1574_s1 + $0x194] sm:$0xf0]  ;;  %v1026_v43 = vld [vmem:[%s1574_s1 + $0x18c] sm:$0xf]  ;;  %v886_v44 = vld [vmem:[%s1574_s1 + $0x198] sm:$0xf0]  ;;  %v761_v45 = vor.u32 %v994_v35, %v758_v36  ;;  %v741_v46 = vor.u32 %v992_v40, %v740_v39 }
  0x28   :  { %559 = vmatpush.bf16.msrb.mxu0 %v945_v0  ;;  %v92_v47 = vld [vmem:[%s1576_s2 + $0x8] sm:$0xff]  ;;  %v742_v49 = vld [vmem:[%s1574_s1 + $0x78] sm:$0xf0]  ;;  %v885_v50 = vor.u32 %v1028_v42, %v884_v41  ;;  %v889_v51 = vor.u32 %v1026_v43, %v886_v44  ;;  %v988_v53 = vld [vmem:[%s1574_s1 + $0x54] sm:$0xf0] }
  0x29   :  { %567 = vmatpush.bf16.msrb.mxu1 %v789_v7  ;;  %601 = vmatpush.bf16.msrb.mxu2 %v949_v8  ;;  %v990_v48 = vld [vmem:[%s1574_s1 + $0x6c] sm:$0xf]  ;;  %v724_v52 = vld [vmem:[%s1574_s1 + $0x48] sm:$0xf]  ;;  %v1024_v55 = vld [vmem:[%s1574_s1 + $0x174] sm:$0xf0] }
  0x2a   :  { %531 = vmatpush.bf16.msrb.mxu3 %v689_v5  ;;  %v868_v54 = vld [vmem:[%s1574_s1 + $0x168] sm:$0xf]  ;;  %v1022_v56 = vld [vmem:[%s1574_s1 + $0x16c] sm:$0xf]  ;;  %v870_v57 = vld [vmem:[%s1574_s1 + $0x178] sm:$0xf0]  ;;  %v745_v58 = vor.u32 %v990_v48, %v742_v49  ;;  %v725_v60 = vor.u32 %v988_v53, %v724_v52 }
  0x2b   :  { %v986_v61 = vld [vmem:[%s1574_s1 + $0x4c] sm:$0xf]  ;;  %v726_v62 = vld [vmem:[%s1574_s1 + $0x58] sm:$0xf0]  ;;  %v869_v0 = vor.u32 %v1024_v55, %v868_v54  ;;  %v873_v2 = vor.u32 %v1022_v56, %v870_v57  ;;  %v708_v3 = vld [vmem:[%s1574_s1 + $0x28] sm:$0xf] }
  0x2c   :  { %608 = vmatpush.bf16.msra.mxu0 %v809_v6  ;;  %v984_v4 = vld [vmem:[%s1574_s1 + $0x34] sm:$0xf0]  ;;  %v852_v5 = vld [vmem:[%s1574_s1 + $0x148] sm:$0xf]  ;;  %v1018_v7 = vld [vmem:[%s1574_s1 + $0x14c] sm:$0xf]  ;;  %v729_v9 = vor.u32 %v986_v61, %v726_v62 }
  0x2d   :  { %622 = vmatpush.bf16.msra.mxu2 %v937_v12  ;;  %532 = vmatmul.bf16.vlgmr.msrb.gmra.mxu3 %v1334_v59  ;;  %v1020_v6 = vld [vmem:[%s1574_s1 + $0x154] sm:$0xf0]  ;;  %v854_v8 = vld [vmem:[%s1574_s1 + $0x158] sm:$0xf0]  ;;  %v709_v10 = vor.u32 %v984_v4, %v708_v3  ;;  %v692_v15 = vld [vmem:[%s1574_s1 + $0x8] sm:$0xf] }
  0x2e   :  { %580 = vmatpush.bf16.msra.mxu3 %v933_v11  ;;  %568 = vmatpush.bf16.msrb.mxu1 %v773_v20  ;;  %v982_v11 = vld [vmem:[%s1574_s1 + $0x2c] sm:$0xf]  ;;  %v710_v12 = vld [vmem:[%s1574_s1 + $0x38] sm:$0xf0]  ;;  %v853_v13 = vor.u32 %v1020_v6, %v852_v5  ;;  %v857_v14 = vor.u32 %v1018_v7, %v854_v8  ;;  %v980_v16 = vld [vmem:[%s1574_s1 + $0x14] sm:$0xf0] }
  0x2f   :  { %100 = vperm.xlu0 %1050, %v92_v47   ;;  %v836_v17 = vld [vmem:[%s1574_s1 + $0x128] sm:$0xf]  ;;  %v1016_v18 = vld [vmem:[%s1574_s1 + $0x134] sm:$0xf0]  ;;  %v838_v20 = vld [vmem:[%s1574_s1 + $0x138] sm:$0xf0]  ;;  %v713_v21 = vor.u32 %v982_v11, %v710_v12 }
  0x30   :  { %609 = vmatpush.bf16.msra.mxu0 %v793_v19  ;;  %v1014_v19 = vld [vmem:[%s1574_s1 + $0x12c] sm:$0xf]  ;;  %v966_v23 = vld [vmem:[%s1574_s1 + $0x238] sm:$0xf0]  ;;  %v837_v27 = vor.u32 %v1016_v18, %v836_v17  ;;  %v820_v29 = vld [vmem:[%s1574_s1 + $0x108] sm:$0xf] }
  0x31   :  { %623 = vmatpush.bf16.msra.mxu2 %v921_v25  ;;  %v1046_v22 = vld [vmem:[%s1574_s1 + $0x22c] sm:$0xf]  ;;  %v694_v26 = vld [vmem:[%s1574_s1 + $0x18] sm:$0xf0]  ;;  %v841_v28 = vor.u32 %v1014_v19, %v838_v20  ;;  %v1012_v31 = vld [vmem:[%s1574_s1 + $0x114] sm:$0xf0] }
  0x32   :  { %581 = vmatpush.bf16.msra.mxu3 %v917_v24  ;;  %569 = vmatpush.bf16.msrb.mxu1 %v757_v34  ;;  %v693_v24 = vor.u32 %v980_v16, %v692_v15  ;;  %v978_v25 = vld [vmem:[%s1574_s1 + $0xc] sm:$0xf]  ;;  %v969_v30 = vor.u32 %v1046_v22, %v966_v23  ;;  %v950_v36 = vld [vmem:[%s1574_s1 + $0x218] sm:$0xf0] }
  0x33   :  { %971 = vmatmul.msk.bf16.vlgmr.msrb.gmra.mxu0 %vm478_vm0, %v1210_v1  ;;  %v1010_v32 = vld [vmem:[%s1574_s1 + $0x10c] sm:$0xf]  ;;  %v697_v34 = vor.u32 %v978_v25, %v694_v26 }
  0x34   :  { %610 = vmatpush.bf16.msra.mxu0 %v777_v33  ;;  %v822_v33 = vld [vmem:[%s1574_s1 + $0x118] sm:$0xf0]  ;;  %v1042_v35 = vld [vmem:[%s1574_s1 + $0x20c] sm:$0xf] }
  0x35   :  { %624 = vmatpush.bf16.msra.mxu2 %v905_v38  ;;  %v825_v38 = vor.u32 %v1010_v32, %v822_v33  ;;  %v953_v39 = vor.u32 %v1042_v35, %v950_v36 }
  0x36   :  { %582 = vmatpush.bf16.msra.mxu3 %v901_v37  ;;  %570 = vmatpush.bf16.msrb.mxu1 %v741_v46  ;;  %v821_v37 = vor.u32 %v1012_v31, %v820_v29 }
  0x37   :  { %972 = vmatmul.msk.bf16.vlgmr.msrb.gmra.mxu2 %vm478_vm0, %v1210_v1 }
  0x38   :  { %611 = vmatpush.bf16.msra.mxu0 %v761_v45 }
  0x39   :  { %625 = vmatpush.bf16.msra.mxu2 %v889_v51 }
  0x3a   :  { %583 = vmatpush.bf16.msra.mxu3 %v885_v50  ;;  %571 = vmatpush.bf16.msrb.mxu1 %v725_v60 }
  0x3c   :  { %612 = vmatpush.bf16.msra.mxu0 %v745_v58 }
  0x3d   :  { %626 = vmatpush.bf16.msra.mxu2 %v873_v2 }
  0x3e   :  { %584 = vmatpush.bf16.msra.mxu3 %v869_v0  ;;  %572 = vmatpush.bf16.msrb.mxu1 %v709_v10 }
  0x40   :  { %613 = vmatpush.bf16.msra.mxu0 %v729_v9 }
  0x41   :  { %627 = vmatpush.bf16.msra.mxu2 %v857_v14 }
  0x42   :  { %585 = vmatpush.bf16.msra.mxu3 %v853_v13  ;;  %573 = vmatpush.bf16.msrb.mxu1 %v693_v24 }
  0x44   :  { %614 = vmatpush.bf16.msra.mxu0 %v713_v21 }
  0x45   :  { %628 = vmatpush.bf16.msra.mxu2 %v841_v28  ;;  %574 = vmatmul.bf16.vlgmr.msrb.gmra.mxu1 %v1334_v59 }
  0x46   :  { %586 = vmatpush.bf16.msra.mxu3 %v837_v27  ;;  %642 = vmatpush.bf16.msra.mxu1 %v969_v30 }
  0x48   :  { %615 = vmatpush.bf16.msra.mxu0 %v697_v34 }
  0x49   :  { %629 = vmatpush.bf16.msra.mxu2 %v825_v38 }
  0x4a   :  { %587 = vmatpush.bf16.msra.mxu3 %v821_v37  ;;  %643 = vmatpush.bf16.msra.mxu1 %v953_v39 }
  0x4b   :  { %616 = vmatmul.bf16.vlgmr.msra.gmra.mxu0 %v1334_v59 }
  0x4c   :  { %630 = vmatmul.bf16.vlgmr.msra.gmra.mxu2 %v1345_v63 }
  0x4d   :  { %588 = vmatmul.bf16.vlgmr.msra.gmra.mxu3 %v1345_v63 }
  0x55   :  { %973 = vmatmul.msk.bf16.vlgmr.msra.gmra.mxu1 %vm478_vm0, %v1210_v1 }
  0x96   :  { %v519_v40 = vpop.f32.mrf.mxu3 }
  0x99   :  { %v96_v41 = vpop.permute.xlu0 %95 }
  0x9e   :  { %v521_v45 = vpop.f32.mrf.mxu3 }
  0xa0   :  { %v491_v42 = vpop.f32.mrf.mxu0 }
  0xa1   :  { %v505_v43 = vpop.f32.mrf.mxu1  ;;  %v492_v44 = vadd.f32 %v491_v42, %v96_v41  ;;  %v101_v48 = vpop.permute.xlu0 %100 }
  0xa3   :  { %v506_v46 = vadd.f32 %v505_v43, %v492_v44 }
  0xa5   :  { %v520_v47 = vadd.f32 %v519_v40, %v506_v46 }
  0xa7   :  { %v650_v49 = vmax.f32 %v520_v47, 0.0 }
  0xa8   :  { %v493_v59 = vpop.f32.mrf.mxu0 }
  0xa9   :  { %v547_v50 = vpop.f32.mrf.mxu2  ;;  %v507_v51 = vpop.f32.mrf.mxu1  ;;  %658 = vst [vmem:[%s1577_s3] sm:$0xff] %v650_v49  ;;  %v494_v63 = vadd.f32 %v493_v59, %v101_v48 }
  0xab   :  { %v508_v52 = vadd.f32 %v507_v51, %v494_v63 }
  0xad   :  { %v522_v54 = vadd.f32 %v521_v45, %v508_v52 }
  0xaf   :  { %v654_v56 = vmax.f32 %v522_v54, 0.0 }
  0xb0   :  { %v533_v1 = vpop.f32.mrf.mxu3  ;;  %v561_v58 = vpop.f32.mrf.mxu0 }
  0xb1   :  { %v534_v53 = vadd.f32 %v533_v1, %v96_v41  ;;  %v549_v57 = vpop.f32.mrf.mxu2  ;;  %662 = vst [vmem:[%s1577_s3 + $0x20] sm:$0xff] %v654_v56 }
  0xb3   :  { %v548_v55 = vadd.f32 %v547_v50, %v534_v53 }
  0xb5   :  { %v562_v60 = vadd.f32 %v561_v58, %v548_v55 }
  0xb7   :  { %v651_v62 = vmax.f32 %v562_v60, 0.0 }
  0xb8   :  { %v535_v61 = vpop.f32.mrf.mxu3  ;;  %v563_v4 = vpop.f32.mrf.mxu0 }
  0xb9   :  { %v536_v0 = vadd.f32 %v535_v61, %v101_v48  ;;  %659 = vst [vmem:[%s1577_s3 + $0x8] sm:$0xff] %v651_v62 }
  0xba   :  { %v603_v3 = vpop.f32.mrf.mxu2 }
  0xbb   :  { %v550_v2 = vadd.f32 %v549_v57, %v536_v0 }
  0xbd   :  { %v564_v5 = vadd.f32 %v563_v4, %v550_v2 }
  0xbf   :  { %v655_v6 = vmax.f32 %v564_v5, 0.0 }
  0xc1   :  { %663 = vst [vmem:[%s1577_s3 + $0x28] sm:$0xff] %v655_v6 }
  0xc2   :  { %v575_v7 = vpop.f32.mrf.mxu1  ;;  %v605_v8 = vpop.f32.mrf.mxu2 }
  0xc3   :  { %v576_v12 = vadd.f32 %v575_v7, %v96_v41 }
  0xc8   :  { %v617_v9 = vpop.f32.mrf.mxu0 }
  0xc9   :  { %v618_v11 = vadd.f32 %v617_v9, %v96_v41 }
  0xca   :  { %v577_v10 = vpop.f32.mrf.mxu1 }
  0xcb   :  { %v578_v21 = vadd.f32 %v577_v10, %v101_v48 }
  0xcf   :  { %v631_v14 = vpop.f32.mrf.mxu2 }
  0xd0   :  { %v589_v13 = vpop.f32.mrf.mxu3  ;;  %v632_v16 = vadd.f32 %v631_v14, %v618_v11  ;;  %v619_v22 = vpop.f32.mrf.mxu0 }
  0xd1   :  { %v590_v15 = vadd.f32 %v589_v13, %v576_v12  ;;  %v620_v27 = vadd.f32 %v619_v22, %v101_v48 }
  0xd2   :  { %v645_v19 = vpop.f32.mrf.mxu1 }
  0xd3   :  { %v604_v17 = vadd.f32 %v603_v3, %v590_v15  ;;  %v646_v20 = vadd.f32 %v645_v19, %v632_v16 }
  0xd5   :  { %v652_v18 = vmax.f32 %v604_v17, 0.0  ;;  %v653_v23 = vmax.f32 %v646_v20, 0.0 }
  0xd7   :  { %660 = vst [vmem:[%s1577_s3 + $0x10] sm:$0xff] %v652_v18  ;;  %v633_v26 = vpop.f32.mrf.mxu2 }
  0xd8   :  { %v591_v24 = vpop.f32.mrf.mxu3  ;;  %661 = vst [vmem:[%s1577_s3 + $0x18] sm:$0xff] %v653_v23  ;;  %v634_v29 = vadd.f32 %v633_v26, %v620_v27 }
  0xd9   :  { %v592_v25 = vadd.f32 %v591_v24, %v578_v21 }
  0xda   :  { %v647_v31 = vpop.f32.mrf.mxu1 }
  0xdb   :  { %v606_v28 = vadd.f32 %v605_v8, %v592_v25  ;;  %v648_v32 = vadd.f32 %v647_v31, %v634_v29 }
  0xdd   :  { %v656_v30 = vmax.f32 %v606_v28, 0.0  ;;  %v657_v33 = vmax.f32 %v648_v32, 0.0 }
  0xdf   :  { %664 = vst [vmem:[%s1577_s3 + $0x30] sm:$0xff] %v656_v30 }
  0xe0   :  { %665 = vst [vmem:[%s1577_s3 + $0x38] sm:$0xff] %v657_v33 }

// kernel: hrnn_forward.12
= control target key start
LH: loop header
LB: loop body
LE: loop exit
PB: predicated region body
PF: predicated region fallthrough
CT: control target
= control target key end

     0   :  { %vm892_vm0 = vcmask 130048   ;;  %s3099_s1 = inlined_call_operand.vmem [shape: bf16[144,2048], index: 1, kind: input, shape index: {}]   ;;  %s3100_s0 = inlined_call_operand.vmem [shape: bf16[8,144], index: 0, kind: input, shape index: {}]   ;;  %s3101_s2 = inlined_call_operand.vmem [shape: f32[8,1], index: 2, kind: input, shape index: {}]   ;;  %s3102_s3 = inlined_call_operand.vmem [shape: f32[8,2048], index: 3, kind: output, shape index: {}]  }
   0x1   :  { %v1798_v0 = vld [vmem:[%s3099_s1 + $0x380] sm:$0xf]  ;;  %v1806_v5 = vld [vmem:[%s3099_s1 + $0x388] sm:$0xf]  ;;  %v2052_v9 = vld [vmem:[%s3099_s1 + $0x384] sm:$0xf] }
   0x2   :  { %v2060_v1 = vld [vmem:[%s3099_s1 + $0x3bc] sm:$0xf0]  ;;  %v2061_v6 = vld [vmem:[%s3099_s1 + $0x3c4] sm:$0xf0]  ;;  %v1800_v10 = vld [vmem:[%s3099_s1 + $0x3c0] sm:$0xf0] }
   0x3   :  { %v1862_v2 = vld [vmem:[%s3099_s1 + $0x400] sm:$0xf]  ;;  %v1799_v3 = vor.u32 %v2060_v1, %v1798_v0  ;;  %v1807_v8 = vor.u32 %v2061_v6, %v1806_v5  ;;  %v1803_v12 = vor.u32 %v2052_v9, %v1800_v10  ;;  %v1742_v14 = vld [vmem:[%s3099_s1 + $0x308] sm:$0xf]  ;;  %v2036_v18 = vld [vmem:[%s3099_s1 + $0x304] sm:$0xf] }
   0x4   :  { %v2076_v4 = vld [vmem:[%s3099_s1 + $0x43c] sm:$0xf0]  ;;  %v2045_v15 = vld [vmem:[%s3099_s1 + $0x344] sm:$0xf0]  ;;  %v1736_v19 = vld [vmem:[%s3099_s1 + $0x340] sm:$0xf0] }
   0x5   :  { %v1863_v7 = vor.u32 %v2076_v4, %v1862_v2  ;;  %v1734_v11 = vld [vmem:[%s3099_s1 + $0x300] sm:$0xf]  ;;  %896 = vmatpush.bf16.msra.mxu0 %v1799_v3  ;;  %948 = vmatpush.bf16.msra.mxu1 %v1807_v8  ;;  %v1743_v17 = vor.u32 %v2045_v15, %v1742_v14  ;;  %v2068_v20 = vld [vmem:[%s3099_s1 + $0x404] sm:$0xf]  ;;  %v1739_v21 = vor.u32 %v2036_v18, %v1736_v19  ;;  %v1678_v26 = vld [vmem:[%s3099_s1 + $0x288] sm:$0xf] }
   0x6   :  { %v2044_v13 = vld [vmem:[%s3099_s1 + $0x33c] sm:$0xf0]  ;;  %v1864_v22 = vld [vmem:[%s3099_s1 + $0x440] sm:$0xf0]  ;;  %v2029_v27 = vld [vmem:[%s3099_s1 + $0x2c4] sm:$0xf0] }
   0x7   :  { %916 = vmatpush.bf16.msra.mxu2 %v1863_v7  ;;  %v1735_v16 = vor.u32 %v2044_v13, %v1734_v11  ;;  %v1670_v23 = vld [vmem:[%s3099_s1 + $0x280] sm:$0xf]  ;;  %v1867_v25 = vor.u32 %v2068_v20, %v1864_v22  ;;  %v1870_v28 = vld [vmem:[%s3099_s1 + $0x408] sm:$0xf]  ;;  %v2020_v31 = vld [vmem:[%s3099_s1 + $0x284] sm:$0xf]  ;;  %v1679_v33 = vor.u32 %v2029_v27, %v1678_v26 }
   0x8   :  { %v2028_v24 = vld [vmem:[%s3099_s1 + $0x2bc] sm:$0xf0]  ;;  %v2077_v30 = vld [vmem:[%s3099_s1 + $0x444] sm:$0xf0]  ;;  %v1672_v32 = vld [vmem:[%s3099_s1 + $0x2c0] sm:$0xf0] }
   0x9   :  { %897 = vmatpush.bf16.msra.mxu0 %v1735_v16  ;;  %v1671_v29 = vor.u32 %v2028_v24, %v1670_v23  ;;  %949 = vmatpush.bf16.msra.mxu1 %v1743_v17  ;;  %v1871_v34 = vor.u32 %v2077_v30, %v1870_v28  ;;  %v2182_v35 = vld [vmem:[%s3100_s0] sm:$0xff]  ;;  %v2053_v36 = vld [vmem:[%s3099_s1 + $0x38c] sm:$0xf]  ;;  %v1675_v38 = vor.u32 %v2020_v31, %v1672_v32  ;;  %v1614_v42 = vld [vmem:[%s3099_s1 + $0x208] sm:$0xf] }
   0xa   :  { %942 = vmatpush.bf16.msra.mxu3 %v1867_v25  ;;  %v1808_v37 = vld [vmem:[%s3099_s1 + $0x3c8] sm:$0xf0]  ;;  %v168_v39 = vunpack.c.h.b16 %v2182_v35  ;;  %v1606_v40 = vld [vmem:[%s3099_s1 + $0x200] sm:$0xf]  ;;  %v2013_v44 = vld [vmem:[%s3099_s1 + $0x244] sm:$0xf0] }
   0xb   :  { %922 = vmatpush.bf16.msrb.mxu2 %v1803_v12  ;;  %v2012_v41 = vld [vmem:[%s3099_s1 + $0x23c] sm:$0xf0]  ;;  %v1811_v43 = vor.u32 %v2053_v36, %v1808_v37  ;;  %v2004_v45 = vld [vmem:[%s3099_s1 + $0x204] sm:$0xf]  ;;  %v2037_v49 = vld [vmem:[%s3099_s1 + $0x30c] sm:$0xf]  ;;  %v1615_v51 = vor.u32 %v2013_v44, %v1614_v42  ;;  %v167_v42 = vunpack.c.l.b16 %v2182_v35 }
   0xc   :  { %v1608_v46 = vld [vmem:[%s3099_s1 + $0x240] sm:$0xf0]  ;;  %v2209_v47 = vpack.c.b16 %v168_v39, %v168_v39  ;;  %v1607_v48 = vor.u32 %v2012_v41, %v1606_v40  ;;  %v1744_v50 = vld [vmem:[%s3099_s1 + $0x348] sm:$0xf0]  ;;  %v1542_v52 = vld [vmem:[%s3099_s1 + $0x180] sm:$0xf] }
   0xd   :  { %898 = vmatpush.bf16.msra.mxu0 %v1671_v29  ;;  %950 = vmatpush.bf16.msra.mxu1 %v1679_v33  ;;  %v1996_v53 = vld [vmem:[%s3099_s1 + $0x1bc] sm:$0xf0]  ;;  %v1611_v54 = vor.u32 %v2004_v45, %v1608_v46  ;;  %v1550_v55 = vld [vmem:[%s3099_s1 + $0x188] sm:$0xf]  ;;  %v1747_v57 = vor.u32 %v2037_v49, %v1744_v50  ;;  %v1988_v58 = vld [vmem:[%s3099_s1 + $0x184] sm:$0xf] }
   0xe   :  { %968 = vmatpush.bf16.msrb.mxu3 %v1871_v34  ;;  %v1997_v56 = vld [vmem:[%s3099_s1 + $0x1c4] sm:$0xf0]  ;;  %1924 = vmatmul.msk.bf16.vlgmr.msra.gmra.mxu2 %vm892_vm0, %v2209_v47  ;;  %v1544_v59 = vld [vmem:[%s3099_s1 + $0x1c0] sm:$0xf0]  ;;  %v1543_v60 = vor.u32 %v1996_v53, %v1542_v52  ;;  %v2021_v61 = vld [vmem:[%s3099_s1 + $0x28c] sm:$0xf]  ;;  %v2347_v52 = vpack.c.b16 %v167_v42, %v167_v42 }
   0xf   :  { %923 = vmatpush.bf16.msrb.mxu2 %v1739_v21  ;;  %1925 = vmatmul.msk.bf16.vlgmr.msra.gmra.mxu3 %vm892_vm0, %v2209_v47  ;;  %v1680_v62 = vld [vmem:[%s3099_s1 + $0x2c8] sm:$0xf0]  ;;  %v1551_v63 = vor.u32 %v1997_v56, %v1550_v55  ;;  %v1478_v0 = vld [vmem:[%s3099_s1 + $0x100] sm:$0xf]  ;;  %v1547_v2 = vor.u32 %v1988_v58, %v1544_v59  ;;  %v1486_v3 = vld [vmem:[%s3099_s1 + $0x108] sm:$0xf] }
  0x10   :  { %v1980_v1 = vld [vmem:[%s3099_s1 + $0x13c] sm:$0xf0]  ;;  %v1981_v4 = vld [vmem:[%s3099_s1 + $0x144] sm:$0xf0]  ;;  %v1683_v5 = vor.u32 %v2021_v61, %v1680_v62  ;;  %v1972_v6 = vld [vmem:[%s3099_s1 + $0x104] sm:$0xf] }
  0x11   :  { %899 = vmatpush.bf16.msra.mxu0 %v1607_v48  ;;  %951 = vmatpush.bf16.msra.mxu1 %v1615_v51  ;;  %v1480_v7 = vld [vmem:[%s3099_s1 + $0x140] sm:$0xf0]  ;;  %v1479_v8 = vor.u32 %v1980_v1, %v1478_v0  ;;  %v2005_v9 = vld [vmem:[%s3099_s1 + $0x20c] sm:$0xf]  ;;  %v1487_v11 = vor.u32 %v1981_v4, %v1486_v3  ;;  %v1414_v12 = vld [vmem:[%s3099_s1 + $0x80] sm:$0xf] }
  0x12   :  { %974 = vmatpush.bf16.msra.mxu3 %v1811_v43  ;;  %v1616_v10 = vld [vmem:[%s3099_s1 + $0x248] sm:$0xf0]  ;;  %v1964_v13 = vld [vmem:[%s3099_s1 + $0xbc] sm:$0xf0]  ;;  %v1483_v14 = vor.u32 %v1972_v6, %v1480_v7  ;;  %v1422_v15 = vld [vmem:[%s3099_s1 + $0x88] sm:$0xf] }
  0x13   :  { %924 = vmatpush.bf16.msrb.mxu2 %v1675_v38  ;;  %v1965_v16 = vld [vmem:[%s3099_s1 + $0xc4] sm:$0xf0]  ;;  %v1619_v17 = vor.u32 %v2005_v9, %v1616_v10  ;;  %v1956_v18 = vld [vmem:[%s3099_s1 + $0x84] sm:$0xf]  ;;  %v1989_v20 = vld [vmem:[%s3099_s1 + $0x18c] sm:$0xf]  ;;  %v1415_v21 = vor.u32 %v1964_v13, %v1414_v12 }
  0x14   :  { %v1416_v19 = vld [vmem:[%s3099_s1 + $0xc0] sm:$0xf0]  ;;  %v1552_v22 = vld [vmem:[%s3099_s1 + $0x1c8] sm:$0xf0]  ;;  %v1350_v23 = vld [vmem:[%s3099_s1] sm:$0xf]  ;;  %v1423_v25 = vor.u32 %v1965_v16, %v1422_v15 }
  0x15   :  { %900 = vmatpush.bf16.msra.mxu0 %v1543_v60  ;;  %952 = vmatpush.bf16.msra.mxu1 %v1551_v63  ;;  %v1948_v24 = vld [vmem:[%s3099_s1 + $0x3c] sm:$0xf0]  ;;  %v1358_v26 = vld [vmem:[%s3099_s1 + $0x8] sm:$0xf]  ;;  %v1940_v28 = vld [vmem:[%s3099_s1 + $0x4] sm:$0xf]  ;;  %v1419_v29 = vor.u32 %v1956_v18, %v1416_v19  ;;  %v1555_v33 = vor.u32 %v1989_v20, %v1552_v22 }
  0x16   :  { %975 = vmatpush.bf16.msra.mxu3 %v1747_v57  ;;  %v1949_v27 = vld [vmem:[%s3099_s1 + $0x44] sm:$0xf0]  ;;  %v1352_v30 = vld [vmem:[%s3099_s1 + $0x40] sm:$0xf0]  ;;  %v2069_v31 = vld [vmem:[%s3099_s1 + $0x40c] sm:$0xf]  ;;  %v1351_v38 = vor.u32 %v1948_v24, %v1350_v23 }
  0x17   :  { %925 = vmatpush.bf16.msrb.mxu2 %v1611_v54  ;;  %v1872_v32 = vld [vmem:[%s3099_s1 + $0x448] sm:$0xf0]  ;;  %v1878_v36 = vld [vmem:[%s3099_s1 + $0x410] sm:$0xf]  ;;  %v1359_v43 = vor.u32 %v1949_v27, %v1358_v26  ;;  %v1355_v45 = vor.u32 %v1940_v28, %v1352_v30  ;;  %v2054_v46 = vld [vmem:[%s3099_s1 + $0x394] sm:$0xf] }
  0x18   :  { %v1973_v34 = vld [vmem:[%s3099_s1 + $0x10c] sm:$0xf]  ;;  %v2078_v37 = vld [vmem:[%s3099_s1 + $0x44c] sm:$0xf0]  ;;  %v1875_v44 = vor.u32 %v2069_v31, %v1872_v32  ;;  %v1816_v48 = vld [vmem:[%s3099_s1 + $0x3d0] sm:$0xf0] }
  0x19   :  { %901 = vmatpush.bf16.msra.mxu0 %v1479_v8  ;;  %953 = vmatpush.bf16.msra.mxu1 %v1487_v11  ;;  %v1488_v39 = vld [vmem:[%s3099_s1 + $0x148] sm:$0xf0]  ;;  %v1814_v40 = vld [vmem:[%s3099_s1 + $0x390] sm:$0xf]  ;;  %v1879_v49 = vor.u32 %v2078_v37, %v1878_v36  ;;  %v1819_v56 = vor.u32 %v2054_v46, %v1816_v48  ;;  %v2038_v57 = vld [vmem:[%s3099_s1 + $0x314] sm:$0xf] }
  0x1a   :  { %976 = vmatpush.bf16.msra.mxu3 %v1683_v5  ;;  %v2062_v41 = vld [vmem:[%s3099_s1 + $0x3cc] sm:$0xf0]  ;;  %v1491_v50 = vor.u32 %v1973_v34, %v1488_v39  ;;  %v1957_v51 = vld [vmem:[%s3099_s1 + $0x8c] sm:$0xf]  ;;  %v1752_v58 = vld [vmem:[%s3099_s1 + $0x350] sm:$0xf0] }
  0x1b   :  { %926 = vmatpush.bf16.msrb.mxu2 %v1547_v2  ;;  %v1815_v35 = vor.u32 %v2062_v41, %v1814_v40  ;;  %v1424_v53 = vld [vmem:[%s3099_s1 + $0xc8] sm:$0xf0]  ;;  %v1750_v54 = vld [vmem:[%s3099_s1 + $0x310] sm:$0xf]  ;;  %v2070_v59 = vld [vmem:[%s3099_s1 + $0x414] sm:$0xf]  ;;  %v1755_v4 = vor.u32 %v2038_v57, %v1752_v58 }
  0x1c   :  { %v2046_v55 = vld [vmem:[%s3099_s1 + $0x34c] sm:$0xf0]  ;;  %v1880_v60 = vld [vmem:[%s3099_s1 + $0x450] sm:$0xf0]  ;;  %v1427_v61 = vor.u32 %v1957_v51, %v1424_v53  ;;  %v1941_v63 = vld [vmem:[%s3099_s1 + $0xc] sm:$0xf] }
  0x1d   :  { %902 = vmatpush.bf16.msra.mxu0 %v1415_v21  ;;  %954 = vmatpush.bf16.msra.mxu1 %v1423_v25  ;;  %v1751_v62 = vor.u32 %v2046_v55, %v1750_v54  ;;  %v1883_v0 = vor.u32 %v2070_v59, %v1880_v60  ;;  %v1360_v1 = vld [vmem:[%s3099_s1 + $0x48] sm:$0xf0]  ;;  %v1686_v2 = vld [vmem:[%s3099_s1 + $0x290] sm:$0xf]  ;;  %v1822_v5 = vld [vmem:[%s3099_s1 + $0x398] sm:$0xf] }
  0x1e   :  { %977 = vmatpush.bf16.msra.mxu3 %v1619_v17  ;;  %v2030_v3 = vld [vmem:[%s3099_s1 + $0x2cc] sm:$0xf0]  ;;  %v2063_v6 = vld [vmem:[%s3099_s1 + $0x3d4] sm:$0xf0]  ;;  %v160_v7 = vld [vmem:[%s3101_s2] sm:$0xff]  ;;  %v2086_v10 = vmov 0   ;;  %v1363_v11 = vor.u32 %v1941_v63, %v1360_v1 }
  0x1f   :  { %927 = vmatpush.bf16.msrb.mxu2 %v1483_v14  ;;  %1926 = vmatmul.msk.bf16.vlgmr.msrb.gmra.mxu3 %vm892_vm0, %v2209_v47  ;;  %v2022_v8 = vld [vmem:[%s3099_s1 + $0x294] sm:$0xf]  ;;  %v1687_v12 = vor.u32 %v2030_v3, %v1686_v2  ;;  %v1823_v13 = vor.u32 %v2063_v6, %v1822_v5  ;;  %v1622_v14 = vld [vmem:[%s3099_s1 + $0x210] sm:$0xf]  ;;  %v1758_v17 = vld [vmem:[%s3099_s1 + $0x318] sm:$0xf] }
  0x20   :  { %v1688_v9 = vld [vmem:[%s3099_s1 + $0x2d0] sm:$0xf0]  ;;  %2085 = vset.pattern.permute.xlu0 %v2086_v10  ;;  %v2014_v15 = vld [vmem:[%s3099_s1 + $0x24c] sm:$0xf0]  ;;  %v2047_v18 = vld [vmem:[%s3099_s1 + $0x354] sm:$0xf0] }
  0x21   :  { %903 = vmatpush.bf16.msra.mxu0 %v1351_v38  ;;  %955 = vmatpush.bf16.msra.mxu1 %v1359_v43  ;;  %v1691_v16 = vor.u32 %v2022_v8, %v1688_v9  ;;  %v2006_v19 = vld [vmem:[%s3099_s1 + $0x214] sm:$0xf]  ;;  %v1623_v21 = vor.u32 %v2014_v15, %v1622_v14  ;;  %v1759_v22 = vor.u32 %v2047_v18, %v1758_v17  ;;  %v1558_v23 = vld [vmem:[%s3099_s1 + $0x190] sm:$0xf]  ;;  %v1694_v26 = vld [vmem:[%s3099_s1 + $0x298] sm:$0xf] }
  0x22   :  { %978 = vmatpush.bf16.msra.mxu3 %v1555_v33  ;;  %163 = vperm.xlu0 %2085, %v160_v7   ;;  %v1624_v20 = vld [vmem:[%s3099_s1 + $0x250] sm:$0xf0]  ;;  %v1998_v24 = vld [vmem:[%s3099_s1 + $0x1cc] sm:$0xf0]  ;;  %v2031_v27 = vld [vmem:[%s3099_s1 + $0x2d4] sm:$0xf0] }
  0x23   :  { %928 = vmatpush.bf16.msrb.mxu2 %v1419_v29  ;;  %v1627_v25 = vor.u32 %v2006_v19, %v1624_v20  ;;  %v1990_v28 = vld [vmem:[%s3099_s1 + $0x194] sm:$0xf]  ;;  %v1559_v30 = vor.u32 %v1998_v24, %v1558_v23  ;;  %v2055_v31 = vld [vmem:[%s3099_s1 + $0x39c] sm:$0xf]  ;;  %v1695_v33 = vor.u32 %v2031_v27, %v1694_v26  ;;  %v1494_v34 = vld [vmem:[%s3099_s1 + $0x110] sm:$0xf] }
  0x24   :  { %904 = vmatmul.bf16.vlgmr.msra.gmra.mxu0 %v2347_v52  ;;  %956 = vmatmul.bf16.vlgmr.msra.gmra.mxu1 %v2347_v52  ;;  %v1560_v29 = vld [vmem:[%s3099_s1 + $0x1d0] sm:$0xf0]  ;;  %v1824_v32 = vld [vmem:[%s3099_s1 + $0x3d8] sm:$0xf0]  ;;  %v1982_v36 = vld [vmem:[%s3099_s1 + $0x14c] sm:$0xf0] }
  0x25   :  { %994 = vmatpush.bf16.msrb.mxu0 %v1875_v44  ;;  %1020 = vmatpush.bf16.msrb.mxu1 %v1879_v49  ;;  %v1563_v37 = vor.u32 %v1990_v28, %v1560_v29  ;;  %v1630_v38 = vld [vmem:[%s3099_s1 + $0x218] sm:$0xf]  ;;  %v1827_v40 = vor.u32 %v2055_v31, %v1824_v32  ;;  %v1974_v41 = vld [vmem:[%s3099_s1 + $0x114] sm:$0xf]  ;;  %v1495_v43 = vor.u32 %v1982_v36, %v1494_v34  ;;  %v2039_v44 = vld [vmem:[%s3099_s1 + $0x31c] sm:$0xf] }
  0x26   :  { %979 = vmatpush.bf16.msra.mxu3 %v1491_v50  ;;  %v2015_v39 = vld [vmem:[%s3099_s1 + $0x254] sm:$0xf0]  ;;  %v1496_v42 = vld [vmem:[%s3099_s1 + $0x150] sm:$0xf0]  ;;  %v1430_v48 = vld [vmem:[%s3099_s1 + $0x90] sm:$0xf] }
  0x27   :  { %929 = vmatpush.bf16.msrb.mxu2 %v1355_v45  ;;  %v1760_v45 = vld [vmem:[%s3099_s1 + $0x358] sm:$0xf0]  ;;  %v1631_v46 = vor.u32 %v2015_v39, %v1630_v38  ;;  %v1966_v49 = vld [vmem:[%s3099_s1 + $0xcc] sm:$0xf0]  ;;  %v1499_v50 = vor.u32 %v1974_v41, %v1496_v42  ;;  %v1999_v51 = vld [vmem:[%s3099_s1 + $0x1d4] sm:$0xf0] }
  0x28   :  { %v1763_v53 = vor.u32 %v2039_v44, %v1760_v45  ;;  %v1958_v54 = vld [vmem:[%s3099_s1 + $0x94] sm:$0xf]  ;;  %v2023_v57 = vld [vmem:[%s3099_s1 + $0x29c] sm:$0xf]  ;;  %v1366_v60 = vld [vmem:[%s3099_s1 + $0x10] sm:$0xf] }
  0x29   :  { %1026 = vmatpush.bf16.msra.mxu0 %v1819_v56  ;;  %1046 = vmatpush.bf16.msra.mxu1 %v1883_v0  ;;  %v1432_v55 = vld [vmem:[%s3099_s1 + $0xd0] sm:$0xf0]  ;;  %v1431_v56 = vor.u32 %v1966_v49, %v1430_v48  ;;  %v1696_v58 = vld [vmem:[%s3099_s1 + $0x2d8] sm:$0xf0]  ;;  %v1983_v0 = vld [vmem:[%s3099_s1 + $0x154] sm:$0xf0] }
  0x2a   :  { %930 = vmatmul.bf16.vlgmr.msrb.gmra.mxu2 %v2347_v52  ;;  %980 = vmatpush.bf16.msra.mxu3 %v1427_v61  ;;  %v1950_v61 = vld [vmem:[%s3099_s1 + $0x4c] sm:$0xf0]  ;;  %v1435_v63 = vor.u32 %v1958_v54, %v1432_v55  ;;  %v1886_v1 = vld [vmem:[%s3099_s1 + $0x418] sm:$0xf]  ;;  %v1699_v3 = vor.u32 %v2023_v57, %v1696_v58  ;;  %v1368_v5 = vld [vmem:[%s3099_s1 + $0x50] sm:$0xf0] }
  0x2b   :  { %1000 = vmatpush.bf16.msra.mxu2 %v1815_v35  ;;  %v1566_v35 = vld [vmem:[%s3099_s1 + $0x198] sm:$0xf]  ;;  %v1367_v6 = vor.u32 %v1950_v61, %v1366_v60  ;;  %v2007_v7 = vld [vmem:[%s3099_s1 + $0x21c] sm:$0xf]  ;;  %v1830_v9 = vld [vmem:[%s3099_s1 + $0x3a0] sm:$0xf] }
  0x2c   :  { %v1567_v59 = vor.u32 %v1999_v51, %v1566_v35  ;;  %v2079_v2 = vld [vmem:[%s3099_s1 + $0x454] sm:$0xf0]  ;;  %v1632_v8 = vld [vmem:[%s3099_s1 + $0x258] sm:$0xf0]  ;;  %v2056_v19 = vld [vmem:[%s3099_s1 + $0x3a4] sm:$0xf] }
  0x2d   :  { %1027 = vmatpush.bf16.msra.mxu0 %v1755_v4  ;;  %v1942_v4 = vld [vmem:[%s3099_s1 + $0x14] sm:$0xf]  ;;  %v1888_v14 = vld [vmem:[%s3099_s1 + $0x458] sm:$0xf0]  ;;  %v1967_v17 = vld [vmem:[%s3099_s1 + $0xd4] sm:$0xf0]  ;;  %v1635_v18 = vor.u32 %v2007_v7, %v1632_v8 }
  0x2e   :  { %981 = vmatpush.bf16.msra.mxu3 %v1363_v11  ;;  %v1887_v11 = vor.u32 %v2079_v2, %v1886_v1  ;;  %v1371_v15 = vor.u32 %v1942_v4, %v1368_v5  ;;  %v1832_v20 = vld [vmem:[%s3099_s1 + $0x3e0] sm:$0xf0]  ;;  %v1991_v23 = vld [vmem:[%s3099_s1 + $0x19c] sm:$0xf]  ;;  %v1766_v26 = vld [vmem:[%s3099_s1 + $0x320] sm:$0xf] }
  0x2f   :  { %1001 = vmatpush.bf16.msra.mxu2 %v1751_v62  ;;  %v1502_v62 = vld [vmem:[%s3099_s1 + $0x118] sm:$0xf]  ;;  %v1568_v24 = vld [vmem:[%s3099_s1 + $0x1d8] sm:$0xf0]  ;;  %v2048_v27 = vld [vmem:[%s3099_s1 + $0x35c] sm:$0xf0]  ;;  %v1835_v28 = vor.u32 %v2056_v19, %v1832_v20 }
  0x30   :  { %v1503_v10 = vor.u32 %v1983_v0, %v1502_v62  ;;  %v1374_v29 = vld [vmem:[%s3099_s1 + $0x18] sm:$0xf]  ;;  %v2040_v31 = vld [vmem:[%s3099_s1 + $0x324] sm:$0xf]  ;;  %v1571_v32 = vor.u32 %v1991_v23, %v1568_v24  ;;  %v1894_v34 = vld [vmem:[%s3099_s1 + $0x420] sm:$0xf] }
  0x31   :  { %1028 = vmatpush.bf16.msra.mxu0 %v1691_v16  ;;  %982 = vmatmul.bf16.vlgmr.msra.gmra.mxu3 %v2347_v52  ;;  %v1438_v16 = vld [vmem:[%s3099_s1 + $0x98] sm:$0xf]  ;;  %v2080_v36 = vld [vmem:[%s3099_s1 + $0x45c] sm:$0xf0]  ;;  %v1975_v38 = vld [vmem:[%s3099_s1 + $0x11c] sm:$0xf] }
  0x32   :  { %1052 = vmatpush.bf16.msrb.mxu3 %v1823_v13  ;;  %v2071_v13 = vld [vmem:[%s3099_s1 + $0x41c] sm:$0xf]  ;;  %v1702_v41 = vld [vmem:[%s3099_s1 + $0x2a0] sm:$0xf]  ;;  %v1895_v44 = vor.u32 %v2080_v36, %v1894_v34  ;;  %v1838_v45 = vld [vmem:[%s3099_s1 + $0x3a8] sm:$0xf] }
  0x33   :  { %1002 = vmatpush.bf16.msra.mxu2 %v1687_v12  ;;  %v2064_v12 = vld [vmem:[%s3099_s1 + $0x3dc] sm:$0xf0]  ;;  %v1504_v39 = vld [vmem:[%s3099_s1 + $0x158] sm:$0xf0]  ;;  %v2024_v49 = vld [vmem:[%s3099_s1 + $0x2a4] sm:$0xf] }
  0x34   :  { %1927 = vmatmul.msk.bf16.vlgmr.msrb.gmra.mxu0 %vm892_vm0, %v2209_v47  ;;  %1928 = vmatmul.msk.bf16.vlgmr.msrb.gmra.mxu1 %vm892_vm0, %v2209_v47  ;;  %v2032_v42 = vld [vmem:[%s3099_s1 + $0x2dc] sm:$0xf0]  ;;  %v1507_v48 = vor.u32 %v1975_v38, %v1504_v39  ;;  %v1959_v51 = vld [vmem:[%s3099_s1 + $0x9c] sm:$0xf]  ;;  %v1774_v58 = vld [vmem:[%s3099_s1 + $0x328] sm:$0xf] }
  0x35   :  { %1029 = vmatpush.bf16.msra.mxu0 %v1627_v25  ;;  %1078 = vmatpush.bf16.msrb.mxu1 %v1827_v40  ;;  %v1439_v25 = vor.u32 %v1967_v17, %v1438_v16  ;;  %v1703_v35 = vor.u32 %v2032_v42, %v1702_v41  ;;  %v1638_v55 = vld [vmem:[%s3099_s1 + $0x220] sm:$0xf]  ;;  %v2008_v61 = vld [vmem:[%s3099_s1 + $0x224] sm:$0xf]  ;;  %v1943_v0 = vld [vmem:[%s3099_s1 + $0x1c] sm:$0xf] }
  0x36   :  { %1053 = vmatpush.bf16.msrb.mxu3 %v1759_v22  ;;  %v1891_v22 = vor.u32 %v2071_v13, %v1888_v14  ;;  %v1640_v62 = vld [vmem:[%s3099_s1 + $0x260] sm:$0xf0]  ;;  %v1376_v1 = vld [vmem:[%s3099_s1 + $0x58] sm:$0xf0]  ;;  %v1574_v2 = vld [vmem:[%s3099_s1 + $0x1a0] sm:$0xf] }
  0x37   :  { %1003 = vmatpush.bf16.msra.mxu2 %v1623_v21  ;;  %v1831_v21 = vor.u32 %v2064_v12, %v1830_v9  ;;  %v2000_v4 = vld [vmem:[%s3099_s1 + $0x1dc] sm:$0xf0]  ;;  %v2072_v5 = vld [vmem:[%s3099_s1 + $0x424] sm:$0xf]  ;;  %v1643_v7 = vor.u32 %v2008_v61, %v1640_v62  ;;  %v1710_v8 = vld [vmem:[%s3099_s1 + $0x2a8] sm:$0xf] }
  0x38   :  { %v2033_v9 = vld [vmem:[%s3099_s1 + $0x2e4] sm:$0xf0]  ;;  %v1576_v12 = vld [vmem:[%s3099_s1 + $0x1e0] sm:$0xf0]  ;;  %v1575_v13 = vor.u32 %v2000_v4, %v1574_v2  ;;  %v1840_v16 = vld [vmem:[%s3099_s1 + $0x3e8] sm:$0xf0] }
  0x39   :  { %1030 = vmatpush.bf16.msra.mxu0 %v1563_v37  ;;  %1079 = vmatpush.bf16.msrb.mxu1 %v1763_v53  ;;  %v1767_v37 = vor.u32 %v2048_v27, %v1766_v26  ;;  %v1440_v53 = vld [vmem:[%s3099_s1 + $0xd8] sm:$0xf0]  ;;  %v1711_v17 = vor.u32 %v2033_v9, %v1710_v8  ;;  %v1984_v19 = vld [vmem:[%s3099_s1 + $0x15c] sm:$0xf0]  ;;  %v1976_v24 = vld [vmem:[%s3099_s1 + $0x124] sm:$0xf] }
  0x3a   :  { %1054 = vmatpush.bf16.msrb.mxu3 %v1695_v33  ;;  %v1768_v33 = vld [vmem:[%s3099_s1 + $0x360] sm:$0xf0]  ;;  %v1443_v60 = vor.u32 %v1959_v51, %v1440_v53  ;;  %v2041_v27 = vld [vmem:[%s3099_s1 + $0x32c] sm:$0xf]  ;;  %v2001_v34 = vld [vmem:[%s3099_s1 + $0x1e4] sm:$0xf0] }
  0x3b   :  { %1004 = vmatpush.bf16.msra.mxu2 %v1559_v30  ;;  %v1951_v30 = vld [vmem:[%s3099_s1 + $0x54] sm:$0xf0]  ;;  %v1448_v38 = vld [vmem:[%s3099_s1 + $0xe0] sm:$0xf0]  ;;  %v1712_v41 = vld [vmem:[%s3099_s1 + $0x2e8] sm:$0xf0] }
  0x3c   :  { %v1375_v40 = vor.u32 %v1951_v30, %v1374_v29  ;;  %v1446_v30 = vld [vmem:[%s3099_s1 + $0xa0] sm:$0xf]  ;;  %v1944_v51 = vld [vmem:[%s3099_s1 + $0x24] sm:$0xf]  ;;  %v2073_v61 = vld [vmem:[%s3099_s1 + $0x42c] sm:$0xf] }
  0x3d   :  { %1031 = vmatpush.bf16.msra.mxu0 %v1499_v50  ;;  %1080 = vmatpush.bf16.msrb.mxu1 %v1699_v3  ;;  %v1704_v50 = vld [vmem:[%s3099_s1 + $0x2e0] sm:$0xf0]  ;;  %v1904_v62 = vld [vmem:[%s3099_s1 + $0x468] sm:$0xf0]  ;;  %v1848_v4 = vld [vmem:[%s3099_s1 + $0x3f0] sm:$0xf0] }
  0x3e   :  { %1055 = vmatpush.bf16.msrb.mxu3 %v1631_v46  ;;  %v2065_v46 = vld [vmem:[%s3099_s1 + $0x3e4] sm:$0xf0]  ;;  %v1707_v57 = vor.u32 %v2024_v49, %v1704_v50  ;;  %v1384_v53 = vld [vmem:[%s3099_s1 + $0x60] sm:$0xf0]  ;;  %v1584_v8 = vld [vmem:[%s3099_s1 + $0x1e8] sm:$0xf0] }
  0x3f   :  { %1005 = vmatpush.bf16.msra.mxu2 %v1495_v43  ;;  %v1771_v43 = vor.u32 %v2040_v31, %v1768_v33  ;;  %v1839_v54 = vor.u32 %v2065_v46, %v1838_v45  ;;  %v1968_v31 = vld [vmem:[%s3099_s1 + $0xdc] sm:$0xf0]  ;;  %v1582_v33 = vld [vmem:[%s3099_s1 + $0x1a8] sm:$0xf] }
  0x40   :  { %v1447_v39 = vor.u32 %v1968_v31, %v1446_v30  ;;  %v1583_v42 = vor.u32 %v2001_v34, %v1582_v33  ;;  %v1518_v45 = vld [vmem:[%s3099_s1 + $0x128] sm:$0xf]  ;;  %v2026_v31 = vld [vmem:[%s3099_s1 + $0x2b4] sm:$0xf]  ;;  %v1961_v34 = vld [vmem:[%s3099_s1 + $0xac] sm:$0xf] }
  0x41   :  { %1032 = vmatpush.bf16.msra.mxu0 %v1435_v63  ;;  %1081 = vmatpush.bf16.msrb.mxu1 %v1635_v18  ;;  %v1510_v18 = vld [vmem:[%s3099_s1 + $0x120] sm:$0xf]  ;;  %v1902_v49 = vld [vmem:[%s3099_s1 + $0x428] sm:$0xf] }
  0x42   :  { %1056 = vmatpush.bf16.msrb.mxu3 %v1567_v59  ;;  %v2049_v59 = vld [vmem:[%s3099_s1 + $0x364] sm:$0xf0]  ;;  %v1511_v26 = vor.u32 %v1984_v19, %v1510_v18  ;;  %v1910_v18 = vld [vmem:[%s3099_s1 + $0x430] sm:$0xf] }
  0x43   :  { %1006 = vmatpush.bf16.msra.mxu2 %v1431_v56  ;;  %v2016_v56 = vld [vmem:[%s3099_s1 + $0x25c] sm:$0xf0]  ;;  %v1775_v3 = vor.u32 %v2049_v59, %v1774_v58  ;;  %v2081_v50 = vld [vmem:[%s3099_s1 + $0x464] sm:$0xf0]  ;;  %v2082_v19 = vld [vmem:[%s3099_s1 + $0x46c] sm:$0xf0] }
  0x44   :  { %1929 = vmatmul.msk.bf16.vlgmr.msra.gmra.mxu1 %vm892_vm0, %v2209_v47  ;;  %v1639_v63 = vor.u32 %v2016_v56, %v1638_v55  ;;  %v2009_v55 = vld [vmem:[%s3099_s1 + $0x22c] sm:$0xf]  ;;  %v1903_v59 = vor.u32 %v2081_v50, %v1902_v49  ;;  %v1590_v50 = vld [vmem:[%s3099_s1 + $0x1b0] sm:$0xf] }
  0x45   :  { %1033 = vmatpush.bf16.msra.mxu0 %v1371_v15  ;;  %1082 = vmatpush.bf16.msrb.mxu1 %v1571_v32  ;;  %v2057_v15 = vld [vmem:[%s3099_s1 + $0x3ac] sm:$0xf] }
  0x46   :  { %1057 = vmatpush.bf16.msrb.mxu3 %v1503_v10  ;;  %v1379_v10 = vor.u32 %v1943_v0, %v1376_v1  ;;  %v1843_v23 = vor.u32 %v2057_v15, %v1840_v16  ;;  %v1648_v56 = vld [vmem:[%s3099_s1 + $0x268] sm:$0xf0]  ;;  %v1454_v0 = vld [vmem:[%s3099_s1 + $0xa8] sm:$0xf]  ;;  %v2042_v15 = vld [vmem:[%s3099_s1 + $0x334] sm:$0xf] }
  0x47   :  { %1007 = vmatpush.bf16.msra.mxu2 %v1367_v6  ;;  %v1896_v6 = vld [vmem:[%s3099_s1 + $0x460] sm:$0xf0]  ;;  %v1969_v1 = vld [vmem:[%s3099_s1 + $0xe4] sm:$0xf0]  ;;  %v1651_v2 = vor.u32 %v2009_v55, %v1648_v56  ;;  %v1392_v49 = vld [vmem:[%s3099_s1 + $0x68] sm:$0xf0] }
  0x48   :  { %1034 = vmatmul.bf16.vlgmr.msra.gmra.mxu0 %v2347_v52  ;;  %v1899_v14 = vor.u32 %v2072_v5, %v1896_v6  ;;  %v1907_v6 = vor.u32 %v2073_v61, %v1904_v62  ;;  %v1455_v9 = vor.u32 %v1969_v1, %v1454_v0  ;;  %v1726_v56 = vld [vmem:[%s3099_s1 + $0x2b8] sm:$0xf]  ;;  %v1856_v0 = vld [vmem:[%s3099_s1 + $0x3f8] sm:$0xf0] }
  0x49   :  { %1098 = vmatpush.bf16.msrb.mxu0 %v1891_v22  ;;  %1083 = vmatpush.bf16.msrb.mxu1 %v1507_v48  ;;  %v2017_v22 = vld [vmem:[%s3099_s1 + $0x264] sm:$0xf0] }
  0x4a   :  { %1008 = vmatmul.bf16.vlgmr.msra.gmra.mxu2 %v2347_v52  ;;  %1058 = vmatpush.bf16.msrb.mxu3 %v1439_v25  ;;  %v1512_v25 = vld [vmem:[%s3099_s1 + $0x160] sm:$0xf0]  ;;  %v1985_v48 = vld [vmem:[%s3099_s1 + $0x164] sm:$0xf0] }
  0x4b   :  { %1072 = vmatpush.bf16.msrb.mxu2 %v1887_v11  ;;  %v1992_v11 = vld [vmem:[%s3099_s1 + $0x1a4] sm:$0xf]  ;;  %v1515_v32 = vor.u32 %v1976_v24, %v1512_v25  ;;  %v1519_v58 = vor.u32 %v1985_v48, %v1518_v45  ;;  %v1718_v24 = vld [vmem:[%s3099_s1 + $0x2b0] sm:$0xf]  ;;  %v1656_v45 = vld [vmem:[%s3099_s1 + $0x270] sm:$0xf0] }
  0x4c   :  { %v1579_v20 = vor.u32 %v1992_v11, %v1576_v12  ;;  %v2050_v11 = vld [vmem:[%s3099_s1 + $0x36c] sm:$0xf0]  ;;  %v1945_v48 = vld [vmem:[%s3099_s1 + $0x2c] sm:$0xf] }
  0x4d   :  { %1130 = vmatpush.bf16.msra.mxu0 %v1835_v28  ;;  %1084 = vmatpush.bf16.msrb.mxu1 %v1443_v60  ;;  %v1776_v28 = vld [vmem:[%s3099_s1 + $0x368] sm:$0xf0]  ;;  %v2066_v60 = vld [vmem:[%s3099_s1 + $0x3ec] sm:$0xf0] }
  0x4e   :  { %1059 = vmatpush.bf16.msrb.mxu3 %v1375_v40  ;;  %v1779_v36 = vor.u32 %v2041_v27, %v1776_v28  ;;  %v2025_v40 = vld [vmem:[%s3099_s1 + $0x2ac] sm:$0xf]  ;;  %v2034_v25 = vld [vmem:[%s3099_s1 + $0x2ec] sm:$0xf0]  ;;  %v1911_v27 = vor.u32 %v2082_v19, %v1910_v18  ;;  %v1854_v28 = vld [vmem:[%s3099_s1 + $0x3b8] sm:$0xf] }
  0x4f   :  { %1104 = vmatpush.bf16.msra.mxu2 %v1831_v21  ;;  %v1646_v21 = vld [vmem:[%s3099_s1 + $0x228] sm:$0xf]  ;;  %v1719_v33 = vor.u32 %v2034_v25, %v1718_v24  ;;  %v2003_v18 = vld [vmem:[%s3099_s1 + $0x1f4] sm:$0xf0]  ;;  %v1728_v24 = vld [vmem:[%s3099_s1 + $0x2f8] sm:$0xf0] }
  0x50   :  { %v1647_v29 = vor.u32 %v2017_v22, %v1646_v21  ;;  %v1977_v21 = vld [vmem:[%s3099_s1 + $0x12c] sm:$0xf] }
  0x51   :  { %1131 = vmatpush.bf16.msra.mxu0 %v1771_v43  ;;  %1060 = vmatmul.bf16.vlgmr.msrb.gmra.mxu3 %v2347_v52  ;;  %v1382_v43 = vld [vmem:[%s3099_s1 + $0x20] sm:$0xf]  ;;  %v1520_v22 = vld [vmem:[%s3099_s1 + $0x168] sm:$0xf0] }
  0x52   :  { %1124 = vmatpush.bf16.msra.mxu3 %v1895_v44  ;;  %1085 = vmatpush.bf16.msrb.mxu1 %v1379_v10  ;;  %v1952_v44 = vld [vmem:[%s3099_s1 + $0x5c] sm:$0xf0]  ;;  %v1782_v10 = vld [vmem:[%s3099_s1 + $0x330] sm:$0xf]  ;;  %v1523_v30 = vor.u32 %v1977_v21, %v1520_v22  ;;  %v1464_v21 = vld [vmem:[%s3099_s1 + $0xf0] sm:$0xf0] }
  0x53   :  { %1105 = vmatpush.bf16.msra.mxu2 %v1767_v37  ;;  %v1960_v37 = vld [vmem:[%s3099_s1 + $0xa4] sm:$0xf] }
  0x54   :  { %v1451_v46 = vor.u32 %v1960_v37, %v1448_v38  ;;  %v1654_v38 = vld [vmem:[%s3099_s1 + $0x230] sm:$0xf] }
  0x55   :  { %1132 = vmatpush.bf16.msra.mxu0 %v1707_v57  ;;  %1086 = vmatmul.bf16.vlgmr.msrb.gmra.mxu1 %v2347_v52  ;;  %v1846_v57 = vld [vmem:[%s3099_s1 + $0x3b0] sm:$0xf] }
  0x56   :  { %1156 = vmatpush.bf16.msrb.mxu3 %v1839_v54  ;;  %1150 = vmatpush.bf16.msra.mxu1 %v1899_v14  ;;  %v1383_v54 = vor.u32 %v1952_v44, %v1382_v43  ;;  %v1847_v5 = vor.u32 %v2066_v60, %v1846_v57  ;;  %v1953_v14 = vld [vmem:[%s3099_s1 + $0x64] sm:$0xf0]  ;;  %v2010_v44 = vld [vmem:[%s3099_s1 + $0x234] sm:$0xf]  ;;  %v2035_v57 = vld [vmem:[%s3099_s1 + $0x2f4] sm:$0xf0] }
  0x57   :  { %1106 = vmatpush.bf16.msra.mxu2 %v1703_v35  ;;  %v1715_v35 = vor.u32 %v2025_v40, %v1712_v41  ;;  %v1790_v41 = vld [vmem:[%s3099_s1 + $0x338] sm:$0xf]  ;;  %v1659_v55 = vor.u32 %v2010_v44, %v1656_v45  ;;  %v1592_v60 = vld [vmem:[%s3099_s1 + $0x1f0] sm:$0xf0]  ;;  %v1727_v1 = vor.u32 %v2035_v57, %v1726_v56  ;;  %v1979_v56 = vld [vmem:[%s3099_s1 + $0x13c] sm:$0xf] }
  0x58   :  { %1931 = vmatmul.msk.bf16.vlgmr.msrb.gmra.mxu0 %vm892_vm0, %v2209_v47  ;;  %v1470_v45 = vld [vmem:[%s3099_s1 + $0xb8] sm:$0xf]  ;;  %v1536_v57 = vld [vmem:[%s3099_s1 + $0x178] sm:$0xf0] }
  0x59   :  { %1133 = vmatpush.bf16.msra.mxu0 %v1643_v7  ;;  %v1993_v7 = vld [vmem:[%s3099_s1 + $0x1ac] sm:$0xf] }
  0x5a   :  { %1157 = vmatpush.bf16.msrb.mxu3 %v1775_v3  ;;  %1930 = vmatmul.msk.bf16.vlgmr.msrb.gmra.mxu2 %vm892_vm0, %v2209_v47  ;;  %v2058_v3 = vld [vmem:[%s3099_s1 + $0x3b4] sm:$0xf]  ;;  %v1587_v16 = vor.u32 %v1993_v7, %v1584_v8 }
  0x5b   :  { %1107 = vmatpush.bf16.msra.mxu2 %v1639_v63  ;;  %1182 = vmatpush.bf16.msrb.mxu1 %v1843_v23  ;;  %v1387_v63 = vor.u32 %v1944_v51, %v1384_v53  ;;  %v1851_v12 = vor.u32 %v2058_v3, %v1848_v4  ;;  %v2002_v51 = vld [vmem:[%s3099_s1 + $0x1ec] sm:$0xf0]  ;;  %v2074_v53 = vld [vmem:[%s3099_s1 + $0x434] sm:$0xf] }
  0x5c   :  { %v1591_v61 = vor.u32 %v2002_v51, %v1590_v50  ;;  %v1986_v3 = vld [vmem:[%s3099_s1 + $0x16c] sm:$0xf0]  ;;  %v1978_v8 = vld [vmem:[%s3099_s1 + $0x134] sm:$0xf]  ;;  %v1600_v50 = vld [vmem:[%s3099_s1 + $0x1f8] sm:$0xf0] }
  0x5d   :  { %1134 = vmatpush.bf16.msra.mxu0 %v1579_v20  ;;  %v1783_v20 = vor.u32 %v2050_v11, %v1782_v10  ;;  %v2043_v11 = vld [vmem:[%s3099_s1 + $0x33c] sm:$0xf] }
  0x5e   :  { %1158 = vmatpush.bf16.msrb.mxu3 %v1711_v17  ;;  %v1784_v17 = vld [vmem:[%s3099_s1 + $0x370] sm:$0xf0] }
  0x5f   :  { %1108 = vmatpush.bf16.msra.mxu2 %v1575_v13  ;;  %1183 = vmatpush.bf16.msrb.mxu1 %v1779_v36  ;;  %v1390_v13 = vld [vmem:[%s3099_s1 + $0x28] sm:$0xf]  ;;  %v1456_v36 = vld [vmem:[%s3099_s1 + $0xe8] sm:$0xf0] }
  0x60   :  { %v1391_v23 = vor.u32 %v1953_v14, %v1390_v13  ;;  %v1459_v43 = vor.u32 %v1961_v34, %v1456_v36  ;;  %v1462_v14 = vld [vmem:[%s3099_s1 + $0xb0] sm:$0xf]  ;;  %v1946_v34 = vld [vmem:[%s3099_s1 + $0x34] sm:$0xf] }
  0x61   :  { %1135 = vmatpush.bf16.msra.mxu0 %v1515_v32  ;;  %1932 = vmatmul.msk.bf16.vlgmr.msra.gmra.mxu3 %vm892_vm0, %v2209_v47  ;;  %v1720_v32 = vld [vmem:[%s3099_s1 + $0x2f0] sm:$0xf0] }
  0x62   :  { %1159 = vmatpush.bf16.msrb.mxu3 %v1647_v29  ;;  %v2067_v29 = vld [vmem:[%s3099_s1 + $0x3f4] sm:$0xf0]  ;;  %v1723_v40 = vor.u32 %v2026_v31, %v1720_v32  ;;  %v1400_v36 = vld [vmem:[%s3099_s1 + $0x70] sm:$0xf0] }
  0x63   :  { %1109 = vmatpush.bf16.msra.mxu2 %v1511_v26  ;;  %1184 = vmatpush.bf16.msrb.mxu1 %v1715_v35  ;;  %v1787_v26 = vor.u32 %v2042_v15, %v1784_v17  ;;  %v1855_v37 = vor.u32 %v2067_v29, %v1854_v28  ;;  %v1970_v15 = vld [vmem:[%s3099_s1 + $0xec] sm:$0xf0]  ;;  %v1598_v17 = vld [vmem:[%s3099_s1 + $0x1b8] sm:$0xf]  ;;  %v1403_v44 = vor.u32 %v1946_v34, %v1400_v36 }
  0x64   :  { %v1463_v22 = vor.u32 %v1970_v15, %v1462_v14  ;;  %v1599_v25 = vor.u32 %v2003_v18, %v1598_v17  ;;  %v1534_v28 = vld [vmem:[%s3099_s1 + $0x138] sm:$0xf] }
  0x65   :  { %1136 = vmatpush.bf16.msra.mxu0 %v1451_v46  ;;  %1933 = vmatmul.msk.bf16.vlgmr.msra.gmra.mxu1 %vm892_vm0, %v2209_v47  ;;  %v1918_v31 = vld [vmem:[%s3099_s1 + $0x438] sm:$0xf] }
  0x66   :  { %1160 = vmatpush.bf16.msrb.mxu3 %v1583_v42  ;;  %v2051_v42 = vld [vmem:[%s3099_s1 + $0x374] sm:$0xf0] }
  0x67   :  { %1110 = vmatpush.bf16.msra.mxu2 %v1447_v39  ;;  %1185 = vmatpush.bf16.msrb.mxu1 %v1651_v2  ;;  %v2018_v39 = vld [vmem:[%s3099_s1 + $0x26c] sm:$0xf0]  ;;  %v1791_v35 = vor.u32 %v2051_v42, %v1790_v41  ;;  %v2083_v32 = vld [vmem:[%s3099_s1 + $0x474] sm:$0xf0]  ;;  %v2075_v42 = vld [vmem:[%s3099_s1 + $0x43c] sm:$0xf] }
  0x68   :  { %v1655_v46 = vor.u32 %v2018_v39, %v1654_v38  ;;  %v1526_v2 = vld [vmem:[%s3099_s1 + $0x130] sm:$0xf]  ;;  %v2011_v38 = vld [vmem:[%s3099_s1 + $0x23c] sm:$0xf]  ;;  %v1919_v41 = vor.u32 %v2083_v32, %v1918_v31 }
  0x69   :  { %1137 = vmatpush.bf16.msra.mxu0 %v1387_v63  ;;  %v2059_v63 = vld [vmem:[%s3099_s1 + $0x3bc] sm:$0xf]  ;;  %v1527_v10 = vor.u32 %v1986_v3, %v1526_v2 }
  0x6a   :  { %1161 = vmatpush.bf16.msrb.mxu3 %v1519_v58  ;;  %v1395_v58 = vor.u32 %v1945_v48, %v1392_v49  ;;  %v1859_v7 = vor.u32 %v2059_v63, %v1856_v0  ;;  %v1664_v39 = vld [vmem:[%s3099_s1 + $0x278] sm:$0xf0] }
  0x6b   :  { %1111 = vmatpush.bf16.msra.mxu2 %v1383_v54  ;;  %1186 = vmatpush.bf16.msrb.mxu1 %v1587_v16  ;;  %v1912_v54 = vld [vmem:[%s3099_s1 + $0x470] sm:$0xf0]  ;;  %v1667_v48 = vor.u32 %v2011_v38, %v1664_v39  ;;  %v1995_v49 = vld [vmem:[%s3099_s1 + $0x1bc] sm:$0xf] }
  0x6c   :  { %1138 = vmatmul.bf16.vlgmr.msra.gmra.mxu0 %v2347_v52  ;;  %v1915_v62 = vor.u32 %v2074_v53, %v1912_v54  ;;  %v1406_v53 = vld [vmem:[%s3099_s1 + $0x38] sm:$0xf]  ;;  %v1947_v63 = vld [vmem:[%s3099_s1 + $0x3c] sm:$0xf] }
  0x6d   :  { %1202 = vmatpush.bf16.msrb.mxu0 %v1907_v6  ;;  %v2019_v6 = vld [vmem:[%s3099_s1 + $0x274] sm:$0xf0]  ;;  %v1408_v0 = vld [vmem:[%s3099_s1 + $0x78] sm:$0xf0] }
  0x6e   :  { %1112 = vmatmul.bf16.vlgmr.msra.gmra.mxu2 %v2347_v52  ;;  %1162 = vmatpush.bf16.msrb.mxu3 %v1455_v9  ;;  %v1528_v9 = vld [vmem:[%s3099_s1 + $0x170] sm:$0xf0]  ;;  %v1955_v54 = vld [vmem:[%s3099_s1 + $0x74] sm:$0xf0] }
  0x6f   :  { %1176 = vmatpush.bf16.msrb.mxu2 %v1903_v59  ;;  %1187 = vmatpush.bf16.msrb.mxu1 %v1523_v30  ;;  %v1994_v59 = vld [vmem:[%s3099_s1 + $0x1b4] sm:$0xf]  ;;  %v1531_v16 = vor.u32 %v1978_v8, %v1528_v9  ;;  %v1987_v30 = vld [vmem:[%s3099_s1 + $0x174] sm:$0xf0] }
  0x70   :  { %v1595_v4 = vor.u32 %v1994_v59, %v1592_v60  ;;  %v1539_v59 = vor.u32 %v1979_v56, %v1536_v57  ;;  %v1963_v60 = vld [vmem:[%s3099_s1 + $0xbc] sm:$0xf] }
  0x71   :  { %1234 = vmatpush.bf16.msra.mxu0 %v1851_v12  ;;  %v1792_v12 = vld [vmem:[%s3099_s1 + $0x378] sm:$0xf0] }
  0x72   :  { %1163 = vmatpush.bf16.msrb.mxu3 %v1391_v23  ;;  %v1795_v19 = vor.u32 %v2043_v11, %v1792_v12  ;;  %v2027_v23 = vld [vmem:[%s3099_s1 + $0x2bc] sm:$0xf] }
  0x73   :  { %1208 = vmatpush.bf16.msra.mxu2 %v1847_v5  ;;  %1188 = vmatpush.bf16.msrb.mxu1 %v1459_v43  ;;  %v1662_v5 = vld [vmem:[%s3099_s1 + $0x238] sm:$0xf]  ;;  %v1920_v43 = vld [vmem:[%s3099_s1 + $0x478] sm:$0xf0] }
  0x74   :  { %v1663_v13 = vor.u32 %v2019_v6, %v1662_v5 }
  0x75   :  { %1235 = vmatpush.bf16.msra.mxu0 %v1787_v26  ;;  %1164 = vmatmul.bf16.vlgmr.msrb.gmra.mxu3 %v2347_v52  ;;  %v1398_v26 = vld [vmem:[%s3099_s1 + $0x30] sm:$0xf] }
  0x76   :  { %1228 = vmatpush.bf16.msra.mxu3 %v1911_v27  ;;  %v1954_v27 = vld [vmem:[%s3099_s1 + $0x6c] sm:$0xf0] }
  0x77   :  { %1209 = vmatpush.bf16.msra.mxu2 %v1783_v20  ;;  %1189 = vmatpush.bf16.msrb.mxu1 %v1395_v58  ;;  %v1962_v20 = vld [vmem:[%s3099_s1 + $0xb4] sm:$0xf]  ;;  %v1407_v58 = vor.u32 %v1955_v54, %v1406_v53 }
  0x78   :  { %v1467_v29 = vor.u32 %v1962_v20, %v1464_v21 }
  0x79   :  { %1236 = vmatpush.bf16.msra.mxu0 %v1723_v40  ;;  %v1535_v40 = vor.u32 %v1987_v30, %v1534_v28 }
  0x7a   :  { %1260 = vmatpush.bf16.msrb.mxu3 %v1855_v37  ;;  %1190 = vmatmul.bf16.vlgmr.msrb.gmra.mxu1 %v2347_v52  ;;  %v1399_v37 = vor.u32 %v1954_v27, %v1398_v26 }
  0x7b   :  { %1210 = vmatpush.bf16.msra.mxu2 %v1719_v33  ;;  %1254 = vmatpush.bf16.msra.mxu1 %v1915_v62  ;;  %v1731_v33 = vor.u32 %v2027_v23, %v1728_v24 }
  0x7c   :  { %1935 = vmatmul.msk.bf16.vlgmr.msrb.gmra.mxu0 %vm892_vm0, %v2209_v47 }
  0x7d   :  { %1237 = vmatpush.bf16.msra.mxu0 %v1659_v55  ;;  %v1603_v55 = vor.u32 %v1995_v49, %v1600_v50 }
  0x7e   :  { %1261 = vmatpush.bf16.msrb.mxu3 %v1791_v35  ;;  %1934 = vmatmul.msk.bf16.vlgmr.msrb.gmra.mxu2 %vm892_vm0, %v2209_v47  ;;  %v1923_v35 = vor.u32 %v2075_v42, %v1920_v43 }
  0x7f   :  { %1211 = vmatpush.bf16.msra.mxu2 %v1655_v46  ;;  %1286 = vmatpush.bf16.msrb.mxu1 %v1859_v7  ;;  %v1971_v46 = vld [vmem:[%s3099_s1 + $0xf4] sm:$0xf0] }
  0x80   :  { %v1471_v51 = vor.u32 %v1971_v46, %v1470_v45 }
  0x81   :  { %1238 = vmatpush.bf16.msra.mxu0 %v1595_v4 }
  0x82   :  { %1262 = vmatpush.bf16.msrb.mxu3 %v1727_v1  ;;  %v1411_v1 = vor.u32 %v1947_v63, %v1408_v0 }
  0x83   :  { %1212 = vmatpush.bf16.msra.mxu2 %v1591_v61  ;;  %1287 = vmatpush.bf16.msrb.mxu1 %v1795_v19  ;;  %v1472_v61 = vld [vmem:[%s3099_s1 + $0xf8] sm:$0xf0] }
  0x84   :  { %v1475_v62 = vor.u32 %v1963_v60, %v1472_v61 }
  0x85   :  { %1239 = vmatpush.bf16.msra.mxu0 %v1531_v16  ;;  %1936 = vmatmul.msk.bf16.vlgmr.msra.gmra.mxu3 %vm892_vm0, %v2209_v47 }
  0x86   :  { %1263 = vmatpush.bf16.msrb.mxu3 %v1663_v13 }
  0x87   :  { %1213 = vmatpush.bf16.msra.mxu2 %v1527_v10  ;;  %1288 = vmatpush.bf16.msrb.mxu1 %v1731_v33 }
  0x89   :  { %1240 = vmatpush.bf16.msra.mxu0 %v1467_v29 }
  0x8a   :  { %1264 = vmatpush.bf16.msrb.mxu3 %v1599_v25  ;;  %1937 = vmatmul.msk.bf16.vlgmr.msra.gmra.mxu1 %vm892_vm0, %v2209_v47 }
  0x8b   :  { %1214 = vmatpush.bf16.msra.mxu2 %v1463_v22  ;;  %1289 = vmatpush.bf16.msrb.mxu1 %v1667_v48 }
  0x8d   :  { %1241 = vmatpush.bf16.msra.mxu0 %v1403_v44 }
  0x8e   :  { %1265 = vmatpush.bf16.msrb.mxu3 %v1535_v40 }
  0x8f   :  { %1215 = vmatpush.bf16.msra.mxu2 %v1399_v37  ;;  %1290 = vmatpush.bf16.msrb.mxu1 %v1603_v55 }
  0x90   :  { %1242 = vmatmul.bf16.vlgmr.msra.gmra.mxu0 %v2347_v52 }
  0x91   :  { %1306 = vmatpush.bf16.msrb.mxu0 %v1923_v35  ;;  %v918_v3 = vpop.f32.mrf.mxu2 }
  0x92   :  { %1216 = vmatmul.bf16.vlgmr.msra.gmra.mxu2 %v2347_v52  ;;  %1266 = vmatpush.bf16.msrb.mxu3 %v1471_v51  ;;  %v944_v2 = vpop.f32.mrf.mxu3 }
  0x93   :  { %1280 = vmatpush.bf16.msrb.mxu2 %v1919_v41  ;;  %1291 = vmatpush.bf16.msrb.mxu1 %v1539_v59 }
  0x94   :  { %v3033_v6 = vpop.permute.xlu0 %163 }
  0x96   :  { %1267 = vmatpush.bf16.msrb.mxu3 %v1407_v58 }
  0x97   :  { %1292 = vmatpush.bf16.msrb.mxu1 %v1475_v62 }
  0x99   :  { %1268 = vmatmul.bf16.vlgmr.msrb.gmra.mxu3 %v2347_v52  ;;  %v920_v5 = vpop.f32.mrf.mxu2 }
  0x9a   :  { %v946_v4 = vpop.f32.mrf.mxu3 }
  0x9b   :  { %1293 = vmatpush.bf16.msrb.mxu1 %v1411_v1 }
  0x9e   :  { %1294 = vmatmul.bf16.vlgmr.msrb.gmra.mxu1 %v2347_v52 }
  0xa0   :  { %1939 = vmatmul.msk.bf16.vlgmr.msrb.gmra.mxu0 %vm892_vm0, %v2209_v47 }
  0xa1   :  { %v905_v7 = vpop.f32.mrf.mxu0  ;;  %v957_v8 = vpop.f32.mrf.mxu1 }
  0xa2   :  { %1938 = vmatmul.msk.bf16.vlgmr.msrb.gmra.mxu2 %vm892_vm0, %v2209_v47  ;;  %v906_v9 = vadd.f32 %v905_v7, %v3033_v6  ;;  %v958_v10 = vadd.f32 %v957_v8, %v3033_v6  ;;  %v970_v11 = vpop.f32.mrf.mxu3 }
  0xa4   :  { %v919_v12 = vadd.f32 %v918_v3, %v906_v9  ;;  %v971_v13 = vadd.f32 %v970_v11, %v958_v10 }
  0xa6   :  { %v1312_v14 = vmax.f32 %v919_v12, 0.0  ;;  %v1314_v15 = vmax.f32 %v971_v13, 0.0 }
  0xa8   :  { %1328 = vst [vmem:[%s3102_s3] sm:$0xff] %v1312_v14 }
  0xa9   :  { %1330 = vst [vmem:[%s3102_s3 + $0x10] sm:$0xff] %v1314_v15  ;;  %v907_v16 = vpop.f32.mrf.mxu0  ;;  %v959_v17 = vpop.f32.mrf.mxu1 }
  0xaa   :  { %v972_v18 = vpop.f32.mrf.mxu3 }
  0xad   :  { %v931_v47 = vpop.f32.mrf.mxu2 }
  0xae   :  { %v932_v52 = vadd.f32 %v931_v47, %v3033_v6 }
  0xb0   :  { %v945_v19 = vadd.f32 %v944_v2, %v932_v52 }
  0xb1   :  { %v996_v22 = vpop.f32.mrf.mxu0  ;;  %v1022_v23 = vpop.f32.mrf.mxu1 }
  0xb2   :  { %v1313_v20 = vmax.f32 %v945_v19, 0.0 }
  0xb4   :  { %1329 = vst [vmem:[%s3102_s3 + $0x8] sm:$0xff] %v1313_v20  ;;  %v983_v24 = vpop.f32.mrf.mxu3 }
  0xb5   :  { %v933_v21 = vpop.f32.mrf.mxu2  ;;  %v984_v25 = vadd.f32 %v983_v24, %v3033_v6 }
  0xb7   :  { %v997_v26 = vadd.f32 %v996_v22, %v984_v25 }
  0xb9   :  { %v1315_v27 = vmax.f32 %v997_v26, 0.0  ;;  %v998_v28 = vpop.f32.mrf.mxu0  ;;  %v1024_v29 = vpop.f32.mrf.mxu1 }
  0xbb   :  { %1331 = vst [vmem:[%s3102_s3 + $0x18] sm:$0xff] %v1315_v27 }
  0xbc   :  { %v985_v30 = vpop.f32.mrf.mxu3 }
  0xc1   :  { %v1048_v33 = vpop.f32.mrf.mxu1 }
  0xc5   :  { %v1035_v31 = vpop.f32.mrf.mxu0 }
  0xc6   :  { %v1036_v32 = vadd.f32 %v1035_v31, %v3033_v6 }
  0xc8   :  { %v1049_v34 = vadd.f32 %v1048_v33, %v1036_v32 }
  0xc9   :  { %v1050_v42 = vpop.f32.mrf.mxu1 }
  0xca   :  { %v1317_v37 = vmax.f32 %v1049_v34, 0.0 }
  0xcc   :  { %1333 = vst [vmem:[%s3102_s3 + $0x28] sm:$0xff] %v1317_v37 }
  0xcd   :  { %v1009_v36 = vpop.f32.mrf.mxu2  ;;  %v1037_v40 = vpop.f32.mrf.mxu0 }
  0xce   :  { %v1010_v38 = vadd.f32 %v1009_v36, %v3033_v6 }
  0xd0   :  { %v1023_v39 = vadd.f32 %v1022_v23, %v1010_v38 }
  0xd2   :  { %v1316_v41 = vmax.f32 %v1023_v39, 0.0  ;;  %v1087_v48 = vpop.f32.mrf.mxu1 }
  0xd3   :  { %v1088_v49 = vadd.f32 %v1087_v48, %v3033_v6 }
  0xd4   :  { %1332 = vst [vmem:[%s3102_s3 + $0x20] sm:$0xff] %v1316_v41  ;;  %v1061_v44 = vpop.f32.mrf.mxu3 }
  0xd5   :  { %v1011_v43 = vpop.f32.mrf.mxu2  ;;  %v1100_v45 = vpop.f32.mrf.mxu0  ;;  %v1062_v46 = vadd.f32 %v1061_v44, %v3033_v6 }
  0xd6   :  { %v1101_v50 = vadd.f32 %v1100_v45, %v1088_v49 }
  0xd8   :  { %v1319_v54 = vmax.f32 %v1101_v50, 0.0 }
  0xda   :  { %1335 = vst [vmem:[%s3102_s3 + $0x38] sm:$0xff] %v1319_v54  ;;  %v1089_v57 = vpop.f32.mrf.mxu1 }
  0xdc   :  { %v1063_v51 = vpop.f32.mrf.mxu3 }
  0xdd   :  { %v1074_v35 = vpop.f32.mrf.mxu2  ;;  %v1102_v56 = vpop.f32.mrf.mxu0 }
  0xde   :  { %v1075_v53 = vadd.f32 %v1074_v35, %v1062_v46 }
  0xe0   :  { %v1318_v55 = vmax.f32 %v1075_v53, 0.0 }
  0xe2   :  { %1334 = vst [vmem:[%s3102_s3 + $0x30] sm:$0xff] %v1318_v55  ;;  %v1152_v62 = vpop.f32.mrf.mxu1 }
  0xe4   :  { %v1126_v59 = vpop.f32.mrf.mxu3 }
  0xe5   :  { %v1076_v58 = vpop.f32.mrf.mxu2 }
  0xe9   :  { %v1139_v60 = vpop.f32.mrf.mxu0 }
  0xea   :  { %v1140_v61 = vadd.f32 %v1139_v60, %v3033_v6  ;;  %v1154_v8 = vpop.f32.mrf.mxu1 }
  0xec   :  { %v1153_v63 = vadd.f32 %v1152_v62, %v1140_v61  ;;  %v1128_v3 = vpop.f32.mrf.mxu3 }
  0xee   :  { %v1321_v1 = vmax.f32 %v1153_v63, 0.0 }
  0xf0   :  { %1337 = vst [vmem:[%s3102_s3 + $0x48] sm:$0xff] %v1321_v1 }
  0xf1   :  { %v1113_v0 = vpop.f32.mrf.mxu2  ;;  %v1141_v5 = vpop.f32.mrf.mxu0 }
  0xf2   :  { %v1114_v2 = vadd.f32 %v1113_v0, %v3033_v6 }
  0xf4   :  { %v1127_v4 = vadd.f32 %v1126_v59, %v1114_v2 }
  0xf6   :  { %v1320_v7 = vmax.f32 %v1127_v4, 0.0 }
  0xf7   :  { %v1191_v13 = vpop.f32.mrf.mxu1 }
  0xf8   :  { %1336 = vst [vmem:[%s3102_s3 + $0x40] sm:$0xff] %v1320_v7  ;;  %v1165_v10 = vpop.f32.mrf.mxu3  ;;  %v1192_v14 = vadd.f32 %v1191_v13, %v3033_v6 }
  0xf9   :  { %v1115_v9 = vpop.f32.mrf.mxu2  ;;  %v1204_v11 = vpop.f32.mrf.mxu0  ;;  %v1166_v12 = vadd.f32 %v1165_v10, %v3033_v6 }
  0xfa   :  { %v1205_v15 = vadd.f32 %v1204_v11, %v1192_v14 }
  0xfc   :  { %v1323_v17 = vmax.f32 %v1205_v15, 0.0 }
  0xfe   :  { %1339 = vst [vmem:[%s3102_s3 + $0x58] sm:$0xff] %v1323_v17 }
  0xff   :  { %v1193_v20 = vpop.f32.mrf.mxu1 }
 0x100   :  { %v1167_v52 = vpop.f32.mrf.mxu3 }
 0x101   :  { %v1178_v47 = vpop.f32.mrf.mxu2  ;;  %v1206_v19 = vpop.f32.mrf.mxu0 }
 0x102   :  { %v1179_v16 = vadd.f32 %v1178_v47, %v1166_v12 }
 0x104   :  { %v1322_v18 = vmax.f32 %v1179_v16, 0.0 }
 0x106   :  { %1338 = vst [vmem:[%s3102_s3 + $0x50] sm:$0xff] %v1322_v18 }
 0x107   :  { %v1256_v25 = vpop.f32.mrf.mxu1 }
 0x108   :  { %v1230_v22 = vpop.f32.mrf.mxu3 }
 0x109   :  { %v1180_v21 = vpop.f32.mrf.mxu2 }
 0x10d   :  { %v1243_v23 = vpop.f32.mrf.mxu0 }
 0x10e   :  { %v1244_v24 = vadd.f32 %v1243_v23, %v3033_v6 }
 0x10f   :  { %v1258_v34 = vpop.f32.mrf.mxu1 }
 0x110   :  { %v1257_v26 = vadd.f32 %v1256_v25, %v1244_v24  ;;  %v1232_v30 = vpop.f32.mrf.mxu3 }
 0x112   :  { %v1325_v28 = vmax.f32 %v1257_v26, 0.0 }
 0x114   :  { %1341 = vst [vmem:[%s3102_s3 + $0x68] sm:$0xff] %v1325_v28 }
 0x115   :  { %v1217_v27 = vpop.f32.mrf.mxu2  ;;  %v1245_v32 = vpop.f32.mrf.mxu0 }
 0x116   :  { %v1218_v29 = vadd.f32 %v1217_v27, %v3033_v6 }
 0x118   :  { %v1231_v31 = vadd.f32 %v1230_v22, %v1218_v29 }
 0x11a   :  { %v1324_v33 = vmax.f32 %v1231_v31, 0.0 }
 0x11b   :  { %v1295_v40 = vpop.f32.mrf.mxu1 }
 0x11c   :  { %1340 = vst [vmem:[%s3102_s3 + $0x60] sm:$0xff] %v1324_v33  ;;  %v1269_v37 = vpop.f32.mrf.mxu3  ;;  %v1296_v41 = vadd.f32 %v1295_v40, %v3033_v6 }
 0x11d   :  { %v1219_v36 = vpop.f32.mrf.mxu2  ;;  %v1308_v38 = vpop.f32.mrf.mxu0  ;;  %v1270_v39 = vadd.f32 %v1269_v37, %v3033_v6 }
 0x11e   :  { %v1309_v42 = vadd.f32 %v1308_v38, %v1296_v41 }
 0x120   :  { %v1327_v46 = vmax.f32 %v1309_v42, 0.0 }
 0x122   :  { %1343 = vst [vmem:[%s3102_s3 + $0x78] sm:$0xff] %v1327_v46 }
 0x123   :  { %v1297_v50 = vpop.f32.mrf.mxu1 }
 0x124   :  { %v1271_v44 = vpop.f32.mrf.mxu3 }
 0x125   :  { %v1282_v43 = vpop.f32.mrf.mxu2  ;;  %v1310_v49 = vpop.f32.mrf.mxu0 }
 0x126   :  { %v1283_v45 = vadd.f32 %v1282_v43, %v1270_v39 }
 0x128   :  { %v1326_v48 = vmax.f32 %v1283_v45, 0.0 }
 0x12a   :  { %1342 = vst [vmem:[%s3102_s3 + $0x70] sm:$0xff] %v1326_v48 }
 0x12d   :  { %v1284_v35 = vpop.f32.mrf.mxu2 }

// kernel: hrnn_forward.13
= control target key start
LH: loop header
LB: loop body
LE: loop exit
PB: predicated region body
PF: predicated region fallthrough
CT: control target
= control target key end

     0   :  { %s3552_s12 = smov 0   ;;  %s3554_s13 = smov 0   ;;  %s4883_s0 = inlined_call_operand.vmem [shape: bf16[3,72], index: 0, kind: input, shape index: {}]   ;;  %s4884_s1 = inlined_call_operand.vmem [shape: bf16[72,8192], index: 1, kind: input, shape index: {}]   ;;  %s4885_s2 = inlined_call_operand.vmem [shape: f32[3,1], index: 2, kind: input, shape index: {}]   ;;  %s4886_s3 = inlined_call_operand.vmem [shape: f32[3,8192], index: 3, kind: output, shape index: {}]  }
   0x1   :  { %s3556_s14 = smov 0  }
   0x2 LB: > { %s2634_s15 = sadd.s32 4294967295, %s3529_s14   ;;  %s3569_s16 = sadd.s32 1, %s3529_s14   ;;  %s3529_s14 = sphi %s3556_s14, %s4957_s14   ;;  %s3525_s13 = sphi %s3554_s13, %s4956_s13   ;;  %s3521_s12 = sphi %s3552_s12, %s4955_s12  }
   0x3   : > { %s38_s17 = ssub.s32 %s3529_s14, %s3569_s16  ;;  %s41_s18 = sadd.s32 1, %s3525_s13 }
   0x4   : > { %p39_p0 = scmp.eq.s32.totalorder %s38_s17, 0  ;;  %p48_p1 = scmp.ne.s32.totalorder %s3525_s13, %s3521_s12 }
   0x5   : > { %p49_p2 = scmp.eq.s32.totalorder %s3529_s14, 0  ;;  %p2637_p4 = scmp.ge.s32.totalorder %s3529_s14, 2 }
   0x6   : > { %s3578_s19 = scalar_select %p39_p0, %s3525_s13, %s41_s18  }
   0x7   : > { %p50_p3 = por %p49_p2, %p48_p1  ;;  %127 = sbr.rel (%p2637_p4) target bundleno = 160 (0xa0), region = 24 }
   0xc   : > { %130 = sbr.rel (!%p50_p3) target bundleno = 160 (0xa0), region = 28  ;;  %s132_s20 = sand.u32 (%p50_p3), 1, %s3525_s13  }
   0xd   : > { %s3221_s21 = sshll.u32 (%p50_p3), %s3529_s14, 7  ;;  %s3350_s22 = smul.u32 (%p50_p3), 1152, %s132_s20 }
   0xe   : > { %s3586_s25 = scalar_lea.vmem (%p50_p3), %s4884_s1, %s3221_s21 }
   0xf   : > { %v150_v0 = vld [vmem:[%s3586_s25] sm:$0xff] (%p50_p3)  ;;  %v152_v1 = vld [vmem:[%s3586_s25 + $0x8] sm:$0xff] (%p50_p3)  ;;  %v154_v2 = vld [vmem:[%s3586_s25 + $0x10] sm:$0xff] (%p50_p3)  ;;  %s3591_s26 = scalar_lea.vmem (%p50_p3), [#allocation2], %s3350_s22 }
  0x10   : > { %151 = vst [vmem:[%s3591_s26] sm:$0xff] (%p50_p3), %v150_v0  ;;  %v156_v3 = vld [vmem:[%s3586_s25 + $0x18] sm:$0xff] (%p50_p3)  ;;  %v158_v4 = vld [vmem:[%s3586_s25 + $0x20] sm:$0xff] (%p50_p3)  ;;  %v160_v5 = vld [vmem:[%s3586_s25 + $0x28] sm:$0xff] (%p50_p3) }
  0x11   : > { %153 = vst [vmem:[%s3591_s26 + $0x8] sm:$0xff] %v152_v1  ;;  %v162_v6 = vld [vmem:[%s3586_s25 + $0x30] sm:$0xff]  ;;  %v164_v7 = vld [vmem:[%s3586_s25 + $0x38] sm:$0xff]  ;;  %v166_v8 = vld [vmem:[%s3586_s25 + $0x40] sm:$0xff] }
  0x12   : > { %155 = vst [vmem:[%s3591_s26 + $0x10] sm:$0xff] %v154_v2  ;;  %v168_v9 = vld [vmem:[%s3586_s25 + $0x48] sm:$0xff]  ;;  %v170_v10 = vld [vmem:[%s3586_s25 + $0x50] sm:$0xff]  ;;  %v172_v11 = vld [vmem:[%s3586_s25 + $0x58] sm:$0xff] }
  0x13   : > { %157 = vst [vmem:[%s3591_s26 + $0x18] sm:$0xff] %v156_v3  ;;  %v174_v12 = vld [vmem:[%s3586_s25 + $0x60] sm:$0xff]  ;;  %v176_v13 = vld [vmem:[%s3586_s25 + $0x68] sm:$0xff]  ;;  %v178_v14 = vld [vmem:[%s3586_s25 + $0x70] sm:$0xff] }
  0x14   : > { %159 = vst [vmem:[%s3591_s26 + $0x20] sm:$0xff] %v158_v4  ;;  %v180_v15 = vld [vmem:[%s3586_s25 + $0x78] sm:$0xff]  ;;  %v182_v16 = vld [vmem:[%s3586_s25 + $0x100] sm:$0xff]  ;;  %v184_v17 = vld [vmem:[%s3586_s25 + $0x108] sm:$0xff] }
  0x15   : > { %161 = vst [vmem:[%s3591_s26 + $0x28] sm:$0xff] %v160_v5  ;;  %v186_v18 = vld [vmem:[%s3586_s25 + $0x110] sm:$0xff]  ;;  %v188_v19 = vld [vmem:[%s3586_s25 + $0x118] sm:$0xff]  ;;  %v190_v20 = vld [vmem:[%s3586_s25 + $0x120] sm:$0xff] }
  0x16   : > { %163 = vst [vmem:[%s3591_s26 + $0x30] sm:$0xff] %v162_v6  ;;  %v192_v21 = vld [vmem:[%s3586_s25 + $0x128] sm:$0xff]  ;;  %v194_v22 = vld [vmem:[%s3586_s25 + $0x130] sm:$0xff]  ;;  %v196_v23 = vld [vmem:[%s3586_s25 + $0x138] sm:$0xff] }
  0x17   : > { %165 = vst [vmem:[%s3591_s26 + $0x38] sm:$0xff] %v164_v7  ;;  %v198_v24 = vld [vmem:[%s3586_s25 + $0x140] sm:$0xff]  ;;  %v200_v25 = vld [vmem:[%s3586_s25 + $0x148] sm:$0xff]  ;;  %v202_v26 = vld [vmem:[%s3586_s25 + $0x150] sm:$0xff] }
  0x18   : > { %167 = vst [vmem:[%s3591_s26 + $0x40] sm:$0xff] %v166_v8  ;;  %v204_v27 = vld [vmem:[%s3586_s25 + $0x158] sm:$0xff]  ;;  %v206_v28 = vld [vmem:[%s3586_s25 + $0x160] sm:$0xff]  ;;  %v208_v29 = vld [vmem:[%s3586_s25 + $0x168] sm:$0xff] }
  0x19   : > { %169 = vst [vmem:[%s3591_s26 + $0x48] sm:$0xff] %v168_v9  ;;  %v210_v30 = vld [vmem:[%s3586_s25 + $0x170] sm:$0xff]  ;;  %v212_v31 = vld [vmem:[%s3586_s25 + $0x178] sm:$0xff]  ;;  %v214_v32 = vld [vmem:[%s3586_s25 + $0x200] sm:$0xff] }
  0x1a   : > { %171 = vst [vmem:[%s3591_s26 + $0x50] sm:$0xff] %v170_v10  ;;  %v216_v33 = vld [vmem:[%s3586_s25 + $0x208] sm:$0xff]  ;;  %v218_v34 = vld [vmem:[%s3586_s25 + $0x210] sm:$0xff]  ;;  %v220_v35 = vld [vmem:[%s3586_s25 + $0x218] sm:$0xff] }
  0x1b   : > { %173 = vst [vmem:[%s3591_s26 + $0x58] sm:$0xff] %v172_v11  ;;  %v222_v36 = vld [vmem:[%s3586_s25 + $0x220] sm:$0xff]  ;;  %v224_v37 = vld [vmem:[%s3586_s25 + $0x228] sm:$0xff]  ;;  %v226_v38 = vld [vmem:[%s3586_s25 + $0x230] sm:$0xff] }
  0x1c   : > { %175 = vst [vmem:[%s3591_s26 + $0x60] sm:$0xff] %v174_v12  ;;  %v228_v39 = vld [vmem:[%s3586_s25 + $0x238] sm:$0xff]  ;;  %v230_v40 = vld [vmem:[%s3586_s25 + $0x240] sm:$0xff]  ;;  %v232_v41 = vld [vmem:[%s3586_s25 + $0x248] sm:$0xff] }
  0x1d   : > { %177 = vst [vmem:[%s3591_s26 + $0x68] sm:$0xff] %v176_v13  ;;  %v234_v42 = vld [vmem:[%s3586_s25 + $0x250] sm:$0xff]  ;;  %v236_v43 = vld [vmem:[%s3586_s25 + $0x258] sm:$0xff]  ;;  %v238_v44 = vld [vmem:[%s3586_s25 + $0x260] sm:$0xff] }
  0x1e   : > { %179 = vst [vmem:[%s3591_s26 + $0x70] sm:$0xff] %v178_v14  ;;  %v240_v45 = vld [vmem:[%s3586_s25 + $0x268] sm:$0xff]  ;;  %v242_v46 = vld [vmem:[%s3586_s25 + $0x270] sm:$0xff]  ;;  %v244_v47 = vld [vmem:[%s3586_s25 + $0x278] sm:$0xff] }
  0x1f   : > { %181 = vst [vmem:[%s3591_s26 + $0x78] sm:$0xff] %v180_v15  ;;  %v246_v48 = vld [vmem:[%s3586_s25 + $0x300] sm:$0xff]  ;;  %v248_v49 = vld [vmem:[%s3586_s25 + $0x308] sm:$0xff]  ;;  %v250_v50 = vld [vmem:[%s3586_s25 + $0x310] sm:$0xff] }
  0x20   : > { %183 = vst [vmem:[%s3591_s26 + $0x80] sm:$0xff] %v182_v16  ;;  %v252_v51 = vld [vmem:[%s3586_s25 + $0x318] sm:$0xff]  ;;  %v254_v52 = vld [vmem:[%s3586_s25 + $0x320] sm:$0xff]  ;;  %v256_v53 = vld [vmem:[%s3586_s25 + $0x328] sm:$0xff] }
  0x21   : > { %185 = vst [vmem:[%s3591_s26 + $0x88] sm:$0xff] %v184_v17  ;;  %v258_v54 = vld [vmem:[%s3586_s25 + $0x330] sm:$0xff]  ;;  %v260_v55 = vld [vmem:[%s3586_s25 + $0x338] sm:$0xff]  ;;  %v262_v56 = vld [vmem:[%s3586_s25 + $0x340] sm:$0xff] }
  0x22   : > { %187 = vst [vmem:[%s3591_s26 + $0x90] sm:$0xff] %v186_v18  ;;  %v264_v57 = vld [vmem:[%s3586_s25 + $0x348] sm:$0xff]  ;;  %v266_v58 = vld [vmem:[%s3586_s25 + $0x350] sm:$0xff]  ;;  %v268_v59 = vld [vmem:[%s3586_s25 + $0x358] sm:$0xff] }
  0x23   : > { %189 = vst [vmem:[%s3591_s26 + $0x98] sm:$0xff] %v188_v19  ;;  %v270_v60 = vld [vmem:[%s3586_s25 + $0x360] sm:$0xff]  ;;  %v272_v61 = vld [vmem:[%s3586_s25 + $0x368] sm:$0xff]  ;;  %v274_v62 = vld [vmem:[%s3586_s25 + $0x370] sm:$0xff] }
  0x24   : > { %191 = vst [vmem:[%s3591_s26 + $0xa0] sm:$0xff] %v190_v20  ;;  %v276_v63 = vld [vmem:[%s3586_s25 + $0x378] sm:$0xff]  ;;  %v278_v0 = vld [vmem:[%s3586_s25 + $0x400] sm:$0xff]  ;;  %v280_v1 = vld [vmem:[%s3586_s25 + $0x408] sm:$0xff] }
  0x25   : > { %193 = vst [vmem:[%s3591_s26 + $0xa8] sm:$0xff] %v192_v21  ;;  %v282_v2 = vld [vmem:[%s3586_s25 + $0x410] sm:$0xff]  ;;  %v284_v3 = vld [vmem:[%s3586_s25 + $0x418] sm:$0xff]  ;;  %v286_v4 = vld [vmem:[%s3586_s25 + $0x420] sm:$0xff] }
  0x26   : > { %195 = vst [vmem:[%s3591_s26 + $0xb0] sm:$0xff] %v194_v22  ;;  %v288_v5 = vld [vmem:[%s3586_s25 + $0x428] sm:$0xff]  ;;  %v290_v6 = vld [vmem:[%s3586_s25 + $0x430] sm:$0xff]  ;;  %v292_v7 = vld [vmem:[%s3586_s25 + $0x438] sm:$0xff] }
  0x27   : > { %197 = vst [vmem:[%s3591_s26 + $0xb8] sm:$0xff] %v196_v23  ;;  %v294_v8 = vld [vmem:[%s3586_s25 + $0x440] sm:$0xff]  ;;  %v296_v9 = vld [vmem:[%s3586_s25 + $0x448] sm:$0xff]  ;;  %v298_v10 = vld [vmem:[%s3586_s25 + $0x450] sm:$0xff] }
  0x28   : > { %199 = vst [vmem:[%s3591_s26 + $0xc0] sm:$0xff] %v198_v24  ;;  %v300_v11 = vld [vmem:[%s3586_s25 + $0x458] sm:$0xff]  ;;  %v302_v12 = vld [vmem:[%s3586_s25 + $0x460] sm:$0xff]  ;;  %v304_v13 = vld [vmem:[%s3586_s25 + $0x468] sm:$0xff] }
  0x29   : > { %201 = vst [vmem:[%s3591_s26 + $0xc8] sm:$0xff] %v200_v25  ;;  %v306_v14 = vld [vmem:[%s3586_s25 + $0x470] sm:$0xff]  ;;  %v308_v15 = vld [vmem:[%s3586_s25 + $0x478] sm:$0xff]  ;;  %v310_v16 = vld [vmem:[%s3586_s25 + $0x500] sm:$0xff] }
  0x2a   : > { %203 = vst [vmem:[%s3591_s26 + $0xd0] sm:$0xff] %v202_v26  ;;  %v312_v17 = vld [vmem:[%s3586_s25 + $0x508] sm:$0xff]  ;;  %v314_v18 = vld [vmem:[%s3586_s25 + $0x510] sm:$0xff]  ;;  %v316_v19 = vld [vmem:[%s3586_s25 + $0x518] sm:$0xff] }
  0x2b   : > { %205 = vst [vmem:[%s3591_s26 + $0xd8] sm:$0xff] %v204_v27  ;;  %v318_v20 = vld [vmem:[%s3586_s25 + $0x520] sm:$0xff]  ;;  %v320_v21 = vld [vmem:[%s3586_s25 + $0x528] sm:$0xff]  ;;  %v322_v22 = vld [vmem:[%s3586_s25 + $0x530] sm:$0xff] }
  0x2c   : > { %207 = vst [vmem:[%s3591_s26 + $0xe0] sm:$0xff] %v206_v28  ;;  %v324_v23 = vld [vmem:[%s3586_s25 + $0x538] sm:$0xff]  ;;  %v326_v24 = vld [vmem:[%s3586_s25 + $0x540] sm:$0xff]  ;;  %v328_v25 = vld [vmem:[%s3586_s25 + $0x548] sm:$0xff] }
  0x2d   : > { %209 = vst [vmem:[%s3591_s26 + $0xe8] sm:$0xff] %v208_v29  ;;  %v330_v26 = vld [vmem:[%s3586_s25 + $0x550] sm:$0xff]  ;;  %v332_v27 = vld [vmem:[%s3586_s25 + $0x558] sm:$0xff]  ;;  %v334_v28 = vld [vmem:[%s3586_s25 + $0x560] sm:$0xff] }
  0x2e   : > { %211 = vst [vmem:[%s3591_s26 + $0xf0] sm:$0xff] %v210_v30  ;;  %v336_v29 = vld [vmem:[%s3586_s25 + $0x568] sm:$0xff]  ;;  %v338_v30 = vld [vmem:[%s3586_s25 + $0x570] sm:$0xff] }
  0x2f   : > { %213 = vst [vmem:[%s3591_s26 + $0xf8] sm:$0xff] %v212_v31  ;;  %v340_v31 = vld [vmem:[%s3586_s25 + $0x578] sm:$0xff] }
  0x30   : > { %215 = vst [vmem:[%s3591_s26 + $0x100] sm:$0xff] %v214_v32  ;;  %v342_v32 = vld [vmem:[%s3586_s25 + $0x600] sm:$0xff] }
  0x31   : > { %217 = vst [vmem:[%s3591_s26 + $0x108] sm:$0xff] %v216_v33  ;;  %v344_v33 = vld [vmem:[%s3586_s25 + $0x608] sm:$0xff] }
  0x32   : > { %219 = vst [vmem:[%s3591_s26 + $0x110] sm:$0xff] %v218_v34  ;;  %v346_v34 = vld [vmem:[%s3586_s25 + $0x610] sm:$0xff] }
  0x33   : > { %221 = vst [vmem:[%s3591_s26 + $0x118] sm:$0xff] %v220_v35  ;;  %v348_v35 = vld [vmem:[%s3586_s25 + $0x618] sm:$0xff] }
  0x34   : > { %223 = vst [vmem:[%s3591_s26 + $0x120] sm:$0xff] %v222_v36  ;;  %v350_v36 = vld [vmem:[%s3586_s25 + $0x620] sm:$0xff] }
  0x35   : > { %225 = vst [vmem:[%s3591_s26 + $0x128] sm:$0xff] %v224_v37  ;;  %v352_v37 = vld [vmem:[%s3586_s25 + $0x628] sm:$0xff] }
  0x36   : > { %227 = vst [vmem:[%s3591_s26 + $0x130] sm:$0xff] %v226_v38  ;;  %v354_v38 = vld [vmem:[%s3586_s25 + $0x630] sm:$0xff] }
  0x37   : > { %229 = vst [vmem:[%s3591_s26 + $0x138] sm:$0xff] %v228_v39  ;;  %v356_v39 = vld [vmem:[%s3586_s25 + $0x638] sm:$0xff] }
  0x38   : > { %231 = vst [vmem:[%s3591_s26 + $0x140] sm:$0xff] %v230_v40  ;;  %v358_v40 = vld [vmem:[%s3586_s25 + $0x640] sm:$0xff] }
  0x39   : > { %233 = vst [vmem:[%s3591_s26 + $0x148] sm:$0xff] %v232_v41  ;;  %v360_v41 = vld [vmem:[%s3586_s25 + $0x648] sm:$0xff] }
  0x3a   : > { %235 = vst [vmem:[%s3591_s26 + $0x150] sm:$0xff] %v234_v42  ;;  %v362_v42 = vld [vmem:[%s3586_s25 + $0x650] sm:$0xff] }
  0x3b   : > { %237 = vst [vmem:[%s3591_s26 + $0x158] sm:$0xff] %v236_v43  ;;  %v364_v43 = vld [vmem:[%s3586_s25 + $0x658] sm:$0xff] }
  0x3c   : > { %239 = vst [vmem:[%s3591_s26 + $0x160] sm:$0xff] %v238_v44  ;;  %v366_v44 = vld [vmem:[%s3586_s25 + $0x660] sm:$0xff] }
  0x3d   : > { %241 = vst [vmem:[%s3591_s26 + $0x168] sm:$0xff] %v240_v45  ;;  %v368_v45 = vld [vmem:[%s3586_s25 + $0x668] sm:$0xff] }
  0x3e   : > { %243 = vst [vmem:[%s3591_s26 + $0x170] sm:$0xff] %v242_v46  ;;  %v370_v46 = vld [vmem:[%s3586_s25 + $0x670] sm:$0xff] }
  0x3f   : > { %245 = vst [vmem:[%s3591_s26 + $0x178] sm:$0xff] %v244_v47  ;;  %v372_v47 = vld [vmem:[%s3586_s25 + $0x678] sm:$0xff] }
  0x40   : > { %247 = vst [vmem:[%s3591_s26 + $0x180] sm:$0xff] %v246_v48  ;;  %v374_v48 = vld [vmem:[%s3586_s25 + $0x700] sm:$0xff] }
  0x41   : > { %249 = vst [vmem:[%s3591_s26 + $0x188] sm:$0xff] %v248_v49  ;;  %v376_v49 = vld [vmem:[%s3586_s25 + $0x708] sm:$0xff] }
  0x42   : > { %251 = vst [vmem:[%s3591_s26 + $0x190] sm:$0xff] %v250_v50  ;;  %v378_v50 = vld [vmem:[%s3586_s25 + $0x710] sm:$0xff] }
  0x43   : > { %253 = vst [vmem:[%s3591_s26 + $0x198] sm:$0xff] %v252_v51  ;;  %v380_v51 = vld [vmem:[%s3586_s25 + $0x718] sm:$0xff] }
  0x44   : > { %255 = vst [vmem:[%s3591_s26 + $0x1a0] sm:$0xff] %v254_v52  ;;  %v382_v52 = vld [vmem:[%s3586_s25 + $0x720] sm:$0xff] }
  0x45   : > { %257 = vst [vmem:[%s3591_s26 + $0x1a8] sm:$0xff] %v256_v53  ;;  %v384_v53 = vld [vmem:[%s3586_s25 + $0x728] sm:$0xff] }
  0x46   : > { %259 = vst [vmem:[%s3591_s26 + $0x1b0] sm:$0xff] %v258_v54  ;;  %v386_v54 = vld [vmem:[%s3586_s25 + $0x730] sm:$0xff] }
  0x47   : > { %261 = vst [vmem:[%s3591_s26 + $0x1b8] sm:$0xff] %v260_v55  ;;  %v388_v55 = vld [vmem:[%s3586_s25 + $0x738] sm:$0xff] }
  0x48   : > { %263 = vst [vmem:[%s3591_s26 + $0x1c0] sm:$0xff] %v262_v56  ;;  %v390_v56 = vld [vmem:[%s3586_s25 + $0x740] sm:$0xff] }
  0x49   : > { %265 = vst [vmem:[%s3591_s26 + $0x1c8] sm:$0xff] %v264_v57  ;;  %v392_v57 = vld [vmem:[%s3586_s25 + $0x748] sm:$0xff] }
  0x4a   : > { %267 = vst [vmem:[%s3591_s26 + $0x1d0] sm:$0xff] %v266_v58  ;;  %v394_v58 = vld [vmem:[%s3586_s25 + $0x750] sm:$0xff] }
  0x4b   : > { %269 = vst [vmem:[%s3591_s26 + $0x1d8] sm:$0xff] %v268_v59  ;;  %v396_v59 = vld [vmem:[%s3586_s25 + $0x758] sm:$0xff] }
  0x4c   : > { %271 = vst [vmem:[%s3591_s26 + $0x1e0] sm:$0xff] %v270_v60  ;;  %v398_v60 = vld [vmem:[%s3586_s25 + $0x760] sm:$0xff] }
  0x4d   : > { %273 = vst [vmem:[%s3591_s26 + $0x1e8] sm:$0xff] %v272_v61  ;;  %v400_v61 = vld [vmem:[%s3586_s25 + $0x768] sm:$0xff] }
  0x4e   : > { %275 = vst [vmem:[%s3591_s26 + $0x1f0] sm:$0xff] %v274_v62  ;;  %v402_v62 = vld [vmem:[%s3586_s25 + $0x770] sm:$0xff] }
  0x4f   : > { %277 = vst [vmem:[%s3591_s26 + $0x1f8] sm:$0xff] %v276_v63  ;;  %v404_v63 = vld [vmem:[%s3586_s25 + $0x778] sm:$0xff] }
  0x50   : > { %279 = vst [vmem:[%s3591_s26 + $0x200] sm:$0xff] %v278_v0  ;;  %v406_v0 = vld [vmem:[%s3586_s25 + $0x800] sm:$0xff] }
  0x51   : > { %281 = vst [vmem:[%s3591_s26 + $0x208] sm:$0xff] %v280_v1  ;;  %v408_v1 = vld [vmem:[%s3586_s25 + $0x808] sm:$0xff] }
  0x52   : > { %283 = vst [vmem:[%s3591_s26 + $0x210] sm:$0xff] %v282_v2  ;;  %v410_v2 = vld [vmem:[%s3586_s25 + $0x810] sm:$0xff] }
  0x53   : > { %285 = vst [vmem:[%s3591_s26 + $0x218] sm:$0xff] %v284_v3  ;;  %v412_v3 = vld [vmem:[%s3586_s25 + $0x818] sm:$0xff] }
  0x54   : > { %287 = vst [vmem:[%s3591_s26 + $0x220] sm:$0xff] %v286_v4  ;;  %v414_v4 = vld [vmem:[%s3586_s25 + $0x820] sm:$0xff] }
  0x55   : > { %289 = vst [vmem:[%s3591_s26 + $0x228] sm:$0xff] %v288_v5  ;;  %v416_v5 = vld [vmem:[%s3586_s25 + $0x828] sm:$0xff] }
  0x56   : > { %291 = vst [vmem:[%s3591_s26 + $0x230] sm:$0xff] %v290_v6  ;;  %v418_v6 = vld [vmem:[%s3586_s25 + $0x830] sm:$0xff] }
  0x57   : > { %293 = vst [vmem:[%s3591_s26 + $0x238] sm:$0xff] %v292_v7  ;;  %v420_v7 = vld [vmem:[%s3586_s25 + $0x838] sm:$0xff] }
  0x58   : > { %295 = vst [vmem:[%s3591_s26 + $0x240] sm:$0xff] %v294_v8  ;;  %v422_v8 = vld [vmem:[%s3586_s25 + $0x840] sm:$0xff] }
  0x59   : > { %297 = vst [vmem:[%s3591_s26 + $0x248] sm:$0xff] %v296_v9  ;;  %v424_v9 = vld [vmem:[%s3586_s25 + $0x848] sm:$0xff] }
  0x5a   : > { %299 = vst [vmem:[%s3591_s26 + $0x250] sm:$0xff] %v298_v10  ;;  %v426_v10 = vld [vmem:[%s3586_s25 + $0x850] sm:$0xff] }
  0x5b   : > { %301 = vst [vmem:[%s3591_s26 + $0x258] sm:$0xff] %v300_v11  ;;  %v428_v11 = vld [vmem:[%s3586_s25 + $0x858] sm:$0xff] }
  0x5c   : > { %303 = vst [vmem:[%s3591_s26 + $0x260] sm:$0xff] %v302_v12  ;;  %v430_v12 = vld [vmem:[%s3586_s25 + $0x860] sm:$0xff] }
  0x5d   : > { %305 = vst [vmem:[%s3591_s26 + $0x268] sm:$0xff] %v304_v13  ;;  %v432_v13 = vld [vmem:[%s3586_s25 + $0x868] sm:$0xff] }
  0x5e   : > { %307 = vst [vmem:[%s3591_s26 + $0x270] sm:$0xff] %v306_v14  ;;  %v434_v14 = vld [vmem:[%s3586_s25 + $0x870] sm:$0xff] }
  0x5f   : > { %309 = vst [vmem:[%s3591_s26 + $0x278] sm:$0xff] %v308_v15  ;;  %v436_v15 = vld [vmem:[%s3586_s25 + $0x878] sm:$0xff] }
  0x60   : > { %311 = vst [vmem:[%s3591_s26 + $0x280] sm:$0xff] %v310_v16 }
  0x61   : > { %313 = vst [vmem:[%s3591_s26 + $0x288] sm:$0xff] %v312_v17 }
  0x62   : > { %315 = vst [vmem:[%s3591_s26 + $0x290] sm:$0xff] %v314_v18 }
  0x63   : > { %317 = vst [vmem:[%s3591_s26 + $0x298] sm:$0xff] %v316_v19 }
  0x64   : > { %319 = vst [vmem:[%s3591_s26 + $0x2a0] sm:$0xff] %v318_v20 }
  0x65   : > { %321 = vst [vmem:[%s3591_s26 + $0x2a8] sm:$0xff] %v320_v21 }
  0x66   : > { %323 = vst [vmem:[%s3591_s26 + $0x2b0] sm:$0xff] %v322_v22 }
  0x67   : > { %325 = vst [vmem:[%s3591_s26 + $0x2b8] sm:$0xff] %v324_v23 }
  0x68   : > { %327 = vst [vmem:[%s3591_s26 + $0x2c0] sm:$0xff] %v326_v24 }
  0x69   : > { %329 = vst [vmem:[%s3591_s26 + $0x2c8] sm:$0xff] %v328_v25 }
  0x6a   : > { %331 = vst [vmem:[%s3591_s26 + $0x2d0] sm:$0xff] %v330_v26 }
  0x6b   : > { %333 = vst [vmem:[%s3591_s26 + $0x2d8] sm:$0xff] %v332_v27 }
  0x6c   : > { %335 = vst [vmem:[%s3591_s26 + $0x2e0] sm:$0xff] %v334_v28 }
  0x6d   : > { %337 = vst [vmem:[%s3591_s26 + $0x2e8] sm:$0xff] %v336_v29 }
  0x6e   : > { %339 = vst [vmem:[%s3591_s26 + $0x2f0] sm:$0xff] %v338_v30 }
  0x6f   : > { %341 = vst [vmem:[%s3591_s26 + $0x2f8] sm:$0xff] %v340_v31 }
  0x70   : > { %343 = vst [vmem:[%s3591_s26 + $0x300] sm:$0xff] %v342_v32 }
  0x71   : > { %345 = vst [vmem:[%s3591_s26 + $0x308] sm:$0xff] %v344_v33 }
  0x72   : > { %347 = vst [vmem:[%s3591_s26 + $0x310] sm:$0xff] %v346_v34 }
  0x73   : > { %349 = vst [vmem:[%s3591_s26 + $0x318] sm:$0xff] %v348_v35 }
  0x74   : > { %351 = vst [vmem:[%s3591_s26 + $0x320] sm:$0xff] %v350_v36 }
  0x75   : > { %353 = vst [vmem:[%s3591_s26 + $0x328] sm:$0xff] %v352_v37 }
  0x76   : > { %355 = vst [vmem:[%s3591_s26 + $0x330] sm:$0xff] %v354_v38 }
  0x77   : > { %357 = vst [vmem:[%s3591_s26 + $0x338] sm:$0xff] %v356_v39 }
  0x78   : > { %359 = vst [vmem:[%s3591_s26 + $0x340] sm:$0xff] %v358_v40 }
  0x79   : > { %361 = vst [vmem:[%s3591_s26 + $0x348] sm:$0xff] %v360_v41 }
  0x7a   : > { %363 = vst [vmem:[%s3591_s26 + $0x350] sm:$0xff] %v362_v42 }
  0x7b   : > { %365 = vst [vmem:[%s3591_s26 + $0x358] sm:$0xff] %v364_v43 }
  0x7c   : > { %367 = vst [vmem:[%s3591_s26 + $0x360] sm:$0xff] %v366_v44 }
  0x7d   : > { %369 = vst [vmem:[%s3591_s26 + $0x368] sm:$0xff] %v368_v45 }
  0x7e   : > { %371 = vst [vmem:[%s3591_s26 + $0x370] sm:$0xff] %v370_v46 }
  0x7f   : > { %373 = vst [vmem:[%s3591_s26 + $0x378] sm:$0xff] %v372_v47 }
  0x80   : > { %375 = vst [vmem:[%s3591_s26 + $0x380] sm:$0xff] %v374_v48 }
  0x81   : > { %377 = vst [vmem:[%s3591_s26 + $0x388] sm:$0xff] %v376_v49 }
  0x82   : > { %379 = vst [vmem:[%s3591_s26 + $0x390] sm:$0xff] %v378_v50 }
  0x83   : > { %381 = vst [vmem:[%s3591_s26 + $0x398] sm:$0xff] %v380_v51 }
  0x84   : > { %383 = vst [vmem:[%s3591_s26 + $0x3a0] sm:$0xff] %v382_v52 }
  0x85   : > { %385 = vst [vmem:[%s3591_s26 + $0x3a8] sm:$0xff] %v384_v53 }
  0x86   : > { %387 = vst [vmem:[%s3591_s26 + $0x3b0] sm:$0xff] %v386_v54 }
  0x87   : > { %389 = vst [vmem:[%s3591_s26 + $0x3b8] sm:$0xff] %v388_v55 }
  0x88   : > { %391 = vst [vmem:[%s3591_s26 + $0x3c0] sm:$0xff] %v390_v56 }
  0x89   : > { %393 = vst [vmem:[%s3591_s26 + $0x3c8] sm:$0xff] %v392_v57 }
  0x8a   : > { %395 = vst [vmem:[%s3591_s26 + $0x3d0] sm:$0xff] %v394_v58 }
  0x8b   : > { %397 = vst [vmem:[%s3591_s26 + $0x3d8] sm:$0xff] %v396_v59 }
  0x8c   : > { %399 = vst [vmem:[%s3591_s26 + $0x3e0] sm:$0xff] %v398_v60 }
  0x8d   : > { %401 = vst [vmem:[%s3591_s26 + $0x3e8] sm:$0xff] %v400_v61 }
  0x8e   : > { %403 = vst [vmem:[%s3591_s26 + $0x3f0] sm:$0xff] %v402_v62 }
  0x8f   : > { %405 = vst [vmem:[%s3591_s26 + $0x3f8] sm:$0xff] %v404_v63 }
  0x90   : > { %407 = vst [vmem:[%s3591_s26 + $0x400] sm:$0xff] %v406_v0 }
  0x91   : > { %409 = vst [vmem:[%s3591_s26 + $0x408] sm:$0xff] %v408_v1 }
  0x92   : > { %411 = vst [vmem:[%s3591_s26 + $0x410] sm:$0xff] %v410_v2 }
  0x93   : > { %413 = vst [vmem:[%s3591_s26 + $0x418] sm:$0xff] %v412_v3 }
  0x94   : > { %415 = vst [vmem:[%s3591_s26 + $0x420] sm:$0xff] %v414_v4 }
  0x95   : > { %417 = vst [vmem:[%s3591_s26 + $0x428] sm:$0xff] %v416_v5 }
  0x96   : > { %419 = vst [vmem:[%s3591_s26 + $0x430] sm:$0xff] %v418_v6 }
  0x97   : > { %421 = vst [vmem:[%s3591_s26 + $0x438] sm:$0xff] %v420_v7 }
  0x98   : > { %423 = vst [vmem:[%s3591_s26 + $0x440] sm:$0xff] %v422_v8 }
  0x99   : > { %425 = vst [vmem:[%s3591_s26 + $0x448] sm:$0xff] %v424_v9 }
  0x9a   : > { %427 = vst [vmem:[%s3591_s26 + $0x450] sm:$0xff] %v426_v10 }
  0x9b   : > { %429 = vst [vmem:[%s3591_s26 + $0x458] sm:$0xff] %v428_v11 }
  0x9c   : > { %431 = vst [vmem:[%s3591_s26 + $0x460] sm:$0xff] %v430_v12 }
  0x9d   : > { %433 = vst [vmem:[%s3591_s26 + $0x468] sm:$0xff] %v432_v13 }
  0x9e   : > { %435 = vst [vmem:[%s3591_s26 + $0x470] sm:$0xff] %v434_v14 }
  0x9f   : > { %437 = vst [vmem:[%s3591_s26 + $0x478] sm:$0xff] %v436_v15 }
  0xa0 PF: > { %p2640_p5 = scmp.ge.s32.totalorder %s3529_s14, 1  ;;  %p442_p6 = scmp.lt.s32.totalorder %s3529_s14, 3 }
  0xa2   : > { %p443_p7 = pnand %p2640_p5, %p442_p6 }
  0xa3   : > { %s449_s27 = sand.u32 (!%p443_p7), 1, %s3521_s12   ;;  %s2641_s9 = sshll.u32 (!%p443_p7), %s2634_s15, 5 }
  0xa4   : > { %446 = sbr.rel (%p443_p7) target bundleno = 502 (0x1f6), region = 51  ;;  %p474_p8 = scmp.lt.s32.totalorder (!%p443_p7), %s2641_s9, 63 }
  0xa5   : > { %s3351_s28 = smul.u32 (!%p443_p7), 1152, %s449_s27 }
  0xa7   : > { %s3881_s29 = scalar_lea.vmem (!%p443_p7), [#allocation2], %s3351_s28 }
  0xa9   : > { %v609_v16 = vld [vmem:[%s3881_s29 + $0x400] sm:$0xff]  ;;  %v610_v17 = vld [vmem:[%s3881_s29 + $0x408] sm:$0xff]  ;;  %vm1355_vm0 = vcmask 1043456   ;;  %v611_v62 = vld [vmem:[%s3881_s29 + $0x410] sm:$0xff]  ;;  %v3531_v2 = vmov 0   ;;  %vm1351_vm1 = vcmask 588800  }
  0xaa   : > { %v1031_v18 = vunpack.c.l.b16 %v609_v16  ;;  %v1032_v19 = vunpack.c.h.b16 %v609_v16  ;;  %v1033_v20 = vunpack.c.l.b16 %v610_v17  ;;  %v1034_v21 = vunpack.c.h.b16 %v610_v17  ;;  %v3029_v22 = vld [vmem:[%s3881_s29 + $0x300] sm:$0xf]  ;;  %v3318_v28 = vld [vmem:[%s3881_s29 + $0x304] sm:$0xf]  ;;  %v3037_v30 = vld [vmem:[%s3881_s29 + $0x308] sm:$0xf]  ;;  %3377 = vset.pattern.permute.xlu0 %v3531_v2 }
  0xab   : > { %v3334_v23 = vld [vmem:[%s3881_s29 + $0x37c] sm:$0xf0]  ;;  %v3031_v29 = vld [vmem:[%s3881_s29 + $0x380] sm:$0xf0]  ;;  %v3335_v31 = vld [vmem:[%s3881_s29 + $0x384] sm:$0xf0]  ;;  %v1035_v0 = vunpack.c.l.b16 %v611_v62  ;;  %v1036_v1 = vunpack.c.h.b16 %v611_v62 }
  0xac   : > { %v1191_v24 = vpack.c.b16 %v1031_v18, %v1031_v18  ;;  %v1192_v25 = vpack.c.b16 %v1032_v19, %v1032_v19  ;;  %v1193_v26 = vpack.c.b16 %v1033_v20, %v1033_v20  ;;  %v1194_v27 = vpack.c.b16 %v1034_v21, %v1034_v21  ;;  %v3319_v32 = vld [vmem:[%s3881_s29 + $0x30c] sm:$0xf]  ;;  %v2901_v40 = vld [vmem:[%s3881_s29 + $0x200] sm:$0xf]  ;;  %v3286_v44 = vld [vmem:[%s3881_s29 + $0x204] sm:$0xf] }
  0xad   : > { %v3039_v33 = vld [vmem:[%s3881_s29 + $0x388] sm:$0xf0]  ;;  %v3030_v38 = vor.u32 %v3334_v23, %v3029_v22  ;;  %v3034_v39 = vor.u32 %v3318_v28, %v3031_v29  ;;  %v3302_v41 = vld [vmem:[%s3881_s29 + $0x27c] sm:$0xf0]  ;;  %v3038_v42 = vor.u32 %v3335_v31, %v3037_v30  ;;  %v2903_v45 = vld [vmem:[%s3881_s29 + $0x280] sm:$0xf0]  ;;  %v1195_v18 = vpack.c.b16 %v1035_v0, %v1035_v0 }
  0xae   : > { %v1357_v34 = vsel %vm1355_vm0, %v1191_v24, 0  ;;  %v1360_v35 = vsel %vm1355_vm0, %v1192_v25, 0  ;;  %v1363_v36 = vsel %vm1355_vm0, %v1193_v26, 0  ;;  %v1366_v37 = vsel %vm1355_vm0, %v1194_v27, 0  ;;  %v2909_v46 = vld [vmem:[%s3881_s29 + $0x208] sm:$0xf] }
  0xaf   : > { %1455 = vmatpush.bf16.msra.mxu0 %v1357_v34  ;;  %1468 = vmatpush.bf16.msra.mxu1 %v1360_v35  ;;  %v3042_v43 = vor.u32 %v3319_v32, %v3039_v33  ;;  %v3303_v47 = vld [vmem:[%s3881_s29 + $0x284] sm:$0xf0]  ;;  %v3287_v48 = vld [vmem:[%s3881_s29 + $0x20c] sm:$0xf]  ;;  %v2773_v50 = vld [vmem:[%s3881_s29 + $0x100] sm:$0xf]  ;;  %v2902_v51 = vor.u32 %v3302_v41, %v2901_v40  ;;  %v2906_v52 = vor.u32 %v3286_v44, %v2903_v45 }
  0xb0   : > { %1481 = vmatpush.bf16.msra.mxu2 %v1363_v36  ;;  %1494 = vmatpush.bf16.msra.mxu3 %v1366_v37  ;;  %v2911_v49 = vld [vmem:[%s3881_s29 + $0x288] sm:$0xf0]  ;;  %v3270_v53 = vld [vmem:[%s3881_s29 + $0x17c] sm:$0xf0]  ;;  %v3254_v54 = vld [vmem:[%s3881_s29 + $0x104] sm:$0xf]  ;;  %v2910_v56 = vor.u32 %v3303_v47, %v2909_v46  ;;  %v1196_v19 = vpack.c.b16 %v1036_v1, %v1036_v1 }
  0xb1   : > { %v2775_v55 = vld [vmem:[%s3881_s29 + $0x180] sm:$0xf0]  ;;  %v2914_v57 = vor.u32 %v3287_v48, %v2911_v49  ;;  %v2781_v58 = vld [vmem:[%s3881_s29 + $0x108] sm:$0xf]  ;;  %v3255_v60 = vld [vmem:[%s3881_s29 + $0x10c] sm:$0xf]  ;;  %v2774_v3 = vor.u32 %v3270_v53, %v2773_v50 }
  0xb2   : > { %v3271_v59 = vld [vmem:[%s3881_s29 + $0x184] sm:$0xf0]  ;;  %v2783_v61 = vld [vmem:[%s3881_s29 + $0x188] sm:$0xf0]  ;;  %v612_v63 = vld [vmem:[%s3881_s29 + $0x418] sm:$0xff]  ;;  %v2778_v4 = vor.u32 %v3254_v54, %v2775_v55  ;;  %v1369_v29 = vsel %vm1355_vm0, %v1195_v18, 0 }
  0xb3   : > { %1456 = vmatpush.bf16.msra.mxu0 %v3030_v38  ;;  %1469 = vmatpush.bf16.msra.mxu1 %v3034_v39  ;;  %v2645_v5 = vld [vmem:[%s3881_s29] sm:$0xf]  ;;  %v1037_v7 = vunpack.c.l.b16 %v612_v63  ;;  %v1038_v8 = vunpack.c.h.b16 %v612_v63  ;;  %v2782_v9 = vor.u32 %v3271_v59, %v2781_v58  ;;  %v2786_v10 = vor.u32 %v3255_v60, %v2783_v61  ;;  %v3222_v11 = vld [vmem:[%s3881_s29 + $0x4] sm:$0xf]  ;;  %v2653_v13 = vld [vmem:[%s3881_s29 + $0x8] sm:$0xf] }
  0xb4   : > { %1482 = vmatpush.bf16.msra.mxu2 %v3038_v42  ;;  %1495 = vmatpush.bf16.msra.mxu3 %v3042_v43  ;;  %v3238_v6 = vld [vmem:[%s3881_s29 + $0x7c] sm:$0xf0]  ;;  %v2647_v12 = vld [vmem:[%s3881_s29 + $0x80] sm:$0xf0]  ;;  %v3239_v14 = vld [vmem:[%s3881_s29 + $0x84] sm:$0xf0] }
  0xb5   : > { %v3223_v15 = vld [vmem:[%s3881_s29 + $0xc] sm:$0xf]  ;;  %v2646_v17 = vor.u32 %v3238_v6, %v2645_v5  ;;  %v2650_v20 = vor.u32 %v3222_v11, %v2647_v12  ;;  %v1197_v21 = vpack.c.b16 %v1037_v7, %v1037_v7  ;;  %v1198_v22 = vpack.c.b16 %v1038_v8, %v1038_v8  ;;  %v3045_v25 = vld [vmem:[%s3881_s29 + $0x310] sm:$0xf]  ;;  %v3320_v27 = vld [vmem:[%s3881_s29 + $0x314] sm:$0xf] }
  0xb6   : > { %v2655_v16 = vld [vmem:[%s3881_s29 + $0x88] sm:$0xf0]  ;;  %v2654_v23 = vor.u32 %v3239_v14, %v2653_v13  ;;  %v3336_v26 = vld [vmem:[%s3881_s29 + $0x38c] sm:$0xf0]  ;;  %v3047_v28 = vld [vmem:[%s3881_s29 + $0x390] sm:$0xf0] }
  0xb7   : > { %1457 = vmatpush.bf16.msra.mxu0 %v2902_v51  ;;  %1470 = vmatpush.bf16.msra.mxu1 %v2906_v52  ;;  %v2658_v24 = vor.u32 %v3223_v15, %v2655_v16  ;;  %v1372_v30 = vsel %vm1355_vm0, %v1196_v19, 0  ;;  %v3053_v31 = vld [vmem:[%s3881_s29 + $0x318] sm:$0xf]  ;;  %v1375_v33 = vsel %vm1355_vm0, %v1197_v21, 0  ;;  %v1378_v34 = vsel %vm1355_vm0, %v1198_v22, 0  ;;  %v613_v47 = vld [vmem:[%s3881_s29 + $0x420] sm:$0xff] }
  0xb8   : > { %1483 = vmatpush.bf16.msra.mxu2 %v2910_v56  ;;  %1496 = vmatpush.bf16.msra.mxu3 %v2914_v57  ;;  %v3337_v32 = vld [vmem:[%s3881_s29 + $0x394] sm:$0xf0]  ;;  %v3321_v35 = vld [vmem:[%s3881_s29 + $0x31c] sm:$0xf]  ;;  %v3938_v37 = vld [vmem:[%s4883_s0] sm:$0x3]  ;;  %v3046_v38 = vor.u32 %v3336_v26, %v3045_v25  ;;  %v3050_v39 = vor.u32 %v3320_v27, %v3047_v28  ;;  %v1039_v57 = vunpack.c.l.b16 %v613_v47  ;;  %v1040_v63 = vunpack.c.h.b16 %v613_v47 }
  0xb9   : > { %v3055_v36 = vld [vmem:[%s3881_s29 + $0x398] sm:$0xf0]  ;;  %v2917_v40 = vld [vmem:[%s3881_s29 + $0x210] sm:$0xf]  ;;  %v3288_v42 = vld [vmem:[%s3881_s29 + $0x214] sm:$0xf]  ;;  %v3054_v43 = vor.u32 %v3337_v32, %v3053_v31 }
  0xba   : > { %v3304_v41 = vld [vmem:[%s3881_s29 + $0x28c] sm:$0xf0]  ;;  %v3058_v44 = vor.u32 %v3321_v35, %v3055_v36  ;;  %v2919_v45 = vld [vmem:[%s3881_s29 + $0x290] sm:$0xf0]  ;;  %v2925_v46 = vld [vmem:[%s3881_s29 + $0x218] sm:$0xf]  ;;  %v1200_v15 = vpack.c.b16 %v1040_v63, %v1040_v63 }
  0xbb   : > { %1458 = vmatpush.bf16.msra.mxu0 %v2774_v3  ;;  %1471 = vmatpush.bf16.msra.mxu1 %v2778_v4  ;;  %v3305_v48 = vld [vmem:[%s3881_s29 + $0x294] sm:$0xf0]  ;;  %v3289_v49 = vld [vmem:[%s3881_s29 + $0x21c] sm:$0xf]  ;;  %v625_v51 = vld [vmem:[%s4885_s2] sm:$0x7]  ;;  %v2918_v53 = vor.u32 %v3304_v41, %v2917_v40  ;;  %v2922_v54 = vor.u32 %v3288_v42, %v2919_v45 }
  0xbc   : > { %1484 = vmatpush.bf16.msra.mxu2 %v2782_v9  ;;  %1497 = vmatpush.bf16.msra.mxu3 %v2786_v10  ;;  %v2927_v50 = vld [vmem:[%s3881_s29 + $0x298] sm:$0xf0]  ;;  %v614_v52 = vld [vmem:[%s3881_s29 + $0x428] sm:$0xff]  ;;  %v2789_v55 = vld [vmem:[%s3881_s29 + $0x110] sm:$0xf]  ;;  %v2926_v58 = vor.u32 %v3305_v48, %v2925_v46  ;;  %v1199_v9 = vpack.c.b16 %v1039_v57, %v1039_v57  ;;  %v1384_v26 = vsel %vm1355_vm0, %v1200_v15, 0 }
  0xbd   : > { %v3272_v56 = vld [vmem:[%s3881_s29 + $0x18c] sm:$0xf0]  ;;  %v2930_v59 = vor.u32 %v3289_v49, %v2927_v50  ;;  %v3256_v60 = vld [vmem:[%s3881_s29 + $0x114] sm:$0xf]  ;;  %v2797_v62 = vld [vmem:[%s3881_s29 + $0x118] sm:$0xf]  ;;  %628 = vperm.xlu0 %3377, %v625_v51   ;;  %v1041_v3 = vunpack.c.l.b16 %v614_v52  ;;  %v1042_v4 = vunpack.c.h.b16 %v614_v52 }
  0xbe   : > { %v2791_v61 = vld [vmem:[%s3881_s29 + $0x190] sm:$0xf0]  ;;  %v3273_v0 = vld [vmem:[%s3881_s29 + $0x194] sm:$0xf0]  ;;  %v3257_v1 = vld [vmem:[%s3881_s29 + $0x11c] sm:$0xf]  ;;  %v2790_v5 = vor.u32 %v3272_v56, %v2789_v55 }
  0xbf   : > { %1459 = vmatpush.bf16.msra.mxu0 %v2646_v17  ;;  %1472 = vmatpush.bf16.msra.mxu1 %v2650_v20  ;;  %v2799_v2 = vld [vmem:[%s3881_s29 + $0x198] sm:$0xf0]  ;;  %v2794_v6 = vor.u32 %v3256_v60, %v2791_v61  ;;  %v2661_v7 = vld [vmem:[%s3881_s29 + $0x10] sm:$0xf]  ;;  %v2798_v10 = vor.u32 %v3273_v0, %v2797_v62  ;;  %v3224_v12 = vld [vmem:[%s3881_s29 + $0x14] sm:$0xf]  ;;  %v1201_v19 = vpack.c.b16 %v1041_v3, %v1041_v3 }
  0xc0   : > { %1485 = vmatpush.bf16.msra.mxu2 %v2654_v23  ;;  %1498 = vmatpush.bf16.msra.mxu3 %v2658_v24  ;;  %v3240_v8 = vld [vmem:[%s3881_s29 + $0x8c] sm:$0xf0]  ;;  %v2802_v11 = vor.u32 %v3257_v1, %v2799_v2  ;;  %v2663_v13 = vld [vmem:[%s3881_s29 + $0x90] sm:$0xf0]  ;;  %v2669_v14 = vld [vmem:[%s3881_s29 + $0x18] sm:$0xf]  ;;  %v1202_v20 = vpack.c.b16 %v1042_v4, %v1042_v4 }
  0xc1   : > { %v3241_v16 = vld [vmem:[%s3881_s29 + $0x94] sm:$0xf0]  ;;  %v3225_v17 = vld [vmem:[%s3881_s29 + $0x1c] sm:$0xf]  ;;  %v2662_v21 = vor.u32 %v3240_v8, %v2661_v7  ;;  %v2666_v22 = vor.u32 %v3224_v12, %v2663_v13  ;;  %v1381_v25 = vsel %vm1355_vm0, %v1199_v9, 0  ;;  %v1387_v27 = vsel %vm1355_vm0, %v1201_v19, 0 }
  0xc2   : > { %3156 = vmatmul.msk.bf16.vlgmr.msra.gmra.mxu1 %vm1351_vm1, %v3938_v37  ;;  %3155 = vmatmul.msk.bf16.vlgmr.msra.gmra.mxu0 %vm1351_vm1, %v3938_v37  ;;  %v2671_v18 = vld [vmem:[%s3881_s29 + $0x98] sm:$0xf0]  ;;  %v2670_v23 = vor.u32 %v3241_v16, %v2669_v14  ;;  %v1390_v28 = vsel %vm1355_vm0, %v1202_v20, 0  ;;  %v3322_v31 = vld [vmem:[%s3881_s29 + $0x324] sm:$0xf]  ;;  %v615_v55 = vld [vmem:[%s3881_s29 + $0x430] sm:$0xff] }
  0xc3   : > { %1507 = vmatpush.bf16.msrb.mxu0 %v1369_v29  ;;  %1520 = vmatpush.bf16.msrb.mxu1 %v1372_v30  ;;  %v2674_v24 = vor.u32 %v3225_v17, %v2671_v18  ;;  %v3061_v29 = vld [vmem:[%s3881_s29 + $0x320] sm:$0xf]  ;;  %v3063_v32 = vld [vmem:[%s3881_s29 + $0x3a0] sm:$0xf0]  ;;  %v3323_v35 = vld [vmem:[%s3881_s29 + $0x32c] sm:$0xf]  ;;  %v1043_v0 = vunpack.c.l.b16 %v615_v55  ;;  %v1044_v1 = vunpack.c.h.b16 %v615_v55 }
  0xc4   : > { %1533 = vmatpush.bf16.msrb.mxu2 %v1375_v33  ;;  %1546 = vmatpush.bf16.msrb.mxu3 %v1378_v34  ;;  %v3338_v30 = vld [vmem:[%s3881_s29 + $0x39c] sm:$0xf0]  ;;  %v3069_v33 = vld [vmem:[%s3881_s29 + $0x328] sm:$0xf]  ;;  %v3071_v36 = vld [vmem:[%s3881_s29 + $0x3a8] sm:$0xf0] }
  0xc5   : > { %3157 = vmatmul.msk.bf16.vlgmr.msra.gmra.mxu2 %vm1351_vm1, %v3938_v37  ;;  %3158 = vmatmul.msk.bf16.vlgmr.msra.gmra.mxu3 %vm1351_vm1, %v3938_v37  ;;  %v3339_v34 = vld [vmem:[%s3881_s29 + $0x3a4] sm:$0xf0]  ;;  %v2933_v40 = vld [vmem:[%s3881_s29 + $0x220] sm:$0xf]  ;;  %v2935_v45 = vld [vmem:[%s3881_s29 + $0x2a0] sm:$0xf0]  ;;  %v1203_v17 = vpack.c.b16 %v1043_v0, %v1043_v0  ;;  %v1204_v18 = vpack.c.b16 %v1044_v1, %v1044_v1 }
  0xc6   : > { %v3306_v41 = vld [vmem:[%s3881_s29 + $0x29c] sm:$0xf0]  ;;  %v3070_v42 = vor.u32 %v3339_v34, %v3069_v33  ;;  %v2941_v46 = vld [vmem:[%s3881_s29 + $0x228] sm:$0xf]  ;;  %v3291_v48 = vld [vmem:[%s3881_s29 + $0x22c] sm:$0xf] }
  0xc7   : > { %1508 = vmatpush.bf16.msrb.mxu0 %v3046_v38  ;;  %1521 = vmatpush.bf16.msrb.mxu1 %v3050_v39  ;;  %v3062_v38 = vor.u32 %v3338_v30, %v3061_v29  ;;  %v3066_v39 = vor.u32 %v3322_v31, %v3063_v32  ;;  %v3307_v47 = vld [vmem:[%s3881_s29 + $0x2a4] sm:$0xf0]  ;;  %v2943_v49 = vld [vmem:[%s3881_s29 + $0x2a8] sm:$0xf0]  ;;  %v2805_v50 = vld [vmem:[%s3881_s29 + $0x120] sm:$0xf]  ;;  %v2934_v51 = vor.u32 %v3306_v41, %v2933_v40 }
  0xc8   : > { %1534 = vmatpush.bf16.msrb.mxu2 %v3054_v43  ;;  %1547 = vmatpush.bf16.msrb.mxu3 %v3058_v44  ;;  %v3074_v43 = vor.u32 %v3323_v35, %v3071_v36  ;;  %v3290_v44 = vld [vmem:[%s3881_s29 + $0x224] sm:$0xf]  ;;  %v2942_v56 = vor.u32 %v3307_v47, %v2941_v46  ;;  %v2946_v57 = vor.u32 %v3291_v48, %v2943_v49  ;;  %v616_v60 = vld [vmem:[%s3881_s29 + $0x438] sm:$0xff]  ;;  %v3275_v61 = vld [vmem:[%s3881_s29 + $0x1a4] sm:$0xf0]  ;;  %v1396_v29 = vsel %vm1355_vm0, %v1204_v18, 0 }
  0xc9   : > { %v2938_v52 = vor.u32 %v3290_v44, %v2935_v45  ;;  %v3259_v62 = vld [vmem:[%s3881_s29 + $0x12c] sm:$0xf]  ;;  %v2677_v4 = vld [vmem:[%s3881_s29 + $0x20] sm:$0xf]  ;;  %v1046_v7 = vunpack.c.h.b16 %v616_v60  ;;  %v2685_v12 = vld [vmem:[%s3881_s29 + $0x28] sm:$0xf] }
  0xca   : > { %v2815_v63 = vld [vmem:[%s3881_s29 + $0x1a8] sm:$0xf0]  ;;  %v3243_v13 = vld [vmem:[%s3881_s29 + $0xa4] sm:$0xf0]  ;;  %v3085_v30 = vld [vmem:[%s3881_s29 + $0x338] sm:$0xf] }
  0xcb   : > { %1509 = vmatpush.bf16.msrb.mxu0 %v2918_v53  ;;  %1522 = vmatpush.bf16.msrb.mxu1 %v2922_v54  ;;  %v3274_v53 = vld [vmem:[%s3881_s29 + $0x19c] sm:$0xf0]  ;;  %v3258_v54 = vld [vmem:[%s3881_s29 + $0x124] sm:$0xf]  ;;  %v2818_v9 = vor.u32 %v3259_v62, %v2815_v63  ;;  %v3227_v14 = vld [vmem:[%s3881_s29 + $0x2c] sm:$0xf] }
  0xcc   : > { %1535 = vmatpush.bf16.msrb.mxu2 %v2926_v58  ;;  %1548 = vmatpush.bf16.msrb.mxu3 %v2930_v59  ;;  %v2807_v58 = vld [vmem:[%s3881_s29 + $0x1a0] sm:$0xf0]  ;;  %v2813_v59 = vld [vmem:[%s3881_s29 + $0x128] sm:$0xf]  ;;  %v2806_v2 = vor.u32 %v3274_v53, %v2805_v50  ;;  %v2687_v15 = vld [vmem:[%s3881_s29 + $0xa8] sm:$0xf0] }
  0xcd   : > { %v2810_v3 = vor.u32 %v3258_v54, %v2807_v58  ;;  %v2814_v8 = vor.u32 %v3275_v61, %v2813_v59  ;;  %v3341_v31 = vld [vmem:[%s3881_s29 + $0x3b4] sm:$0xf0]  ;;  %v3325_v34 = vld [vmem:[%s3881_s29 + $0x33c] sm:$0xf]  ;;  %v3308_v40 = vld [vmem:[%s3881_s29 + $0x2ac] sm:$0xf0] }
  0xce   : > { %v3087_v35 = vld [vmem:[%s3881_s29 + $0x3b8] sm:$0xf0]  ;;  %v3086_v41 = vor.u32 %v3341_v31, %v3085_v30  ;;  %v2951_v44 = vld [vmem:[%s3881_s29 + $0x2b0] sm:$0xf0]  ;;  %v2957_v45 = vld [vmem:[%s3881_s29 + $0x238] sm:$0xf] }
  0xcf   : > { %1510 = vmatpush.bf16.msrb.mxu0 %v2790_v5  ;;  %1523 = vmatpush.bf16.msrb.mxu1 %v2794_v6  ;;  %v3242_v5 = vld [vmem:[%s3881_s29 + $0x9c] sm:$0xf0]  ;;  %v1045_v6 = vunpack.c.l.b16 %v616_v60  ;;  %v3309_v46 = vld [vmem:[%s3881_s29 + $0x2b4] sm:$0xf0]  ;;  %v3293_v47 = vld [vmem:[%s3881_s29 + $0x23c] sm:$0xf] }
  0xd0   : > { %1536 = vmatpush.bf16.msrb.mxu2 %v2798_v10  ;;  %1549 = vmatpush.bf16.msrb.mxu3 %v2802_v11  ;;  %v3226_v10 = vld [vmem:[%s3881_s29 + $0x24] sm:$0xf]  ;;  %v2678_v16 = vor.u32 %v3242_v5, %v2677_v4  ;;  %v2959_v48 = vld [vmem:[%s3881_s29 + $0x2b8] sm:$0xf0]  ;;  %v2821_v49 = vld [vmem:[%s3881_s29 + $0x130] sm:$0xf]  ;;  %v2958_v55 = vor.u32 %v3309_v46, %v2957_v45 }
  0xd1   : > { %v2679_v11 = vld [vmem:[%s3881_s29 + $0xa0] sm:$0xf0]  ;;  %v1205_v20 = vpack.c.b16 %v1045_v6, %v1045_v6  ;;  %v3260_v53 = vld [vmem:[%s3881_s29 + $0x134] sm:$0xf]  ;;  %v2829_v58 = vld [vmem:[%s3881_s29 + $0x138] sm:$0xf] }
  0xd2   : > { %v2682_v19 = vor.u32 %v3226_v10, %v2679_v11  ;;  %v617_v54 = vld [vmem:[%s3881_s29 + $0x440] sm:$0xff]  ;;  %v618_v59 = vld [vmem:[%s3881_s29 + $0x448] sm:$0xff]  ;;  %v3277_v60 = vld [vmem:[%s3881_s29 + $0x1b4] sm:$0xf0]  ;;  %s4959_s9 = smov (!%p474_p8, %s2641_s9), 63 }
  0xd3   : > { %1511 = vmatpush.bf16.msrb.mxu0 %v2662_v21  ;;  %1524 = vmatpush.bf16.msrb.mxu1 %v2666_v22  ;;  %v1206_v21 = vpack.c.b16 %v1046_v7, %v1046_v7  ;;  %v2686_v22 = vor.u32 %v3243_v13, %v2685_v12  ;;  %v1399_v32 = vsel %vm1355_vm0, %v1205_v20, 0  ;;  %v3261_v61 = vld [vmem:[%s3881_s29 + $0x13c] sm:$0xf]  ;;  %v1047_v63 = vunpack.c.l.b16 %v617_v54  ;;  %v3244_v4 = vld [vmem:[%s3881_s29 + $0xac] sm:$0xf0]  ;;  %s2642_s10 = sshll.u32 %s4959_s9, 2 }
  0xd4   : > { %1537 = vmatpush.bf16.msrb.mxu2 %v2670_v23  ;;  %1550 = vmatpush.bf16.msrb.mxu3 %v2674_v24  ;;  %v2690_v23 = vor.u32 %v3227_v14, %v2687_v15  ;;  %v3077_v24 = vld [vmem:[%s3881_s29 + $0x330] sm:$0xf]  ;;  %v2831_v62 = vld [vmem:[%s3881_s29 + $0x1b8] sm:$0xf0]  ;;  %v1048_v0 = vunpack.c.h.b16 %v617_v54  ;;  %v1049_v5 = vunpack.c.l.b16 %v618_v59  ;;  %v1050_v6 = vunpack.c.h.b16 %v618_v59  ;;  %v2695_v10 = vld [vmem:[%s3881_s29 + $0xb0] sm:$0xf0]  ;;  %s4315_s14 = scalar_lea.vmem %s4886_s3, %s2642_s10 }
  0xd5   : > { %v1402_v33 = vsel %vm1355_vm0, %v1206_v21, 0  ;;  %v2830_v7 = vor.u32 %v3277_v60, %v2829_v58  ;;  %v2701_v11 = vld [vmem:[%s3881_s29 + $0x38] sm:$0xf]  ;;  %v3229_v13 = vld [vmem:[%s3881_s29 + $0x3c] sm:$0xf] }
  0xd6   : > { %3160 = vmatmul.msk.bf16.vlgmr.msrb.gmra.mxu1 %vm1351_vm1, %v3938_v37  ;;  %3159 = vmatmul.msk.bf16.vlgmr.msrb.gmra.mxu0 %vm1351_vm1, %v3938_v37  ;;  %v3245_v12 = vld [vmem:[%s3881_s29 + $0xb4] sm:$0xf0]  ;;  %v2703_v14 = vld [vmem:[%s3881_s29 + $0xb8] sm:$0xf0]  ;;  %v1210_v20 = vpack.c.b16 %v1050_v6, %v1050_v6  ;;  %v3343_v30 = vld [vmem:[%s3881_s29 + $0x3c4] sm:$0xf0] }
  0xd7   : > { %1559 = vmatpush.bf16.msra.mxu0 %v1381_v25  ;;  %1572 = vmatpush.bf16.msra.mxu1 %v1384_v26  ;;  %v3340_v25 = vld [vmem:[%s3881_s29 + $0x3ac] sm:$0xf0]  ;;  %v3324_v26 = vld [vmem:[%s3881_s29 + $0x334] sm:$0xf]  ;;  %v2702_v21 = vor.u32 %v3245_v12, %v2701_v11  ;;  %v3311_v45 = vld [vmem:[%s3881_s29 + $0x2c4] sm:$0xf0] }
  0xd8   : > { %1585 = vmatpush.bf16.msra.mxu2 %v1387_v27  ;;  %1598 = vmatpush.bf16.msra.mxu3 %v1390_v28  ;;  %v3079_v27 = vld [vmem:[%s3881_s29 + $0x3b0] sm:$0xf0]  ;;  %v1393_v28 = vsel %vm1355_vm0, %v1203_v17, 0  ;;  %v3078_v36 = vor.u32 %v3340_v25, %v3077_v24  ;;  %v1208_v17 = vpack.c.b16 %v1048_v0, %v1048_v0  ;;  %v3342_v24 = vld [vmem:[%s3881_s29 + $0x3bc] sm:$0xf0] }
  0xd9   : > { %3161 = vmatmul.msk.bf16.vlgmr.msrb.gmra.mxu2 %vm1351_vm1, %v3938_v37  ;;  %3162 = vmatmul.msk.bf16.vlgmr.msrb.gmra.mxu3 %vm1351_vm1, %v3938_v37  ;;  %v3326_v25 = vld [vmem:[%s3881_s29 + $0x344] sm:$0xf]  ;;  %v3295_v46 = vld [vmem:[%s3881_s29 + $0x24c] sm:$0xf]  ;;  %v2845_v58 = vld [vmem:[%s3881_s29 + $0x148] sm:$0xf] }
  0xda   : > { %v3262_v54 = vld [vmem:[%s3881_s29 + $0x144] sm:$0xf]  ;;  %v3279_v59 = vld [vmem:[%s3881_s29 + $0x1c4] sm:$0xf0]  ;;  %v3246_v6 = vld [vmem:[%s3881_s29 + $0xbc] sm:$0xf0] }
  0xdb   : > { %1560 = vmatpush.bf16.msra.mxu0 %v3062_v38  ;;  %1573 = vmatpush.bf16.msra.mxu1 %v3066_v39  ;;  %v3082_v38 = vor.u32 %v3324_v26, %v3079_v27  ;;  %v2949_v39 = vld [vmem:[%s3881_s29 + $0x230] sm:$0xf]  ;;  %v3095_v26 = vld [vmem:[%s3881_s29 + $0x3c0] sm:$0xf0] }
  0xdc   : > { %1586 = vmatpush.bf16.msra.mxu2 %v3070_v42  ;;  %1599 = vmatpush.bf16.msra.mxu3 %v3074_v43  ;;  %v3090_v42 = vor.u32 %v3325_v34, %v3087_v35  ;;  %v3292_v43 = vld [vmem:[%s3881_s29 + $0x234] sm:$0xf]  ;;  %v2950_v50 = vor.u32 %v3308_v40, %v2949_v39  ;;  %v3103_v34 = vld [vmem:[%s3881_s29 + $0x3c8] sm:$0xf0]  ;;  %v3310_v39 = vld [vmem:[%s3881_s29 + $0x2bc] sm:$0xf0] }
  0xdd   : > { %v3294_v40 = vld [vmem:[%s3881_s29 + $0x244] sm:$0xf] }
  0xdf   : > { %1561 = vmatpush.bf16.msra.mxu0 %v2934_v51  ;;  %1574 = vmatpush.bf16.msra.mxu1 %v2938_v52  ;;  %v2954_v51 = vor.u32 %v3292_v43, %v2951_v44  ;;  %v3276_v52 = vld [vmem:[%s3881_s29 + $0x1ac] sm:$0xf0]  ;;  %v2967_v43 = vld [vmem:[%s3881_s29 + $0x2c0] sm:$0xf0]  ;;  %v2973_v44 = vld [vmem:[%s3881_s29 + $0x248] sm:$0xf] }
  0xe0   : > { %1587 = vmatpush.bf16.msra.mxu2 %v2942_v56  ;;  %1600 = vmatpush.bf16.msra.mxu3 %v2946_v57  ;;  %v2962_v56 = vor.u32 %v3293_v47, %v2959_v48  ;;  %v2823_v57 = vld [vmem:[%s3881_s29 + $0x1b0] sm:$0xf0]  ;;  %v2822_v1 = vor.u32 %v3276_v52, %v2821_v49  ;;  %v2975_v47 = vld [vmem:[%s3881_s29 + $0x2c8] sm:$0xf0]  ;;  %v620_v49 = vld [vmem:[%s3881_s29 + $0x458] sm:$0xff] }
  0xe1   : > { %v619_v48 = vld [vmem:[%s3881_s29 + $0x450] sm:$0xff]  ;;  %v2837_v52 = vld [vmem:[%s3881_s29 + $0x140] sm:$0xf]  ;;  %v1053_v0 = vunpack.c.l.b16 %v620_v49 }
  0xe2   : > { %v1051_v60 = vunpack.c.l.b16 %v619_v48 }
  0xe3   : > { %1562 = vmatpush.bf16.msra.mxu0 %v2806_v2  ;;  %1575 = vmatpush.bf16.msra.mxu1 %v2810_v3  ;;  %v2826_v2 = vor.u32 %v3260_v53, %v2823_v57  ;;  %v2693_v3 = vld [vmem:[%s3881_s29 + $0x30] sm:$0xf]  ;;  %v3278_v53 = vld [vmem:[%s3881_s29 + $0x1bc] sm:$0xf0]  ;;  %v2839_v57 = vld [vmem:[%s3881_s29 + $0x1c0] sm:$0xf0] }
  0xe4   : > { %1588 = vmatpush.bf16.msra.mxu2 %v2814_v8  ;;  %1601 = vmatpush.bf16.msra.mxu3 %v2818_v9  ;;  %v2834_v8 = vor.u32 %v3261_v61, %v2831_v62  ;;  %v3228_v9 = vld [vmem:[%s3881_s29 + $0x34] sm:$0xf]  ;;  %v2694_v15 = vor.u32 %v3244_v4, %v2693_v3  ;;  %v1052_v61 = vunpack.c.h.b16 %v619_v48  ;;  %v3263_v62 = vld [vmem:[%s3881_s29 + $0x14c] sm:$0xf]  ;;  %v2842_v3 = vor.u32 %v3262_v54, %v2839_v57  ;;  %v2861_v57 = vld [vmem:[%s3881_s29 + $0x158] sm:$0xf] }
  0xe5   : > { %v2698_v18 = vor.u32 %v3228_v9, %v2695_v10  ;;  %v2846_v4 = vor.u32 %v3279_v59, %v2845_v58  ;;  %v2711_v9 = vld [vmem:[%s3881_s29 + $0xc0] sm:$0xf0]  ;;  %v2717_v10 = vld [vmem:[%s3881_s29 + $0x48] sm:$0xf]  ;;  %v1211_v11 = vpack.c.b16 %v1051_v60, %v1051_v60  ;;  %v3281_v58 = vld [vmem:[%s3881_s29 + $0x1d4] sm:$0xf0] }
  0xe6   : > { %v1212_v12 = vpack.c.b16 %v1052_v61, %v1052_v61  ;;  %v622_v48 = vld [vmem:[%s3881_s29 + $0x468] sm:$0xff]  ;;  %v3265_v61 = vld [vmem:[%s3881_s29 + $0x15c] sm:$0xf] }
  0xe7   : > { %1563 = vmatpush.bf16.msra.mxu0 %v2678_v16  ;;  %1576 = vmatpush.bf16.msra.mxu1 %v2682_v19  ;;  %v1207_v16 = vpack.c.b16 %v1047_v63, %v1047_v63  ;;  %v1209_v19 = vpack.c.b16 %v1049_v5, %v1049_v5  ;;  %v2847_v63 = vld [vmem:[%s3881_s29 + $0x1c8] sm:$0xf0]  ;;  %v2709_v5 = vld [vmem:[%s3881_s29 + $0x40] sm:$0xf] }
  0xe8   : > { %1589 = vmatpush.bf16.msra.mxu2 %v2686_v22  ;;  %1602 = vmatpush.bf16.msra.mxu3 %v2690_v23  ;;  %v2706_v22 = vor.u32 %v3229_v13, %v2703_v14  ;;  %v3093_v23 = vld [vmem:[%s3881_s29 + $0x340] sm:$0xf]  ;;  %v3247_v13 = vld [vmem:[%s3881_s29 + $0xc4] sm:$0xf0]  ;;  %v3231_v14 = vld [vmem:[%s3881_s29 + $0x4c] sm:$0xf] }
  0xe9   : > { %v1405_v27 = vsel %vm1355_vm0, %v1207_v16, 0  ;;  %v1411_v31 = vsel %vm1355_vm0, %v1209_v19, 0  ;;  %v3094_v35 = vor.u32 %v3342_v24, %v3093_v23  ;;  %v1213_v16 = vpack.c.b16 %v1053_v0, %v1053_v0 }
  0xea   : > { %3163 = vmatmul.msk.bf16.vlgmr.msra.gmra.mxu0 %vm1351_vm1, %v3938_v37  ;;  %3164 = vmatmul.msk.bf16.vlgmr.msra.gmra.mxu1 %vm1351_vm1, %v3938_v37  ;;  %v1420_v23 = vsel %vm1355_vm0, %v1212_v12, 0  ;;  %v1058_v0 = vunpack.c.h.b16 %v622_v48  ;;  %v3249_v12 = vld [vmem:[%s3881_s29 + $0xd4] sm:$0xf0] }
  0xeb   : > { %1611 = vmatpush.bf16.msrb.mxu0 %v1393_v28  ;;  %1624 = vmatpush.bf16.msrb.mxu1 %v1396_v29  ;;  %v1408_v28 = vsel %vm1355_vm0, %v1208_v17, 0  ;;  %v3101_v29 = vld [vmem:[%s3881_s29 + $0x348] sm:$0xf]  ;;  %v1423_v24 = vsel %vm1355_vm0, %v1213_v16, 0 }
  0xec   : > { %1637 = vmatpush.bf16.msrb.mxu2 %v1399_v32  ;;  %1650 = vmatpush.bf16.msrb.mxu3 %v1402_v33  ;;  %v1414_v32 = vsel %vm1355_vm0, %v1210_v20, 0  ;;  %v3327_v33 = vld [vmem:[%s3881_s29 + $0x34c] sm:$0xf]  ;;  %v2718_v20 = vor.u32 %v3247_v13, %v2717_v10  ;;  %v3233_v13 = vld [vmem:[%s3881_s29 + $0x5c] sm:$0xf]  ;;  %v1218_v16 = vpack.c.b16 %v1058_v0, %v1058_v0 }
  0xed   : > { %3165 = vmatmul.msk.bf16.vlgmr.msra.gmra.mxu2 %vm1351_vm1, %v3938_v37  ;;  %3166 = vmatmul.msk.bf16.vlgmr.msra.gmra.mxu3 %vm1351_vm1, %v3938_v37 }
  0xef   : > { %1612 = vmatpush.bf16.msrb.mxu0 %v3078_v36  ;;  %1625 = vmatpush.bf16.msrb.mxu1 %v3082_v38  ;;  %v3098_v36 = vor.u32 %v3326_v25, %v3095_v26  ;;  %v2965_v38 = vld [vmem:[%s3881_s29 + $0x240] sm:$0xf]  ;;  %v3109_v26 = vld [vmem:[%s3881_s29 + $0x350] sm:$0xf] }
  0xf0   : > { %1638 = vmatpush.bf16.msrb.mxu2 %v3086_v41  ;;  %1651 = vmatpush.bf16.msrb.mxu3 %v3090_v42  ;;  %v3102_v41 = vor.u32 %v3343_v30, %v3101_v29  ;;  %v3106_v42 = vor.u32 %v3327_v33, %v3103_v34  ;;  %v3111_v29 = vld [vmem:[%s3881_s29 + $0x3d0] sm:$0xf0]  ;;  %v3117_v30 = vld [vmem:[%s3881_s29 + $0x358] sm:$0xf]  ;;  %v3119_v33 = vld [vmem:[%s3881_s29 + $0x3d8] sm:$0xf0] }
  0xf3   : > { %1613 = vmatpush.bf16.msrb.mxu0 %v2950_v50  ;;  %1626 = vmatpush.bf16.msrb.mxu1 %v2954_v51  ;;  %v2966_v50 = vor.u32 %v3310_v39, %v2965_v38  ;;  %v2970_v51 = vor.u32 %v3294_v40, %v2967_v43  ;;  %v3312_v38 = vld [vmem:[%s3881_s29 + $0x2cc] sm:$0xf0]  ;;  %v3296_v39 = vld [vmem:[%s3881_s29 + $0x254] sm:$0xf]  ;;  %v2989_v43 = vld [vmem:[%s3881_s29 + $0x258] sm:$0xf] }
  0xf4   : > { %1639 = vmatpush.bf16.msrb.mxu2 %v2958_v55  ;;  %1652 = vmatpush.bf16.msrb.mxu3 %v2962_v56  ;;  %v2974_v55 = vor.u32 %v3311_v45, %v2973_v44  ;;  %v2978_v56 = vor.u32 %v3295_v46, %v2975_v47  ;;  %v3313_v44 = vld [vmem:[%s3881_s29 + $0x2d4] sm:$0xf0]  ;;  %v3297_v45 = vld [vmem:[%s3881_s29 + $0x25c] sm:$0xf]  ;;  %v621_v47 = vld [vmem:[%s3881_s29 + $0x460] sm:$0xff] }
  0xf5   : > { %v2991_v46 = vld [vmem:[%s3881_s29 + $0x2d8] sm:$0xf0]  ;;  %v2990_v54 = vor.u32 %v3313_v44, %v2989_v43  ;;  %v1055_v59 = vunpack.c.l.b16 %v621_v47  ;;  %v1056_v60 = vunpack.c.h.b16 %v621_v47  ;;  %v3315_v43 = vld [vmem:[%s3881_s29 + $0x2e4] sm:$0xf0]  ;;  %v3299_v44 = vld [vmem:[%s3881_s29 + $0x26c] sm:$0xf] }
  0xf6   : > { %v624_v47 = vld [vmem:[%s3881_s29 + $0x478] sm:$0xff] }
  0xf7   : > { %1614 = vmatpush.bf16.msrb.mxu0 %v2822_v1  ;;  %1627 = vmatpush.bf16.msrb.mxu1 %v2826_v2  ;;  %v1054_v1 = vunpack.c.h.b16 %v620_v49  ;;  %v2838_v2 = vor.u32 %v3278_v53, %v2837_v52  ;;  %v3280_v52 = vld [vmem:[%s3881_s29 + $0x1cc] sm:$0xf0]  ;;  %v3264_v53 = vld [vmem:[%s3881_s29 + $0x154] sm:$0xf]  ;;  %v1215_v10 = vpack.c.b16 %v1055_v59, %v1055_v59  ;;  %v3267_v59 = vld [vmem:[%s3881_s29 + $0x16c] sm:$0xf] }
  0xf8   : > { %1640 = vmatpush.bf16.msrb.mxu2 %v2830_v7  ;;  %1653 = vmatpush.bf16.msrb.mxu3 %v2834_v8  ;;  %v2850_v7 = vor.u32 %v3263_v62, %v2847_v63  ;;  %v3230_v8 = vld [vmem:[%s3881_s29 + $0x44] sm:$0xf]  ;;  %v2863_v62 = vld [vmem:[%s3881_s29 + $0x1d8] sm:$0xf0]  ;;  %v1057_v63 = vunpack.c.l.b16 %v622_v48 }
  0xf9   : > { %v1214_v17 = vpack.c.b16 %v1054_v1, %v1054_v1  ;;  %v2714_v19 = vor.u32 %v3230_v8, %v2711_v9  ;;  %v2727_v8 = vld [vmem:[%s3881_s29 + $0xd0] sm:$0xf0]  ;;  %v2733_v9 = vld [vmem:[%s3881_s29 + $0x58] sm:$0xf] }
  0xfb   : > { %1615 = vmatpush.bf16.msrb.mxu0 %v2694_v15  ;;  %1628 = vmatpush.bf16.msrb.mxu1 %v2698_v18  ;;  %v2719_v15 = vld [vmem:[%s3881_s29 + $0xc8] sm:$0xf0]  ;;  %v2710_v18 = vor.u32 %v3246_v6, %v2709_v5  ;;  %v1426_v25 = vsel %vm1355_vm0, %v1214_v17, 0  ;;  %v3248_v5 = vld [vmem:[%s3881_s29 + $0xcc] sm:$0xf0]  ;;  %v2866_v6 = vor.u32 %v3265_v61, %v2863_v62  ;;  %v1061_v61 = vunpack.c.l.b16 %v624_v47 }
  0xfc   : > { %1641 = vmatpush.bf16.msrb.mxu2 %v2702_v21  ;;  %1654 = vmatpush.bf16.msrb.mxu3 %v2706_v22  ;;  %v2722_v21 = vor.u32 %v3231_v14, %v2719_v15  ;;  %v1417_v22 = vsel %vm1355_vm0, %v1211_v11, 0  ;;  %v1216_v11 = vpack.c.b16 %v1056_v60, %v1056_v60  ;;  %v2735_v14 = vld [vmem:[%s3881_s29 + $0xd8] sm:$0xf0]  ;;  %v1217_v15 = vpack.c.b16 %v1057_v63, %v1057_v63  ;;  %v2879_v60 = vld [vmem:[%s3881_s29 + $0x1e8] sm:$0xf0] }
  0xfd   : > { %v1062_v62 = vunpack.c.h.b16 %v624_v47  ;;  %v2885_v47 = vld [vmem:[%s3881_s29 + $0x170] sm:$0xf] }
  0xfe   : > { %3167 = vmatmul.msk.bf16.vlgmr.msrb.gmra.mxu0 %vm1351_vm1, %v3938_v37  ;;  %3168 = vmatmul.msk.bf16.vlgmr.msrb.gmra.mxu1 %vm1351_vm1, %v3938_v37 }
  0xff   : > { %1663 = vmatpush.bf16.msra.mxu0 %v1405_v27  ;;  %1676 = vmatpush.bf16.msra.mxu1 %v1408_v28  ;;  %v3344_v27 = vld [vmem:[%s3881_s29 + $0x3cc] sm:$0xf0]  ;;  %v3328_v28 = vld [vmem:[%s3881_s29 + $0x354] sm:$0xf] }
 0x100   : > { %1689 = vmatpush.bf16.msra.mxu2 %v1411_v31  ;;  %1702 = vmatpush.bf16.msra.mxu3 %v1414_v32  ;;  %v3345_v31 = vld [vmem:[%s3881_s29 + $0x3d4] sm:$0xf0]  ;;  %v3329_v32 = vld [vmem:[%s3881_s29 + $0x35c] sm:$0xf]  ;;  %v3110_v34 = vor.u32 %v3344_v27, %v3109_v26  ;;  %v3346_v26 = vld [vmem:[%s3881_s29 + $0x3dc] sm:$0xf0] }
 0x101   : > { %3169 = vmatmul.msk.bf16.vlgmr.msrb.gmra.mxu2 %vm1351_vm1, %v3938_v37  ;;  %3170 = vmatmul.msk.bf16.vlgmr.msrb.gmra.mxu3 %vm1351_vm1, %v3938_v37  ;;  %v3118_v40 = vor.u32 %v3345_v31, %v3117_v30  ;;  %v3330_v27 = vld [vmem:[%s3881_s29 + $0x364] sm:$0xf]  ;;  %v3347_v30 = vld [vmem:[%s3881_s29 + $0x3e4] sm:$0xf0]  ;;  %v3331_v31 = vld [vmem:[%s3881_s29 + $0x36c] sm:$0xf] }
 0x103   : > { %1664 = vmatpush.bf16.msra.mxu0 %v3094_v35  ;;  %1677 = vmatpush.bf16.msra.mxu1 %v3098_v36  ;;  %v3114_v35 = vor.u32 %v3328_v28, %v3111_v29  ;;  %v2981_v36 = vld [vmem:[%s3881_s29 + $0x250] sm:$0xf]  ;;  %v3127_v28 = vld [vmem:[%s3881_s29 + $0x3e0] sm:$0xf0]  ;;  %v3133_v29 = vld [vmem:[%s3881_s29 + $0x368] sm:$0xf] }
 0x104   : > { %1690 = vmatpush.bf16.msra.mxu2 %v3102_v41  ;;  %1703 = vmatpush.bf16.msra.mxu3 %v3106_v42  ;;  %v3122_v41 = vor.u32 %v3329_v32, %v3119_v33  ;;  %v2983_v42 = vld [vmem:[%s3881_s29 + $0x2d0] sm:$0xf0]  ;;  %v2982_v49 = vor.u32 %v3312_v38, %v2981_v36  ;;  %v3135_v32 = vld [vmem:[%s3881_s29 + $0x3e8] sm:$0xf0]  ;;  %v3314_v36 = vld [vmem:[%s3881_s29 + $0x2dc] sm:$0xf0] }
 0x105   : > { %v3298_v38 = vld [vmem:[%s3881_s29 + $0x264] sm:$0xf] }
 0x107   : > { %1665 = vmatpush.bf16.msra.mxu0 %v2966_v50  ;;  %1678 = vmatpush.bf16.msra.mxu1 %v2970_v51  ;;  %v2986_v50 = vor.u32 %v3296_v39, %v2983_v42  ;;  %v2853_v51 = vld [vmem:[%s3881_s29 + $0x150] sm:$0xf]  ;;  %v3134_v39 = vor.u32 %v3347_v30, %v3133_v29  ;;  %v3005_v42 = vld [vmem:[%s3881_s29 + $0x268] sm:$0xf]  ;;  %v3333_v29 = vld [vmem:[%s3881_s29 + $0x37c] sm:$0xf] }
 0x108   : > { %1691 = vmatpush.bf16.msra.mxu2 %v2974_v55  ;;  %1704 = vmatpush.bf16.msra.mxu3 %v2978_v56  ;;  %v2994_v55 = vor.u32 %v3297_v45, %v2991_v46  ;;  %v2855_v56 = vld [vmem:[%s3881_s29 + $0x1d0] sm:$0xf0]  ;;  %v2854_v1 = vor.u32 %v3280_v52, %v2853_v51  ;;  %v3007_v45 = vld [vmem:[%s3881_s29 + $0x2e8] sm:$0xf0]  ;;  %v3282_v51 = vld [vmem:[%s3881_s29 + $0x1dc] sm:$0xf0] }
 0x109   : > { %v623_v46 = vld [vmem:[%s3881_s29 + $0x470] sm:$0xff]  ;;  %v3266_v52 = vld [vmem:[%s3881_s29 + $0x164] sm:$0xf]  ;;  %v3151_v30 = vld [vmem:[%s3881_s29 + $0x3f8] sm:$0xf0] }
 0x10b   : > { %1666 = vmatpush.bf16.msra.mxu0 %v2838_v2  ;;  %1679 = vmatpush.bf16.msra.mxu1 %v2842_v3  ;;  %v2858_v2 = vor.u32 %v3264_v53, %v2855_v56  ;;  %v2862_v3 = vor.u32 %v3281_v58, %v2861_v57  ;;  %v3006_v53 = vor.u32 %v3315_v43, %v3005_v42  ;;  %v2877_v56 = vld [vmem:[%s3881_s29 + $0x168] sm:$0xf]  ;;  %v1060_v58 = vunpack.c.h.b16 %v623_v46  ;;  %v3317_v42 = vld [vmem:[%s3881_s29 + $0x2f4] sm:$0xf0]  ;;  %v3301_v43 = vld [vmem:[%s3881_s29 + $0x27c] sm:$0xf] }
 0x10c   : > { %1692 = vmatpush.bf16.msra.mxu2 %v2846_v4  ;;  %1705 = vmatpush.bf16.msra.mxu3 %v2850_v7  ;;  %v2725_v4 = vld [vmem:[%s3881_s29 + $0x50] sm:$0xf]  ;;  %v3232_v7 = vld [vmem:[%s3881_s29 + $0x54] sm:$0xf]  ;;  %v3283_v57 = vld [vmem:[%s3881_s29 + $0x1e4] sm:$0xf0] }
 0x10d   : > { %v2726_v17 = vor.u32 %v3248_v5, %v2725_v4  ;;  %v2882_v4 = vor.u32 %v3267_v59, %v2879_v60  ;;  %v3234_v5 = vld [vmem:[%s3881_s29 + $0x64] sm:$0xf]  ;;  %v3252_v59 = vld [vmem:[%s3881_s29 + $0xec] sm:$0xf0] }
 0x10f   : > { %1667 = vmatpush.bf16.msra.mxu0 %v2710_v18  ;;  %1680 = vmatpush.bf16.msra.mxu1 %v2714_v19  ;;  %v2730_v18 = vor.u32 %v3232_v7, %v2727_v8  ;;  %v2734_v19 = vor.u32 %v3249_v12, %v2733_v9  ;;  %v2749_v7 = vld [vmem:[%s3881_s29 + $0x68] sm:$0xf]  ;;  %v1220_v9 = vpack.c.b16 %v1060_v58, %v1060_v58  ;;  %v2751_v12 = vld [vmem:[%s3881_s29 + $0xe8] sm:$0xf0]  ;;  %v2757_v58 = vld [vmem:[%s3881_s29 + $0x70] sm:$0xf] }
 0x110   : > { %1693 = vmatpush.bf16.msra.mxu2 %v2718_v20  ;;  %1706 = vmatpush.bf16.msra.mxu3 %v2722_v21  ;;  %v2738_v20 = vor.u32 %v3233_v13, %v2735_v14  ;;  %v1429_v21 = vsel %vm1355_vm0, %v1215_v10, 0  ;;  %v3251_v10 = vld [vmem:[%s3881_s29 + $0xe4] sm:$0xf0]  ;;  %v1221_v13 = vpack.c.b16 %v1061_v61, %v1061_v61  ;;  %v1222_v14 = vpack.c.b16 %v1062_v62, %v1062_v62  ;;  %v3236_v62 = vld [vmem:[%s3881_s29 + $0x74] sm:$0xf] }
 0x112   : > { %3171 = vmatmul.msk.bf16.vlgmr.msra.gmra.mxu0 %vm1351_vm1, %v3938_v37  ;;  %3172 = vmatmul.msk.bf16.vlgmr.msra.gmra.mxu1 %vm1351_vm1, %v3938_v37 }
 0x113   : > { %1715 = vmatpush.bf16.msrb.mxu0 %v1417_v22  ;;  %1728 = vmatpush.bf16.msrb.mxu1 %v1420_v23  ;;  %v1432_v22 = vsel %vm1355_vm0, %v1216_v11, 0  ;;  %v1435_v23 = vsel %vm1355_vm0, %v1217_v15, 0  ;;  %v3235_v11 = vld [vmem:[%s3881_s29 + $0x6c] sm:$0xf] }
 0x114   : > { %1741 = vmatpush.bf16.msrb.mxu2 %v1423_v24  ;;  %1754 = vmatpush.bf16.msrb.mxu3 %v1426_v25  ;;  %v1438_v24 = vsel %vm1355_vm0, %v1218_v16, 0  ;;  %v3125_v25 = vld [vmem:[%s3881_s29 + $0x360] sm:$0xf] }
 0x115   : > { %3173 = vmatmul.msk.bf16.vlgmr.msra.gmra.mxu2 %vm1351_vm1, %v3938_v37  ;;  %3174 = vmatmul.msk.bf16.vlgmr.msra.gmra.mxu3 %vm1351_vm1, %v3938_v37  ;;  %v3126_v33 = vor.u32 %v3346_v26, %v3125_v25  ;;  %v3332_v25 = vld [vmem:[%s3881_s29 + $0x374] sm:$0xf] }
 0x116   : > { %v3143_v26 = vld [vmem:[%s3881_s29 + $0x3f0] sm:$0xf0] }
 0x117   : > { %1716 = vmatpush.bf16.msrb.mxu0 %v3110_v34  ;;  %1729 = vmatpush.bf16.msrb.mxu1 %v3114_v35  ;;  %v3130_v34 = vor.u32 %v3330_v27, %v3127_v28  ;;  %v2997_v35 = vld [vmem:[%s3881_s29 + $0x260] sm:$0xf]  ;;  %v3149_v27 = vld [vmem:[%s3881_s29 + $0x378] sm:$0xf] }
 0x118   : > { %1742 = vmatpush.bf16.msrb.mxu2 %v3118_v40  ;;  %1755 = vmatpush.bf16.msrb.mxu3 %v3122_v41  ;;  %v3138_v40 = vor.u32 %v3331_v31, %v3135_v32  ;;  %v2999_v41 = vld [vmem:[%s3881_s29 + $0x2e0] sm:$0xf0]  ;;  %v2998_v48 = vor.u32 %v3314_v36, %v2997_v35  ;;  %v3349_v28 = vld [vmem:[%s3881_s29 + $0x3f4] sm:$0xf0]  ;;  %v3146_v32 = vor.u32 %v3332_v25, %v3143_v26 }
 0x119   : > { %v3150_v35 = vor.u32 %v3349_v28, %v3149_v27  ;;  %v3154_v36 = vor.u32 %v3333_v29, %v3151_v30 }
 0x11b   : > { %1717 = vmatpush.bf16.msrb.mxu0 %v2982_v49  ;;  %1730 = vmatpush.bf16.msrb.mxu1 %v2986_v50  ;;  %v3002_v49 = vor.u32 %v3298_v38, %v2999_v41  ;;  %v2869_v50 = vld [vmem:[%s3881_s29 + $0x160] sm:$0xf]  ;;  %v3300_v38 = vld [vmem:[%s3881_s29 + $0x274] sm:$0xf] }
 0x11c   : > { %1743 = vmatpush.bf16.msrb.mxu2 %v2990_v54  ;;  %1756 = vmatpush.bf16.msrb.mxu3 %v2994_v55  ;;  %v3010_v54 = vor.u32 %v3299_v44, %v3007_v45  ;;  %v2871_v55 = vld [vmem:[%s3881_s29 + $0x1e0] sm:$0xf0]  ;;  %v2870_v63 = vor.u32 %v3282_v51, %v2869_v50  ;;  %v3506_v41 = vld [vmem:[%s4883_s0] sm:$0x3]  ;;  %v3023_v44 = vld [vmem:[%s3881_s29 + $0x2f8] sm:$0xf0] }
 0x11d   : > { %v2874_v0 = vor.u32 %v3266_v52, %v2871_v55  ;;  %v3026_v50 = vor.u32 %v3301_v43, %v3023_v44  ;;  %v3268_v51 = vld [vmem:[%s3881_s29 + $0x174] sm:$0xf]  ;;  %v3269_v55 = vld [vmem:[%s3881_s29 + $0x17c] sm:$0xf] }
 0x11e   : > { %v2887_v52 = vld [vmem:[%s3881_s29 + $0x1f0] sm:$0xf0] }
 0x11f   : > { %1718 = vmatpush.bf16.msrb.mxu0 %v2854_v1  ;;  %1731 = vmatpush.bf16.msrb.mxu1 %v2858_v2  ;;  %v2878_v1 = vor.u32 %v3283_v57, %v2877_v56  ;;  %v2741_v2 = vld [vmem:[%s3881_s29 + $0x60] sm:$0xf]  ;;  %v2895_v56 = vld [vmem:[%s3881_s29 + $0x1f8] sm:$0xf0] }
 0x120   : > { %1744 = vmatpush.bf16.msrb.mxu2 %v2862_v3  ;;  %1757 = vmatpush.bf16.msrb.mxu3 %v2866_v6  ;;  %v3250_v3 = vld [vmem:[%s3881_s29 + $0xdc] sm:$0xf0]  ;;  %v2743_v6 = vld [vmem:[%s3881_s29 + $0xe0] sm:$0xf0]  ;;  %v2898_v61 = vor.u32 %v3269_v55, %v2895_v56 }
 0x121   : > { %v2742_v15 = vor.u32 %v3250_v3, %v2741_v2  ;;  %v2746_v16 = vor.u32 %v3234_v5, %v2743_v6  ;;  %v3237_v2 = vld [vmem:[%s3881_s29 + $0x7c] sm:$0xf] }
 0x122   : > { %v2767_v3 = vld [vmem:[%s3881_s29 + $0xf8] sm:$0xf0] }
 0x123   : > { %1719 = vmatpush.bf16.msrb.mxu0 %v2726_v17  ;;  %1732 = vmatpush.bf16.msrb.mxu1 %v2730_v18  ;;  %v2750_v17 = vor.u32 %v3251_v10, %v2749_v7  ;;  %v2754_v18 = vor.u32 %v3235_v11, %v2751_v12  ;;  %v2770_v7 = vor.u32 %v3237_v2, %v2767_v3 }
 0x124   : > { %1745 = vmatpush.bf16.msrb.mxu2 %v2734_v19  ;;  %1758 = vmatpush.bf16.msrb.mxu3 %v2738_v20  ;;  %v1444_v20 = vsel %vm1355_vm0, %v1220_v9, 0 }
 0x126   : > { %3175 = vmatmul.msk.bf16.vlgmr.msrb.gmra.mxu0 %vm1351_vm1, %v3938_v37  ;;  %3176 = vmatmul.msk.bf16.vlgmr.msrb.gmra.mxu1 %vm1351_vm1, %v3938_v37 }
 0x127   : > { %1767 = vmatpush.bf16.msra.mxu0 %v1429_v21  ;;  %1780 = vmatpush.bf16.msra.mxu1 %v1432_v22  ;;  %v1447_v21 = vsel %vm1355_vm0, %v1221_v13, 0  ;;  %v1450_v22 = vsel %vm1355_vm0, %v1222_v14, 0 }
 0x128   : > { %1793 = vmatpush.bf16.msra.mxu2 %v1435_v23  ;;  %1806 = vmatpush.bf16.msra.mxu3 %v1438_v24  ;;  %v3141_v23 = vld [vmem:[%s3881_s29 + $0x370] sm:$0xf] }
 0x129   : > { %3177 = vmatmul.msk.bf16.vlgmr.msrb.gmra.mxu2 %vm1351_vm1, %v3938_v37  ;;  %3178 = vmatmul.msk.bf16.vlgmr.msrb.gmra.mxu3 %vm1351_vm1, %v3938_v37  ;;  %v1059_v37 = vunpack.c.l.b16 %v623_v46  ;;  %v3348_v24 = vld [vmem:[%s3881_s29 + $0x3ec] sm:$0xf0] }
 0x12a   : > { %v3142_v31 = vor.u32 %v3348_v24, %v3141_v23 }
 0x12b   : > { %1768 = vmatpush.bf16.msra.mxu0 %v3126_v33  ;;  %1781 = vmatpush.bf16.msra.mxu1 %v3130_v34  ;;  %v1219_v8 = vpack.c.b16 %v1059_v37, %v1059_v37  ;;  %v3013_v33 = vld [vmem:[%s3881_s29 + $0x270] sm:$0xf]  ;;  %v2890_v37 = vor.u32 %v3268_v51, %v2887_v52 }
 0x12c   : > { %1794 = vmatpush.bf16.msra.mxu2 %v3134_v39  ;;  %1807 = vmatpush.bf16.msra.mxu3 %v3138_v40  ;;  %v3316_v34 = vld [vmem:[%s3881_s29 + $0x2ec] sm:$0xf0]  ;;  %v3015_v39 = vld [vmem:[%s3881_s29 + $0x2f0] sm:$0xf0]  ;;  %v3021_v40 = vld [vmem:[%s3881_s29 + $0x278] sm:$0xf] }
 0x12d   : > { %v1441_v19 = vsel %vm1355_vm0, %v1219_v8, 0  ;;  %v3014_v45 = vor.u32 %v3316_v34, %v3013_v33  ;;  %v3018_v46 = vor.u32 %v3300_v38, %v3015_v39 }
 0x12f   : > { %1769 = vmatpush.bf16.msra.mxu0 %v2998_v48  ;;  %1782 = vmatpush.bf16.msra.mxu1 %v3002_v49  ;;  %v3284_v48 = vld [vmem:[%s3881_s29 + $0x1ec] sm:$0xf0]  ;;  %v3022_v49 = vor.u32 %v3317_v42, %v3021_v40  ;;  %v4250_v8 = vpop.permute.xlu0 %628 }
 0x130   : > { %1795 = vmatpush.bf16.msra.mxu2 %v3006_v53  ;;  %1808 = vmatpush.bf16.msra.mxu3 %v3010_v54  ;;  %v2893_v53 = vld [vmem:[%s3881_s29 + $0x178] sm:$0xf]  ;;  %v2886_v57 = vor.u32 %v3284_v48, %v2885_v47 }
 0x131   : > { %v3285_v54 = vld [vmem:[%s3881_s29 + $0x1f4] sm:$0xf0] }
 0x132   : > { %v2894_v60 = vor.u32 %v3285_v54, %v2893_v53 }
 0x133   : > { %1770 = vmatpush.bf16.msra.mxu0 %v2870_v63  ;;  %1783 = vmatpush.bf16.msra.mxu1 %v2874_v0  ;;  %v2759_v63 = vld [vmem:[%s3881_s29 + $0xf0] sm:$0xf0]  ;;  %v2765_v0 = vld [vmem:[%s3881_s29 + $0x78] sm:$0xf] }
 0x134   : > { %1796 = vmatpush.bf16.msra.mxu2 %v2878_v1  ;;  %1809 = vmatpush.bf16.msra.mxu3 %v2882_v4  ;;  %v3253_v1 = vld [vmem:[%s3881_s29 + $0xf4] sm:$0xf0]  ;;  %v2758_v4 = vor.u32 %v3252_v59, %v2757_v58  ;;  %v2762_v5 = vor.u32 %v3236_v62, %v2759_v63 }
 0x135   : > { %v2766_v6 = vor.u32 %v3253_v1, %v2765_v0 }
 0x137   : > { %1771 = vmatpush.bf16.msra.mxu0 %v2742_v15  ;;  %1784 = vmatpush.bf16.msra.mxu1 %v2746_v16 }
 0x138   : > { %1797 = vmatpush.bf16.msra.mxu2 %v2750_v17  ;;  %1810 = vmatpush.bf16.msra.mxu3 %v2754_v18 }
 0x13a   : > { %3179 = vmatmul.msk.bf16.vlgmr.msra.gmra.mxu0 %vm1351_vm1, %v3506_v41  ;;  %3180 = vmatmul.msk.bf16.vlgmr.msra.gmra.mxu1 %vm1351_vm1, %v3506_v41 }
 0x13b   : > { %1819 = vmatpush.bf16.msrb.mxu0 %v1441_v19  ;;  %1832 = vmatpush.bf16.msrb.mxu1 %v1444_v20 }
 0x13c   : > { %1845 = vmatpush.bf16.msrb.mxu2 %v1447_v21  ;;  %1858 = vmatpush.bf16.msrb.mxu3 %v1450_v22 }
 0x13d   : > { %3181 = vmatmul.msk.bf16.vlgmr.msra.gmra.mxu2 %vm1351_vm1, %v3506_v41  ;;  %3182 = vmatmul.msk.bf16.vlgmr.msra.gmra.mxu3 %vm1351_vm1, %v3506_v41 }
 0x13f   : > { %1820 = vmatpush.bf16.msrb.mxu0 %v3142_v31  ;;  %1833 = vmatpush.bf16.msrb.mxu1 %v3146_v32  ;;  %v1474_v9 = vpop.f32.mrf.mxu1  ;;  %v1461_v11 = vpop.f32.mrf.mxu0 }
 0x140   : > { %1846 = vmatpush.bf16.msrb.mxu2 %v3150_v35  ;;  %1859 = vmatpush.bf16.msrb.mxu3 %v3154_v36  ;;  %v1475_v10 = vadd.f32 %v1474_v9, %v4250_v8  ;;  %v1462_v12 = vadd.f32 %v1461_v11, %v4250_v8 }
 0x142   : > { %v3188_v13 = vmul.f32 -1.442695, %v1475_v10  ;;  %v3187_v14 = vmul.f32 -1.442695, %v1462_v12 }
 0x143   : > { %1821 = vmatpush.bf16.msrb.mxu0 %v3014_v45  ;;  %1834 = vmatpush.bf16.msrb.mxu1 %v3018_v46 }
 0x144   : > { %1847 = vmatpush.bf16.msrb.mxu2 %v3022_v49  ;;  %1860 = vmatpush.bf16.msrb.mxu3 %v3026_v50  ;;  %3378 = vpow2.f32 %v3188_v13 }
 0x145   : > { %3380 = vpow2.f32 %v3187_v14 }
 0x147   : > { %1822 = vmatpush.bf16.msrb.mxu0 %v2886_v57  ;;  %1835 = vmatpush.bf16.msrb.mxu1 %v2890_v37  ;;  %v1476_v19 = vpop.f32.mrf.mxu1  ;;  %v1463_v21 = vpop.f32.mrf.mxu0 }
 0x148   : > { %1848 = vmatpush.bf16.msrb.mxu2 %v2894_v60  ;;  %1861 = vmatpush.bf16.msrb.mxu3 %v2898_v61  ;;  %v1487_v15 = vpop.f32.mrf.mxu2  ;;  %v1500_v17 = vpop.f32.mrf.mxu3 }
 0x149   : > { %v1488_v16 = vadd.f32 %v1487_v15, %v4250_v8  ;;  %v1501_v18 = vadd.f32 %v1500_v17, %v4250_v8 }
 0x14a   : > { %v3379_v23 = vpop.eup %3378 }
 0x14b   : > { %1823 = vmatpush.bf16.msrb.mxu0 %v2758_v4  ;;  %1836 = vmatpush.bf16.msrb.mxu1 %v2762_v5  ;;  %v3189_v20 = vmul.f32 -1.442695, %v1488_v16  ;;  %v3190_v22 = vmul.f32 -1.442695, %v1501_v18  ;;  %v3381_v24 = vpop.eup %3380  ;;  %v1965_v25 = vadd.f32 1.0, %v3379_v23 }
 0x14c   : > { %1849 = vmatpush.bf16.msrb.mxu2 %v2766_v6  ;;  %1862 = vmatpush.bf16.msrb.mxu3 %v2770_v7  ;;  %v1964_v26 = vadd.f32 1.0, %v3381_v24 }
 0x14d   : > { %3382 = vpow2.f32 %v3189_v20  ;;  %v2020_v31 = vand.u32 2147483647, %v1965_v25  ;;  %v2022_v34 = vand.u32 2147483648, %v1965_v25  ;;  %vm2016_vm2 = vweird.f32 %v1965_v25 }
 0x14e   : > { %3183 = vmatmul.msk.bf16.vlgmr.msrb.gmra.mxu0 %vm1351_vm1, %v3506_v41  ;;  %3184 = vmatmul.msk.bf16.vlgmr.msrb.gmra.mxu1 %vm1351_vm1, %v3506_v41  ;;  %3384 = vpow2.f32 %v3190_v22  ;;  %v2005_v40 = vand.u32 2147483647, %v1964_v26  ;;  %v2007_v43 = vand.u32 2147483648, %v1964_v26  ;;  %vm2001_vm4 = vweird.f32 %v1964_v26 }
 0x14f   : > { %3185 = vmatmul.msk.bf16.vlgmr.msrb.gmra.mxu2 %vm1351_vm1, %v3506_v41  ;;  %3186 = vmatmul.msk.bf16.vlgmr.msrb.gmra.mxu3 %vm1351_vm1, %v3506_v41  ;;  %3386 = vrcp.f32 %v1965_v25  ;;  %vm4269_vm3 = vcmp.eq.f32.partialorder %v2020_v31, 8.507059e+37  ;;  %v2023_v47 = vor.u32 1.1754944e-38, %v2022_v34 }
 0x150   : > { %v1489_v27 = vpop.f32.mrf.mxu2  ;;  %3388 = vrcp.f32 %v1964_v26  ;;  %v1502_v28 = vpop.f32.mrf.mxu3  ;;  %vm4276_vm7 = vcmp.eq.f32.partialorder %v2005_v40, 8.507059e+37  ;;  %v2008_v54 = vor.u32 1.1754944e-38, %v2007_v43 }
 0x153   : > { %v3383_v29 = vpop.eup %3382  ;;  %v1526_v33 = vpop.f32.mrf.mxu1 }
 0x154   : > { %v3385_v30 = vpop.eup %3384  ;;  %v4262_v32 = vadd.f32 1.0, %v3383_v29  ;;  %v1527_v36 = vadd.f32 %v1526_v33, %v4250_v8  ;;  %v1513_v38 = vpop.f32.mrf.mxu0 }
 0x155   : > { %v4264_v35 = vadd.f32 1.0, %v3385_v30  ;;  %v3387_v39 = vpop.eup %3386  ;;  %v1514_v51 = vadd.f32 %v1513_v38, %v4250_v8 }
 0x156   : > { %3390 = vrcp.f32 %v4262_v32  ;;  %v3389_v41 = vpop.eup %3388  ;;  %v2012_v42 = vmul.f32 %v3387_v39, %v1965_v25  ;;  %vm2017_vm5 = vweird.f32 %v3387_v39  ;;  %v3192_v48 = vmul.f32 -1.442695, %v1527_v36 }
 0x157   : > { %3392 = vrcp.f32 %v4264_v35  ;;  %v1997_v45 = vmul.f32 %v3389_v41, %v1964_v26  ;;  %vm2002_vm6 = vweird.f32 %v3389_v41  ;;  %vm2031_vm8 = vweird.f32 %v4262_v32  ;;  %vm4286_vm9 = vmor %vm2016_vm2, %vm2017_vm5 }
 0x158   : > { %v2013_v46 = vsub.f32 1.0, %v2012_v42  ;;  %3394 = vpow2.f32 %v3192_v48  ;;  %v3191_v58 = vmul.f32 -1.442695, %v1514_v51  ;;  %vm4294_vm10 = vmor %vm2001_vm4, %vm2002_vm6  ;;  %vm2046_vm11 = vweird.f32 %v4264_v35 }
 0x159   : > { %v1998_v49 = vsub.f32 1.0, %v1997_v45  ;;  %v2050_v2 = vand.u32 2147483647, %v4264_v35  ;;  %v2052_v6 = vand.u32 2147483648, %v4264_v35  ;;  %v2037_v24 = vand.u32 2147483648, %v4262_v32 }
 0x15a   : > { %v2014_v53 = vmul.f32 %v3387_v39, %v2013_v46  ;;  %3396 = vpow2.f32 %v3191_v58  ;;  %v2035_v28 = vand.u32 2147483647, %v4262_v32 }
 0x15b   : > { %v1999_v37 = vmul.f32 %v3389_v41, %v1998_v49  ;;  %v1528_v61 = vpop.f32.mrf.mxu1  ;;  %v2053_v30 = vor.u32 1.1754944e-38, %v2052_v6  ;;  %vm2051_vm1 = vcmp.eq.f32.partialorder %v2050_v2, 8.507059e+37  ;;  %v2038_v40 = vor.u32 1.1754944e-38, %v2037_v24 }
 0x15c   : > { %v1539_v52 = vpop.f32.mrf.mxu2  ;;  %v1552_v55 = vpop.f32.mrf.mxu3  ;;  %v2015_v63 = vadd.f32 %v3387_v39, %v2014_v53  ;;  %vm2036_vm2 = vcmp.eq.f32.partialorder %v2035_v28, 8.507059e+37 }
 0x15d   : > { %v4282_v56 = vpop.eup %3390  ;;  %v1540_v59 = vadd.f32 %v1539_v52, %v4250_v8  ;;  %v1553_v60 = vadd.f32 %v1552_v55, %v4250_v8  ;;  %v1515_v3 = vpop.f32.mrf.mxu0  ;;  %v2000_v4 = vadd.f32 %v3389_v41, %v1999_v37 }
 0x15e   : > { %v3393_v62 = vpop.eup %3392  ;;  %v2027_v1 = vmul.f32 %v4282_v56, %v4262_v32  ;;  %v2019_v7 = vsel %vm4286_vm9, %v3387_v39, %v2015_v63  ;;  %vm2032_vm12 = vweird.f32 %v4282_v56 }
 0x15f   : > { %v2042_v5 = vmul.f32 %v3393_v62, %v4264_v35  ;;  %v3193_v10 = vmul.f32 -1.442695, %v1540_v59  ;;  %v3194_v11 = vmul.f32 -1.442695, %v1553_v60  ;;  %v2024_v12 = vsel %vm4269_vm3, %v2023_v47, %v2019_v7  ;;  %v3395_v15 = vpop.eup %3394  ;;  %vm4328_vm14 = vmor %vm2031_vm8, %vm2032_vm12 }
 0x160   : > { %v2028_v9 = vsub.f32 1.0, %v2027_v1  ;;  %v2004_v13 = vsel %vm4294_vm10, %v3389_v41, %v2000_v4  ;;  %v2508_v16 = vrot.slane %v2024_v12, 4  ;;  %vm2047_vm13 = vweird.f32 %v3393_v62  ;;  %v3397_v26 = vpop.eup %3396 }
 0x161   : > { %v2043_v14 = vsub.f32 1.0, %v2042_v5  ;;  %v2009_v17 = vsel %vm4276_vm7, %v2008_v54, %v2004_v13  ;;  %3398 = vpow2.f32 %v3193_v10  ;;  %v1969_v20 = vadd.f32 1.0, %v3395_v15  ;;  %vm2048_vm15 = vmor %vm2046_vm11, %vm2047_vm13 }
 0x162   : > { %v2029_v18 = vmul.f32 %v4282_v56, %v2028_v9  ;;  %3400 = vpow2.f32 %v3194_v11  ;;  %v2524_v22 = vsel %vm1355_vm0, %v2009_v17, %v2508_v16  ;;  %v1968_v31 = vadd.f32 1.0, %v3397_v26 }
 0x163   : > { %v2044_v19 = vmul.f32 %v3393_v62, %v2043_v14  ;;  %2556 = vst [vmem:[%s4315_s14] sm:$0x77] %v2524_v22  ;;  %3402 = vrcp.f32 %v1969_v20  ;;  %v2080_v48 = vand.u32 2147483647, %v1969_v20  ;;  %v2082_v49 = vand.u32 2147483648, %v1969_v20 }
 0x164   : > { %v1541_v21 = vpop.f32.mrf.mxu2  ;;  %v2030_v23 = vadd.f32 %v4282_v56, %v2029_v18  ;;  %v1554_v25 = vpop.f32.mrf.mxu3  ;;  %3404 = vrcp.f32 %v1968_v31  ;;  %v2065_v51 = vand.u32 2147483647, %v1968_v31  ;;  %vm2076_vm3 = vweird.f32 %v1969_v20 }
 0x165   : > { %v2045_v29 = vadd.f32 %v3393_v62, %v2044_v19  ;;  %v2067_v55 = vand.u32 2147483648, %v1968_v31  ;;  %vm4348_vm5 = vcmp.eq.f32.partialorder %v2080_v48, 8.507059e+37  ;;  %v2083_v59 = vor.u32 1.1754944e-38, %v2082_v49 }
 0x166   : > { %v2034_v33 = vsel %vm4328_vm14, %v4282_v56, %v2030_v23  ;;  %vm2061_vm6 = vweird.f32 %v1968_v31  ;;  %vm4352_vm7 = vcmp.eq.f32.partialorder %v2065_v51, 8.507059e+37 }
 0x167   : > { %v2049_v34 = vsel %vm2048_vm15, %v3393_v62, %v2045_v29  ;;  %v1565_v36 = vpop.f32.mrf.mxu0  ;;  %v1578_v38 = vpop.f32.mrf.mxu1  ;;  %v2039_v43 = vsel %vm2036_vm2, %v2038_v40, %v2034_v33  ;;  %v2068_v9 = vor.u32 1.1754944e-38, %v2067_v55 }
 0x168   : > { %v3399_v39 = vpop.eup %3398  ;;  %v2054_v41 = vsel %vm2051_vm1, %v2053_v30, %v2049_v34  ;;  %v1566_v45 = vadd.f32 %v1565_v36, %v4250_v8  ;;  %v1579_v52 = vadd.f32 %v1578_v38, %v4250_v8 }
 0x169   : > { %v3401_v32 = vpop.eup %3400  ;;  %v2509_v42 = vrot.slane %v2054_v41, 4  ;;  %v4338_v35 = vadd.f32 1.0, %v3399_v39 }
 0x16a   : > { %v4340_v44 = vadd.f32 1.0, %v3401_v32  ;;  %v3403_v46 = vpop.eup %3402  ;;  %v3195_v56 = vmul.f32 -1.442695, %v1566_v45  ;;  %v3196_v1 = vmul.f32 -1.442695, %v1579_v52 }
 0x16b   : > { %v2525_v47 = vsel %vm1355_vm0, %v2039_v43, %v2509_v42  ;;  %3406 = vrcp.f32 %v4338_v35  ;;  %v2072_v50 = vmul.f32 %v3403_v46, %v1969_v20  ;;  %v3405_v53 = vpop.eup %3404  ;;  %vm2077_vm4 = vweird.f32 %v3403_v46 }
 0x16c   : > { %2557 = vst [vmem:[%s4315_s14 + $0x8] sm:$0x77] %v2525_v47  ;;  %3408 = vrcp.f32 %v4340_v44  ;;  %v2057_v60 = vmul.f32 %v3405_v53, %v1968_v31  ;;  %vm4360_vm8 = vmor %vm2076_vm3, %vm2077_vm4  ;;  %vm2062_vm9 = vweird.f32 %v3405_v53  ;;  %vm2091_vm10 = vweird.f32 %v4338_v35 }
 0x16d   : > { %v2073_v54 = vsub.f32 1.0, %v2072_v50  ;;  %3410 = vpow2.f32 %v3195_v56  ;;  %vm4372_vm11 = vmor %vm2061_vm6, %vm2062_vm9  ;;  %vm2106_vm12 = vweird.f32 %v4340_v44  ;;  %v2110_v21 = vand.u32 2147483647, %v4340_v44 }
 0x16e   : > { %v2058_v4 = vsub.f32 1.0, %v2057_v60  ;;  %3412 = vpow2.f32 %v3196_v1  ;;  %v2112_v29 = vand.u32 2147483648, %v4340_v44  ;;  %v2097_v39 = vand.u32 2147483648, %v4338_v35 }
 0x16f   : > { %v1567_v61 = vpop.f32.mrf.mxu0  ;;  %v1580_v62 = vpop.f32.mrf.mxu1  ;;  %v2074_v63 = vmul.f32 %v3403_v46, %v2073_v54  ;;  %v2095_v42 = vand.u32 2147483647, %v4338_v35  ;;  %vm2111_vm2 = vcmp.eq.f32.partialorder %v2110_v21, 8.507059e+37 }
 0x170   : > { %v1591_v57 = vpop.f32.mrf.mxu2  ;;  %v1604_v37 = vpop.f32.mrf.mxu3  ;;  %v2059_v12 = vmul.f32 %v3405_v53, %v2058_v4  ;;  %v2113_v47 = vor.u32 1.1754944e-38, %v2112_v29  ;;  %v2098_v52 = vor.u32 1.1754944e-38, %v2097_v39 }
 0x171   : > { %v4356_v2 = vpop.eup %3406  ;;  %v1592_v5 = vadd.f32 %v1591_v57, %v4250_v8  ;;  %v1605_v6 = vadd.f32 %v1604_v37, %v4250_v8  ;;  %v2075_v7 = vadd.f32 %v3403_v46, %v2074_v63  ;;  %vm2096_vm3 = vcmp.eq.f32.partialorder %v2095_v42, 8.507059e+37 }
 0x172   : > { %v2087_v10 = vmul.f32 %v4356_v2, %v4338_v35  ;;  %v3409_v11 = vpop.eup %3408  ;;  %v2060_v20 = vadd.f32 %v3405_v53, %v2059_v12  ;;  %vm2092_vm13 = vweird.f32 %v4356_v2 }
 0x173   : > { %v3197_v13 = vmul.f32 -1.442695, %v1592_v5  ;;  %v3198_v14 = vmul.f32 -1.442695, %v1605_v6  ;;  %v2079_v15 = vsel %vm4360_vm8, %v3403_v46, %v2075_v7  ;;  %v2102_v18 = vmul.f32 %v3409_v11, %v4340_v44  ;;  %v3411_v22 = vpop.eup %3410  ;;  %vm4397_vm15 = vmor %vm2091_vm10, %vm2092_vm13 }
 0x174   : > { %v2088_v17 = vsub.f32 1.0, %v2087_v10  ;;  %v2084_v19 = vsel %vm4348_vm5, %v2083_v59, %v2079_v15  ;;  %v2064_v28 = vsel %vm4372_vm11, %v3405_v53, %v2060_v20  ;;  %v4386_v30 = vadd.f32 1.0, %v3411_v22  ;;  %v3413_v31 = vpop.eup %3412 }
 0x175   : > { %3414 = vpow2.f32 %v3197_v13  ;;  %v2510_v23 = vrot.slane %v2084_v19, 4  ;;  %v2103_v25 = vsub.f32 1.0, %v2102_v18  ;;  %v2069_v33 = vsel %vm4352_vm7, %v2068_v9, %v2064_v28 }
 0x176   : > { %v2089_v24 = vmul.f32 %v4356_v2, %v2088_v17  ;;  %3416 = vpow2.f32 %v3198_v14  ;;  %vm2107_vm14 = vweird.f32 %v3409_v11  ;;  %v4402_v45 = vadd.f32 1.0, %v3413_v31 }
 0x177   : > { %v2104_v36 = vmul.f32 %v3409_v11, %v2103_v25  ;;  %v2526_v38 = vsel %vm1355_vm0, %v2069_v33, %v2510_v23  ;;  %3418 = vrcp.f32 %v4386_v30  ;;  %vm2108_vm1 = vmor %vm2106_vm12, %vm2107_vm14  ;;  %v2125_v58 = vand.u32 2147483647, %v4386_v30 }
 0x178   : > { %v1593_v26 = vpop.f32.mrf.mxu2  ;;  %v1606_v27 = vpop.f32.mrf.mxu3  ;;  %v2090_v34 = vadd.f32 %v4356_v2, %v2089_v24  ;;  %2558 = vst [vmem:[%s4315_s14 + $0x10] sm:$0x77] %v2526_v38  ;;  %3420 = vrcp.f32 %v4402_v45  ;;  %v2127_v0 = vand.u32 2147483648, %v4386_v30  ;;  %v2140_v5 = vand.u32 2147483647, %v4402_v45 }
 0x179   : > { %v2105_v43 = vadd.f32 %v3409_v11, %v2104_v36  ;;  %vm2121_vm4 = vweird.f32 %v4386_v30  ;;  %vm4428_vm5 = vcmp.eq.f32.partialorder %v2125_v58, 8.507059e+37  ;;  %v2142_v10 = vand.u32 2147483648, %v4402_v45 }
 0x17a   : > { %v2094_v50 = vsel %vm4397_vm15, %v4356_v2, %v2090_v34  ;;  %v2128_v13 = vor.u32 1.1754944e-38, %v2127_v0  ;;  %vm2136_vm7 = vweird.f32 %v4402_v45  ;;  %vm4441_vm8 = vcmp.eq.f32.partialorder %v2140_v5, 8.507059e+37 }
 0x17b   : > { %v1617_v40 = vpop.f32.mrf.mxu0  ;;  %v1630_v41 = vpop.f32.mrf.mxu1  ;;  %v2109_v51 = vsel %vm2108_vm1, %v3409_v11, %v2105_v43  ;;  %v2099_v37 = vsel %vm2096_vm3, %v2098_v52, %v2094_v50  ;;  %v2143_v25 = vor.u32 1.1754944e-38, %v2142_v10 }
 0x17c   : > { %v3415_v46 = vpop.eup %3414  ;;  %v1618_v48 = vadd.f32 %v1617_v40, %v4250_v8  ;;  %v1631_v35 = vadd.f32 %v1630_v41, %v4250_v8  ;;  %v2114_v53 = vsel %vm2111_vm2, %v2113_v47, %v2109_v51 }
 0x17d   : > { %v3417_v49 = vpop.eup %3416  ;;  %v4412_v54 = vadd.f32 1.0, %v3415_v46  ;;  %v2511_v44 = vrot.slane %v2114_v53, 4 }
 0x17e   : > { %v4414_v55 = vadd.f32 1.0, %v3417_v49  ;;  %v3199_v56 = vmul.f32 -1.442695, %v1618_v48  ;;  %v4416_v57 = vpop.eup %3418  ;;  %v3200_v61 = vmul.f32 -1.442695, %v1631_v35 }
 0x17f   : > { %3422 = vrcp.f32 %v4412_v54  ;;  %v2527_v59 = vsel %vm1355_vm0, %v2099_v37, %v2511_v44  ;;  %v2117_v60 = vmul.f32 %v4416_v57, %v4386_v30  ;;  %v3421_v3 = vpop.eup %3420  ;;  %vm2122_vm6 = vweird.f32 %v4416_v57 }
 0x180   : > { %2559 = vst [vmem:[%s4315_s14 + $0x18] sm:$0x77] %v2527_v59  ;;  %3424 = vrcp.f32 %v4414_v55  ;;  %v2132_v7 = vmul.f32 %v3421_v3, %v4402_v45  ;;  %vm2137_vm9 = vweird.f32 %v3421_v3  ;;  %vm4450_vm10 = vmor %vm2121_vm4, %vm2122_vm6  ;;  %vm2151_vm11 = vweird.f32 %v4412_v54 }
 0x181   : > { %v2118_v4 = vsub.f32 1.0, %v2117_v60  ;;  %3426 = vpow2.f32 %v3199_v56  ;;  %v2170_v33 = vand.u32 2147483647, %v4414_v55  ;;  %vm2138_vm12 = vmor %vm2136_vm7, %vm2137_vm9  ;;  %v2172_v39 = vand.u32 2147483648, %v4414_v55 }
 0x182   : > { %3428 = vpow2.f32 %v3200_v61  ;;  %v2133_v14 = vsub.f32 1.0, %v2132_v7  ;;  %v2155_v48 = vand.u32 2147483647, %v4412_v54  ;;  %v2157_v49 = vand.u32 2147483648, %v4412_v54 }
 0x183   : > { %v1619_v1 = vpop.f32.mrf.mxu0  ;;  %v1632_v2 = vpop.f32.mrf.mxu1  ;;  %v2119_v9 = vmul.f32 %v4416_v57, %v2118_v4  ;;  %vm2166_vm1 = vweird.f32 %v4414_v55  ;;  %vm2171_vm2 = vcmp.eq.f32.partialorder %v2170_v33, 8.507059e+37  ;;  %v2173_v56 = vor.u32 1.1754944e-38, %v2172_v39 }
 0x184   : > { %v1643_v62 = vpop.f32.mrf.mxu2  ;;  %v1656_v63 = vpop.f32.mrf.mxu3  ;;  %v2134_v21 = vmul.f32 %v3421_v3, %v2133_v14  ;;  %v2158_v61 = vor.u32 1.1754944e-38, %v2157_v49  ;;  %vm2156_vm4 = vcmp.eq.f32.partialorder %v2155_v48, 8.507059e+37 }
 0x185   : > { %v1644_v11 = vadd.f32 %v1643_v62, %v4250_v8  ;;  %v4436_v12 = vpop.eup %3422  ;;  %v1657_v15 = vadd.f32 %v1656_v63, %v4250_v8  ;;  %v2120_v20 = vadd.f32 %v4416_v57, %v2119_v9 }
 0x186   : > { %v2147_v17 = vmul.f32 %v4436_v12, %v4412_v54  ;;  %v3425_v19 = vpop.eup %3424  ;;  %v2135_v31 = vadd.f32 %v3421_v3, %v2134_v21  ;;  %vm2152_vm13 = vweird.f32 %v4436_v12 }
 0x187   : > { %v3201_v18 = vmul.f32 -1.442695, %v1644_v11  ;;  %v3202_v22 = vmul.f32 -1.442695, %v1657_v15  ;;  %v3427_v23 = vpop.eup %3426  ;;  %v2162_v27 = vmul.f32 %v3425_v19, %v4414_v55  ;;  %v2124_v40 = vsel %vm4450_vm10, %v4416_v57, %v2120_v20  ;;  %vm4480_vm15 = vmor %vm2151_vm11, %vm2152_vm13 }
 0x188   : > { %v2148_v26 = vsub.f32 1.0, %v2147_v17  ;;  %v4457_v34 = vadd.f32 1.0, %v3427_v23  ;;  %v3429_v36 = vpop.eup %3428  ;;  %v2139_v41 = vsel %vm2138_vm12, %v3421_v3, %v2135_v31  ;;  %vm2167_vm14 = vweird.f32 %v3425_v19 }
 0x189   : > { %3430 = vpow2.f32 %v3201_v18  ;;  %v2163_v38 = vsub.f32 1.0, %v2162_v27  ;;  %v2144_v43 = vsel %vm4441_vm8, %v2143_v25, %v2139_v41  ;;  %v4474_v50 = vadd.f32 1.0, %v3429_v36  ;;  %vm2168_vm3 = vmor %vm2166_vm1, %vm2167_vm14 }
 0x18a   : > { %v2149_v30 = vmul.f32 %v4436_v12, %v2148_v26  ;;  %3432 = vpow2.f32 %v3202_v22  ;;  %v2512_v47 = vrot.slane %v2144_v43, 4  ;;  %v2129_v51 = vsel %vm4428_vm5, %v2128_v13, %v2124_v40 }
 0x18b   : > { %3434 = vrcp.f32 %v4457_v34  ;;  %v2164_v46 = vmul.f32 %v3425_v19, %v2163_v38  ;;  %v2185_v2 = vand.u32 2147483647, %v4457_v34  ;;  %v2187_v6 = vand.u32 2147483648, %v4457_v34 }
 0x18c   : > { %v1645_v28 = vpop.f32.mrf.mxu2  ;;  %v1658_v29 = vpop.f32.mrf.mxu3  ;;  %v2150_v45 = vadd.f32 %v4436_v12, %v2149_v30  ;;  %v2528_v44 = vsel %vm1355_vm0, %v2129_v51, %v2512_v47  ;;  %3436 = vrcp.f32 %v4474_v50  ;;  %v2200_v15 = vand.u32 2147483647, %v4474_v50 }
 0x18d   : > { %v2165_v52 = vadd.f32 %v3425_v19, %v2164_v46  ;;  %2560 = vst [vmem:[%s4315_s14 + $0x20] sm:$0x77] %v2528_v44  ;;  %vm2181_vm5 = vweird.f32 %v4457_v34  ;;  %v2202_v18 = vand.u32 2147483648, %v4474_v50  ;;  %vm4513_vm7 = vcmp.eq.f32.partialorder %v2185_v2, 8.507059e+37 }
 0x18e   : > { %v2154_v54 = vsel %vm4480_vm15, %v4436_v12, %v2150_v45  ;;  %v2188_v21 = vor.u32 1.1754944e-38, %v2187_v6  ;;  %vm2196_vm8 = vweird.f32 %v4474_v50  ;;  %vm4523_vm9 = vcmp.eq.f32.partialorder %v2200_v15, 8.507059e+37 }
 0x18f   : > { %v1669_v32 = vpop.f32.mrf.mxu0  ;;  %v1682_v42 = vpop.f32.mrf.mxu1  ;;  %v2169_v58 = vsel %vm2168_vm3, %v3425_v19, %v2165_v52  ;;  %v2159_v5 = vsel %vm2156_vm4, %v2158_v61, %v2154_v54  ;;  %v2203_v33 = vor.u32 1.1754944e-38, %v2202_v18 }
 0x190   : > { %v3431_v53 = vpop.eup %3430  ;;  %v1670_v57 = vadd.f32 %v1669_v32, %v4250_v8  ;;  %v1683_v55 = vadd.f32 %v1682_v42, %v4250_v8  ;;  %v2174_v62 = vsel %vm2171_vm2, %v2173_v56, %v2169_v58 }
 0x191   : > { %v3433_v37 = vpop.eup %3432  ;;  %v4492_v59 = vadd.f32 1.0, %v3431_v53  ;;  %v2513_v0 = vrot.slane %v2174_v62, 4 }
 0x192   : > { %v4495_v60 = vpop.eup %3434  ;;  %v4497_v63 = vadd.f32 1.0, %v3433_v37  ;;  %v3203_v7 = vmul.f32 -1.442695, %v1670_v57  ;;  %v3204_v13 = vmul.f32 -1.442695, %v1683_v55 }
 0x193   : > { %v2177_v1 = vmul.f32 %v4495_v60, %v4457_v34  ;;  %3438 = vrcp.f32 %v4492_v59  ;;  %v2529_v11 = vsel %vm1355_vm0, %v2159_v5, %v2513_v0  ;;  %v3437_v14 = vpop.eup %3436  ;;  %vm2182_vm6 = vweird.f32 %v4495_v60 }
 0x194   : > { %3440 = vrcp.f32 %v4497_v63  ;;  %2561 = vst [vmem:[%s4315_s14 + $0x28] sm:$0x77] %v2529_v11  ;;  %v2192_v17 = vmul.f32 %v3437_v14, %v4474_v50  ;;  %vm4529_vm10 = vmor %vm2181_vm5, %vm2182_vm6  ;;  %vm2197_vm11 = vweird.f32 %v3437_v14  ;;  %vm2211_vm12 = vweird.f32 %v4492_v59 }
 0x195   : > { %v2178_v12 = vsub.f32 1.0, %v2177_v1  ;;  %3442 = vpow2.f32 %v3203_v7  ;;  %v2215_v39 = vand.u32 2147483647, %v4492_v59  ;;  %v2230_v32 = vand.u32 2147483647, %v4497_v63  ;;  %vm2198_vm13 = vmor %vm2196_vm8, %vm2197_vm11 }
 0x196   : > { %v2193_v22 = vsub.f32 1.0, %v2192_v17  ;;  %3444 = vpow2.f32 %v3204_v13  ;;  %v2232_v47 = vand.u32 2147483648, %v4497_v63  ;;  %v2217_v54 = vand.u32 2147483648, %v4492_v59 }
 0x197   : > { %v1671_v9 = vpop.f32.mrf.mxu0  ;;  %v1684_v10 = vpop.f32.mrf.mxu1  ;;  %v2179_v16 = vmul.f32 %v4495_v60, %v2178_v12  ;;  %vm2226_vm2 = vweird.f32 %v4497_v63  ;;  %vm4575_vm4 = vcmp.eq.f32.partialorder %v2215_v39, 8.507059e+37  ;;  %vm2231_vm5 = vcmp.eq.f32.partialorder %v2230_v32, 8.507059e+37 }
 0x198   : > { %v1695_v3 = vpop.f32.mrf.mxu2  ;;  %v1708_v4 = vpop.f32.mrf.mxu3  ;;  %v2194_v31 = vmul.f32 %v3437_v14, %v2193_v22  ;;  %v2233_v0 = vor.u32 1.1754944e-38, %v2232_v47 }
 0x199   : > { %v1696_v20 = vadd.f32 %v1695_v3, %v4250_v8  ;;  %v1709_v23 = vadd.f32 %v1708_v4, %v4250_v8  ;;  %v4519_v24 = vpop.eup %3438  ;;  %v2180_v25 = vadd.f32 %v4495_v60, %v2179_v16  ;;  %v2218_v4 = vor.u32 1.1754944e-38, %v2217_v54 }
 0x19a   : > { %v3441_v28 = vpop.eup %3440  ;;  %v2207_v36 = vmul.f32 %v4519_v24, %v4492_v59  ;;  %v2195_v34 = vadd.f32 %v3437_v14, %v2194_v31  ;;  %vm2212_vm14 = vweird.f32 %v4519_v24 }
 0x19b   : > { %v3205_v27 = vmul.f32 -1.442695, %v1696_v20  ;;  %v2222_v40 = vmul.f32 %v3441_v28, %v4497_v63  ;;  %v3206_v42 = vmul.f32 -1.442695, %v1709_v23  ;;  %v3443_v43 = vpop.eup %3442  ;;  %v2184_v45 = vsel %vm4529_vm10, %v4495_v60, %v2180_v25  ;;  %vm4563_vm1 = vmor %vm2211_vm12, %vm2212_vm14 }
 0x19c   : > { %v2208_v41 = vsub.f32 1.0, %v2207_v36  ;;  %v3445_v51 = vpop.eup %3444  ;;  %v2199_v35 = vsel %vm2198_vm13, %v3437_v14, %v2195_v34  ;;  %v4548_v53 = vadd.f32 1.0, %v3443_v43  ;;  %vm2227_vm15 = vweird.f32 %v3441_v28 }
 0x19d   : > { %3446 = vpow2.f32 %v3205_v27  ;;  %v2223_v46 = vsub.f32 1.0, %v2222_v40  ;;  %v2204_v44 = vsel %vm4523_vm9, %v2203_v33, %v2199_v35  ;;  %v4552_v50 = vadd.f32 1.0, %v3445_v51  ;;  %vm2228_vm3 = vmor %vm2226_vm2, %vm2227_vm15 }
 0x19e   : > { %v2209_v52 = vmul.f32 %v4519_v24, %v2208_v41  ;;  %3448 = vpow2.f32 %v3206_v42  ;;  %v2514_v57 = vrot.slane %v2204_v44, 4  ;;  %v2189_v55 = vsel %vm4513_vm7, %v2188_v21, %v2184_v45 }
 0x19f   : > { %v2224_v56 = vmul.f32 %v3441_v28, %v2223_v46  ;;  %3450 = vrcp.f32 %v4548_v53  ;;  %v2245_v6 = vand.u32 2147483647, %v4548_v53  ;;  %v2247_v12 = vand.u32 2147483648, %v4548_v53 }
 0x1a0   : > { %v1697_v30 = vpop.f32.mrf.mxu2  ;;  %v1710_v38 = vpop.f32.mrf.mxu3  ;;  %v2210_v37 = vadd.f32 %v4519_v24, %v2209_v52  ;;  %3452 = vrcp.f32 %v4552_v50  ;;  %v2530_v62 = vsel %vm1355_vm0, %v2189_v55, %v2514_v57  ;;  %v2260_v13 = vand.u32 2147483647, %v4552_v50 }
 0x1a1   : > { %v2225_v61 = vadd.f32 %v3441_v28, %v2224_v56  ;;  %2562 = vst [vmem:[%s4315_s14 + $0x30] sm:$0x77] %v2530_v62  ;;  %v2262_v25 = vand.u32 2147483648, %v4552_v50  ;;  %vm2241_vm6 = vweird.f32 %v4548_v53  ;;  %v2248_v27 = vor.u32 1.1754944e-38, %v2247_v12 }
 0x1a2   : > { %v2214_v59 = vsel %vm4563_vm1, %v4519_v24, %v2210_v37  ;;  %vm2256_vm7 = vweird.f32 %v4552_v50  ;;  %vm4601_vm8 = vcmp.eq.f32.partialorder %v2245_v6, 8.507059e+37  ;;  %vm4605_vm9 = vcmp.eq.f32.partialorder %v2260_v13, 8.507059e+37 }
 0x1a3   : > { %v1721_v48 = vpop.f32.mrf.mxu0  ;;  %v1734_v49 = vpop.f32.mrf.mxu1  ;;  %v2229_v3 = vsel %vm2228_vm3, %v3441_v28, %v2225_v61  ;;  %v2219_v18 = vsel %vm4575_vm4, %v2218_v4, %v2214_v59  ;;  %v2263_v34 = vor.u32 1.1754944e-38, %v2262_v25 }
 0x1a4   : > { %v3447_v58 = vpop.eup %3446  ;;  %v1722_v1 = vadd.f32 %v1721_v48, %v4250_v8  ;;  %v2234_v5 = vsel %vm2231_vm5, %v2233_v0, %v2229_v3  ;;  %v1735_v20 = vadd.f32 %v1734_v49, %v4250_v8 }
 0x1a5   : > { %v3449_v63 = vpop.eup %3448  ;;  %v4580_v7 = vadd.f32 1.0, %v3447_v58  ;;  %v2515_v11 = vrot.slane %v2234_v5, 4 }
 0x1a6   : > { %v4584_v14 = vadd.f32 1.0, %v3449_v63  ;;  %v4586_v17 = vpop.eup %3450  ;;  %v3207_v19 = vmul.f32 -1.442695, %v1722_v1  ;;  %v3208_v33 = vmul.f32 -1.442695, %v1735_v20 }
 0x1a7   : > { %3454 = vrcp.f32 %v4580_v7  ;;  %v3453_v21 = vpop.eup %3452  ;;  %v2531_v22 = vsel %vm1355_vm0, %v2219_v18, %v2515_v11  ;;  %v2237_v23 = vmul.f32 %v4586_v17, %v4548_v53  ;;  %vm2242_vm10 = vweird.f32 %v4586_v17 }
 0x1a8   : > { %2563 = vst [vmem:[%s4315_s14 + $0x38] sm:$0x77] %v2531_v22  ;;  %v2252_v24 = vmul.f32 %v3453_v21, %v4552_v50  ;;  %3456 = vrcp.f32 %v4584_v14  ;;  %vm2257_vm11 = vweird.f32 %v3453_v21  ;;  %v2277_v45 = vand.u32 2147483648, %v4580_v7  ;;  %vm4623_vm12 = vmor %vm2241_vm6, %vm2242_vm10 }
 0x1a9   : > { %v2238_v26 = vsub.f32 1.0, %v2237_v23  ;;  %3458 = vpow2.f32 %v3207_v19  ;;  %v2290_v51 = vand.u32 2147483647, %v4584_v14  ;;  %v2292_v35 = vand.u32 2147483648, %v4584_v14  ;;  %vm2258_vm13 = vmor %vm2256_vm7, %vm2257_vm11 }
 0x1aa   : > { %v2253_v29 = vsub.f32 1.0, %v2252_v24  ;;  %3460 = vpow2.f32 %v3208_v33  ;;  %vm2271_vm1 = vweird.f32 %v4580_v7  ;;  %v2275_v6 = vand.u32 2147483647, %v4580_v7 }
 0x1ab   : > { %v1736_v15 = vpop.f32.mrf.mxu1  ;;  %v1723_v16 = vpop.f32.mrf.mxu0  ;;  %v2239_v36 = vmul.f32 %v4586_v17, %v2238_v26  ;;  %vm2286_vm3 = vweird.f32 %v4584_v14  ;;  %v2278_v18 = vor.u32 1.1754944e-38, %v2277_v45  ;;  %vm2291_vm5 = vcmp.eq.f32.partialorder %v2290_v51, 8.507059e+37 }
 0x1ac   : > { %v1747_v9 = vpop.f32.mrf.mxu2  ;;  %v1760_v10 = vpop.f32.mrf.mxu3  ;;  %v2254_v40 = vmul.f32 %v3453_v21, %v2253_v29  ;;  %v2293_v15 = vor.u32 1.1754944e-38, %v2292_v35  ;;  %vm2276_vm6 = vcmp.eq.f32.partialorder %v2275_v6, 8.507059e+37 }
 0x1ad   : > { %v1748_v30 = vadd.f32 %v1747_v9, %v4250_v8  ;;  %v1761_v38 = vadd.f32 %v1760_v10, %v4250_v8  ;;  %v4613_v39 = vpop.eup %3454  ;;  %v2240_v42 = vadd.f32 %v4586_v17, %v2239_v36 }
 0x1ae   : > { %v2267_v43 = vmul.f32 %v4613_v39, %v4580_v7  ;;  %v3457_v47 = vpop.eup %3456  ;;  %v2255_v49 = vadd.f32 %v3453_v21, %v2254_v40  ;;  %vm2272_vm14 = vweird.f32 %v4613_v39 }
 0x1af   : > { %v3209_v46 = vmul.f32 -1.442695, %v1748_v30  ;;  %v3210_v52 = vmul.f32 -1.442695, %v1761_v38  ;;  %v2244_v44 = vsel %vm4623_vm12, %v4586_v17, %v2240_v42  ;;  %v2282_v53 = vmul.f32 %v3457_v47, %v4584_v14  ;;  %v3459_v54 = vpop.eup %3458  ;;  %vm4656_vm2 = vmor %vm2271_vm1, %vm2272_vm14 }
 0x1b0   : > { %v2268_v56 = vsub.f32 1.0, %v2267_v43  ;;  %v2259_v58 = vsel %vm2258_vm13, %v3453_v21, %v2255_v49  ;;  %vm2287_vm15 = vweird.f32 %v3457_v47  ;;  %v4641_v62 = vadd.f32 1.0, %v3459_v54  ;;  %v3461_v0 = vpop.eup %3460 }
 0x1b1   : > { %3462 = vpow2.f32 %v3209_v46  ;;  %v2264_v60 = vsel %vm4605_vm9, %v2263_v34, %v2259_v58  ;;  %v2283_v50 = vsub.f32 1.0, %v2282_v53  ;;  %v2249_v3 = vsel %vm4601_vm8, %v2248_v27, %v2244_v44  ;;  %vm2288_vm4 = vmor %vm2286_vm3, %vm2287_vm15 }
 0x1b2   : > { %v2269_v61 = vmul.f32 %v4613_v39, %v2268_v56  ;;  %v2516_v1 = vrot.slane %v2264_v60, 4  ;;  %3464 = vpow2.f32 %v3210_v52  ;;  %v4651_v9 = vadd.f32 1.0, %v3461_v0 }
 0x1b3   : > { %v2284_v4 = vmul.f32 %v3457_v47, %v2283_v50  ;;  %3466 = vrcp.f32 %v4641_v62  ;;  %v2307_v23 = vand.u32 2147483648, %v4641_v62  ;;  %v2305_v38 = vand.u32 2147483647, %v4641_v62 }
 0x1b4   : > { %v1749_v41 = vpop.f32.mrf.mxu2  ;;  %v1762_v32 = vpop.f32.mrf.mxu3  ;;  %v2270_v63 = vadd.f32 %v4613_v39, %v2269_v61  ;;  %v2532_v5 = vsel %vm1355_vm0, %v2249_v3, %v2516_v1  ;;  %v2320_v27 = vand.u32 2147483647, %v4651_v9  ;;  %v2322_v33 = vand.u32 2147483648, %v4651_v9 }
 0x1b5   : > { %2564 = vst [vmem:[%s4315_s14 + $0x40] sm:$0x77] %v2532_v5  ;;  %v2285_v11 = vadd.f32 %v3457_v47, %v2284_v4  ;;  %vm2301_vm7 = vweird.f32 %v4641_v62  ;;  %v2308_v34 = vor.u32 1.1754944e-38, %v2307_v23  ;;  %vm2316_vm8 = vweird.f32 %v4651_v9 }
 0x1b6   : > { %v2274_v17 = vsel %vm4656_vm2, %v4613_v39, %v2270_v63  ;;  %vm4685_vm9 = vcmp.eq.f32.partialorder %v2320_v27, 8.507059e+37  ;;  %v2323_v46 = vor.u32 1.1754944e-38, %v2322_v33  ;;  %vm4694_vm11 = vcmp.eq.f32.partialorder %v2305_v38, 8.507059e+37 }
 0x1b7   : > { %v1773_v57 = vpop.f32.mrf.mxu0  ;;  %v1786_v37 = vpop.f32.mrf.mxu1  ;;  %v2289_v19 = vsel %vm2288_vm4, %v3457_v47, %v2285_v11  ;;  %v2279_v29 = vsel %vm2276_vm6, %v2278_v18, %v2274_v17 }
 0x1b8   : > { %v1774_v55 = vadd.f32 %v1773_v57, %v4250_v8  ;;  %v1787_v2 = vadd.f32 %v1786_v37, %v4250_v8  ;;  %v3463_v13 = vpop.eup %3462  ;;  %v2294_v22 = vsel %vm2291_vm5, %v2293_v15, %v2289_v19 }
 0x1b9   : > { %v3465_v14 = vpop.eup %3464  ;;  %v4667_v24 = vadd.f32 1.0, %v3463_v13  ;;  %v2517_v26 = vrot.slane %v2294_v22, 4 }
 0x1ba   : > { %v3211_v59 = vmul.f32 -1.442695, %v1774_v55  ;;  %v3212_v12 = vmul.f32 -1.442695, %v1787_v2  ;;  %v4669_v25 = vpop.eup %3466  ;;  %v4672_v28 = vadd.f32 1.0, %v3465_v14 }
 0x1bb   : > { %v2297_v31 = vmul.f32 %v4669_v25, %v4641_v62  ;;  %v2533_v30 = vsel %vm1355_vm0, %v2279_v29, %v2517_v26  ;;  %vm2302_vm10 = vweird.f32 %v4669_v25  ;;  %v2335_v52 = vand.u32 2147483647, %v4667_v24 }
 0x1bc   : > { %3468 = vpow2.f32 %v3211_v59  ;;  %2565 = vst [vmem:[%s4315_s14 + $0x48] sm:$0x77] %v2533_v30  ;;  %v2337_v44 = vand.u32 2147483648, %v4667_v24  ;;  %v2350_v56 = vand.u32 2147483647, %v4672_v28  ;;  %v2352_v57 = vand.u32 2147483648, %v4672_v28  ;;  %vm4718_vm15 = vmor %vm2301_vm7, %vm2302_vm10 }
 0x1bd   : > { %3470 = vrcp.f32 %v4651_v9  ;;  %v2298_v40 = vsub.f32 1.0, %v2297_v31  ;;  %vm2331_vm13 = vweird.f32 %v4667_v24  ;;  %vm2346_vm14 = vweird.f32 %v4672_v28 }
 0x1be   : > { %3472 = vpow2.f32 %v3212_v12  ;;  %v2338_v4 = vor.u32 1.1754944e-38, %v2337_v44  ;;  %vm4722_vm1 = vcmp.eq.f32.partialorder %v2350_v56, 8.507059e+37  ;;  %vm4730_vm4 = vcmp.eq.f32.partialorder %v2335_v52, 8.507059e+37 }
 0x1bf   : > { %v1788_v20 = vpop.f32.mrf.mxu1  ;;  %v1775_v21 = vpop.f32.mrf.mxu0  ;;  %3474 = vrcp.f32 %v4667_v24  ;;  %v2299_v45 = vmul.f32 %v4669_v25, %v2298_v40  ;;  %v2353_v10 = vor.u32 1.1754944e-38, %v2352_v57 }
 0x1c0   : > { %v1799_v7 = vpop.f32.mrf.mxu2  ;;  %v1812_v16 = vpop.f32.mrf.mxu3  ;;  %3476 = vrcp.f32 %v4672_v28 }
 0x1c1   : > { %v1800_v42 = vadd.f32 %v1799_v7, %v4250_v8  ;;  %v2300_v60 = vadd.f32 %v4669_v25, %v2299_v45  ;;  %v1813_v59 = vadd.f32 %v1812_v16, %v4250_v8 }
 0x1c2   : > { %v3469_v36 = vpop.eup %3468 }
 0x1c3   : > { %v3471_v39 = vpop.eup %3470  ;;  %v4692_v47 = vadd.f32 1.0, %v3469_v36  ;;  %v3213_v0 = vmul.f32 -1.442695, %v1800_v42  ;;  %v2304_v11 = vsel %vm4718_vm15, %v4669_v25, %v2300_v60  ;;  %v3214_v16 = vmul.f32 -1.442695, %v1813_v59 }
 0x1c4   : > { %v2312_v41 = vmul.f32 %v3471_v39, %v4651_v9  ;;  %v3473_v43 = vpop.eup %3472  ;;  %vm2317_vm12 = vweird.f32 %v3471_v39  ;;  %v2309_v14 = vsel %vm4694_vm11, %v2308_v34, %v2304_v11 }
 0x1c5   : > { %v4701_v53 = vpop.eup %3474  ;;  %3478 = vrcp.f32 %v4692_v47  ;;  %v4705_v37 = vadd.f32 1.0, %v3473_v43  ;;  %vm2318_vm2 = vmor %vm2316_vm8, %vm2317_vm12  ;;  %vm2361_vm6 = vweird.f32 %v4692_v47 }
 0x1c6   : > { %v2313_v35 = vsub.f32 1.0, %v2312_v41  ;;  %v3477_v55 = vpop.eup %3476  ;;  %v2327_v50 = vmul.f32 %v4701_v53, %v4667_v24  ;;  %vm2332_vm3 = vweird.f32 %v4701_v53 }
 0x1c7   : > { %v2342_v1 = vmul.f32 %v3477_v55, %v4672_v28  ;;  %3480 = vrcp.f32 %v4705_v37  ;;  %vm2347_vm5 = vweird.f32 %v3477_v55  ;;  %vm4753_vm7 = vmor %vm2331_vm13, %vm2332_vm3  ;;  %v2380_v32 = vand.u32 2147483647, %v4705_v37 }
 0x1c8   : > { %v1801_v48 = vpop.f32.mrf.mxu2  ;;  %v1814_v49 = vpop.f32.mrf.mxu3  ;;  %v2314_v61 = vmul.f32 %v3471_v39, %v2313_v35  ;;  %v2328_v63 = vsub.f32 1.0, %v2327_v50  ;;  %3482 = vpow2.f32 %v3213_v0  ;;  %vm2348_vm8 = vmor %vm2346_vm14, %vm2347_vm5 }
 0x1c9   : > { %v2343_v62 = vsub.f32 1.0, %v2342_v1  ;;  %3484 = vpow2.f32 %v3214_v16  ;;  %v2382_v49 = vand.u32 2147483648, %v4705_v37  ;;  %vm2381_vm14 = vcmp.eq.f32.partialorder %v2380_v32, 8.507059e+37 }
 0x1ca   : > { %v2315_v3 = vadd.f32 %v3471_v39, %v2314_v61  ;;  %v2329_v13 = vmul.f32 %v4701_v53, %v2328_v63  ;;  %v2365_v61 = vand.u32 2147483647, %v4692_v47 }
 0x1cb   : > { %v1825_v54 = vpop.f32.mrf.mxu0  ;;  %v1838_v58 = vpop.f32.mrf.mxu1  ;;  %v2344_v7 = vmul.f32 %v3477_v55, %v2343_v62  ;;  %v2383_v1 = vor.u32 1.1754944e-38, %v2382_v49 }
 0x1cc   : > { %v2319_v12 = vsel %vm2318_vm2, %v3471_v39, %v2315_v3  ;;  %v4739_v9 = vpop.eup %3478  ;;  %v2330_v18 = vadd.f32 %v4701_v53, %v2329_v13  ;;  %v1826_v25 = vadd.f32 %v1825_v54, %v4250_v8  ;;  %v1839_v24 = vadd.f32 %v1838_v58, %v4250_v8 }
 0x1cd   : > { %v2324_v15 = vsel %vm4685_vm9, %v2323_v46, %v2319_v12  ;;  %v2357_v19 = vmul.f32 %v4739_v9, %v4692_v47  ;;  %v2345_v23 = vadd.f32 %v3477_v55, %v2344_v7  ;;  %vm2376_vm9 = vweird.f32 %v4705_v37  ;;  %v3481_v33 = vpop.eup %3480 }
 0x1ce   : > { %v2518_v17 = vrot.slane %v2324_v15, 4  ;;  %v2334_v36 = vsel %vm4753_vm7, %v4701_v53, %v2330_v18  ;;  %v3215_v38 = vmul.f32 -1.442695, %v1826_v25  ;;  %v3483_v40 = vpop.eup %3482  ;;  %v2372_v41 = vmul.f32 %v3481_v33, %v4705_v37 }
 0x1cf   : > { %v2358_v31 = vsub.f32 1.0, %v2357_v19  ;;  %v2349_v30 = vsel %vm2348_vm8, %v3477_v55, %v2345_v23  ;;  %v4774_v43 = vadd.f32 1.0, %v3483_v40  ;;  %v3216_v45 = vmul.f32 -1.442695, %v1839_v24  ;;  %v3485_v35 = vpop.eup %3484 }
 0x1d0   : > { %v2534_v29 = vsel %vm1355_vm0, %v2309_v14, %v2518_v17  ;;  %v2354_v28 = vsel %vm4722_vm1, %v2353_v10, %v2349_v30  ;;  %3486 = vpow2.f32 %v3215_v38  ;;  %v2339_v46 = vsel %vm4730_vm4, %v2338_v4, %v2334_v36 }
 0x1d1   : > { %2566 = vst [vmem:[%s4315_s14 + $0x50] sm:$0x77] %v2534_v29  ;;  %v2359_v34 = vmul.f32 %v4739_v9, %v2358_v31  ;;  %v2519_v42 = vrot.slane %v2354_v28, 4  ;;  %v2373_v48 = vsub.f32 1.0, %v2372_v41  ;;  %vm2362_vm10 = vweird.f32 %v4739_v9 }
 0x1d2   : > { %v1851_v20 = vpop.f32.mrf.mxu2  ;;  %v1864_v21 = vpop.f32.mrf.mxu3  ;;  %3488 = vrcp.f32 %v4774_v43  ;;  %vm2377_vm11 = vweird.f32 %v3481_v33  ;;  %v1991_v57 = vadd.f32 1.0, %v3485_v35  ;;  %v2367_v55 = vand.u32 2147483648, %v4692_v47  ;;  %vm4788_vm12 = vmor %vm2361_vm6, %vm2362_vm10 }
 0x1d3   : > { %v1827_v26 = vpop.f32.mrf.mxu0  ;;  %v1840_v27 = vpop.f32.mrf.mxu1  ;;  %v1852_v39 = vadd.f32 %v1851_v20, %v4250_v8  ;;  %v1865_v51 = vadd.f32 %v1864_v21, %v4250_v8  ;;  %v2535_v52 = vsel %vm1355_vm0, %v2339_v46, %v2519_v42  ;;  %v2360_v56 = vadd.f32 %v4739_v9, %v2359_v34  ;;  %vm2378_vm13 = vmor %vm2376_vm9, %vm2377_vm11 }
 0x1d4   : > { %2567 = vst [vmem:[%s4315_s14 + $0x58] sm:$0x77] %v2535_v52  ;;  %v2374_v53 = vmul.f32 %v3481_v33, %v2373_v48  ;;  %3490 = vpow2.f32 %v3216_v45  ;;  %v2368_v47 = vor.u32 1.1754944e-38, %v2367_v55  ;;  %vm2366_vm15 = vcmp.eq.f32.partialorder %v2365_v61, 8.507059e+37 }
 0x1d5   : > { %v3217_v44 = vmul.f32 -1.442695, %v1852_v39  ;;  %v3218_v8 = vmul.f32 -1.442695, %v1865_v51  ;;  %3492 = vrcp.f32 %v1991_v57  ;;  %v2364_v59 = vsel %vm4788_vm12, %v4739_v9, %v2360_v56 }
 0x1d6   : > { %v2375_v50 = vadd.f32 %v3481_v33, %v2374_v53  ;;  %v3487_v0 = vpop.eup %3486  ;;  %v2369_v62 = vsel %vm2366_vm15, %v2368_v47, %v2364_v59  ;;  %v2395_v17 = vand.u32 2147483647, %v4774_v43  ;;  %v2397_v18 = vand.u32 2147483648, %v4774_v43 }
 0x1d7   : > { %3494 = vpow2.f32 %v3217_v44  ;;  %v4798_v3 = vadd.f32 1.0, %v3487_v0  ;;  %v2410_v14 = vand.u32 2147483647, %v1991_v57  ;;  %v2412_v22 = vand.u32 2147483648, %v1991_v57 }
 0x1d8   : > { %v2379_v2 = vsel %vm2378_vm13, %v3481_v33, %v2375_v50  ;;  %3496 = vpow2.f32 %v3218_v8  ;;  %v3489_v63 = vpop.eup %3488  ;;  %vm2391_vm3 = vweird.f32 %v4774_v43  ;;  %vm4823_vm5 = vcmp.eq.f32.partialorder %v2395_v17, 8.507059e+37 }
 0x1d9   : > { %v2384_v4 = vsel %vm2381_vm14, %v2383_v1, %v2379_v2  ;;  %v2387_v37 = vmul.f32 %v3489_v63, %v4774_v43  ;;  %3498 = vrcp.f32 %v4798_v3  ;;  %vm2392_vm1 = vweird.f32 %v3489_v63 }
 0x1da   : > { %v1853_v54 = vpop.f32.mrf.mxu2  ;;  %v1866_v58 = vpop.f32.mrf.mxu3  ;;  %v2520_v5 = vrot.slane %v2384_v4, 4  ;;  %vm4819_vm4 = vmor %vm2391_vm3, %vm2392_vm1  ;;  %vm2406_vm6 = vweird.f32 %v1991_v57  ;;  %v2398_v30 = vor.u32 1.1754944e-38, %v2397_v18  ;;  %vm2411_vm8 = vcmp.eq.f32.partialorder %v2410_v14, 8.507059e+37 }
 0x1db   : > { %v3491_v6 = vpop.eup %3490  ;;  %v2388_v12 = vsub.f32 1.0, %v2387_v37  ;;  %v2413_v38 = vor.u32 1.1754944e-38, %v2412_v22  ;;  %vm2421_vm9 = vweird.f32 %v4798_v3  ;;  %v2425_v32 = vand.u32 2147483647, %v4798_v3 }
 0x1dc   : > { %v3493_v10 = vpop.eup %3492  ;;  %v2536_v11 = vsel %vm1355_vm0, %v2369_v62, %v2520_v5  ;;  %v4803_v13 = vadd.f32 1.0, %v3491_v6  ;;  %v2427_v42 = vand.u32 2147483648, %v4798_v3 }
 0x1dd   : > { %v3495_v9 = vpop.eup %3494  ;;  %2568 = vst [vmem:[%s4315_s14 + $0x60] sm:$0x77] %v2536_v11  ;;  %v2402_v15 = vmul.f32 %v3493_v10, %v1991_v57  ;;  %v2389_v16 = vmul.f32 %v3489_v63, %v2388_v12  ;;  %vm2407_vm2 = vweird.f32 %v3493_v10  ;;  %vm4852_vm14 = vcmp.eq.f32.partialorder %v2425_v32, 8.507059e+37 }
 0x1de   : > { %v3497_v7 = vpop.eup %3496  ;;  %3500 = vrcp.f32 %v4803_v13  ;;  %v4809_v20 = vadd.f32 1.0, %v3495_v9  ;;  %vm2408_vm7 = vmor %vm2406_vm6, %vm2407_vm2  ;;  %vm2436_vm10 = vweird.f32 %v4803_v13  ;;  %v2440_v46 = vand.u32 2147483647, %v4803_v13 }
 0x1df   : > { %v2403_v19 = vsub.f32 1.0, %v2402_v15  ;;  %v4811_v21 = vpop.eup %3498  ;;  %v4813_v23 = vadd.f32 1.0, %v3497_v7  ;;  %v2390_v25 = vadd.f32 %v3489_v63, %v2389_v16  ;;  %v2442_v51 = vand.u32 2147483648, %v4803_v13 }
 0x1e0   : > { %v2417_v27 = vmul.f32 %v4811_v21, %v4798_v3  ;;  %3502 = vrcp.f32 %v4809_v20  ;;  %vm2422_vm11 = vweird.f32 %v4811_v21  ;;  %v2428_v60 = vor.u32 1.1754944e-38, %v2427_v42 }
 0x1e1   : > { %v2404_v26 = vmul.f32 %v3493_v10, %v2403_v19  ;;  %3504 = vrcp.f32 %v4813_v23  ;;  %v2394_v39 = vsel %vm4819_vm4, %v3489_v63, %v2390_v25  ;;  %vm4847_vm13 = vmor %vm2421_vm9, %vm2422_vm11  ;;  %vm2441_vm1 = vcmp.eq.f32.partialorder %v2440_v46, 8.507059e+37 }
 0x1e2   : > { %v2418_v33 = vsub.f32 1.0, %v2417_v27  ;;  %v2399_v49 = vsel %vm4823_vm5, %v2398_v30, %v2394_v39  ;;  %v2443_v61 = vor.u32 1.1754944e-38, %v2442_v51  ;;  %v2470_v3 = vand.u32 2147483647, %v4813_v23 }
 0x1e3   : > { %v2405_v24 = vadd.f32 %v3493_v10, %v2404_v26  ;;  %v2472_v63 = vand.u32 2147483648, %v4813_v23  ;;  %vm2451_vm4 = vweird.f32 %v4809_v20  ;;  %v2457_v6 = vand.u32 2147483648, %v4809_v20 }
 0x1e4   : > { %v3501_v36 = vpop.eup %3500  ;;  %v2419_v28 = vmul.f32 %v4811_v21, %v2418_v33  ;;  %vm2466_vm6 = vweird.f32 %v4813_v23 }
 0x1e5   : > { %v2409_v40 = vsel %vm2408_vm7, %v3493_v10, %v2405_v24  ;;  %v2432_v34 = vmul.f32 %v3501_v36, %v4803_v13  ;;  %vm2437_vm12 = vweird.f32 %v3501_v36  ;;  %v2455_v10 = vand.u32 2147483647, %v4809_v20 }
 0x1e6   : > { %v2414_v41 = vsel %vm2411_vm8, %v2413_v38, %v2409_v40  ;;  %v3503_v48 = vpop.eup %3502  ;;  %v2420_v52 = vadd.f32 %v4811_v21, %v2419_v28  ;;  %vm2438_vm15 = vmor %vm2436_vm10, %vm2437_vm12  ;;  %v2473_v12 = vor.u32 1.1754944e-38, %v2472_v63  ;;  %vm2471_vm8 = vcmp.eq.f32.partialorder %v2470_v3, 8.507059e+37 }
 0x1e7   : > { %v2521_v43 = vrot.slane %v2414_v41, 4  ;;  %v2433_v45 = vsub.f32 1.0, %v2432_v34  ;;  %v2447_v56 = vmul.f32 %v3503_v48, %v4809_v20  ;;  %v3505_v53 = vpop.eup %3504  ;;  %vm2452_vm2 = vweird.f32 %v3503_v48 }
 0x1e8   : > { %v2462_v55 = vmul.f32 %v3505_v53, %v4813_v23  ;;  %v2424_v50 = vsel %vm4847_vm13, %v4811_v21, %v2420_v52  ;;  %vm2467_vm3 = vweird.f32 %v3505_v53  ;;  %vm2453_vm5 = vmor %vm2451_vm4, %vm2452_vm2  ;;  %v2458_v15 = vor.u32 1.1754944e-38, %v2457_v6 }
 0x1e9   : > { %v2537_v35 = vsel %vm1355_vm0, %v2399_v49, %v2521_v43  ;;  %v2434_v44 = vmul.f32 %v3501_v36, %v2433_v45  ;;  %v2448_v58 = vsub.f32 1.0, %v2447_v56  ;;  %v2429_v37 = vsel %vm4852_vm14, %v2428_v60, %v2424_v50  ;;  %vm2468_vm7 = vmor %vm2466_vm6, %vm2467_vm3 }
 0x1ea   : > { %2569 = vst [vmem:[%s4315_s14 + $0x68] sm:$0x77] %v2537_v35  ;;  %v2463_v59 = vsub.f32 1.0, %v2462_v55  ;;  %vm2456_vm9 = vcmp.eq.f32.partialorder %v2455_v10, 8.507059e+37 }
 0x1eb   : > { %v2435_v54 = vadd.f32 %v3501_v36, %v2434_v44  ;;  %v2449_v1 = vmul.f32 %v3503_v48, %v2448_v58 }
 0x1ec   : > { %v2464_v5 = vmul.f32 %v3505_v53, %v2463_v59 }
 0x1ed   : > { %v2439_v0 = vsel %vm2438_vm15, %v3501_v36, %v2435_v54  ;;  %v2450_v4 = vadd.f32 %v3503_v48, %v2449_v1 }
 0x1ee   : > { %v2444_v2 = vsel %vm2441_vm1, %v2443_v61, %v2439_v0  ;;  %v2465_v11 = vadd.f32 %v3505_v53, %v2464_v5 }
 0x1ef   : > { %v2522_v47 = vrot.slane %v2444_v2, 4  ;;  %v2454_v13 = vsel %vm2453_vm5, %v3503_v48, %v2450_v4 }
 0x1f0   : > { %v2469_v9 = vsel %vm2468_vm7, %v3505_v53, %v2465_v11  ;;  %v2459_v17 = vsel %vm2456_vm9, %v2458_v15, %v2454_v13 }
 0x1f1   : > { %v2538_v62 = vsel %vm1355_vm0, %v2429_v37, %v2522_v47  ;;  %v2474_v7 = vsel %vm2471_vm8, %v2473_v12, %v2469_v9 }
 0x1f2   : > { %2570 = vst [vmem:[%s4315_s14 + $0x70] sm:$0x77] %v2538_v62  ;;  %v2523_v16 = vrot.slane %v2474_v7, 4 }
 0x1f4   : > { %v2539_v18 = vsel %vm1355_vm0, %v2459_v17, %v2523_v16 }
 0x1f5   : > { %2571 = vst [vmem:[%s4315_s14 + $0x78] sm:$0x77] %v2539_v18 }
 0x1f6 PF: > { %p10_p9 = scmp.ge.s32.totalorder %s3569_s16, 4   ;;  %s4955_s12 = smov %s3525_s13 }
 0x1f7   : > { %s4956_s13 = smov %s3578_s19  ;;  %s4957_s14 = smov %s3569_s16 }
 0x1f8   :  { %12 = sbr.rel (!%p10_p9) target bundleno = 2 (0x2), region = 90 }

</bundles_post_ra>
